<compile_context>
chip_gen: v5e
topology: v5e:2x2
jax: 0.10.0
libtpu: 0.0.40
codegen_flags: <defaults>
</compile_context>

<pallas_src>
import jax
import jax.numpy as jnp
from jax.experimental import pallas as pl
from jax.experimental.pallas import tpu as pltpu


# ----------------------------------------------------------------------------
# Fused kernel: reduce_dim (modality-tiled, int8 weight stream) + fc/ReLU +
# gated attention + softmax pooling + classifier + softmax + argmax.
# ----------------------------------------------------------------------------
def _fused_mil_kernel(h_ref, w_red_ref, scale_ref, b_red_ref,
                      w_fc_ref, b_fc_ref, w_a_ref, b_a_ref,
                      w_b_ref, b_b_ref, w_c_ref, b_c_ref,
                      w_cls_ref, b_cls_ref,
                      araw_ref, m_ref, logits_ref, prob_ref, yhat_ref,
                      acc_ref):
    k = pl.program_id(0)

    @pl.when(k == 0)
    def _():
        acc_ref[...] = jnp.zeros_like(acc_ref)

    # reduce_dim partial product for modality k on the MXU.
    # w_red is streamed int8; the per-output-column scale is applied after the
    # full accumulation, so here we only need the int8 -> bf16 cast (VPU work
    # that overlaps the DMA of the next modality slice).
    w_blk = w_red_ref[0].astype(jnp.bfloat16)                      # [feat, L0]
    acc_ref[...] += jnp.dot(h_ref[0], w_blk,
                            preferred_element_type=jnp.float32)    # [N, L0] f32

    # Tail runs once, on the last reduction step; all small weights below have
    # constant index maps so they are DMA'd once (no re-fetch across steps).
    @pl.when(k == pl.num_programs(0) - 1)
    def _():
        # dequant scale (per output column) + reduce_dim bias
        h = acc_ref[...] * scale_ref[...] + b_red_ref[...]         # [N, L0] f32

        # fc_radio[0]: Linear + ReLU  (Dropout -> identity at eval)
        h1 = jnp.dot(h.astype(jnp.bfloat16), w_fc_ref[...],
                     preferred_element_type=jnp.float32) + b_fc_ref[...]
        h1 = jnp.maximum(h1, 0.0)                                   # [N, L1] f32
        h1b = h1.astype(jnp.bfloat16)

        # Attn_Net_Gated
        a = jnp.tanh(jnp.dot(h1b, w_a_ref[...],
                             preferred_element_type=jnp.float32) + b_a_ref[...])
        b = jax.nn.sigmoid(jnp.dot(h1b, w_b_ref[...],
                                   preferred_element_type=jnp.float32) + b_b_ref[...])
        s = jnp.sum(a * b * w_c_ref[...], axis=1, keepdims=True) + b_c_ref[0, 0]  # [N,1]

        # A_raw emitted lane-dense as [1, N] (column -> row via iota/select;
        # avoids an explicit transpose and any wrapper-side .T).
        n = s.shape[0]
        rows = jax.lax.broadcasted_iota(jnp.int32, (n, n), 0)
        cols = jax.lax.broadcasted_iota(jnp.int32, (n, n), 1)
        araw_ref[...] = jnp.sum(jnp.where(rows == cols, s, 0.0),
                                axis=0, keepdims=True)              # [1, N]

        # softmax over the instance (sublane) axis
        smax = jnp.max(s, axis=0, keepdims=True)
        e = jnp.exp(s - smax)
        attn = e / jnp.sum(e, axis=0, keepdims=True)                # [N, 1]

        # bag feature  M = softmax(A)^T @ h
        mfeat = jnp.sum(attn * h1, axis=0, keepdims=True)           # [1, L1]
        m_ref[...] = mfeat

        # classifier + softmax + argmax (all in-kernel; lane-dense row outputs)
        logits = jnp.dot(mfeat.astype(jnp.bfloat16), w_cls_ref[...],
                         preferred_element_type=jnp.float32) + b_cls_ref[...]  # [1, C]
        logits_ref[...] = logits
        lmax = jnp.max(logits, axis=1, keepdims=True)
        el = jnp.exp(logits - lmax)
        prob_ref[...] = el / jnp.sum(el, axis=1, keepdims=True)
        cidx = jax.lax.broadcasted_iota(jnp.int32, logits.shape, 1)
        yhat_ref[...] = jnp.min(jnp.where(logits >= lmax, cidx, logits.shape[1]),
                                axis=1, keepdims=True)              # [1, 1] int32


def mil_attention_fc_radio_forward(params, h_stack):
    """h_stack: stacked per-modality features [n_mod, N, feat] (bf16), concat fusion."""
    num_mod, N, feat = h_stack.shape
    nm_w, feat_w, L0 = params["w_red_q"].shape
    assert nm_w == num_mod and feat_w == feat
    L1 = params["w_fc"].shape[1]
    D = params["w_a"].shape[1]
    C = params["w_cls"].shape[1]

    in_specs = [
        pl.BlockSpec((1, N, feat), lambda k: (k, 0, 0)),    # h modality slice (bf16)
        pl.BlockSpec((1, feat, L0), lambda k: (k, 0, 0)),   # w_red slice k (int8)
        pl.BlockSpec((1, L0), lambda k: (0, 0)),            # per-col dequant scale
        pl.BlockSpec((1, L0), lambda k: (0, 0)),            # b_red
        pl.BlockSpec((L0, L1), lambda k: (0, 0)),           # w_fc (bf16)
        pl.BlockSpec((1, L1), lambda k: (0, 0)),            # b_fc
        pl.BlockSpec((L1, D), lambda k: (0, 0)),            # w_a (bf16)
        pl.BlockSpec((1, D), lambda k: (0, 0)),             # b_a
        pl.BlockSpec((L1, D), lambda k: (0, 0)),            # w_b (bf16)
        pl.BlockSpec((1, D), lambda k: (0, 0)),             # b_b
        pl.BlockSpec((1, D), lambda k: (0, 0)),             # w_c  (row form, f32)
        pl.BlockSpec((1, 1), lambda k: (0, 0)),             # b_c
        pl.BlockSpec((L1, C), lambda k: (0, 0)),            # w_cls (pre-transposed, bf16)
        pl.BlockSpec((1, C), lambda k: (0, 0)),             # b_cls
    ]
    out_specs = (
        pl.BlockSpec((1, N), lambda k: (0, 0)),     # A_raw (row form)
        pl.BlockSpec((1, L1), lambda k: (0, 0)),    # M bag feature
        pl.BlockSpec((1, C), lambda k: (0, 0)),     # logits
        pl.BlockSpec((1, C), lambda k: (0, 0)),     # Y_prob
        pl.BlockSpec((1, 1), lambda k: (0, 0)),     # Y_hat (int32)
    )
    out_shape = (
        jax.ShapeDtypeStruct((1, N), jnp.float32),
        jax.ShapeDtypeStruct((1, L1), jnp.float32),
        jax.ShapeDtypeStruct((1, C), jnp.float32),
        jax.ShapeDtypeStruct((1, C), jnp.float32),
        jax.ShapeDtypeStruct((1, 1), jnp.int32),
    )

    A_raw, M, logits, Y_prob, Y_hat = pl.pallas_call(
        _fused_mil_kernel,
        out_shape=out_shape,
        grid_spec=pltpu.PrefetchScalarGridSpec(
            num_scalar_prefetch=0,
            grid=(num_mod,),                        # reduction over modalities
            in_specs=in_specs,
            out_specs=out_specs,
            scratch_shapes=[pltpu.VMEM((N, L0), jnp.float32)],   # reduce_dim acc
        ),
        compiler_params=pltpu.CompilerParams(
            dimension_semantics=("arbitrary",)),
    )(h_stack,
      params["w_red_q"], params["scale_red"], params["b_red"],
      params["w_fc"], params["b_fc"],
      params["w_a"], params["b_a"],
      params["w_b"], params["b_b"],
      params["w_c"], params["b_c"],
      params["w_cls"], params["b_cls"])

    return logits, Y_prob, Y_hat, A_raw, M


# ----------------------------------------------------------------------------
# Parameter init (Xavier-uniform weights, zero biases — matches initialize_weights)
# ----------------------------------------------------------------------------
def init_params(key, size_radio=(1024, 256, 256), n_classes=4, num_modalities=4):
    L0, L1, D = size_radio
    ks = jax.random.split(key, 6)

    def xavier(k, fan_in, fan_out):
        lim = (6.0 / (fan_in + fan_out)) ** 0.5
        return jax.random.uniform(k, (fan_in, fan_out), jnp.float32, -lim, lim)

    # reduce_dim: Linear(L0 * n_mod, L0). Quantized to int8 with per-output-column
    # symmetric scales (halves the only HBM-stream-bound weight); split per
    # modality so the kernel streams one [L0, L0] int8 slice per grid step.
    w_red = xavier(ks[0], L0 * num_modalities, L0)
    amax = jnp.maximum(jnp.max(jnp.abs(w_red), axis=0, keepdims=True), 1e-8)
    scale_red = amax / 127.0                                        # [1, L0] f32
    w_red_q = jnp.clip(jnp.round(w_red / scale_red), -127, 127).astype(jnp.int8)

    return {
        "w_red_q": w_red_q.reshape(num_modalities, L0, L0),
        "scale_red": scale_red,
        "b_red": jnp.zeros((1, L0), jnp.float32),
        # fc_radio[0]: Linear(L0, L1) + ReLU (+ Dropout -> identity at eval)
        "w_fc": xavier(ks[1], L0, L1).astype(jnp.bfloat16),
        "b_fc": jnp.zeros((1, L1), jnp.float32),
        # Attn_Net_Gated: attention_a (tanh), attention_b (sigmoid), attention_c
        "w_a": xavier(ks[2], L1, D).astype(jnp.bfloat16),
        "b_a": jnp.zeros((1, D), jnp.float32),
        "w_b": xavier(ks[3], L1, D).astype(jnp.bfloat16),
        "b_b": jnp.zeros((1, D), jnp.float32),
        "w_c": xavier(ks[4], D, 1).T,                 # stored as [1, D], f32 (tiny)
        "b_c": jnp.zeros((1, 1), jnp.float32),
        # classifier: Linear(L1, n_classes), stored pre-transposed [L1, C]
        "w_cls": xavier(ks[5], L1, n_classes).astype(jnp.bfloat16),
        "b_cls": jnp.zeros((1, n_classes), jnp.float32),
    }


# ----------------------------------------------------------------------------
# Pure-JAX reference for the correctness check.
# NOTE: the kernel intentionally quantizes reduce_dim to int8 (per-column scales)
# and the remaining weights/activations to bf16 (perf optimization on an
# HBM/latency-bound model); the reference mirrors those quantizations, so the
# check validates the kernel math.  Fidelity vs the original fp32 PyTorch model
# must be validated end-to-end separately if this quantization is adopted.
# ----------------------------------------------------------------------------
def _reference_forward(params, h_stack):
    hp = jax.lax.Precision.HIGHEST
    f32 = jnp.float32
    bf = lambda x: x.astype(jnp.bfloat16).astype(f32)

    n_mod, N, feat = h_stack.shape
    h_cat = jnp.transpose(h_stack.astype(f32), (1, 0, 2)).reshape(N, n_mod * feat)
    w_red = params["w_red_q"].astype(f32).reshape(n_mod * feat, -1)
    h = jnp.dot(h_cat, w_red, precision=hp) * params["scale_red"] + params["b_red"]

    h1 = jnp.maximum(
        jnp.dot(bf(h), params["w_fc"].astype(f32), precision=hp) + params["b_fc"], 0.0)
    a = jnp.tanh(jnp.dot(bf(h1), params["w_a"].astype(f32), precision=hp) + params["b_a"])
    b = jax.nn.sigmoid(jnp.dot(bf(h1), params["w_b"].astype(f32), precision=hp) + params["b_b"])
    s = jnp.sum(a * b * params["w_c"], axis=1, keepdims=True) + params["b_c"][0, 0]  # [N,1]
    A_raw = s.T                                                                      # [1,N]
    A = jax.nn.softmax(A_raw, axis=1)
    M = jnp.dot(A, h1, precision=hp)                                                 # [1,L1]
    logits = jnp.dot(bf(M), params["w_cls"].astype(f32), precision=hp) + params["b_cls"]
    return logits, jax.nn.softmax(logits, axis=1), A_raw, M


if __name__ == "__main__":
    key = jax.random.PRNGKey(0)
    modalities = ["T1", "T2", "T1Gd", "FLAIR"]
    N = 8            # number of MIL instances (bag size)
    FEAT = 1024      # per-modality feature dim (size_radio[0])
    n_classes = 4

    k_par, k_in = jax.random.split(key)
    params = init_params(k_par, size_radio=(FEAT, 256, 256),
                         n_classes=n_classes, num_modalities=len(modalities))

    in_keys = jax.random.split(k_in, len(modalities))
    h_mods = [jax.random.normal(k, (N, FEAT), jnp.float32) for k in in_keys]
    # concat-fusion layout: stacked [n_mod, N, feat] bf16 activations
    h_stack = jnp.stack([hm.astype(jnp.bfloat16) for hm in h_mods], axis=0)

    logits, Y_prob, Y_hat, A_raw, M = mil_attention_fc_radio_forward(params, h_stack)
    jax.block_until_ready((logits, Y_prob, Y_hat, A_raw, M))

    # sanity check against a pure-JAX reference
    ref_logits, ref_prob, ref_A, ref_M = _reference_forward(params, h_stack)
    assert logits.shape == (1, n_classes) and Y_prob.shape == (1, n_classes)
    assert A_raw.shape == (1, N) and M.shape == (1, 256) and Y_hat.shape == (1, 1)
    assert jnp.allclose(logits, ref_logits, rtol=5e-3, atol=5e-3)
    assert jnp.allclose(Y_prob, ref_prob, rtol=5e-3, atol=5e-3)
    assert jnp.allclose(A_raw, ref_A, rtol=5e-3, atol=5e-3)
    assert jnp.allclose(M, ref_M, rtol=5e-3, atol=5e-3)
    # in-kernel argmax must agree with argmax of the kernel's own logits
    assert int(Y_hat[0, 0]) == int(jnp.argmax(logits, axis=1)[0])

    # TODO(synk): the original PyTorch forward body is `pass`; this implements the
    # canonical concat-fusion + gated-attention MIL forward implied by __init__.
    print("KERNEL_OK")
</pallas_src>

<mosaic_0001>
module attributes {stable_mosaic.version = 11 : i64} {
  func.func @_fused_mil_kernel(%arg0: i32, %arg1: memref<1x8x1024xbf16, #tpu.memory_space<vmem>>, %arg2: memref<1x1024x1024xi8, #tpu.memory_space<vmem>>, %arg3: memref<1x1024xf32, #tpu.memory_space<vmem>>, %arg4: memref<1x1024xf32, #tpu.memory_space<vmem>>, %arg5: memref<1024x256xbf16, #tpu.memory_space<vmem>>, %arg6: memref<1x256xf32, #tpu.memory_space<vmem>>, %arg7: memref<256x256xbf16, #tpu.memory_space<vmem>>, %arg8: memref<1x256xf32, #tpu.memory_space<vmem>>, %arg9: memref<256x256xbf16, #tpu.memory_space<vmem>>, %arg10: memref<1x256xf32, #tpu.memory_space<vmem>>, %arg11: memref<1x256xf32, #tpu.memory_space<vmem>>, %arg12: memref<1x1xf32, #tpu.memory_space<vmem>>, %arg13: memref<256x4xbf16, #tpu.memory_space<vmem>>, %arg14: memref<1x4xf32, #tpu.memory_space<vmem>>, %arg15: memref<1x8xf32, #tpu.memory_space<vmem>>, %arg16: memref<1x256xf32, #tpu.memory_space<vmem>>, %arg17: memref<1x4xf32, #tpu.memory_space<vmem>>, %arg18: memref<1x4xf32, #tpu.memory_space<vmem>>, %arg19: memref<1x1xi32, #tpu.memory_space<vmem>>, %arg20: memref<8x1024xf32, #tpu.memory_space<vmem>>) attributes {dimension_semantics = [#tpu.dimension_semantics<arbitrary>], iteration_bounds = array<i64: 4>, scalar_prefetch = 0 : i64, scratch_operands = 1 : i64, tpu.core_type = #tpu.core_type<tc>, window_params = [{transform_indices = @transform_0, window_bounds = array<i64: 1, 8, 1024>}, {transform_indices = @transform_1, window_bounds = array<i64: 1, 1024, 1024>}, {pipeline_mode = #tpu.pipeline_mode<synchronous>, transform_indices = @transform_2, window_bounds = array<i64: 1, 1024>}, {pipeline_mode = #tpu.pipeline_mode<synchronous>, transform_indices = @transform_3, window_bounds = array<i64: 1, 1024>}, {pipeline_mode = #tpu.pipeline_mode<synchronous>, transform_indices = @transform_4, window_bounds = array<i64: 1024, 256>}, {pipeline_mode = #tpu.pipeline_mode<synchronous>, transform_indices = @transform_5, window_bounds = array<i64: 1, 256>}, {pipeline_mode = #tpu.pipeline_mode<synchronous>, transform_indices = @transform_6, window_bounds = array<i64: 256, 256>}, {pipeline_mode = #tpu.pipeline_mode<synchronous>, transform_indices = @transform_7, window_bounds = array<i64: 1, 256>}, {pipeline_mode = #tpu.pipeline_mode<synchronous>, transform_indices = @transform_8, window_bounds = array<i64: 256, 256>}, {pipeline_mode = #tpu.pipeline_mode<synchronous>, transform_indices = @transform_9, window_bounds = array<i64: 1, 256>}, {pipeline_mode = #tpu.pipeline_mode<synchronous>, transform_indices = @transform_10, window_bounds = array<i64: 1, 256>}, {pipeline_mode = #tpu.pipeline_mode<synchronous>, transform_indices = @transform_11, window_bounds = array<i64: 1, 1>}, {pipeline_mode = #tpu.pipeline_mode<synchronous>, transform_indices = @transform_12, window_bounds = array<i64: 256, 4>}, {pipeline_mode = #tpu.pipeline_mode<synchronous>, transform_indices = @transform_13, window_bounds = array<i64: 1, 4>}, {pipeline_mode = #tpu.pipeline_mode<synchronous>, transform_indices = @transform_14, window_bounds = array<i64: 1, 8>}, {pipeline_mode = #tpu.pipeline_mode<synchronous>, transform_indices = @transform_15, window_bounds = array<i64: 1, 256>}, {pipeline_mode = #tpu.pipeline_mode<synchronous>, transform_indices = @transform_16, window_bounds = array<i64: 1, 4>}, {pipeline_mode = #tpu.pipeline_mode<synchronous>, transform_indices = @transform_17, window_bounds = array<i64: 1, 4>}, {pipeline_mode = #tpu.pipeline_mode<synchronous>, transform_indices = @transform_18, window_bounds = array<i64: 1, 1>}]} {
    %c0_i32 = arith.constant 0 : i32
    %0 = arith.cmpi eq, %arg0, %c0_i32 : i32
    %1 = arith.extui %0 : i1 to i32
    %c0_i32_0 = arith.constant 0 : i32
    %2 = arith.cmpi ne, %1, %c0_i32_0 : i32
    scf.if %2 {
      %cst_11 = arith.constant 0.000000e+00 : f32
      %15 = vector.broadcast %cst_11 : f32 to vector<8x1024xf32>
      %c0_12 = arith.constant 0 : index
      %c0_13 = arith.constant 0 : index
      %16 = vector.load %arg20[%c0_12, %c0_13] : memref<8x1024xf32, #tpu.memory_space<vmem>>, vector<8x1024xf32>
      tpu.vector_store %arg20[%c0_12, %c0_13], %15 {strides = array<i32>} : memref<8x1024xf32, #tpu.memory_space<vmem>>, vector<8x1024xf32>,
    } else {
    }
    %c0 = arith.constant 0 : index
    %c0_1 = arith.constant 0 : index
    %c0_2 = arith.constant 0 : index
    %3 = vector.load %arg2[%c0, %c0_1, %c0_2] : memref<1x1024x1024xi8, #tpu.memory_space<vmem>>, vector<1x1024x1024xi8>
    %4 = vector.shape_cast %3 : vector<1x1024x1024xi8> to vector<1024x1024xi8>
    %5 = arith.sitofp %4 : vector<1024x1024xi8> to vector<1024x1024xbf16>
    %c0_3 = arith.constant 0 : index
    %c0_4 = arith.constant 0 : index
    %6 = vector.load %arg20[%c0_3, %c0_4] : memref<8x1024xf32, #tpu.memory_space<vmem>>, vector<8x1024xf32>
    %c0_5 = arith.constant 0 : index
    %c0_6 = arith.constant 0 : index
    %c0_7 = arith.constant 0 : index
    %7 = vector.load %arg1[%c0_5, %c0_6, %c0_7] : memref<1x8x1024xbf16, #tpu.memory_space<vmem>>, vector<1x8x1024xbf16>
    %8 = vector.shape_cast %7 : vector<1x8x1024xbf16> to vector<8x1024xbf16>
    %cst = arith.constant dense<0.000000e+00> : vector<8x1024xf32>
    %9 = tpu.matmul %8, %5, %cst {dimension_numbers = #tpu.dot_dimension_numbers<[1], [0], [0], [1], [0, 0, 1, 1], [], []>} : vector<8x1024xbf16>, vector<1024x1024xbf16>, vector<8x1024xf32> -> vector<8x1024xf32>
    %10 = arith.addf %6, %9 : vector<8x1024xf32>
    %c0_8 = arith.constant 0 : index
    %c0_9 = arith.constant 0 : index
    %11 = vector.load %arg20[%c0_8, %c0_9] : memref<8x1024xf32, #tpu.memory_space<vmem>>, vector<8x1024xf32>
    tpu.vector_store %arg20[%c0_8, %c0_9], %10 {strides = array<i32>} : memref<8x1024xf32, #tpu.memory_space<vmem>>, vector<8x1024xf32>,
    %c3_i32 = arith.constant 3 : i32
    %12 = arith.cmpi eq, %arg0, %c3_i32 : i32
    %13 = arith.extui %12 : i1 to i32
    %c0_i32_10 = arith.constant 0 : i32
    %14 = arith.cmpi ne, %13, %c0_i32_10 : i32
    scf.if %14 {
      %c0_11 = arith.constant 0 : index
      %c0_12 = arith.constant 0 : index
      %15 = vector.load %arg20[%c0_11, %c0_12] : memref<8x1024xf32, #tpu.memory_space<vmem>>, vector<8x1024xf32>
      %c0_13 = arith.constant 0 : index
      %c0_14 = arith.constant 0 : index
      %16 = vector.load %arg3[%c0_13, %c0_14] : memref<1x1024xf32, #tpu.memory_space<vmem>>, vector<1x1024xf32>
      %17 = vector.broadcast %16 : vector<1x1024xf32> to vector<8x1024xf32>
      %18 = arith.mulf %15, %17 : vector<8x1024xf32>
      %c0_15 = arith.constant 0 : index
      %c0_16 = arith.constant 0 : index
      %19 = vector.load %arg4[%c0_15, %c0_16] : memref<1x1024xf32, #tpu.memory_space<vmem>>, vector<1x1024xf32>
      %20 = vector.broadcast %19 : vector<1x1024xf32> to vector<8x1024xf32>
      %21 = arith.addf %18, %20 : vector<8x1024xf32>
      %22 = arith.truncf %21 : vector<8x1024xf32> to vector<8x1024xbf16>
      %c0_17 = arith.constant 0 : index
      %c0_18 = arith.constant 0 : index
      %23 = vector.load %arg5[%c0_17, %c0_18] : memref<1024x256xbf16, #tpu.memory_space<vmem>>, vector<1024x256xbf16>
      %cst_19 = arith.constant dense<0.000000e+00> : vector<8x256xf32>
      %24 = tpu.matmul %22, %23, %cst_19 {dimension_numbers = #tpu.dot_dimension_numbers<[1], [0], [0], [1], [0, 0, 1, 1], [], []>} : vector<8x1024xbf16>, vector<1024x256xbf16>, vector<8x256xf32> -> vector<8x256xf32>
      %c0_20 = arith.constant 0 : index
      %c0_21 = arith.constant 0 : index
      %25 = vector.load %arg6[%c0_20, %c0_21] : memref<1x256xf32, #tpu.memory_space<vmem>>, vector<1x256xf32>
      %26 = vector.broadcast %25 : vector<1x256xf32> to vector<8x256xf32>
      %27 = arith.addf %24, %26 : vector<8x256xf32>
      %cst_22 = arith.constant 0.000000e+00 : f32
      %28 = vector.broadcast %cst_22 : f32 to vector<8x256xf32>
      %29 = arith.maximumf %27, %28 : vector<8x256xf32>
      %30 = arith.truncf %29 : vector<8x256xf32> to vector<8x256xbf16>
      %c0_23 = arith.constant 0 : index
      %c0_24 = arith.constant 0 : index
      %31 = vector.load %arg7[%c0_23, %c0_24] : memref<256x256xbf16, #tpu.memory_space<vmem>>, vector<256x256xbf16>
      %cst_25 = arith.constant dense<0.000000e+00> : vector<8x256xf32>
      %32 = tpu.matmul %30, %31, %cst_25 {dimension_numbers = #tpu.dot_dimension_numbers<[1], [0], [0], [1], [0, 0, 1, 1], [], []>} : vector<8x256xbf16>, vector<256x256xbf16>, vector<8x256xf32> -> vector<8x256xf32>
      %c0_26 = arith.constant 0 : index
      %c0_27 = arith.constant 0 : index
      %33 = vector.load %arg8[%c0_26, %c0_27] : memref<1x256xf32, #tpu.memory_space<vmem>>, vector<1x256xf32>
      %34 = vector.broadcast %33 : vector<1x256xf32> to vector<8x256xf32>
      %35 = arith.addf %32, %34 : vector<8x256xf32>
      %36 = math.tanh %35 : vector<8x256xf32>
      %c0_28 = arith.constant 0 : index
      %c0_29 = arith.constant 0 : index
      %37 = vector.load %arg9[%c0_28, %c0_29] : memref<256x256xbf16, #tpu.memory_space<vmem>>, vector<256x256xbf16>
      %cst_30 = arith.constant dense<0.000000e+00> : vector<8x256xf32>
      %38 = tpu.matmul %30, %37, %cst_30 {dimension_numbers = #tpu.dot_dimension_numbers<[1], [0], [0], [1], [0, 0, 1, 1], [], []>} : vector<8x256xbf16>, vector<256x256xbf16>, vector<8x256xf32> -> vector<8x256xf32>
      %c0_31 = arith.constant 0 : index
      %c0_32 = arith.constant 0 : index
      %39 = vector.load %arg10[%c0_31, %c0_32] : memref<1x256xf32, #tpu.memory_space<vmem>>, vector<1x256xf32>
      %40 = vector.broadcast %39 : vector<1x256xf32> to vector<8x256xf32>
      %41 = arith.addf %38, %40 : vector<8x256xf32>
      %42 = arith.negf %41 : vector<8x256xf32>
      %43 = math.exp %42 : vector<8x256xf32>
      %cst_33 = arith.constant 1.000000e+00 : f32
      %44 = vector.broadcast %cst_33 : f32 to vector<8x256xf32>
      %45 = arith.addf %44, %43 : vector<8x256xf32>
      %46 = arith.divf %44, %45 : vector<8x256xf32>
      %47 = arith.mulf %36, %46 : vector<8x256xf32>
      %c0_34 = arith.constant 0 : index
      %c0_35 = arith.constant 0 : index
      %48 = vector.load %arg11[%c0_34, %c0_35] : memref<1x256xf32, #tpu.memory_space<vmem>>, vector<1x256xf32>
      %49 = vector.broadcast %48 : vector<1x256xf32> to vector<8x256xf32>
      %50 = arith.mulf %47, %49 : vector<8x256xf32>
      %cst_36 = arith.constant dense<0.000000e+00> : vector<8xf32>
      %51 = vector.multi_reduction <add>, %50, %cst_36 [1] : vector<8x256xf32> to vector<8xf32>
      %52 = vector.shape_cast %51 : vector<8xf32> to vector<8x1xf32>
      %c0_37 = arith.constant 0 : index
      %c0_38 = arith.constant 0 : index
      %53 = vector.load %arg12[%c0_37, %c0_38] : memref<1x1xf32, #tpu.memory_space<vmem>>, vector<1x1xf32>
      %54 = vector.extract %53[0, 0] : f32 from vector<1x1xf32>
      %55 = vector.broadcast %54 : f32 to vector<8x1xf32>
      %56 = arith.addf %52, %55 : vector<8x1xf32>
      %57 = tpu.iota {dimensions = array<i32: 0>} : vector<8x8xi32>
      %58 = tpu.iota {dimensions = array<i32: 1>} : vector<8x8xi32>
      %59 = arith.cmpi eq, %57, %58 : vector<8x8xi32>
      %cst_39 = arith.constant 0.000000e+00 : f32
      %60 = vector.shape_cast %56 : vector<8x1xf32> to vector<8x1xf32>
      %61 = vector.broadcast %60 : vector<8x1xf32> to vector<8x8xf32>
      %62 = vector.broadcast %cst_39 : f32 to vector<8x8xf32>
      %63 = arith.select %59, %61, %62 : vector<8x8xi1>, vector<8x8xf32>
      %cst_40 = arith.constant dense<0.000000e+00> : vector<8xf32>
      %64 = vector.multi_reduction <add>, %63, %cst_40 [0] : vector<8x8xf32> to vector<8xf32>
      %65 = vector.shape_cast %64 : vector<8xf32> to vector<1x8xf32>
      %c0_41 = arith.constant 0 : index
      %c0_42 = arith.constant 0 : index
      %66 = vector.load %arg15[%c0_41, %c0_42] : memref<1x8xf32, #tpu.memory_space<vmem>>, vector<1x8xf32>
      tpu.vector_store %arg15[%c0_41, %c0_42], %65 {strides = array<i32>} : memref<1x8xf32, #tpu.memory_space<vmem>>, vector<1x8xf32>,
      %cst_43 = arith.constant dense<0xFF800000> : vector<1xf32>
      %67 = vector.multi_reduction <maximumf>, %56, %cst_43 [0] : vector<8x1xf32> to vector<1xf32>
      %68 = vector.shape_cast %67 : vector<1xf32> to vector<1x1xf32>
      %69 = vector.broadcast %68 : vector<1x1xf32> to vector<8x1xf32>
      %70 = arith.subf %56, %69 : vector<8x1xf32>
      %71 = math.exp %70 : vector<8x1xf32>
      %cst_44 = arith.constant dense<0.000000e+00> : vector<1xf32>
      %72 = vector.multi_reduction <add>, %71, %cst_44 [0] : vector<8x1xf32> to vector<1xf32>
      %73 = vector.shape_cast %72 : vector<1xf32> to vector<1x1xf32>
      %74 = vector.broadcast %73 : vector<1x1xf32> to vector<8x1xf32>
      %75 = arith.divf %71, %74 : vector<8x1xf32>
      %76 = vector.broadcast %75 : vector<8x1xf32> to vector<8x256xf32>
      %77 = arith.mulf %76, %29 : vector<8x256xf32>
      %cst_45 = arith.constant dense<0.000000e+00> : vector<256xf32>
      %78 = vector.multi_reduction <add>, %77, %cst_45 [0] : vector<8x256xf32> to vector<256xf32>
      %79 = vector.shape_cast %78 : vector<256xf32> to vector<1x256xf32>
      %c0_46 = arith.constant 0 : index
      %c0_47 = arith.constant 0 : index
      %80 = vector.load %arg16[%c0_46, %c0_47] : memref<1x256xf32, #tpu.memory_space<vmem>>, vector<1x256xf32>
      tpu.vector_store %arg16[%c0_46, %c0_47], %79 {strides = array<i32>} : memref<1x256xf32, #tpu.memory_space<vmem>>, vector<1x256xf32>,
      %81 = arith.truncf %79 : vector<1x256xf32> to vector<1x256xbf16>
      %c0_48 = arith.constant 0 : index
      %c0_49 = arith.constant 0 : index
      %82 = vector.load %arg13[%c0_48, %c0_49] : memref<256x4xbf16, #tpu.memory_space<vmem>>, vector<256x4xbf16>
      %cst_50 = arith.constant dense<0.000000e+00> : vector<1x4xf32>
      %83 = tpu.matmul %81, %82, %cst_50 {dimension_numbers = #tpu.dot_dimension_numbers<[1], [0], [0], [1], [0, 0, 1, 1], [], []>} : vector<1x256xbf16>, vector<256x4xbf16>, vector<1x4xf32> -> vector<1x4xf32>
      %c0_51 = arith.constant 0 : index
      %c0_52 = arith.constant 0 : index
      %84 = vector.load %arg14[%c0_51, %c0_52] : memref<1x4xf32, #tpu.memory_space<vmem>>, vector<1x4xf32>
      %85 = arith.addf %83, %84 : vector<1x4xf32>
      %c0_53 = arith.constant 0 : index
      %c0_54 = arith.constant 0 : index
      %86 = vector.load %arg17[%c0_53, %c0_54] : memref<1x4xf32, #tpu.memory_space<vmem>>, vector<1x4xf32>
      tpu.vector_store %arg17[%c0_53, %c0_54], %85 {strides = array<i32>} : memref<1x4xf32, #tpu.memory_space<vmem>>, vector<1x4xf32>,
      %cst_55 = arith.constant dense<0xFF800000> : vector<1xf32>
      %87 = vector.multi_reduction <maximumf>, %85, %cst_55 [1] : vector<1x4xf32> to vector<1xf32>
      %88 = vector.shape_cast %87 : vector<1xf32> to vector<1x1xf32>
      %89 = vector.broadcast %88 : vector<1x1xf32> to vector<1x4xf32>
      %90 = arith.subf %85, %89 : vector<1x4xf32>
      %91 = math.exp %90 : vector<1x4xf32>
      %cst_56 = arith.constant dense<0.000000e+00> : vector<1xf32>
      %92 = vector.multi_reduction <add>, %91, %cst_56 [1] : vector<1x4xf32> to vector<1xf32>
      %93 = vector.shape_cast %92 : vector<1xf32> to vector<1x1xf32>
      %94 = vector.broadcast %93 : vector<1x1xf32> to vector<1x4xf32>
      %95 = arith.divf %91, %94 : vector<1x4xf32>
      %c0_57 = arith.constant 0 : index
      %c0_58 = arith.constant 0 : index
      %96 = vector.load %arg18[%c0_57, %c0_58] : memref<1x4xf32, #tpu.memory_space<vmem>>, vector<1x4xf32>
      tpu.vector_store %arg18[%c0_57, %c0_58], %95 {strides = array<i32>} : memref<1x4xf32, #tpu.memory_space<vmem>>, vector<1x4xf32>,
      %97 = tpu.iota {dimensions = array<i32: 1>} : vector<1x4xi32>
      %98 = vector.broadcast %88 : vector<1x1xf32> to vector<1x4xf32>
      %99 = arith.cmpf oge, %85, %98 : vector<1x4xf32>
      %c4_i32 = arith.constant 4 : i32
      %100 = vector.broadcast %c4_i32 : i32 to vector<1x4xi32>
      %101 = arith.select %99, %97, %100 : vector<1x4xi1>, vector<1x4xi32>
      %cst_59 = arith.constant dense<2147483647> : vector<1xi32>
      %102 = vector.multi_reduction <minsi>, %101, %cst_59 [1] : vector<1x4xi32> to vector<1xi32>
      %103 = vector.shape_cast %102 : vector<1xi32> to vector<1x1xi32>
      %c0_60 = arith.constant 0 : index
      %c0_61 = arith.constant 0 : index
      %104 = vector.load %arg19[%c0_60, %c0_61] : memref<1x1xi32, #tpu.memory_space<vmem>>, vector<1x1xi32>
      tpu.vector_store %arg19[%c0_60, %c0_61], %103 {strides = array<i32>} : memref<1x1xi32, #tpu.memory_space<vmem>>, vector<1x1xi32>,
    } else {
    }
    return
  }
  func.func @transform_0(%arg0: i32) -> (i32, i32, i32) {
    %c0_i32 = arith.constant 0 : i32
    %c0_i32_0 = arith.constant 0 : i32
    %c0_i32_1 = arith.constant 0 : i32
    return %arg0, %c0_i32, %c0_i32_0 : i32, i32, i32
  }
  func.func @transform_1(%arg0: i32) -> (i32, i32, i32) {
    %c0_i32 = arith.constant 0 : i32
    %c0_i32_0 = arith.constant 0 : i32
    %c0_i32_1 = arith.constant 0 : i32
    return %arg0, %c0_i32, %c0_i32_0 : i32, i32, i32
  }
  func.func @transform_2(%arg0: i32) -> (i32, i32) {
    %c0_i32 = arith.constant 0 : i32
    %c0_i32_0 = arith.constant 0 : i32
    %c0_i32_1 = arith.constant 0 : i32
    return %c0_i32, %c0_i32_0 : i32, i32
  }
  func.func @transform_3(%arg0: i32) -> (i32, i32) {
    %c0_i32 = arith.constant 0 : i32
    %c0_i32_0 = arith.constant 0 : i32
    %c0_i32_1 = arith.constant 0 : i32
    return %c0_i32, %c0_i32_0 : i32, i32
  }
  func.func @transform_4(%arg0: i32) -> (i32, i32) {
    %c0_i32 = arith.constant 0 : i32
    %c0_i32_0 = arith.constant 0 : i32
    %c0_i32_1 = arith.constant 0 : i32
    return %c0_i32, %c0_i32_0 : i32, i32
  }
  func.func @transform_5(%arg0: i32) -> (i32, i32) {
    %c0_i32 = arith.constant 0 : i32
    %c0_i32_0 = arith.constant 0 : i32
    %c0_i32_1 = arith.constant 0 : i32
    return %c0_i32, %c0_i32_0 : i32, i32
  }
  func.func @transform_6(%arg0: i32) -> (i32, i32) {
    %c0_i32 = arith.constant 0 : i32
    %c0_i32_0 = arith.constant 0 : i32
    %c0_i32_1 = arith.constant 0 : i32
    return %c0_i32, %c0_i32_0 : i32, i32
  }
  func.func @transform_7(%arg0: i32) -> (i32, i32) {
    %c0_i32 = arith.constant 0 : i32
    %c0_i32_0 = arith.constant 0 : i32
    %c0_i32_1 = arith.constant 0 : i32
    return %c0_i32, %c0_i32_0 : i32, i32
  }
  func.func @transform_8(%arg0: i32) -> (i32, i32) {
    %c0_i32 = arith.constant 0 : i32
    %c0_i32_0 = arith.constant 0 : i32
    %c0_i32_1 = arith.constant 0 : i32
    return %c0_i32, %c0_i32_0 : i32, i32
  }
  func.func @transform_9(%arg0: i32) -> (i32, i32) {
    %c0_i32 = arith.constant 0 : i32
    %c0_i32_0 = arith.constant 0 : i32
    %c0_i32_1 = arith.constant 0 : i32
    return %c0_i32, %c0_i32_0 : i32, i32
  }
  func.func @transform_10(%arg0: i32) -> (i32, i32) {
    %c0_i32 = arith.constant 0 : i32
    %c0_i32_0 = arith.constant 0 : i32
    %c0_i32_1 = arith.constant 0 : i32
    return %c0_i32, %c0_i32_0 : i32, i32
  }
  func.func @transform_11(%arg0: i32) -> (i32, i32) {
    %c0_i32 = arith.constant 0 : i32
    %c0_i32_0 = arith.constant 0 : i32
    %c0_i32_1 = arith.constant 0 : i32
    return %c0_i32, %c0_i32_0 : i32, i32
  }
  func.func @transform_12(%arg0: i32) -> (i32, i32) {
    %c0_i32 = arith.constant 0 : i32
    %c0_i32_0 = arith.constant 0 : i32
    %c0_i32_1 = arith.constant 0 : i32
    return %c0_i32, %c0_i32_0 : i32, i32
  }
  func.func @transform_13(%arg0: i32) -> (i32, i32) {
    %c0_i32 = arith.constant 0 : i32
    %c0_i32_0 = arith.constant 0 : i32
    %c0_i32_1 = arith.constant 0 : i32
    return %c0_i32, %c0_i32_0 : i32, i32
  }
  func.func @transform_14(%arg0: i32) -> (i32, i32) {
    %c0_i32 = arith.constant 0 : i32
    %c0_i32_0 = arith.constant 0 : i32
    %c0_i32_1 = arith.constant 0 : i32
    return %c0_i32, %c0_i32_0 : i32, i32
  }
  func.func @transform_15(%arg0: i32) -> (i32, i32) {
    %c0_i32 = arith.constant 0 : i32
    %c0_i32_0 = arith.constant 0 : i32
    %c0_i32_1 = arith.constant 0 : i32
    return %c0_i32, %c0_i32_0 : i32, i32
  }
  func.func @transform_16(%arg0: i32) -> (i32, i32) {
    %c0_i32 = arith.constant 0 : i32
    %c0_i32_0 = arith.constant 0 : i32
    %c0_i32_1 = arith.constant 0 : i32
    return %c0_i32, %c0_i32_0 : i32, i32
  }
  func.func @transform_17(%arg0: i32) -> (i32, i32) {
    %c0_i32 = arith.constant 0 : i32
    %c0_i32_0 = arith.constant 0 : i32
    %c0_i32_1 = arith.constant 0 : i32
    return %c0_i32, %c0_i32_0 : i32, i32
  }
  func.func @transform_18(%arg0: i32) -> (i32, i32) {
    %c0_i32 = arith.constant 0 : i32
    %c0_i32_0 = arith.constant 0 : i32
    %c0_i32_1 = arith.constant 0 : i32
    return %c0_i32, %c0_i32_0 : i32, i32
  }
}

</mosaic_0001>

<bundles_post_ra>
// kernel: tpu_custom_call.1
= control target key start
LH: loop header
LB: loop body
LE: loop exit
PB: predicated region body
PF: predicated region fallthrough
CT: control target
= control target key end

     0   :  { %s9536_s0 = inlined_call_operand.hbm [shape: bf16[4,8,1024], index: 0, kind: input, shape index: {}]   ;;  %s9537_s1 = inlined_call_operand.hbm [shape: s8[4,1024,1024], index: 1, kind: input, shape index: {}]   ;;  %s9538_s2 = inlined_call_operand.hbm [shape: f32[1,1024], index: 2, kind: input, shape index: {}]   ;;  %s9539_s3 = inlined_call_operand.hbm [shape: f32[1,1024], index: 3, kind: input, shape index: {}]   ;;  %s9540_s4 = inlined_call_operand.hbm [shape: bf16[1024,256], index: 4, kind: input, shape index: {}]   ;;  %s9541_s5 = inlined_call_operand.hbm [shape: f32[1,256], index: 5, kind: input, shape index: {}]   ;;  %s9542_s6 = inlined_call_operand.hbm [shape: bf16[256,256], index: 6, kind: input, shape index: {}]   ;;  %s9543_s7 = inlined_call_operand.hbm [shape: f32[1,256], index: 7, kind: input, shape index: {}]   ;;  %s9544_s8 = inlined_call_operand.hbm [shape: bf16[256,256], index: 8, kind: input, shape index: {}]   ;;  %s9545_s9 = inlined_call_operand.hbm [shape: f32[1,256], index: 9, kind: input, shape index: {}]   ;;  %s9546_s10 = inlined_call_operand.hbm [shape: f32[1,256], index: 10, kind: input, shape index: {}]   ;;  %s9547_s11 = inlined_call_operand.<no memory space> [shape: f32[1,1], index: 11, kind: input, shape index: {}]   ;;  %s9548_s12 = inlined_call_operand.vmem [shape: bf16[256,4], index: 12, kind: input, shape index: {}]   ;;  %s9549_s13 = inlined_call_operand.hbm [shape: f32[1,4], index: 13, kind: input, shape index: {}]   ;;  %s9550_s14 = inlined_call_operand.hbm [shape: f32[1,8], index: 14, kind: output, shape index: {0}]   ;;  %s9551_s15 = inlined_call_operand.hbm [shape: f32[1,256], index: 15, kind: output, shape index: {1}]   ;;  %s9552_s16 = inlined_call_operand.hbm [shape: f32[1,4], index: 16, kind: output, shape index: {2}]   ;;  %s9553_s17 = inlined_call_operand.hbm [shape: f32[1,4], index: 17, kind: output, shape index: {3}]   ;;  %s9554_s18 = inlined_call_operand.hbm [shape: s32[1,1], index: 18, kind: output, shape index: {4}]  }
   0x1   :  { %9557 = sst [smem:[#allocation42_spill]] %s9536_s0  ;;  %v24_v0 = vstv %s9547_s11 }
   0x2   :  { %9558 = sst [smem:[#allocation43_spill]] %s9537_s1  ;;  %25 = vst [vmem:[#allocation3] sm:$0x1] %v24_v0 }
   0x3   :  { %9559 = sst [smem:[#allocation44_spill]] %s9538_s2 }
   0x4   :  { %9560 = sst [smem:[#allocation45_spill]] %s9539_s3 }
   0x5   :  { %9561 = sst [smem:[#allocation46_spill]] %s9540_s4 }
   0x6   :  { %9562 = sst [smem:[#allocation47_spill]] %s9541_s5 }
   0x7   :  { %9563 = sst [smem:[#allocation48_spill]] %s9542_s6 }
   0x8   :  { %9564 = sst [smem:[#allocation49_spill]] %s9543_s7 }
   0x9   :  { %9565 = sst [smem:[#allocation50_spill]] %s9544_s8 }
   0xa   :  { %9566 = sst [smem:[#allocation51_spill]] %s9545_s9 }
   0xb   :  { %9567 = sst [smem:[#allocation52_spill]] %s9546_s10 }
   0xc   :  { %9568 = sst [smem:[#allocation53_spill]] %s9550_s14 }
   0xd   :  { %9569 = sst [smem:[#allocation54_spill]] %s9552_s16 }
   0xe   :  { %9570 = sst [smem:[#allocation55_spill]] %s9554_s18 }
   0xf   :  { %26 = vsyncpa [#allocation5], 0 }
  0x10   :  { %28 = vsyncpa [#allocation5 + $0x1], 0 }
  0x11   :  { %29 = vsyncpa [#allocation8], 0 }
  0x12   :  { %31 = vsyncpa [#allocation8 + $0x1], 0 }
  0x13   :  { %32 = vsyncpa [#allocation11], 0 }
  0x14   :  { %33 = vsyncpa [#allocation14], 0 }
  0x15   :  { %34 = vsyncpa [#allocation17], 0 }
  0x16   :  { %35 = vsyncpa [#allocation20], 0 }
  0x17   :  { %36 = vsyncpa [#allocation23], 0 }
  0x18   :  { %37 = vsyncpa [#allocation6], 0 }
  0x19   :  { %38 = vsyncpa [#allocation26], 0 }
  0x1a   :  { %39 = vsyncpa [#allocation29], 0  ;;  %s8635_s29 = smov 0   ;;  %s8637_s30 = smov 0  }
  0x1b   :  { %s8639_s0 = smov 0   ;;  %s8641_s11 = smov 0  }
  0x1c LB: > { %s9571_s20 = sld [smem:[#allocation44_spill]]  ;;  %s8659_s22 = sadd.s32 4294967295, %s8515_s11   ;;  %s8515_s11 = sphi %s8641_s11, %s9593_s11   ;;  %s8511_s0 = sphi %s8639_s0, %s9592_s0   ;;  %s8507_s30 = sphi %s8637_s30, %s9591_s30   ;;  %s8503_s29 = sphi %s8635_s29, %s9590_s29  }
  0x1d   : > { %p6645_p0 = scmp.ge.s32.totalorder %s8515_s11, 1  ;;  %p66_p1 = scmp.eq.s32.totalorder %s8659_s22, 0 }
  0x1e   : > { %p459_p2 = scmp.lt.s32.totalorder %s8515_s11, 5  ;;  %p6646_p3 = scmp.ne.s32.totalorder %s8659_s22, 0 }
  0x1f   : > { %s8517_s23 = smov [#allocation9]   ;;  %s9573_s3 = sld [smem:[#allocation45_spill]] }
  0x20   : > { %p8665_p4 = pnand %p6645_p0, %p459_p2  ;;  %s473_s24 = sshll.u32 %s8517_s23, 4  ;;  %s474_s24 = int_to_ptr.vmem [resolvable:$true] %s473_s24 }
  0x21   : > { %s8518_s19 = smov [#allocation10]   ;;  %s9575_s5 = sld [smem:[#allocation47_spill]] }
  0x22   : > { %s471_s21 = sshll.u32 %s9571_s20, 4  ;;  %p7800_p5 = pneg %p8665_p4  ;;  %s472_s21 = int_to_ptr.hbm [resolvable:$true] %s471_s21 }
  0x23   : > { %s485_s1 = sshll.u32 %s8518_s19, 4  ;;  %s9576_s7 = sld [smem:[#allocation49_spill]]  ;;  %s486_s1 = int_to_ptr.vmem [resolvable:$true] %s485_s1 }
  0x24   : > { %p8676_p6 = pnand %p7800_p5, %p66_p1  ;;  %s8519_s16 = smov [#allocation13]  }
  0x25   : > { %s483_s27 = sshll.u32 %s9573_s3, 4  ;;  %s511_s14 = sshll.u32 %s8519_s16, 4  ;;  %s484_s27 = int_to_ptr.hbm [resolvable:$true] %s483_s27  ;;  %s512_s14 = int_to_ptr.vmem [resolvable:$true] %s511_s14 }
  0x26   : > { %7803 = dma.hbm_to_vmem [thread:$0]  (!%p8676_p6), %s472_s21, 128, %s474_s24, [#allocation8]  }
  0x27   : > { %s509_s18 = sshll.u32 %s9575_s5, 4  ;;  %s8520_s19 = smov [#allocation16]   ;;  %s510_s18 = int_to_ptr.hbm [resolvable:$true] %s509_s18 }
  0x28   : > { %7806 = dma.hbm_to_vmem [thread:$0]  (!%p8676_p6), %s484_s27, 128, %s486_s1, [#allocation11]  }
  0x29   : > { %s535_s3 = sshll.u32 %s9576_s7, 4  ;;  %s537_s20 = sshll.u32 %s8520_s19, 4  ;;  %s536_s3 = int_to_ptr.hbm [resolvable:$true] %s535_s3  ;;  %s538_s20 = int_to_ptr.vmem [resolvable:$true] %s537_s20 }
  0x2a   : > { %7812 = dma.hbm_to_vmem [thread:$0]  (!%p8676_p6), %s510_s18, 32, %s512_s14, [#allocation14]  }
  0x2b   : > { %s9577_s9 = sld [smem:[#allocation51_spill]]  ;;  %s8521_s16 = smov [#allocation19]  }
  0x2c   : > { %7818 = dma.hbm_to_vmem [thread:$0]  (!%p8676_p6), %s536_s3, 32, %s538_s20, [#allocation17]  }
  0x2d   : > { %s9578_s4 = sld [smem:[#allocation46_spill]]  ;;  %s563_s25 = sshll.u32 %s8521_s16, 4  ;;  %s564_s25 = int_to_ptr.vmem [resolvable:$true] %s563_s25 }
  0x2e   : > { %s8522_s14 = smov [#allocation12]   ;;  %s8523_s5 = smov 128  }
  0x2f   : > { %s496_s18 = sshll.u32 %s8522_s14, 4  ;;  %s8524_s26 = smov 8   ;;  %s497_s18 = int_to_ptr.vmem [resolvable:$true] %s496_s18 }
  0x30   : > { %s9579_s6 = sld [smem:[#allocation48_spill]]  ;;  %s8525_s23 = smov [#allocation15]  }
  0x31   : > { %s561_s21 = sshll.u32 %s9577_s9, 4  ;;  %s522_s24 = sshll.u32 %s8525_s23, 4  ;;  %s562_s21 = int_to_ptr.hbm [resolvable:$true] %s561_s21  ;;  %s523_s24 = int_to_ptr.vmem [resolvable:$true] %s522_s24 }
  0x32   : > { %7824 = dma.hbm_to_vmem [thread:$0]  (!%p8676_p6), %s562_s21, 32, %s564_s25, [#allocation20]  }
  0x33   : > { %s494_s1 = sshll.u32 %s9578_s4, 4  ;;  %s9580_s8 = sld [smem:[#allocation50_spill]]  ;;  %s495_s1 = int_to_ptr.hbm [resolvable:$true] %s494_s1 }
  0x34   : > { %7809 = dma.hbm_to_vmem [thread:$0]  (!%p8676_p6), %s495_s1, 16384, %s497_s18, [#allocation11], %s8523_s5, %s8523_s5, %s8524_s26  }
  0x35   : > { %s8526_s25 = smov [#allocation18]   ;;  %s9581_s10 = sld [smem:[#allocation52_spill]] }
  0x36   : > { %s520_s20 = sshll.u32 %s9579_s6, 4  ;;  %s548_s1 = sshll.u32 %s8526_s25, 4  ;;  %s521_s20 = int_to_ptr.hbm [resolvable:$true] %s520_s20  ;;  %s549_s1 = int_to_ptr.vmem [resolvable:$true] %s548_s1 }
  0x37   : > { %7815 = dma.hbm_to_vmem [thread:$0]  (!%p8676_p6), %s521_s20, 4096, %s523_s24, [#allocation14], %s8523_s5, %s8523_s5, %s8524_s26  }
  0x38   : > { %s591_s20 = sshll.u32 %s9549_s13, 4  ;;  %s8527_s24 = smov [#allocation21]   ;;  %s592_s20 = int_to_ptr.hbm [resolvable:$true] %s591_s20 }
  0x39   : > { %s546_s21 = sshll.u32 %s9580_s8, 4  ;;  %s575_s27 = sshll.u32 %s8527_s24, 4  ;;  %s547_s21 = int_to_ptr.hbm [resolvable:$true] %s546_s21  ;;  %s576_s27 = int_to_ptr.vmem [resolvable:$true] %s575_s27 }
  0x3a   : > { %7821 = dma.hbm_to_vmem [thread:$0]  (!%p8676_p6), %s547_s21, 4096, %s549_s1, [#allocation17], %s8523_s5, %s8523_s5, %s8524_s26  }
  0x3b   : > { %s573_s3 = sshll.u32 %s9581_s10, 4  ;;  %s8528_s16 = smov [#allocation22]   ;;  %s574_s3 = int_to_ptr.hbm [resolvable:$true] %s573_s3 }
  0x3c   : > { %7827 = dma.hbm_to_vmem [thread:$0]  (!%p8676_p6), %s574_s3, 32, %s576_s27, [#allocation20]  }
  0x3d   : > { %s593_s5 = sshll.u32 %s8528_s16, 4  ;;  %s8725_s26 = sadd.s32 1, %s8515_s11   ;;  %s594_s5 = int_to_ptr.vmem [resolvable:$true] %s593_s5 }
  0x3e   : > { %7830 = dma.hbm_to_vmem [thread:$0]  (!%p8676_p6), %s592_s20, 16, %s594_s5, [#allocation23]  }
  0x3f   : > { %s52_s21 = sadd.s32 1, %s8511_s0  ;;  %s49_s25 = ssub.s32 %s8515_s11, %s8725_s26 }
  0x40   : > { %p59_p7 = scmp.ne.s32.totalorder %s8511_s0, %s8507_s30  ;;  %p50_p8 = scmp.eq.s32.totalorder %s49_s25, 0 }
  0x41   : > { %p60_p9 = scmp.eq.s32.totalorder %s8515_s11, 0  ;;  %p65_p10 = scmp.ne.s32.totalorder %s8507_s30, %s8503_s29 }
  0x42   : > { %p7848_p11 = scmp.lt.s32.totalorder %s8515_s11, 4  ;;  %s8746_s28 = sand.u32 1, %s8511_s0  }
  0x43   : > { %s8737_s1 = scalar_select %p50_p8, %s8511_s0, %s52_s21  }
  0x44   : > { %p61_p12 = por %p60_p9, %p59_p7  ;;  %p8741_p13 = por %p66_p1, %p65_p10 }
  0x45   : > { %s7524_s18 = sshll.u32 %s8515_s11, 5  ;;  %s6657_s3 = sshll.u32 %s8746_s28, 5 }
  0x46   : > { %s9583_s29 = sld [smem:[#allocation42_spill]]  ;;  %s608_s16 = scalar_lea.vmem [#allocation4], %s6657_s3 }
  0x47   : > { %s617_s5 = sshll.u32 %s608_s16, 4  ;;  %p8755_p0 = pnand %p7848_p11, %p61_p12  ;;  %s618_s5 = int_to_ptr.vmem [resolvable:$true] %s617_s5 }
  0x48   : > { %s6660_s25 = sshll.u32 %s8746_s28, 11  ;;  %s624_s4 = sand.u32 1, %s8515_s11  }
  0x49   : > { %s628_s6 = scalar_lea.vmem [#allocation7], %s6660_s25  ;;  %s605_s8 = scalar_lea.sflag [#allocation5], %s8746_s28 }
  0x4a   : > { %s636_s7 = sshll.u32 %s628_s6, 4  ;;  %p8245_p5 = pneg %p8755_p0  ;;  %s637_s7 = int_to_ptr.vmem [resolvable:$true] %s636_s7 }
  0x4c   : > { %s9584_s20 = smov %s9583_s29  ;;  %s613_s24 = scalar_lea.hbm %s9583_s29, %s7524_s18 }
  0x4d   : > { %s615_s27 = sshll.u32 %s613_s24, 4  ;;  %s8248_s23 = scalar_lea.hbm %s9584_s20, 128  ;;  %s616_s27 = int_to_ptr.hbm [resolvable:$true] %s615_s27 }
  0x4e   : > { %s8241_s9 = sshra.s32 %s616_s27, 4  ;;  %s8242_s9 = int_to_ptr.hbm [resolvable:$true] %s8241_s9 }
  0x4f   : > { %s8243_s18 = scalar_lea.hbm %s8242_s9, 32  ;;  %p8249_p8 = scmp.lt.s32.totalorder %s8242_s9, %s9584_s20 }
  0x50   : > { %p8244_p2 = scmp.ne.s32.totalorder %s8242_s9, %s8243_s18  ;;  %p8250_p9 = scmp.lt.s32.totalorder %s8248_s23, %s8243_s18 }
  0x52   : > { %p8246_p6 = pnand %p8245_p5, %p8244_p2  ;;  %p8251_p10 = por %p8250_p9, %p8249_p8 }
  0x54   : > { %p8247_p7 = pneg %p8246_p6 }
  0x56   : > { %p8252_p11 = pnand %p8251_p10, %p8247_p7 }
  0x58   : > { %8255 = shalt.err (!%p8252_p11)
}
  0x59   : > { %7834 = dma.hbm_to_vmem [thread:$0]  (!%p8755_p0), %s616_s27, 512, %s618_s5, %s605_s8  }
  0x5a   : > { %s7525_s6 = sshll.u32 %s8515_s11, 11  ;;  %s9586_s25 = sld [smem:[#allocation43_spill]] }
  0x5b   : > { %s625_s10 = scalar_lea.sflag [#allocation8], %s624_s4 }
  0x60   : > { %s633_s3 = scalar_lea.hbm %s9586_s25, %s7525_s6  ;;  %s8278_s8 = scalar_lea.hbm %s9586_s25, 8192 }
  0x61   : > { %s634_s19 = sshll.u32 %s633_s3, 4  ;;  %s635_s19 = int_to_ptr.hbm [resolvable:$true] %s634_s19 }
  0x62   : > { %s8271_s29 = sshra.s32 %s635_s19, 4  ;;  %s8272_s29 = int_to_ptr.hbm [resolvable:$true] %s8271_s29 }
  0x63   : > { %s8273_s9 = scalar_lea.hbm %s8272_s29, 2048  ;;  %p8279_p7 = scmp.lt.s32.totalorder %s8272_s29, %s9586_s25 }
  0x64   : > { %p8274_p12 = scmp.ne.s32.totalorder %s8272_s29, %s8273_s9  ;;  %p8280_p8 = scmp.lt.s32.totalorder %s8278_s8, %s8273_s9 }
  0x66   : > { %p8276_p2 = pnand %p8274_p12, %p8245_p5  ;;  %p8281_p9 = por %p8280_p8, %p8279_p7 }
  0x68   : > { %p8277_p6 = pneg %p8276_p2 }
  0x6a   : > { %p8282_p10 = pnand %p8281_p9, %p8277_p6 }
  0x6c   : > { %8285 = shalt.err (!%p8282_p10)
}
  0x6d   : > { %s8529_s4 = smov 1024   ;;  %s8530_s5 = smov 64  }
  0x6e   : > { %7837 = dma.hbm_to_vmem [thread:$0]  (!%p8755_p0), %s635_s19, 32768, %s637_s7, %s625_s10, %s8529_s4, %s8529_s4, %s8530_s5  }
  0x6f   : > { %648 = sbr.rel (%p8665_p4) target bundleno = 2108 (0x83c), region = 76  ;;  %s650_s24 = sand.u32 (!%p8665_p4), 1, %s8507_s30  }
  0x70   : > { %s6664_s6 = sshll.u32 (!%p8665_p4), %s650_s24, 5  ;;  %s651_s28 = scalar_lea.sflag (!%p8665_p4), [#allocation5], %s650_s24 }
  0x71   : > { %s8793_s16 = scalar_lea.vmem (!%p8665_p4), [#allocation4], %s6664_s6 }
  0x74   : > { %8458 = dma.done.wait (%p8741_p13), %s651_s28, 512  }
  0x75   : > { %8460 = vsyncadd (%p8741_p13), %s651_s28, 4294966784  ;;  %s660_s3 = sand.u32 1, %s8659_s22   ;;  %s6665_s21 = sshll.u32 %s650_s24, 11 }
  0x76   : > { %s661_s7 = scalar_lea.sflag [#allocation8], %s660_s3  ;;  %s8800_s10 = scalar_lea.vmem [#allocation7], %s6665_s21 }
  0x77   : > { %8462 = dma.done.wait (%p8741_p13), %s661_s7, 32768  }
  0x78   : > { %8464 = vsyncadd (%p8741_p13), %s661_s7, 4294934528 }
  0x79   : > { %8466 = dma.done.wait (%p66_p1), [#allocation8], 128  }
  0x7a   : > { %8468 = vsyncadd (%p66_p1), [#allocation8], 4294967168 }
  0x7b   : > { %8470 = dma.done.wait (%p66_p1), [#allocation11], 16512  }
  0x7c   : > { %8472 = vsyncadd (%p66_p1), [#allocation11], 4294950784 }
  0x7d   : > { %8474 = dma.done.wait (%p66_p1), [#allocation14], 4128  }
  0x7e   : > { %8476 = vsyncadd (%p66_p1), [#allocation14], 4294963168 }
  0x7f   : > { %8478 = dma.done.wait (%p66_p1), [#allocation17], 4128  }
  0x80   : > { %8480 = vsyncadd (%p66_p1), [#allocation17], 4294963168 }
  0x81   : > { %8482 = dma.done.wait (%p66_p1), [#allocation20], 64  }
  0x82   : > { %8484 = vsyncadd (%p66_p1), [#allocation20], 4294967232 }
  0x83   : > { %8486 = dma.done.wait (%p66_p1), [#allocation23], 16  }
  0x84   : > { %8488 = vsyncadd (%p66_p1), [#allocation23], 4294967280  ;;  %771 = sbr.rel (%p6646_p3) target bundleno = 146 (0x92), region = 128 }
  0x89   : > { %v8531_v1 = vmov 0.0  }
  0x8a   : > { %772 = vst [vmem:[#allocation2 + $0x30] sm:$0xff] %v8531_v1 }
  0x8b   : > { %773 = vst [vmem:[#allocation2] sm:$0xff] %v8531_v1 }
  0x8c   : > { %774 = vst [vmem:[#allocation2 + $0x18] sm:$0xff] %v8531_v1 }
  0x8d   : > { %775 = vst [vmem:[#allocation2 + $0x10] sm:$0xff] %v8531_v1 }
  0x8e   : > { %776 = vst [vmem:[#allocation2 + $0x8] sm:$0xff] %v8531_v1 }
  0x8f   : > { %777 = vst [vmem:[#allocation2 + $0x20] sm:$0xff] %v8531_v1 }
  0x90   : > { %778 = vst [vmem:[#allocation2 + $0x28] sm:$0xff] %v8531_v1 }
  0x91   : > { %779 = vst [vmem:[#allocation2 + $0x38] sm:$0xff] %v8531_v1 }
  0x92 PF: > { %v804_v2 = vld [vmem:[%s8800_s10 + $0xc0] sm:$0xff]  ;;  %p6677_p1 = scmp.ne.s32.totalorder %s8659_s22, 3 }
  0x93   : > { %v836_v3 = vld [vmem:[%s8800_s10 + $0x1c0] sm:$0xff]  ;;  %v1148_v5 = vunpack.c.2.s8 %v804_v2  ;;  %v1156_v6 = vunpack.c.3.s8 %v804_v2  ;;  %v1132_v24 = vunpack.c.0.s8 %v804_v2  ;;  %v1140_v25 = vunpack.c.1.s8 %v804_v2 }
  0x94   : > { %v868_v4 = vld [vmem:[%s8800_s10 + $0x2c0] sm:$0xff]  ;;  %v1276_v7 = vunpack.c.2.s8 %v836_v3  ;;  %v1284_v8 = vunpack.c.3.s8 %v836_v3  ;;  %v1260_v28 = vunpack.c.0.s8 %v836_v3  ;;  %v1268_v29 = vunpack.c.1.s8 %v836_v3 }
  0x95   : > { %v900_v9 = vld [vmem:[%s8800_s10 + $0x3c0] sm:$0xff]  ;;  %v1404_v10 = vunpack.c.2.s8 %v868_v4  ;;  %v1412_v11 = vunpack.c.3.s8 %v868_v4  ;;  %v2172_v14 = vcvt.s32.f32 %v1148_v5  ;;  %v2180_v15 = vcvt.s32.f32 %v1156_v6 }
  0x96   : > { %v1532_v12 = vunpack.c.2.s8 %v900_v9  ;;  %v1540_v13 = vunpack.c.3.s8 %v900_v9  ;;  %v2300_v16 = vcvt.s32.f32 %v1276_v7  ;;  %v2308_v17 = vcvt.s32.f32 %v1284_v8  ;;  %v796_v30 = vld [vmem:[%s8800_s10 + $0x80] sm:$0xff] }
  0x97   : > { %v2428_v18 = vcvt.s32.f32 %v1404_v10  ;;  %v2436_v19 = vcvt.s32.f32 %v1412_v11  ;;  %v3140_v22 = vpack.c.bf16 %v2180_v15, %v2172_v14  ;;  %v2156_v31 = vcvt.s32.f32 %v1132_v24  ;;  %v828_v39 = vld [vmem:[%s8800_s10 + $0x180] sm:$0xff] }
  0x98   : > { %v2556_v20 = vcvt.s32.f32 %v1532_v12  ;;  %v2564_v21 = vcvt.s32.f32 %v1540_v13  ;;  %v3204_v23 = vpack.c.bf16 %v2308_v17, %v2300_v16  ;;  %v2164_v32 = vcvt.s32.f32 %v1140_v25  ;;  %v860_v44 = vld [vmem:[%s8800_s10 + $0x280] sm:$0xff] }
  0x99   : > { %v3268_v26 = vpack.c.bf16 %v2436_v19, %v2428_v18  ;;  %3636 = vmatpush.bf16.msra.mxu0 %v3140_v22  ;;  %v1388_v33 = vunpack.c.0.s8 %v868_v4  ;;  %v1396_v34 = vunpack.c.1.s8 %v868_v4  ;;  %v2284_v35 = vcvt.s32.f32 %v1260_v28  ;;  %v892_v49 = vld [vmem:[%s8800_s10 + $0x380] sm:$0xff] }
  0x9a   : > { %v3332_v27 = vpack.c.bf16 %v2564_v21, %v2556_v20  ;;  %3649 = vmatpush.bf16.msra.mxu1 %v3204_v23  ;;  %v2292_v36 = vcvt.s32.f32 %v1268_v29  ;;  %v1516_v37 = vunpack.c.0.s8 %v900_v9  ;;  %v1524_v38 = vunpack.c.1.s8 %v900_v9  ;;  %v788_v10 = vld [vmem:[%s8800_s10 + $0x40] sm:$0xff] }
  0x9b   : > { %3662 = vmatpush.bf16.msra.mxu2 %v3268_v26  ;;  %v3132_v40 = vpack.c.bf16 %v2164_v32, %v2156_v31  ;;  %v2412_v41 = vcvt.s32.f32 %v1388_v33  ;;  %v2420_v42 = vcvt.s32.f32 %v1396_v34  ;;  %v1116_v43 = vunpack.c.2.s8 %v796_v30  ;;  %v820_v19 = vld [vmem:[%s8800_s10 + $0x140] sm:$0xff] }
  0x9c   : > { %3675 = vmatpush.bf16.msra.mxu3 %v3332_v27  ;;  %v3196_v45 = vpack.c.bf16 %v2292_v36, %v2284_v35  ;;  %v2540_v46 = vcvt.s32.f32 %v1516_v37  ;;  %v2548_v47 = vcvt.s32.f32 %v1524_v38  ;;  %v1124_v48 = vunpack.c.3.s8 %v796_v30  ;;  %v852_v24 = vld [vmem:[%s8800_s10 + $0x240] sm:$0xff] }
  0x9d   : > { %3637 = vmatpush.bf16.msra.mxu0 %v3132_v40  ;;  %v3260_v50 = vpack.c.bf16 %v2420_v42, %v2412_v41  ;;  %v2140_v51 = vcvt.s32.f32 %v1116_v43  ;;  %v1244_v52 = vunpack.c.2.s8 %v828_v39  ;;  %v1252_v53 = vunpack.c.3.s8 %v828_v39  ;;  %v884_v29 = vld [vmem:[%s8800_s10 + $0x340] sm:$0xff] }
  0x9e   : > { %3650 = vmatpush.bf16.msra.mxu1 %v3196_v45  ;;  %v3324_v54 = vpack.c.bf16 %v2548_v47, %v2540_v46  ;;  %v2148_v55 = vcvt.s32.f32 %v1124_v48  ;;  %v1372_v56 = vunpack.c.2.s8 %v860_v44  ;;  %v1380_v57 = vunpack.c.3.s8 %v860_v44 }
  0x9f   : > { %3663 = vmatpush.bf16.msra.mxu2 %v3260_v50  ;;  %v2268_v58 = vcvt.s32.f32 %v1244_v52  ;;  %v2276_v59 = vcvt.s32.f32 %v1252_v53  ;;  %v1500_v60 = vunpack.c.2.s8 %v892_v49  ;;  %v1508_v61 = vunpack.c.3.s8 %v892_v49 }
  0xa0   : > { %3676 = vmatpush.bf16.msra.mxu3 %v3324_v54  ;;  %v3124_v62 = vpack.c.bf16 %v2148_v55, %v2140_v51  ;;  %v2396_v63 = vcvt.s32.f32 %v1372_v56  ;;  %v2404_v0 = vcvt.s32.f32 %v1380_v57  ;;  %v1100_v1 = vunpack.c.0.s8 %v796_v30  ;;  %v780_v54 = vld [vmem:[%s8800_s10] sm:$0xff] }
  0xa1   : > { %v3188_v2 = vpack.c.bf16 %v2276_v59, %v2268_v58  ;;  %v2524_v3 = vcvt.s32.f32 %v1500_v60  ;;  %v2532_v4 = vcvt.s32.f32 %v1508_v61  ;;  %v1108_v5 = vunpack.c.1.s8 %v796_v30 }
  0xa2   : > { %3638 = vmatpush.bf16.msra.mxu0 %v3124_v62  ;;  %v3252_v6 = vpack.c.bf16 %v2404_v0, %v2396_v63  ;;  %v2124_v7 = vcvt.s32.f32 %v1100_v1  ;;  %v1228_v8 = vunpack.c.0.s8 %v828_v39  ;;  %v1236_v9 = vunpack.c.1.s8 %v828_v39  ;;  %v812_v63 = vld [vmem:[%s8800_s10 + $0x100] sm:$0xff] }
  0xa3   : > { %3651 = vmatpush.bf16.msra.mxu1 %v3188_v2  ;;  %v3316_v11 = vpack.c.bf16 %v2532_v4, %v2524_v3  ;;  %v2132_v12 = vcvt.s32.f32 %v1108_v5  ;;  %v1356_v13 = vunpack.c.0.s8 %v860_v44  ;;  %v1364_v14 = vunpack.c.1.s8 %v860_v44  ;;  %v844_v4 = vld [vmem:[%s8800_s10 + $0x200] sm:$0xff] }
  0xa4   : > { %3664 = vmatpush.bf16.msra.mxu2 %v3252_v6  ;;  %v2252_v15 = vcvt.s32.f32 %v1228_v8  ;;  %v2260_v16 = vcvt.s32.f32 %v1236_v9  ;;  %v1484_v17 = vunpack.c.0.s8 %v892_v49  ;;  %v1492_v18 = vunpack.c.1.s8 %v892_v49  ;;  %v876_v9 = vld [vmem:[%s8800_s10 + $0x300] sm:$0xff] }
  0xa5   : > { %3677 = vmatpush.bf16.msra.mxu3 %v3316_v11  ;;  %v3116_v20 = vpack.c.bf16 %v2132_v12, %v2124_v7  ;;  %v2380_v21 = vcvt.s32.f32 %v1356_v13  ;;  %v2388_v22 = vcvt.s32.f32 %v1364_v14  ;;  %v1084_v23 = vunpack.c.2.s8 %v788_v10 }
  0xa6   : > { %v3180_v25 = vpack.c.bf16 %v2260_v16, %v2252_v15  ;;  %v2508_v26 = vcvt.s32.f32 %v1484_v17  ;;  %v2516_v27 = vcvt.s32.f32 %v1492_v18  ;;  %v1092_v28 = vunpack.c.3.s8 %v788_v10 }
  0xa7   : > { %3639 = vmatpush.bf16.msra.mxu0 %v3116_v20  ;;  %v3244_v30 = vpack.c.bf16 %v2388_v22, %v2380_v21  ;;  %v2108_v31 = vcvt.s32.f32 %v1084_v23  ;;  %v1212_v32 = vunpack.c.2.s8 %v820_v19  ;;  %v1220_v33 = vunpack.c.3.s8 %v820_v19 }
  0xa8   : > { %3652 = vmatpush.bf16.msra.mxu1 %v3180_v25  ;;  %v3308_v34 = vpack.c.bf16 %v2516_v27, %v2508_v26  ;;  %v2116_v35 = vcvt.s32.f32 %v1092_v28  ;;  %v1340_v36 = vunpack.c.2.s8 %v852_v24  ;;  %v1348_v37 = vunpack.c.3.s8 %v852_v24 }
  0xa9   : > { %3665 = vmatpush.bf16.msra.mxu2 %v3244_v30  ;;  %v2236_v38 = vcvt.s32.f32 %v1212_v32  ;;  %v2244_v39 = vcvt.s32.f32 %v1220_v33  ;;  %v1468_v40 = vunpack.c.2.s8 %v884_v29  ;;  %v1476_v41 = vunpack.c.3.s8 %v884_v29 }
  0xaa   : > { %3678 = vmatpush.bf16.msra.mxu3 %v3308_v34  ;;  %v3108_v42 = vpack.c.bf16 %v2116_v35, %v2108_v31  ;;  %v2364_v43 = vcvt.s32.f32 %v1340_v36  ;;  %v2372_v44 = vcvt.s32.f32 %v1348_v37  ;;  %v1068_v45 = vunpack.c.0.s8 %v788_v10  ;;  %v932_v34 = vld [vmem:[%s8800_s10 + $0x4c0] sm:$0xff] }
  0xab   : > { %v3172_v46 = vpack.c.bf16 %v2244_v39, %v2236_v38  ;;  %v2492_v47 = vcvt.s32.f32 %v1468_v40  ;;  %v2500_v48 = vcvt.s32.f32 %v1476_v41  ;;  %v1076_v49 = vunpack.c.1.s8 %v788_v10 }
  0xac   : > { %3640 = vmatpush.bf16.msra.mxu0 %v3108_v42  ;;  %v3236_v50 = vpack.c.bf16 %v2372_v44, %v2364_v43  ;;  %v2092_v51 = vcvt.s32.f32 %v1068_v45  ;;  %v1196_v52 = vunpack.c.0.s8 %v820_v19  ;;  %v1204_v53 = vunpack.c.1.s8 %v820_v19  ;;  %v964_v43 = vld [vmem:[%s8800_s10 + $0x5c0] sm:$0xff] }
  0xad   : > { %3653 = vmatpush.bf16.msra.mxu1 %v3172_v46  ;;  %v3300_v55 = vpack.c.bf16 %v2500_v48, %v2492_v47  ;;  %v2100_v56 = vcvt.s32.f32 %v1076_v49  ;;  %v1324_v57 = vunpack.c.0.s8 %v852_v24  ;;  %v1332_v58 = vunpack.c.1.s8 %v852_v24  ;;  %v996_v48 = vld [vmem:[%s8800_s10 + $0x6c0] sm:$0xff] }
  0xae   : > { %3666 = vmatpush.bf16.msra.mxu2 %v3236_v50  ;;  %v2220_v59 = vcvt.s32.f32 %v1196_v52  ;;  %v2228_v60 = vcvt.s32.f32 %v1204_v53  ;;  %v1452_v61 = vunpack.c.0.s8 %v884_v29  ;;  %v1460_v62 = vunpack.c.1.s8 %v884_v29  ;;  %v1028_v53 = vld [vmem:[%s8800_s10 + $0x7c0] sm:$0xff] }
  0xaf   : > { %3679 = vmatpush.bf16.msra.mxu3 %v3300_v55  ;;  %v3100_v0 = vpack.c.bf16 %v2100_v56, %v2092_v51  ;;  %v2348_v1 = vcvt.s32.f32 %v1324_v57  ;;  %v2356_v2 = vcvt.s32.f32 %v1332_v58  ;;  %v1052_v3 = vunpack.c.2.s8 %v780_v54 }
  0xb0   : > { %v3164_v5 = vpack.c.bf16 %v2228_v60, %v2220_v59  ;;  %v2476_v6 = vcvt.s32.f32 %v1452_v61  ;;  %v2484_v7 = vcvt.s32.f32 %v1460_v62  ;;  %v1060_v8 = vunpack.c.3.s8 %v780_v54 }
  0xb1   : > { %3641 = vmatpush.bf16.msra.mxu0 %v3100_v0  ;;  %v3228_v10 = vpack.c.bf16 %v2356_v2, %v2348_v1  ;;  %v2076_v11 = vcvt.s32.f32 %v1052_v3  ;;  %v1180_v12 = vunpack.c.2.s8 %v812_v63  ;;  %v1188_v13 = vunpack.c.3.s8 %v812_v63 }
  0xb2   : > { %3654 = vmatpush.bf16.msra.mxu1 %v3164_v5  ;;  %v3292_v14 = vpack.c.bf16 %v2484_v7, %v2476_v6  ;;  %v2084_v15 = vcvt.s32.f32 %v1060_v8  ;;  %v1308_v16 = vunpack.c.2.s8 %v844_v4  ;;  %v1316_v17 = vunpack.c.3.s8 %v844_v4 }
  0xb3   : > { %3667 = vmatpush.bf16.msra.mxu2 %v3228_v10  ;;  %v2204_v18 = vcvt.s32.f32 %v1180_v12  ;;  %v2212_v19 = vcvt.s32.f32 %v1188_v13  ;;  %v1436_v20 = vunpack.c.2.s8 %v876_v9  ;;  %v1444_v21 = vunpack.c.3.s8 %v876_v9 }
  0xb4   : > { %3680 = vmatpush.bf16.msra.mxu3 %v3292_v14  ;;  %v3092_v22 = vpack.c.bf16 %v2084_v15, %v2076_v11  ;;  %v2332_v23 = vcvt.s32.f32 %v1308_v16  ;;  %v2340_v24 = vcvt.s32.f32 %v1316_v17  ;;  %v1036_v25 = vunpack.c.0.s8 %v780_v54  ;;  %v924_v14 = vld [vmem:[%s8800_s10 + $0x480] sm:$0xff] }
  0xb5   : > { %v3156_v26 = vpack.c.bf16 %v2212_v19, %v2204_v18  ;;  %v2460_v27 = vcvt.s32.f32 %v1436_v20  ;;  %v2468_v28 = vcvt.s32.f32 %v1444_v21  ;;  %v1044_v29 = vunpack.c.1.s8 %v780_v54 }
  0xb6   : > { %3642 = vmatpush.bf16.msra.mxu0 %v3092_v22  ;;  %v3220_v30 = vpack.c.bf16 %v2340_v24, %v2332_v23  ;;  %v2060_v31 = vcvt.s32.f32 %v1036_v25  ;;  %v1164_v32 = vunpack.c.0.s8 %v812_v63  ;;  %v1172_v33 = vunpack.c.1.s8 %v812_v63  ;;  %v956_v23 = vld [vmem:[%s8800_s10 + $0x580] sm:$0xff] }
  0xb7   : > { %3655 = vmatpush.bf16.msra.mxu1 %v3156_v26  ;;  %v3284_v35 = vpack.c.bf16 %v2468_v28, %v2460_v27  ;;  %v2068_v36 = vcvt.s32.f32 %v1044_v29  ;;  %v1292_v37 = vunpack.c.0.s8 %v844_v4  ;;  %v1300_v38 = vunpack.c.1.s8 %v844_v4  ;;  %v988_v28 = vld [vmem:[%s8800_s10 + $0x680] sm:$0xff] }
  0xb8   : > { %3668 = vmatpush.bf16.msra.mxu2 %v3220_v30  ;;  %v2188_v39 = vcvt.s32.f32 %v1164_v32  ;;  %v2196_v40 = vcvt.s32.f32 %v1172_v33  ;;  %v1420_v41 = vunpack.c.0.s8 %v876_v9  ;;  %v1428_v42 = vunpack.c.1.s8 %v876_v9  ;;  %v1020_v33 = vld [vmem:[%s8800_s10 + $0x780] sm:$0xff] }
  0xb9   : > { %3681 = vmatpush.bf16.msra.mxu3 %v3284_v35  ;;  %v3084_v44 = vpack.c.bf16 %v2068_v36, %v2060_v31  ;;  %v2316_v45 = vcvt.s32.f32 %v1292_v37  ;;  %v2324_v46 = vcvt.s32.f32 %v1300_v38  ;;  %v1660_v47 = vunpack.c.2.s8 %v932_v34 }
  0xba   : > { %v3148_v49 = vpack.c.bf16 %v2196_v40, %v2188_v39  ;;  %v2444_v50 = vcvt.s32.f32 %v1420_v41  ;;  %v2452_v51 = vcvt.s32.f32 %v1428_v42  ;;  %v1668_v52 = vunpack.c.3.s8 %v932_v34 }
  0xbb   : > { %3643 = vmatpush.bf16.msra.mxu0 %v3084_v44  ;;  %v3212_v54 = vpack.c.bf16 %v2324_v46, %v2316_v45  ;;  %v2684_v55 = vcvt.s32.f32 %v1660_v47  ;;  %v1788_v56 = vunpack.c.2.s8 %v964_v43  ;;  %v1796_v57 = vunpack.c.3.s8 %v964_v43 }
  0xbc   : > { %3656 = vmatpush.bf16.msra.mxu1 %v3148_v49  ;;  %v3276_v58 = vpack.c.bf16 %v2452_v51, %v2444_v50  ;;  %v2692_v59 = vcvt.s32.f32 %v1668_v52  ;;  %v1916_v60 = vunpack.c.2.s8 %v996_v48  ;;  %v1924_v61 = vunpack.c.3.s8 %v996_v48 }
  0xbd   : > { %3669 = vmatpush.bf16.msra.mxu2 %v3212_v54  ;;  %v2812_v62 = vcvt.s32.f32 %v1788_v56  ;;  %v2820_v63 = vcvt.s32.f32 %v1796_v57  ;;  %v2044_v0 = vunpack.c.2.s8 %v1028_v53  ;;  %v2052_v1 = vunpack.c.3.s8 %v1028_v53 }
  0xbe   : > { %3682 = vmatpush.bf16.msra.mxu3 %v3276_v58  ;;  %v3396_v2 = vpack.c.bf16 %v2692_v59, %v2684_v55  ;;  %v2940_v3 = vcvt.s32.f32 %v1916_v60  ;;  %v2948_v4 = vcvt.s32.f32 %v1924_v61  ;;  %v1644_v5 = vunpack.c.0.s8 %v932_v34  ;;  %v916_v58 = vld [vmem:[%s8800_s10 + $0x440] sm:$0xff] }
  0xbf   : > { %v3460_v6 = vpack.c.bf16 %v2820_v63, %v2812_v62  ;;  %v3068_v7 = vcvt.s32.f32 %v2044_v0  ;;  %v3076_v8 = vcvt.s32.f32 %v2052_v1  ;;  %v1652_v9 = vunpack.c.1.s8 %v932_v34 }
  0xc0   : > { %3688 = vmatpush.bf16.msrb.mxu0 %v3396_v2  ;;  %v3524_v10 = vpack.c.bf16 %v2948_v4, %v2940_v3  ;;  %v2668_v11 = vcvt.s32.f32 %v1644_v5  ;;  %v1772_v12 = vunpack.c.0.s8 %v964_v43  ;;  %v1780_v13 = vunpack.c.1.s8 %v964_v43  ;;  %v948_v3 = vld [vmem:[%s8800_s10 + $0x540] sm:$0xff] }
  0xc1   : > { %3701 = vmatpush.bf16.msrb.mxu1 %v3460_v6  ;;  %v3588_v15 = vpack.c.bf16 %v3076_v8, %v3068_v7  ;;  %v2676_v16 = vcvt.s32.f32 %v1652_v9  ;;  %v1900_v17 = vunpack.c.0.s8 %v996_v48  ;;  %v1908_v18 = vunpack.c.1.s8 %v996_v48  ;;  %v980_v8 = vld [vmem:[%s8800_s10 + $0x640] sm:$0xff] }
  0xc2   : > { %3714 = vmatpush.bf16.msrb.mxu2 %v3524_v10  ;;  %v2796_v19 = vcvt.s32.f32 %v1772_v12  ;;  %v2804_v20 = vcvt.s32.f32 %v1780_v13  ;;  %v2028_v21 = vunpack.c.0.s8 %v1028_v53  ;;  %v2036_v22 = vunpack.c.1.s8 %v1028_v53  ;;  %v1012_v13 = vld [vmem:[%s8800_s10 + $0x740] sm:$0xff] }
  0xc3   : > { %3727 = vmatpush.bf16.msrb.mxu3 %v3588_v15  ;;  %v3388_v24 = vpack.c.bf16 %v2676_v16, %v2668_v11  ;;  %v2924_v25 = vcvt.s32.f32 %v1900_v17  ;;  %v2932_v26 = vcvt.s32.f32 %v1908_v18  ;;  %v1628_v27 = vunpack.c.2.s8 %v924_v14  ;;  %v3605_v18 = vld [vmem:[%s8793_s16 + $0x8] sm:$0xff] }
  0xc4   : > { %v3452_v29 = vpack.c.bf16 %v2804_v20, %v2796_v19  ;;  %v3052_v30 = vcvt.s32.f32 %v2028_v21  ;;  %v3060_v31 = vcvt.s32.f32 %v2036_v22  ;;  %v1636_v32 = vunpack.c.3.s8 %v924_v14 }
  0xc5   : > { %3689 = vmatpush.bf16.msrb.mxu0 %v3388_v24  ;;  %v3516_v34 = vpack.c.bf16 %v2932_v26, %v2924_v25  ;;  %v2652_v35 = vcvt.s32.f32 %v1628_v27  ;;  %v1756_v36 = vunpack.c.2.s8 %v956_v23  ;;  %v1764_v37 = vunpack.c.3.s8 %v956_v23 }
  0xc6   : > { %3702 = vmatpush.bf16.msrb.mxu1 %v3452_v29  ;;  %v3580_v38 = vpack.c.bf16 %v3060_v31, %v3052_v30  ;;  %v2660_v39 = vcvt.s32.f32 %v1636_v32  ;;  %v1884_v40 = vunpack.c.2.s8 %v988_v28  ;;  %v1892_v41 = vunpack.c.3.s8 %v988_v28 }
  0xc7   : > { %3715 = vmatpush.bf16.msrb.mxu2 %v3516_v34  ;;  %v2780_v42 = vcvt.s32.f32 %v1756_v36  ;;  %v2788_v43 = vcvt.s32.f32 %v1764_v37  ;;  %v2012_v44 = vunpack.c.2.s8 %v1020_v33  ;;  %v2020_v45 = vunpack.c.3.s8 %v1020_v33 }
  0xc8   : > { %3728 = vmatpush.bf16.msrb.mxu3 %v3580_v38  ;;  %v3380_v46 = vpack.c.bf16 %v2660_v39, %v2652_v35  ;;  %v2908_v47 = vcvt.s32.f32 %v1884_v40  ;;  %v2916_v48 = vcvt.s32.f32 %v1892_v41  ;;  %v1612_v49 = vunpack.c.0.s8 %v924_v14  ;;  %v3604_v39 = vld [vmem:[%s8793_s16] sm:$0xff] }
  0xc9   : > { %v3444_v50 = vpack.c.bf16 %v2788_v43, %v2780_v42  ;;  %v3036_v51 = vcvt.s32.f32 %v2012_v44  ;;  %v3044_v52 = vcvt.s32.f32 %v2020_v45  ;;  %v1620_v53 = vunpack.c.1.s8 %v924_v14 }
  0xca   : > { %3690 = vmatpush.bf16.msrb.mxu0 %v3380_v46  ;;  %v3508_v54 = vpack.c.bf16 %v2916_v48, %v2908_v47  ;;  %v2636_v55 = vcvt.s32.f32 %v1612_v49  ;;  %v1740_v56 = vunpack.c.0.s8 %v956_v23  ;;  %v1748_v57 = vunpack.c.1.s8 %v956_v23 }
  0xcb   : > { %3703 = vmatpush.bf16.msrb.mxu1 %v3444_v50  ;;  %v3572_v59 = vpack.c.bf16 %v3044_v52, %v3036_v51  ;;  %v2644_v60 = vcvt.s32.f32 %v1620_v53  ;;  %v1868_v61 = vunpack.c.0.s8 %v988_v28  ;;  %v1876_v62 = vunpack.c.1.s8 %v988_v28  ;;  %v908_v52 = vld [vmem:[%s8800_s10 + $0x400] sm:$0xff] }
  0xcc   : > { %3716 = vmatpush.bf16.msrb.mxu2 %v3508_v54  ;;  %v2764_v63 = vcvt.s32.f32 %v1740_v56  ;;  %v2772_v0 = vcvt.s32.f32 %v1748_v57  ;;  %v1996_v1 = vunpack.c.0.s8 %v1020_v33  ;;  %v2004_v2 = vunpack.c.1.s8 %v1020_v33  ;;  %v940_v57 = vld [vmem:[%s8800_s10 + $0x500] sm:$0xff] }
  0xcd   : > { %3729 = vmatpush.bf16.msrb.mxu3 %v3572_v59  ;;  %v3372_v4 = vpack.c.bf16 %v2644_v60, %v2636_v55  ;;  %v2892_v5 = vcvt.s32.f32 %v1868_v61  ;;  %v2900_v6 = vcvt.s32.f32 %v1876_v62  ;;  %v1596_v7 = vunpack.c.2.s8 %v916_v58  ;;  %v972_v62 = vld [vmem:[%s8800_s10 + $0x600] sm:$0xff] }
  0xce   : > { %v3436_v9 = vpack.c.bf16 %v2772_v0, %v2764_v63  ;;  %v3020_v10 = vcvt.s32.f32 %v1996_v1  ;;  %v3028_v11 = vcvt.s32.f32 %v2004_v2  ;;  %v1604_v12 = vunpack.c.3.s8 %v916_v58 }
  0xcf   : > { %3691 = vmatpush.bf16.msrb.mxu0 %v3372_v4  ;;  %v3500_v14 = vpack.c.bf16 %v2900_v6, %v2892_v5  ;;  %v2620_v15 = vcvt.s32.f32 %v1596_v7  ;;  %v1724_v16 = vunpack.c.2.s8 %v948_v3  ;;  %v1732_v17 = vunpack.c.3.s8 %v948_v3 }
  0xd0   : > { %3704 = vmatpush.bf16.msrb.mxu1 %v3436_v9  ;;  %v3564_v19 = vpack.c.bf16 %v3028_v11, %v3020_v10  ;;  %v2628_v20 = vcvt.s32.f32 %v1604_v12  ;;  %v1852_v21 = vunpack.c.2.s8 %v980_v8  ;;  %v1860_v22 = vunpack.c.3.s8 %v980_v8 }
  0xd1   : > { %3717 = vmatpush.bf16.msrb.mxu2 %v3500_v14  ;;  %v2748_v23 = vcvt.s32.f32 %v1724_v16  ;;  %v2756_v24 = vcvt.s32.f32 %v1732_v17  ;;  %v1980_v25 = vunpack.c.2.s8 %v1012_v13  ;;  %v1988_v26 = vunpack.c.3.s8 %v1012_v13 }
  0xd2   : > { %3730 = vmatpush.bf16.msrb.mxu3 %v3564_v19  ;;  %v3364_v27 = vpack.c.bf16 %v2628_v20, %v2620_v15  ;;  %v2876_v28 = vcvt.s32.f32 %v1852_v21  ;;  %v2884_v29 = vcvt.s32.f32 %v1860_v22  ;;  %v3614_v30 = vunpack.c.l.b16 %v3605_v18 }
  0xd3   : > { %v3428_v31 = vpack.c.bf16 %v2756_v24, %v2748_v23  ;;  %v3004_v32 = vcvt.s32.f32 %v1980_v25  ;;  %v3012_v33 = vcvt.s32.f32 %v1988_v26  ;;  %v1580_v34 = vunpack.c.0.s8 %v916_v58 }
  0xd4   : > { %3692 = vmatpush.bf16.msrb.mxu0 %v3364_v27  ;;  %v3492_v35 = vpack.c.bf16 %v2884_v29, %v2876_v28  ;;  %v8861_v36 = vpack.c.b16 %v3614_v30, %v3614_v30  ;;  %v1588_v37 = vunpack.c.1.s8 %v916_v58  ;;  %v1708_v38 = vunpack.c.0.s8 %v948_v3  ;;  %v805_v28 = vld [vmem:[%s8800_s10 + $0xc8] sm:$0xff] }
  0xd5   : > { %3705 = vmatpush.bf16.msrb.mxu1 %v3428_v31  ;;  %v3556_v40 = vpack.c.bf16 %v3012_v33, %v3004_v32  ;;  %v2604_v41 = vcvt.s32.f32 %v1580_v34  ;;  %v1716_v42 = vunpack.c.1.s8 %v948_v3  ;;  %v1836_v43 = vunpack.c.0.s8 %v980_v8  ;;  %v1004_v3 = vld [vmem:[%s8800_s10 + $0x700] sm:$0xff] }
  0xd6   : > { %3718 = vmatpush.bf16.msrb.mxu2 %v3492_v35  ;;  %v2612_v44 = vcvt.s32.f32 %v1588_v37  ;;  %v2732_v45 = vcvt.s32.f32 %v1708_v38  ;;  %v1844_v46 = vunpack.c.1.s8 %v980_v8  ;;  %v1964_v47 = vunpack.c.0.s8 %v1012_v13  ;;  %v837_v38 = vld [vmem:[%s8800_s10 + $0x1c8] sm:$0xff] }
  0xd7   : > { %3731 = vmatpush.bf16.msrb.mxu3 %v3556_v40  ;;  %3670 = vmatmul.bf16.vlgmr.msra.gmra.mxu2 %v8861_v36  ;;  %v2740_v48 = vcvt.s32.f32 %v1716_v42  ;;  %v2860_v49 = vcvt.s32.f32 %v1836_v43  ;;  %v1972_v50 = vunpack.c.1.s8 %v1012_v13  ;;  %v3612_v51 = vunpack.c.l.b16 %v3604_v39  ;;  %v869_v43 = vld [vmem:[%s8800_s10 + $0x2c8] sm:$0xff] }
  0xd8   : > { %v3356_v53 = vpack.c.bf16 %v2612_v44, %v2604_v41  ;;  %v2868_v54 = vcvt.s32.f32 %v1844_v46  ;;  %v2988_v55 = vcvt.s32.f32 %v1964_v47  ;;  %v3615_v56 = vunpack.c.h.b16 %v3605_v18 }
  0xd9   : > { %v3420_v58 = vpack.c.bf16 %v2740_v48, %v2732_v45  ;;  %v2996_v59 = vcvt.s32.f32 %v1972_v50  ;;  %v8867_v60 = vpack.c.b16 %v3612_v51, %v3612_v51  ;;  %v3613_v61 = vunpack.c.h.b16 %v3604_v39  ;;  %v901_v48 = vld [vmem:[%s8800_s10 + $0x3c8] sm:$0xff] }
  0xda   : > { %3693 = vmatpush.bf16.msrb.mxu0 %v3356_v53  ;;  %v3484_v63 = vpack.c.bf16 %v2868_v54, %v2860_v49  ;;  %v8870_v0 = vpack.c.b16 %v3615_v56, %v3615_v56  ;;  %v1564_v1 = vunpack.c.2.s8 %v908_v52  ;;  %v1572_v2 = vunpack.c.3.s8 %v908_v52 }
  0xdb   : > { %3706 = vmatpush.bf16.msrb.mxu1 %v3420_v58  ;;  %v3548_v4 = vpack.c.bf16 %v2996_v59, %v2988_v55  ;;  %3644 = vmatmul.bf16.vlgmr.msra.gmra.mxu0 %v8867_v60  ;;  %v8874_v5 = vpack.c.b16 %v3613_v61, %v3613_v61  ;;  %v1692_v6 = vunpack.c.2.s8 %v940_v57  ;;  %v1700_v7 = vunpack.c.3.s8 %v940_v57 }
  0xdc   : > { %3719 = vmatpush.bf16.msrb.mxu2 %v3484_v63  ;;  %3683 = vmatmul.bf16.vlgmr.msra.gmra.mxu3 %v8870_v0  ;;  %v2588_v8 = vcvt.s32.f32 %v1564_v1  ;;  %v2596_v9 = vcvt.s32.f32 %v1572_v2  ;;  %v1820_v10 = vunpack.c.2.s8 %v972_v62  ;;  %v1828_v11 = vunpack.c.3.s8 %v972_v62 }
  0xdd   : > { %3732 = vmatpush.bf16.msrb.mxu3 %v3548_v4  ;;  %3657 = vmatmul.bf16.vlgmr.msra.gmra.mxu1 %v8874_v5  ;;  %v2716_v12 = vcvt.s32.f32 %v1692_v6  ;;  %v2724_v13 = vcvt.s32.f32 %v1700_v7  ;;  %v1948_v14 = vunpack.c.2.s8 %v1004_v3  ;;  %v1956_v15 = vunpack.c.3.s8 %v1004_v3 }
  0xde   : > { %v3348_v16 = vpack.c.bf16 %v2596_v9, %v2588_v8  ;;  %v2844_v17 = vcvt.s32.f32 %v1820_v10  ;;  %v2852_v18 = vcvt.s32.f32 %v1828_v11  ;;  %v1548_v19 = vunpack.c.0.s8 %v908_v52 }
  0xdf   : > { %v3412_v20 = vpack.c.bf16 %v2724_v13, %v2716_v12  ;;  %v2972_v21 = vcvt.s32.f32 %v1948_v14  ;;  %v2980_v22 = vcvt.s32.f32 %v1956_v15  ;;  %v1556_v23 = vunpack.c.1.s8 %v908_v52  ;;  %v3607_v12 = vld [vmem:[%s8793_s16 + $0x18] sm:$0xff] }
  0xe0   : > { %3694 = vmatpush.bf16.msrb.mxu0 %v3348_v16  ;;  %v3476_v24 = vpack.c.bf16 %v2852_v18, %v2844_v17  ;;  %v2572_v25 = vcvt.s32.f32 %v1548_v19  ;;  %v1676_v26 = vunpack.c.0.s8 %v940_v57  ;;  %v1684_v27 = vunpack.c.1.s8 %v940_v57  ;;  %v3606_v17 = vld [vmem:[%s8793_s16 + $0x10] sm:$0xff] }
  0xe1   : > { %3707 = vmatpush.bf16.msrb.mxu1 %v3412_v20  ;;  %v3540_v29 = vpack.c.bf16 %v2980_v22, %v2972_v21  ;;  %v2580_v30 = vcvt.s32.f32 %v1556_v23  ;;  %v1804_v31 = vunpack.c.0.s8 %v972_v62  ;;  %v1812_v32 = vunpack.c.1.s8 %v972_v62  ;;  %v797_v22 = vld [vmem:[%s8800_s10 + $0x88] sm:$0xff] }
  0xe2   : > { %3720 = vmatpush.bf16.msrb.mxu2 %v3476_v24  ;;  %v2700_v33 = vcvt.s32.f32 %v1676_v26  ;;  %v2708_v34 = vcvt.s32.f32 %v1684_v27  ;;  %v1932_v35 = vunpack.c.0.s8 %v1004_v3  ;;  %v1940_v37 = vunpack.c.1.s8 %v1004_v3  ;;  %v829_v27 = vld [vmem:[%s8800_s10 + $0x188] sm:$0xff] }
  0xe3   : > { %3733 = vmatpush.bf16.msrb.mxu3 %v3540_v29  ;;  %v3340_v39 = vpack.c.bf16 %v2580_v30, %v2572_v25  ;;  %v2828_v40 = vcvt.s32.f32 %v1804_v31  ;;  %v2836_v41 = vcvt.s32.f32 %v1812_v32  ;;  %v1149_v42 = vunpack.c.2.s8 %v805_v28  ;;  %v861_v32 = vld [vmem:[%s8800_s10 + $0x288] sm:$0xff] }
  0xe4   : > { %v3404_v44 = vpack.c.bf16 %v2708_v34, %v2700_v33  ;;  %v2956_v45 = vcvt.s32.f32 %v1932_v35  ;;  %v2964_v46 = vcvt.s32.f32 %v1940_v37  ;;  %v1157_v47 = vunpack.c.3.s8 %v805_v28 }
  0xe5   : > { %3695 = vmatpush.bf16.msrb.mxu0 %v3340_v39  ;;  %v3468_v49 = vpack.c.bf16 %v2836_v41, %v2828_v40  ;;  %v2173_v50 = vcvt.s32.f32 %v1149_v42  ;;  %v1277_v51 = vunpack.c.2.s8 %v837_v38  ;;  %v1285_v52 = vunpack.c.3.s8 %v837_v38 }
  0xe6   : > { %3708 = vmatpush.bf16.msrb.mxu1 %v3404_v44  ;;  %v3532_v53 = vpack.c.bf16 %v2964_v46, %v2956_v45  ;;  %v2181_v54 = vcvt.s32.f32 %v1157_v47  ;;  %v1405_v55 = vunpack.c.2.s8 %v869_v43  ;;  %v1413_v56 = vunpack.c.3.s8 %v869_v43 }
  0xe7   : > { %3721 = vmatpush.bf16.msrb.mxu2 %v3468_v49  ;;  %v2301_v57 = vcvt.s32.f32 %v1277_v51  ;;  %v2309_v58 = vcvt.s32.f32 %v1285_v52  ;;  %v1533_v59 = vunpack.c.2.s8 %v901_v48  ;;  %v1541_v61 = vunpack.c.3.s8 %v901_v48 }
  0xe8   : > { %3734 = vmatpush.bf16.msrb.mxu3 %v3532_v53  ;;  %v3141_v62 = vpack.c.bf16 %v2181_v54, %v2173_v50  ;;  %v2429_v63 = vcvt.s32.f32 %v1405_v55  ;;  %v2437_v1 = vcvt.s32.f32 %v1413_v56  ;;  %v1133_v2 = vunpack.c.0.s8 %v805_v28 }
  0xe9   : > { %v3205_v3 = vpack.c.bf16 %v2309_v58, %v2301_v57  ;;  %v2557_v4 = vcvt.s32.f32 %v1533_v59  ;;  %v2565_v6 = vcvt.s32.f32 %v1541_v61  ;;  %v1141_v7 = vunpack.c.1.s8 %v805_v28 }
  0xea   : > { %3740 = vmatpush.bf16.msra.mxu0 %v3141_v62  ;;  %v3269_v8 = vpack.c.bf16 %v2437_v1, %v2429_v63  ;;  %v2157_v9 = vcvt.s32.f32 %v1133_v2  ;;  %v1261_v10 = vunpack.c.0.s8 %v837_v38  ;;  %v1269_v11 = vunpack.c.1.s8 %v837_v38  ;;  %v893_v38 = vld [vmem:[%s8800_s10 + $0x388] sm:$0xff] }
  0xeb   : > { %3753 = vmatpush.bf16.msra.mxu1 %v3205_v3  ;;  %v3333_v13 = vpack.c.bf16 %v2565_v6, %v2557_v4  ;;  %v2165_v14 = vcvt.s32.f32 %v1141_v7  ;;  %v1389_v15 = vunpack.c.0.s8 %v869_v43  ;;  %v1397_v16 = vunpack.c.1.s8 %v869_v43  ;;  %v789_v6 = vld [vmem:[%s8800_s10 + $0x48] sm:$0xff] }
  0xec   : > { %3766 = vmatpush.bf16.msra.mxu2 %v3269_v8  ;;  %v2285_v18 = vcvt.s32.f32 %v1261_v10  ;;  %v2293_v19 = vcvt.s32.f32 %v1269_v11  ;;  %v1517_v20 = vunpack.c.0.s8 %v901_v48  ;;  %v1525_v21 = vunpack.c.1.s8 %v901_v48 }
  0xed   : > { %3779 = vmatpush.bf16.msra.mxu3 %v3333_v13  ;;  %v3133_v23 = vpack.c.bf16 %v2165_v14, %v2157_v9  ;;  %v2413_v24 = vcvt.s32.f32 %v1389_v15  ;;  %v2421_v25 = vcvt.s32.f32 %v1397_v16  ;;  %v3618_v26 = vunpack.c.l.b16 %v3607_v12  ;;  %v821_v15 = vld [vmem:[%s8800_s10 + $0x148] sm:$0xff] }
  0xee   : > { %v3197_v28 = vpack.c.bf16 %v2293_v19, %v2285_v18  ;;  %v2541_v29 = vcvt.s32.f32 %v1517_v20  ;;  %v2549_v30 = vcvt.s32.f32 %v1525_v21  ;;  %v3616_v31 = vunpack.c.l.b16 %v3606_v17  ;;  %v853_v20 = vld [vmem:[%s8800_s10 + $0x248] sm:$0xff] }
  0xef   : > { %3741 = vmatpush.bf16.msra.mxu0 %v3133_v23  ;;  %v3261_v33 = vpack.c.bf16 %v2421_v25, %v2413_v24  ;;  %v8887_v34 = vpack.c.b16 %v3618_v26, %v3618_v26  ;;  %v3619_v35 = vunpack.c.h.b16 %v3607_v12  ;;  %v1117_v37 = vunpack.c.2.s8 %v797_v22  ;;  %v885_v25 = vld [vmem:[%s8800_s10 + $0x348] sm:$0xff] }
  0xf0   : > { %3754 = vmatpush.bf16.msra.mxu1 %v3197_v28  ;;  %v3325_v39 = vpack.c.bf16 %v2549_v30, %v2541_v29  ;;  %v8890_v40 = vpack.c.b16 %v3616_v31, %v3616_v31  ;;  %v1125_v41 = vunpack.c.3.s8 %v797_v22  ;;  %v1245_v42 = vunpack.c.2.s8 %v829_v27 }
  0xf1   : > { %3767 = vmatpush.bf16.msra.mxu2 %v3261_v33  ;;  %v8892_v43 = vpack.c.b16 %v3619_v35, %v3619_v35  ;;  %v2141_v44 = vcvt.s32.f32 %v1117_v37  ;;  %v1253_v45 = vunpack.c.3.s8 %v829_v27  ;;  %v1373_v46 = vunpack.c.2.s8 %v861_v32 }
  0xf2   : > { %3780 = vmatpush.bf16.msra.mxu3 %v3325_v39  ;;  %3722 = vmatmul.bf16.vlgmr.msrb.gmra.mxu2 %v8887_v34  ;;  %v2149_v47 = vcvt.s32.f32 %v1125_v41  ;;  %v2269_v48 = vcvt.s32.f32 %v1245_v42  ;;  %v1381_v49 = vunpack.c.3.s8 %v861_v32  ;;  %v1501_v50 = vunpack.c.2.s8 %v893_v38 }
  0xf3   : > { %3696 = vmatmul.bf16.vlgmr.msrb.gmra.mxu0 %v8890_v40  ;;  %3735 = vmatmul.bf16.vlgmr.msrb.gmra.mxu3 %v8892_v43  ;;  %v2277_v51 = vcvt.s32.f32 %v1253_v45  ;;  %v2397_v52 = vcvt.s32.f32 %v1373_v46  ;;  %v1509_v53 = vunpack.c.3.s8 %v893_v38  ;;  %v3617_v54 = vunpack.c.h.b16 %v3606_v17 }
  0xf4   : > { %v3125_v55 = vpack.c.bf16 %v2149_v47, %v2141_v44  ;;  %v2405_v56 = vcvt.s32.f32 %v1381_v49  ;;  %v2525_v57 = vcvt.s32.f32 %v1501_v50  ;;  %v1101_v58 = vunpack.c.0.s8 %v797_v22 }
  0xf5   : > { %v3189_v59 = vpack.c.bf16 %v2277_v51, %v2269_v48  ;;  %v2533_v61 = vcvt.s32.f32 %v1509_v53  ;;  %v8897_v62 = vpack.c.b16 %v3617_v54, %v3617_v54  ;;  %v1109_v63 = vunpack.c.1.s8 %v797_v22  ;;  %v781_v54 = vld [vmem:[%s8800_s10 + $0x8] sm:$0xff] }
  0xf6   : > { %3742 = vmatpush.bf16.msra.mxu0 %v3125_v55  ;;  %v3253_v1 = vpack.c.bf16 %v2405_v56, %v2397_v52  ;;  %v2125_v2 = vcvt.s32.f32 %v1101_v58  ;;  %v1229_v3 = vunpack.c.0.s8 %v829_v27  ;;  %v1237_v4 = vunpack.c.1.s8 %v829_v27 }
  0xf7   : > { %3755 = vmatpush.bf16.msra.mxu1 %v3189_v59  ;;  %v3317_v7 = vpack.c.bf16 %v2533_v61, %v2525_v57  ;;  %v2133_v8 = vcvt.s32.f32 %v1109_v63  ;;  %v1357_v9 = vunpack.c.0.s8 %v861_v32  ;;  %v1365_v10 = vunpack.c.1.s8 %v861_v32 }
  0xf8   : > { %3768 = vmatpush.bf16.msra.mxu2 %v3253_v1  ;;  %3709 = vmatmul.bf16.vlgmr.msrb.gmra.mxu1 %v8897_v62  ;;  %v2253_v11 = vcvt.s32.f32 %v1229_v3  ;;  %v2261_v12 = vcvt.s32.f32 %v1237_v4  ;;  %v1485_v13 = vunpack.c.0.s8 %v893_v38  ;;  %v1493_v14 = vunpack.c.1.s8 %v893_v38 }
  0xf9   : > { %3781 = vmatpush.bf16.msra.mxu3 %v3317_v7  ;;  %v3117_v16 = vpack.c.bf16 %v2133_v8, %v2125_v2  ;;  %v2381_v17 = vcvt.s32.f32 %v1357_v9  ;;  %v2389_v18 = vcvt.s32.f32 %v1365_v10  ;;  %v1085_v19 = vunpack.c.2.s8 %v789_v6  ;;  %v813_v2 = vld [vmem:[%s8800_s10 + $0x108] sm:$0xff] }
  0xfa   : > { %v3181_v21 = vpack.c.bf16 %v2261_v12, %v2253_v11  ;;  %v2509_v22 = vcvt.s32.f32 %v1485_v13  ;;  %v2517_v23 = vcvt.s32.f32 %v1493_v14  ;;  %v1093_v24 = vunpack.c.3.s8 %v789_v6  ;;  %v845_v8 = vld [vmem:[%s8800_s10 + $0x208] sm:$0xff] }
  0xfb   : > { %3743 = vmatpush.bf16.msra.mxu0 %v3117_v16  ;;  %v3245_v26 = vpack.c.bf16 %v2389_v18, %v2381_v17  ;;  %v2109_v27 = vcvt.s32.f32 %v1085_v19  ;;  %v1213_v28 = vunpack.c.2.s8 %v821_v15  ;;  %v1221_v29 = vunpack.c.3.s8 %v821_v15  ;;  %v877_v13 = vld [vmem:[%s8800_s10 + $0x308] sm:$0xff] }
  0xfc   : > { %3756 = vmatpush.bf16.msra.mxu1 %v3181_v21  ;;  %v3309_v30 = vpack.c.bf16 %v2517_v23, %v2509_v22  ;;  %v2117_v31 = vcvt.s32.f32 %v1093_v24  ;;  %v1341_v32 = vunpack.c.2.s8 %v853_v20  ;;  %v1349_v33 = vunpack.c.3.s8 %v853_v20 }
  0xfd   : > { %3769 = vmatpush.bf16.msra.mxu2 %v3245_v26  ;;  %v2237_v35 = vcvt.s32.f32 %v1213_v28  ;;  %v2245_v37 = vcvt.s32.f32 %v1221_v29  ;;  %v1469_v38 = vunpack.c.2.s8 %v885_v25  ;;  %v1477_v39 = vunpack.c.3.s8 %v885_v25 }
  0xfe   : > { %3782 = vmatpush.bf16.msra.mxu3 %v3309_v30  ;;  %v3109_v41 = vpack.c.bf16 %v2117_v31, %v2109_v27  ;;  %v2365_v42 = vcvt.s32.f32 %v1341_v32  ;;  %v2373_v44 = vcvt.s32.f32 %v1349_v33  ;;  %v1069_v45 = vunpack.c.0.s8 %v789_v6 }
  0xff   : > { %v3173_v46 = vpack.c.bf16 %v2245_v37, %v2237_v35  ;;  %v2493_v47 = vcvt.s32.f32 %v1469_v38  ;;  %v2501_v48 = vcvt.s32.f32 %v1477_v39  ;;  %v1077_v49 = vunpack.c.1.s8 %v789_v6 }
 0x100   : > { %3744 = vmatpush.bf16.msra.mxu0 %v3109_v41  ;;  %v3237_v50 = vpack.c.bf16 %v2373_v44, %v2365_v42  ;;  %v2093_v51 = vcvt.s32.f32 %v1069_v45  ;;  %v1197_v52 = vunpack.c.0.s8 %v821_v15  ;;  %v1205_v53 = vunpack.c.1.s8 %v821_v15  ;;  %v933_v41 = vld [vmem:[%s8800_s10 + $0x4c8] sm:$0xff] }
 0x101   : > { %3757 = vmatpush.bf16.msra.mxu1 %v3173_v46  ;;  %v3301_v55 = vpack.c.bf16 %v2501_v48, %v2493_v47  ;;  %v2101_v56 = vcvt.s32.f32 %v1077_v49  ;;  %v1325_v57 = vunpack.c.0.s8 %v853_v20  ;;  %v1333_v58 = vunpack.c.1.s8 %v853_v20 }
 0x102   : > { %3770 = vmatpush.bf16.msra.mxu2 %v3237_v50  ;;  %v2221_v59 = vcvt.s32.f32 %v1197_v52  ;;  %v2229_v61 = vcvt.s32.f32 %v1205_v53  ;;  %v1453_v63 = vunpack.c.0.s8 %v885_v25  ;;  %v1461_v1 = vunpack.c.1.s8 %v885_v25 }
 0x103   : > { %3783 = vmatpush.bf16.msra.mxu3 %v3301_v55  ;;  %v3101_v3 = vpack.c.bf16 %v2101_v56, %v2093_v51  ;;  %v2349_v4 = vcvt.s32.f32 %v1325_v57  ;;  %v2357_v6 = vcvt.s32.f32 %v1333_v58  ;;  %v1053_v7 = vunpack.c.2.s8 %v781_v54  ;;  %v965_v51 = vld [vmem:[%s8800_s10 + $0x5c8] sm:$0xff] }
 0x104   : > { %v3165_v9 = vpack.c.bf16 %v2229_v61, %v2221_v59  ;;  %v2477_v10 = vcvt.s32.f32 %v1453_v63  ;;  %v2485_v11 = vcvt.s32.f32 %v1461_v1  ;;  %v1061_v12 = vunpack.c.3.s8 %v781_v54  ;;  %v997_v56 = vld [vmem:[%s8800_s10 + $0x6c8] sm:$0xff] }
 0x105   : > { %3745 = vmatpush.bf16.msra.mxu0 %v3101_v3  ;;  %v3229_v14 = vpack.c.bf16 %v2357_v6, %v2349_v4  ;;  %v2077_v15 = vcvt.s32.f32 %v1053_v7  ;;  %v1181_v16 = vunpack.c.2.s8 %v813_v2  ;;  %v1189_v17 = vunpack.c.3.s8 %v813_v2  ;;  %v1029_v63 = vld [vmem:[%s8800_s10 + $0x7c8] sm:$0xff] }
 0x106   : > { %3758 = vmatpush.bf16.msra.mxu1 %v3165_v9  ;;  %v3293_v18 = vpack.c.bf16 %v2485_v11, %v2477_v10  ;;  %v2085_v19 = vcvt.s32.f32 %v1061_v12  ;;  %v1309_v20 = vunpack.c.2.s8 %v845_v8  ;;  %v1317_v21 = vunpack.c.3.s8 %v845_v8 }
 0x107   : > { %3771 = vmatpush.bf16.msra.mxu2 %v3229_v14  ;;  %v2205_v22 = vcvt.s32.f32 %v1181_v16  ;;  %v2213_v23 = vcvt.s32.f32 %v1189_v17  ;;  %v1437_v24 = vunpack.c.2.s8 %v877_v13  ;;  %v1445_v25 = vunpack.c.3.s8 %v877_v13 }
 0x108   : > { %3784 = vmatpush.bf16.msra.mxu3 %v3293_v18  ;;  %v3093_v26 = vpack.c.bf16 %v2085_v19, %v2077_v15  ;;  %v2333_v27 = vcvt.s32.f32 %v1309_v20  ;;  %v2341_v28 = vcvt.s32.f32 %v1317_v21  ;;  %v1037_v29 = vunpack.c.0.s8 %v781_v54 }
 0x109   : > { %v3157_v30 = vpack.c.bf16 %v2213_v23, %v2205_v22  ;;  %v2461_v31 = vcvt.s32.f32 %v1437_v24  ;;  %v2469_v32 = vcvt.s32.f32 %v1445_v25  ;;  %v1045_v33 = vunpack.c.1.s8 %v781_v54 }
 0x10a   : > { %3746 = vmatpush.bf16.msra.mxu0 %v3093_v26  ;;  %v3221_v35 = vpack.c.bf16 %v2341_v28, %v2333_v27  ;;  %v2061_v37 = vcvt.s32.f32 %v1037_v29  ;;  %v1165_v38 = vunpack.c.0.s8 %v813_v2  ;;  %v1173_v39 = vunpack.c.1.s8 %v813_v2  ;;  %v925_v26 = vld [vmem:[%s8800_s10 + $0x488] sm:$0xff] }
 0x10b   : > { %3759 = vmatpush.bf16.msra.mxu1 %v3157_v30  ;;  %v3285_v42 = vpack.c.bf16 %v2469_v32, %v2461_v31  ;;  %v2069_v44 = vcvt.s32.f32 %v1045_v33  ;;  %v1293_v45 = vunpack.c.0.s8 %v845_v8  ;;  %v1301_v46 = vunpack.c.1.s8 %v845_v8 }
 0x10c   : > { %3772 = vmatpush.bf16.msra.mxu2 %v3221_v35  ;;  %v2189_v47 = vcvt.s32.f32 %v1165_v38  ;;  %v2197_v48 = vcvt.s32.f32 %v1173_v39  ;;  %v1421_v49 = vunpack.c.0.s8 %v877_v13  ;;  %v1429_v50 = vunpack.c.1.s8 %v877_v13 }
 0x10d   : > { %3785 = vmatpush.bf16.msra.mxu3 %v3285_v42  ;;  %v3085_v52 = vpack.c.bf16 %v2069_v44, %v2061_v37  ;;  %v2317_v53 = vcvt.s32.f32 %v1293_v45  ;;  %v2325_v54 = vcvt.s32.f32 %v1301_v46  ;;  %v1661_v55 = vunpack.c.2.s8 %v933_v41  ;;  %v957_v37 = vld [vmem:[%s8800_s10 + $0x588] sm:$0xff] }
 0x10e   : > { %v3149_v57 = vpack.c.bf16 %v2197_v48, %v2189_v47  ;;  %v2445_v58 = vcvt.s32.f32 %v1421_v49  ;;  %v2453_v59 = vcvt.s32.f32 %v1429_v50  ;;  %v1669_v61 = vunpack.c.3.s8 %v933_v41  ;;  %v989_v44 = vld [vmem:[%s8800_s10 + $0x688] sm:$0xff] }
 0x10f   : > { %3747 = vmatpush.bf16.msra.mxu0 %v3085_v52  ;;  %v3213_v1 = vpack.c.bf16 %v2325_v54, %v2317_v53  ;;  %v2685_v2 = vcvt.s32.f32 %v1661_v55  ;;  %v1789_v3 = vunpack.c.2.s8 %v965_v51  ;;  %v1797_v4 = vunpack.c.3.s8 %v965_v51  ;;  %v1021_v49 = vld [vmem:[%s8800_s10 + $0x788] sm:$0xff] }
 0x110   : > { %3760 = vmatpush.bf16.msra.mxu1 %v3149_v57  ;;  %v3277_v6 = vpack.c.bf16 %v2453_v59, %v2445_v58  ;;  %v2693_v7 = vcvt.s32.f32 %v1669_v61  ;;  %v1917_v8 = vunpack.c.2.s8 %v997_v56  ;;  %v1925_v9 = vunpack.c.3.s8 %v997_v56 }
 0x111   : > { %3773 = vmatpush.bf16.msra.mxu2 %v3213_v1  ;;  %v2813_v10 = vcvt.s32.f32 %v1789_v3  ;;  %v2821_v11 = vcvt.s32.f32 %v1797_v4  ;;  %v2045_v12 = vunpack.c.2.s8 %v1029_v63  ;;  %v2053_v13 = vunpack.c.3.s8 %v1029_v63 }
 0x112   : > { %3786 = vmatpush.bf16.msra.mxu3 %v3277_v6  ;;  %v3397_v14 = vpack.c.bf16 %v2693_v7, %v2685_v2  ;;  %v2941_v15 = vcvt.s32.f32 %v1917_v8  ;;  %v2949_v16 = vcvt.s32.f32 %v1925_v9  ;;  %v1645_v17 = vunpack.c.0.s8 %v933_v41  ;;  %3748 = vmatmul.bf16.vlgmr.msra.gmra.mxu0 %v8867_v60 }
 0x113   : > { %v3461_v18 = vpack.c.bf16 %v2821_v11, %v2813_v10  ;;  %v3069_v19 = vcvt.s32.f32 %v2045_v12  ;;  %v3077_v20 = vcvt.s32.f32 %v2053_v13  ;;  %v1653_v21 = vunpack.c.1.s8 %v933_v41  ;;  %3761 = vmatmul.bf16.vlgmr.msra.gmra.mxu1 %v8874_v5 }
 0x114   : > { %3792 = vmatpush.bf16.msrb.mxu0 %v3397_v14  ;;  %v3525_v22 = vpack.c.bf16 %v2949_v16, %v2941_v15  ;;  %v2669_v23 = vcvt.s32.f32 %v1645_v17  ;;  %v1773_v24 = vunpack.c.0.s8 %v965_v51  ;;  %v1781_v25 = vunpack.c.1.s8 %v965_v51  ;;  %3774 = vmatmul.bf16.vlgmr.msra.gmra.mxu2 %v8861_v36  ;;  %v917_v14 = vld [vmem:[%s8800_s10 + $0x448] sm:$0xff] }
 0x115   : > { %3805 = vmatpush.bf16.msrb.mxu1 %v3461_v18  ;;  %v3589_v27 = vpack.c.bf16 %v3077_v20, %v3069_v19  ;;  %v2677_v28 = vcvt.s32.f32 %v1653_v21  ;;  %v1901_v29 = vunpack.c.0.s8 %v997_v56  ;;  %v1909_v30 = vunpack.c.1.s8 %v997_v56  ;;  %3787 = vmatmul.bf16.vlgmr.msra.gmra.mxu3 %v8870_v0 }
 0x116   : > { %3818 = vmatpush.bf16.msrb.mxu2 %v3525_v22  ;;  %v2797_v31 = vcvt.s32.f32 %v1773_v24  ;;  %v2805_v32 = vcvt.s32.f32 %v1781_v25  ;;  %v2029_v33 = vunpack.c.0.s8 %v1029_v63  ;;  %v2037_v35 = vunpack.c.1.s8 %v1029_v63 }
 0x117   : > { %3831 = vmatpush.bf16.msrb.mxu3 %v3589_v27  ;;  %v3389_v38 = vpack.c.bf16 %v2677_v28, %v2669_v23  ;;  %v2925_v39 = vcvt.s32.f32 %v1901_v29  ;;  %v2933_v41 = vcvt.s32.f32 %v1909_v30  ;;  %v1629_v42 = vunpack.c.2.s8 %v925_v26  ;;  %v949_v23 = vld [vmem:[%s8800_s10 + $0x548] sm:$0xff] }
 0x118   : > { %v3453_v45 = vpack.c.bf16 %v2805_v32, %v2797_v31  ;;  %v3053_v46 = vcvt.s32.f32 %v2029_v33  ;;  %v3061_v47 = vcvt.s32.f32 %v2037_v35  ;;  %v1637_v48 = vunpack.c.3.s8 %v925_v26  ;;  %v981_v28 = vld [vmem:[%s8800_s10 + $0x648] sm:$0xff] }
 0x119   : > { %3793 = vmatpush.bf16.msrb.mxu0 %v3389_v38  ;;  %v3517_v50 = vpack.c.bf16 %v2933_v41, %v2925_v39  ;;  %v2653_v51 = vcvt.s32.f32 %v1629_v42  ;;  %v1757_v52 = vunpack.c.2.s8 %v957_v37  ;;  %v1765_v53 = vunpack.c.3.s8 %v957_v37  ;;  %v1013_v33 = vld [vmem:[%s8800_s10 + $0x748] sm:$0xff] }
 0x11a   : > { %3806 = vmatpush.bf16.msrb.mxu1 %v3453_v45  ;;  %v3581_v54 = vpack.c.bf16 %v3061_v47, %v3053_v46  ;;  %v2661_v55 = vcvt.s32.f32 %v1637_v48  ;;  %v1885_v56 = vunpack.c.2.s8 %v989_v44  ;;  %v1893_v57 = vunpack.c.3.s8 %v989_v44 }
 0x11b   : > { %3819 = vmatpush.bf16.msrb.mxu2 %v3517_v50  ;;  %v2781_v58 = vcvt.s32.f32 %v1757_v52  ;;  %v2789_v59 = vcvt.s32.f32 %v1765_v53  ;;  %v2013_v61 = vunpack.c.2.s8 %v1021_v49  ;;  %v2021_v63 = vunpack.c.3.s8 %v1021_v49 }
 0x11c   : > { %3832 = vmatpush.bf16.msrb.mxu3 %v3581_v54  ;;  %v3381_v1 = vpack.c.bf16 %v2661_v55, %v2653_v51  ;;  %v2909_v2 = vcvt.s32.f32 %v1885_v56  ;;  %v2917_v3 = vcvt.s32.f32 %v1893_v57  ;;  %v1613_v4 = vunpack.c.0.s8 %v925_v26 }
 0x11d   : > { %v3445_v6 = vpack.c.bf16 %v2789_v59, %v2781_v58  ;;  %v3037_v7 = vcvt.s32.f32 %v2013_v61  ;;  %v3045_v8 = vcvt.s32.f32 %v2021_v63  ;;  %v1621_v9 = vunpack.c.1.s8 %v925_v26 }
 0x11e   : > { %3794 = vmatpush.bf16.msrb.mxu0 %v3381_v1  ;;  %v3509_v10 = vpack.c.bf16 %v2917_v3, %v2909_v2  ;;  %v2637_v11 = vcvt.s32.f32 %v1613_v4  ;;  %v1741_v12 = vunpack.c.0.s8 %v957_v37  ;;  %v1749_v13 = vunpack.c.1.s8 %v957_v37  ;;  %v909_v1 = vld [vmem:[%s8800_s10 + $0x408] sm:$0xff] }
 0x11f   : > { %3807 = vmatpush.bf16.msrb.mxu1 %v3445_v6  ;;  %v3573_v15 = vpack.c.bf16 %v3045_v8, %v3037_v7  ;;  %v2645_v16 = vcvt.s32.f32 %v1621_v9  ;;  %v1869_v17 = vunpack.c.0.s8 %v989_v44  ;;  %v1877_v18 = vunpack.c.1.s8 %v989_v44 }
 0x120   : > { %3820 = vmatpush.bf16.msrb.mxu2 %v3509_v10  ;;  %v2765_v19 = vcvt.s32.f32 %v1741_v12  ;;  %v2773_v20 = vcvt.s32.f32 %v1749_v13  ;;  %v1997_v21 = vunpack.c.0.s8 %v1021_v49  ;;  %v2005_v22 = vunpack.c.1.s8 %v1021_v49 }
 0x121   : > { %3833 = vmatpush.bf16.msrb.mxu3 %v3573_v15  ;;  %v3373_v24 = vpack.c.bf16 %v2645_v16, %v2637_v11  ;;  %v2893_v25 = vcvt.s32.f32 %v1869_v17  ;;  %v2901_v26 = vcvt.s32.f32 %v1877_v18  ;;  %v1597_v27 = vunpack.c.2.s8 %v917_v14  ;;  %v941_v11 = vld [vmem:[%s8800_s10 + $0x508] sm:$0xff] }
 0x122   : > { %v3437_v29 = vpack.c.bf16 %v2773_v20, %v2765_v19  ;;  %v3021_v30 = vcvt.s32.f32 %v1997_v21  ;;  %v3029_v31 = vcvt.s32.f32 %v2005_v22  ;;  %v1605_v32 = vunpack.c.3.s8 %v917_v14  ;;  %v973_v16 = vld [vmem:[%s8800_s10 + $0x608] sm:$0xff] }
 0x123   : > { %3795 = vmatpush.bf16.msrb.mxu0 %v3373_v24  ;;  %v3501_v35 = vpack.c.bf16 %v2901_v26, %v2893_v25  ;;  %v2621_v37 = vcvt.s32.f32 %v1597_v27  ;;  %v1725_v38 = vunpack.c.2.s8 %v949_v23  ;;  %v1733_v39 = vunpack.c.3.s8 %v949_v23  ;;  %v1005_v21 = vld [vmem:[%s8800_s10 + $0x708] sm:$0xff] }
 0x124   : > { %3808 = vmatpush.bf16.msrb.mxu1 %v3437_v29  ;;  %v3565_v41 = vpack.c.bf16 %v3029_v31, %v3021_v30  ;;  %v2629_v42 = vcvt.s32.f32 %v1605_v32  ;;  %v1853_v44 = vunpack.c.2.s8 %v981_v28  ;;  %v1861_v45 = vunpack.c.3.s8 %v981_v28 }
 0x125   : > { %3821 = vmatpush.bf16.msrb.mxu2 %v3501_v35  ;;  %v2749_v46 = vcvt.s32.f32 %v1725_v38  ;;  %v2757_v47 = vcvt.s32.f32 %v1733_v39  ;;  %v1981_v48 = vunpack.c.2.s8 %v1013_v33  ;;  %v1989_v49 = vunpack.c.3.s8 %v1013_v33 }
 0x126   : > { %3834 = vmatpush.bf16.msrb.mxu3 %v3565_v41  ;;  %v3365_v50 = vpack.c.bf16 %v2629_v42, %v2621_v37  ;;  %v2877_v51 = vcvt.s32.f32 %v1853_v44  ;;  %v2885_v52 = vcvt.s32.f32 %v1861_v45  ;;  %v1581_v53 = vunpack.c.0.s8 %v917_v14 }
 0x127   : > { %v3429_v54 = vpack.c.bf16 %v2757_v47, %v2749_v46  ;;  %v3005_v55 = vcvt.s32.f32 %v1981_v48  ;;  %v3013_v56 = vcvt.s32.f32 %v1989_v49  ;;  %v1589_v57 = vunpack.c.1.s8 %v917_v14 }
 0x128   : > { %3796 = vmatpush.bf16.msrb.mxu0 %v3365_v50  ;;  %v3493_v58 = vpack.c.bf16 %v2885_v52, %v2877_v51  ;;  %v2605_v59 = vcvt.s32.f32 %v1581_v53  ;;  %v1709_v61 = vunpack.c.0.s8 %v949_v23  ;;  %v1717_v63 = vunpack.c.1.s8 %v949_v23  ;;  %v806_v50 = vld [vmem:[%s8800_s10 + $0xd0] sm:$0xff] }
 0x129   : > { %3809 = vmatpush.bf16.msrb.mxu1 %v3429_v54  ;;  %v3557_v2 = vpack.c.bf16 %v3013_v56, %v3005_v55  ;;  %v2613_v3 = vcvt.s32.f32 %v1589_v57  ;;  %v1837_v4 = vunpack.c.0.s8 %v981_v28  ;;  %v1845_v6 = vunpack.c.1.s8 %v981_v28 }
 0x12a   : > { %3822 = vmatpush.bf16.msrb.mxu2 %v3493_v58  ;;  %v2733_v7 = vcvt.s32.f32 %v1709_v61  ;;  %v2741_v8 = vcvt.s32.f32 %v1717_v63  ;;  %v1965_v9 = vunpack.c.0.s8 %v1013_v33  ;;  %v1973_v10 = vunpack.c.1.s8 %v1013_v33 }
 0x12b   : > { %3835 = vmatpush.bf16.msrb.mxu3 %v3557_v2  ;;  %v3357_v12 = vpack.c.bf16 %v2613_v3, %v2605_v59  ;;  %v2861_v13 = vcvt.s32.f32 %v1837_v4  ;;  %v2869_v14 = vcvt.s32.f32 %v1845_v6  ;;  %v1565_v15 = vunpack.c.2.s8 %v909_v1  ;;  %v838_v59 = vld [vmem:[%s8800_s10 + $0x1d0] sm:$0xff] }
 0x12c   : > { %v3421_v17 = vpack.c.bf16 %v2741_v8, %v2733_v7  ;;  %v2989_v18 = vcvt.s32.f32 %v1965_v9  ;;  %v2997_v19 = vcvt.s32.f32 %v1973_v10  ;;  %v1573_v20 = vunpack.c.3.s8 %v909_v1  ;;  %v870_v3 = vld [vmem:[%s8800_s10 + $0x2d0] sm:$0xff] }
 0x12d   : > { %3797 = vmatpush.bf16.msrb.mxu0 %v3357_v12  ;;  %v3485_v22 = vpack.c.bf16 %v2869_v14, %v2861_v13  ;;  %v2589_v23 = vcvt.s32.f32 %v1565_v15  ;;  %v1693_v24 = vunpack.c.2.s8 %v941_v11  ;;  %v1701_v25 = vunpack.c.3.s8 %v941_v11  ;;  %v902_v9 = vld [vmem:[%s8800_s10 + $0x3d0] sm:$0xff] }
 0x12e   : > { %3810 = vmatpush.bf16.msrb.mxu1 %v3421_v17  ;;  %v3549_v26 = vpack.c.bf16 %v2997_v19, %v2989_v18  ;;  %v2597_v27 = vcvt.s32.f32 %v1573_v20  ;;  %v1821_v28 = vunpack.c.2.s8 %v973_v16  ;;  %v1829_v29 = vunpack.c.3.s8 %v973_v16 }
 0x12f   : > { %3823 = vmatpush.bf16.msrb.mxu2 %v3485_v22  ;;  %v2717_v30 = vcvt.s32.f32 %v1693_v24  ;;  %v2725_v31 = vcvt.s32.f32 %v1701_v25  ;;  %v1949_v32 = vunpack.c.2.s8 %v1005_v21  ;;  %v1957_v33 = vunpack.c.3.s8 %v1005_v21 }
 0x130   : > { %3836 = vmatpush.bf16.msrb.mxu3 %v3549_v26  ;;  %v3349_v35 = vpack.c.bf16 %v2597_v27, %v2589_v23  ;;  %v2845_v37 = vcvt.s32.f32 %v1821_v28  ;;  %v2853_v38 = vcvt.s32.f32 %v1829_v29  ;;  %v1549_v39 = vunpack.c.0.s8 %v909_v1 }
 0x131   : > { %v3413_v41 = vpack.c.bf16 %v2725_v31, %v2717_v30  ;;  %v2973_v42 = vcvt.s32.f32 %v1949_v32  ;;  %v2981_v44 = vcvt.s32.f32 %v1957_v33  ;;  %v1557_v45 = vunpack.c.1.s8 %v909_v1 }
 0x132   : > { %3798 = vmatpush.bf16.msrb.mxu0 %v3349_v35  ;;  %v3477_v46 = vpack.c.bf16 %v2853_v38, %v2845_v37  ;;  %v2573_v47 = vcvt.s32.f32 %v1549_v39  ;;  %v1677_v48 = vunpack.c.0.s8 %v941_v11  ;;  %v1685_v49 = vunpack.c.1.s8 %v941_v11  ;;  %v798_v35 = vld [vmem:[%s8800_s10 + $0x90] sm:$0xff] }
 0x133   : > { %3811 = vmatpush.bf16.msrb.mxu1 %v3413_v41  ;;  %v3541_v51 = vpack.c.bf16 %v2981_v44, %v2973_v42  ;;  %v2581_v52 = vcvt.s32.f32 %v1557_v45  ;;  %v1805_v53 = vunpack.c.0.s8 %v973_v16  ;;  %v1813_v54 = vunpack.c.1.s8 %v973_v16 }
 0x134   : > { %3824 = vmatpush.bf16.msrb.mxu2 %v3477_v46  ;;  %v2701_v55 = vcvt.s32.f32 %v1677_v48  ;;  %v2709_v56 = vcvt.s32.f32 %v1685_v49  ;;  %v1933_v57 = vunpack.c.0.s8 %v1005_v21  ;;  %v1941_v58 = vunpack.c.1.s8 %v1005_v21 }
 0x135   : > { %3837 = vmatpush.bf16.msrb.mxu3 %v3541_v51  ;;  %v3341_v61 = vpack.c.bf16 %v2581_v52, %v2573_v47  ;;  %v2829_v63 = vcvt.s32.f32 %v1805_v53  ;;  %v2837_v1 = vcvt.s32.f32 %v1813_v54  ;;  %v1150_v2 = vunpack.c.2.s8 %v806_v50  ;;  %v830_v47 = vld [vmem:[%s8800_s10 + $0x190] sm:$0xff] }
 0x136   : > { %v3405_v4 = vpack.c.bf16 %v2709_v56, %v2701_v55  ;;  %v2957_v6 = vcvt.s32.f32 %v1933_v57  ;;  %v2965_v7 = vcvt.s32.f32 %v1941_v58  ;;  %v1158_v8 = vunpack.c.3.s8 %v806_v50  ;;  %v862_v52 = vld [vmem:[%s8800_s10 + $0x290] sm:$0xff] }
 0x137   : > { %3799 = vmatpush.bf16.msrb.mxu0 %v3341_v61  ;;  %v3469_v10 = vpack.c.bf16 %v2837_v1, %v2829_v63  ;;  %v2174_v11 = vcvt.s32.f32 %v1150_v2  ;;  %v1278_v12 = vunpack.c.2.s8 %v838_v59  ;;  %v1286_v13 = vunpack.c.3.s8 %v838_v59  ;;  %v894_v57 = vld [vmem:[%s8800_s10 + $0x390] sm:$0xff] }
 0x138   : > { %3812 = vmatpush.bf16.msrb.mxu1 %v3405_v4  ;;  %v3533_v14 = vpack.c.bf16 %v2965_v7, %v2957_v6  ;;  %v2182_v15 = vcvt.s32.f32 %v1158_v8  ;;  %v1406_v16 = vunpack.c.2.s8 %v870_v3  ;;  %v1414_v17 = vunpack.c.3.s8 %v870_v3 }
 0x139   : > { %3825 = vmatpush.bf16.msrb.mxu2 %v3469_v10  ;;  %v2302_v18 = vcvt.s32.f32 %v1278_v12  ;;  %v2310_v19 = vcvt.s32.f32 %v1286_v13  ;;  %v1534_v20 = vunpack.c.2.s8 %v902_v9  ;;  %v1542_v21 = vunpack.c.3.s8 %v902_v9 }
 0x13a   : > { %3838 = vmatpush.bf16.msrb.mxu3 %v3533_v14  ;;  %v3142_v22 = vpack.c.bf16 %v2182_v15, %v2174_v11  ;;  %v2430_v23 = vcvt.s32.f32 %v1406_v16  ;;  %v2438_v24 = vcvt.s32.f32 %v1414_v17  ;;  %v1134_v25 = vunpack.c.0.s8 %v806_v50  ;;  %3800 = vmatmul.bf16.vlgmr.msrb.gmra.mxu0 %v8890_v40 }
 0x13b   : > { %v3206_v26 = vpack.c.bf16 %v2310_v19, %v2302_v18  ;;  %v2558_v27 = vcvt.s32.f32 %v1534_v20  ;;  %v2566_v28 = vcvt.s32.f32 %v1542_v21  ;;  %v1142_v29 = vunpack.c.1.s8 %v806_v50  ;;  %3813 = vmatmul.bf16.vlgmr.msrb.gmra.mxu1 %v8897_v62 }
 0x13c   : > { %3844 = vmatpush.bf16.msra.mxu0 %v3142_v22  ;;  %v3270_v30 = vpack.c.bf16 %v2438_v24, %v2430_v23  ;;  %v2158_v31 = vcvt.s32.f32 %v1134_v25  ;;  %v1262_v32 = vunpack.c.0.s8 %v838_v59  ;;  %v1270_v33 = vunpack.c.1.s8 %v838_v59  ;;  %3826 = vmatmul.bf16.vlgmr.msrb.gmra.mxu2 %v8887_v34  ;;  %v790_v22 = vld [vmem:[%s8800_s10 + $0x50] sm:$0xff] }
 0x13d   : > { %3857 = vmatpush.bf16.msra.mxu1 %v3206_v26  ;;  %v3334_v37 = vpack.c.bf16 %v2566_v28, %v2558_v27  ;;  %v2166_v38 = vcvt.s32.f32 %v1142_v29  ;;  %v1390_v39 = vunpack.c.0.s8 %v870_v3  ;;  %v1398_v41 = vunpack.c.1.s8 %v870_v3  ;;  %3839 = vmatmul.bf16.vlgmr.msrb.gmra.mxu3 %v8892_v43 }
 0x13e   : > { %3870 = vmatpush.bf16.msra.mxu2 %v3270_v30  ;;  %v2286_v42 = vcvt.s32.f32 %v1262_v32  ;;  %v2294_v44 = vcvt.s32.f32 %v1270_v33  ;;  %v1518_v45 = vunpack.c.0.s8 %v902_v9  ;;  %v1526_v46 = vunpack.c.1.s8 %v902_v9 }
 0x13f   : > { %3883 = vmatpush.bf16.msra.mxu3 %v3334_v37  ;;  %v3134_v48 = vpack.c.bf16 %v2166_v38, %v2158_v31  ;;  %v2414_v49 = vcvt.s32.f32 %v1390_v39  ;;  %v2422_v50 = vcvt.s32.f32 %v1398_v41  ;;  %v1118_v51 = vunpack.c.2.s8 %v798_v35  ;;  %v822_v31 = vld [vmem:[%s8800_s10 + $0x150] sm:$0xff] }
 0x140   : > { %v3198_v53 = vpack.c.bf16 %v2294_v44, %v2286_v42  ;;  %v2542_v54 = vcvt.s32.f32 %v1518_v45  ;;  %v2550_v55 = vcvt.s32.f32 %v1526_v46  ;;  %v1126_v56 = vunpack.c.3.s8 %v798_v35  ;;  %v854_v38 = vld [vmem:[%s8800_s10 + $0x250] sm:$0xff] }
 0x141   : > { %3845 = vmatpush.bf16.msra.mxu0 %v3134_v48  ;;  %v3262_v58 = vpack.c.bf16 %v2422_v50, %v2414_v49  ;;  %v2142_v59 = vcvt.s32.f32 %v1118_v51  ;;  %v1246_v61 = vunpack.c.2.s8 %v830_v47  ;;  %v1254_v63 = vunpack.c.3.s8 %v830_v47  ;;  %v886_v45 = vld [vmem:[%s8800_s10 + $0x350] sm:$0xff] }
 0x142   : > { %3858 = vmatpush.bf16.msra.mxu1 %v3198_v53  ;;  %v3326_v1 = vpack.c.bf16 %v2550_v55, %v2542_v54  ;;  %v2150_v2 = vcvt.s32.f32 %v1126_v56  ;;  %v1374_v3 = vunpack.c.2.s8 %v862_v52  ;;  %v1382_v4 = vunpack.c.3.s8 %v862_v52 }
 0x143   : > { %3871 = vmatpush.bf16.msra.mxu2 %v3262_v58  ;;  %v2270_v6 = vcvt.s32.f32 %v1246_v61  ;;  %v2278_v7 = vcvt.s32.f32 %v1254_v63  ;;  %v1502_v8 = vunpack.c.2.s8 %v894_v57  ;;  %v1510_v9 = vunpack.c.3.s8 %v894_v57 }
 0x144   : > { %3884 = vmatpush.bf16.msra.mxu3 %v3326_v1  ;;  %v3126_v10 = vpack.c.bf16 %v2150_v2, %v2142_v59  ;;  %v2398_v11 = vcvt.s32.f32 %v1374_v3  ;;  %v2406_v12 = vcvt.s32.f32 %v1382_v4  ;;  %v1102_v13 = vunpack.c.0.s8 %v798_v35 }
 0x145   : > { %v3190_v14 = vpack.c.bf16 %v2278_v7, %v2270_v6  ;;  %v2526_v15 = vcvt.s32.f32 %v1502_v8  ;;  %v2534_v16 = vcvt.s32.f32 %v1510_v9  ;;  %v1110_v17 = vunpack.c.1.s8 %v798_v35 }
 0x146   : > { %3846 = vmatpush.bf16.msra.mxu0 %v3126_v10  ;;  %v3254_v18 = vpack.c.bf16 %v2406_v12, %v2398_v11  ;;  %v2126_v19 = vcvt.s32.f32 %v1102_v13  ;;  %v1230_v20 = vunpack.c.0.s8 %v830_v47  ;;  %v1238_v21 = vunpack.c.1.s8 %v830_v47  ;;  %v782_v10 = vld [vmem:[%s8800_s10 + $0x10] sm:$0xff] }
 0x147   : > { %3859 = vmatpush.bf16.msra.mxu1 %v3190_v14  ;;  %v3318_v23 = vpack.c.bf16 %v2534_v16, %v2526_v15  ;;  %v2134_v24 = vcvt.s32.f32 %v1110_v17  ;;  %v1358_v25 = vunpack.c.0.s8 %v862_v52  ;;  %v1366_v26 = vunpack.c.1.s8 %v862_v52 }
 0x148   : > { %3872 = vmatpush.bf16.msra.mxu2 %v3254_v18  ;;  %v2254_v27 = vcvt.s32.f32 %v1230_v20  ;;  %v2262_v28 = vcvt.s32.f32 %v1238_v21  ;;  %v1486_v29 = vunpack.c.0.s8 %v894_v57  ;;  %v1494_v30 = vunpack.c.1.s8 %v894_v57 }
 0x149   : > { %3885 = vmatpush.bf16.msra.mxu3 %v3318_v23  ;;  %v3118_v32 = vpack.c.bf16 %v2134_v24, %v2126_v19  ;;  %v2382_v33 = vcvt.s32.f32 %v1358_v25  ;;  %v2390_v35 = vcvt.s32.f32 %v1366_v26  ;;  %v1086_v37 = vunpack.c.2.s8 %v790_v22  ;;  %v814_v19 = vld [vmem:[%s8800_s10 + $0x110] sm:$0xff] }
 0x14a   : > { %v3182_v39 = vpack.c.bf16 %v2262_v28, %v2254_v27  ;;  %v2510_v41 = vcvt.s32.f32 %v1486_v29  ;;  %v2518_v42 = vcvt.s32.f32 %v1494_v30  ;;  %v1094_v44 = vunpack.c.3.s8 %v790_v22  ;;  %v846_v24 = vld [vmem:[%s8800_s10 + $0x210] sm:$0xff] }
 0x14b   : > { %3847 = vmatpush.bf16.msra.mxu0 %v3118_v32  ;;  %v3246_v46 = vpack.c.bf16 %v2390_v35, %v2382_v33  ;;  %v2110_v47 = vcvt.s32.f32 %v1086_v37  ;;  %v1214_v48 = vunpack.c.2.s8 %v822_v31  ;;  %v1222_v49 = vunpack.c.3.s8 %v822_v31  ;;  %v878_v29 = vld [vmem:[%s8800_s10 + $0x310] sm:$0xff] }
 0x14c   : > { %3860 = vmatpush.bf16.msra.mxu1 %v3182_v39  ;;  %v3310_v50 = vpack.c.bf16 %v2518_v42, %v2510_v41  ;;  %v2118_v51 = vcvt.s32.f32 %v1094_v44  ;;  %v1342_v52 = vunpack.c.2.s8 %v854_v38  ;;  %v1350_v53 = vunpack.c.3.s8 %v854_v38 }
 0x14d   : > { %3873 = vmatpush.bf16.msra.mxu2 %v3246_v46  ;;  %v2238_v54 = vcvt.s32.f32 %v1214_v48  ;;  %v2246_v55 = vcvt.s32.f32 %v1222_v49  ;;  %v1470_v56 = vunpack.c.2.s8 %v886_v45  ;;  %v1478_v57 = vunpack.c.3.s8 %v886_v45 }
 0x14e   : > { %3886 = vmatpush.bf16.msra.mxu3 %v3310_v50  ;;  %v3110_v58 = vpack.c.bf16 %v2118_v51, %v2110_v47  ;;  %v2366_v59 = vcvt.s32.f32 %v1342_v52  ;;  %v2374_v61 = vcvt.s32.f32 %v1350_v53  ;;  %v1070_v63 = vunpack.c.0.s8 %v790_v22 }
 0x14f   : > { %v3174_v1 = vpack.c.bf16 %v2246_v55, %v2238_v54  ;;  %v2494_v2 = vcvt.s32.f32 %v1470_v56  ;;  %v2502_v3 = vcvt.s32.f32 %v1478_v57  ;;  %v1078_v4 = vunpack.c.1.s8 %v790_v22 }
 0x150   : > { %3848 = vmatpush.bf16.msra.mxu0 %v3110_v58  ;;  %v3238_v6 = vpack.c.bf16 %v2374_v61, %v2366_v59  ;;  %v2094_v7 = vcvt.s32.f32 %v1070_v63  ;;  %v1198_v8 = vunpack.c.0.s8 %v822_v31  ;;  %v1206_v9 = vunpack.c.1.s8 %v822_v31  ;;  %v934_v58 = vld [vmem:[%s8800_s10 + $0x4d0] sm:$0xff] }
 0x151   : > { %3861 = vmatpush.bf16.msra.mxu1 %v3174_v1  ;;  %v3302_v11 = vpack.c.bf16 %v2502_v3, %v2494_v2  ;;  %v2102_v12 = vcvt.s32.f32 %v1078_v4  ;;  %v1326_v13 = vunpack.c.0.s8 %v854_v38  ;;  %v1334_v14 = vunpack.c.1.s8 %v854_v38 }
 0x152   : > { %3874 = vmatpush.bf16.msra.mxu2 %v3238_v6  ;;  %v2222_v15 = vcvt.s32.f32 %v1198_v8  ;;  %v2230_v16 = vcvt.s32.f32 %v1206_v9  ;;  %v1454_v17 = vunpack.c.0.s8 %v886_v45  ;;  %v1462_v18 = vunpack.c.1.s8 %v886_v45 }
 0x153   : > { %3887 = vmatpush.bf16.msra.mxu3 %v3302_v11  ;;  %v3102_v20 = vpack.c.bf16 %v2102_v12, %v2094_v7  ;;  %v2350_v21 = vcvt.s32.f32 %v1326_v13  ;;  %v2358_v22 = vcvt.s32.f32 %v1334_v14  ;;  %v1054_v23 = vunpack.c.2.s8 %v782_v10  ;;  %v966_v7 = vld [vmem:[%s8800_s10 + $0x5d0] sm:$0xff] }
 0x154   : > { %v3166_v25 = vpack.c.bf16 %v2230_v16, %v2222_v15  ;;  %v2478_v26 = vcvt.s32.f32 %v1454_v17  ;;  %v2486_v27 = vcvt.s32.f32 %v1462_v18  ;;  %v1062_v28 = vunpack.c.3.s8 %v782_v10  ;;  %v998_v12 = vld [vmem:[%s8800_s10 + $0x6d0] sm:$0xff] }
 0x155   : > { %3849 = vmatpush.bf16.msra.mxu0 %v3102_v20  ;;  %v3230_v30 = vpack.c.bf16 %v2358_v22, %v2350_v21  ;;  %v2078_v31 = vcvt.s32.f32 %v1054_v23  ;;  %v1182_v32 = vunpack.c.2.s8 %v814_v19  ;;  %v1190_v33 = vunpack.c.3.s8 %v814_v19  ;;  %v1030_v17 = vld [vmem:[%s8800_s10 + $0x7d0] sm:$0xff] }
 0x156   : > { %3862 = vmatpush.bf16.msra.mxu1 %v3166_v25  ;;  %v3294_v35 = vpack.c.bf16 %v2486_v27, %v2478_v26  ;;  %v2086_v37 = vcvt.s32.f32 %v1062_v28  ;;  %v1310_v38 = vunpack.c.2.s8 %v846_v24  ;;  %v1318_v39 = vunpack.c.3.s8 %v846_v24 }
 0x157   : > { %3875 = vmatpush.bf16.msra.mxu2 %v3230_v30  ;;  %v2206_v41 = vcvt.s32.f32 %v1182_v32  ;;  %v2214_v42 = vcvt.s32.f32 %v1190_v33  ;;  %v1438_v44 = vunpack.c.2.s8 %v878_v29  ;;  %v1446_v45 = vunpack.c.3.s8 %v878_v29 }
 0x158   : > { %3888 = vmatpush.bf16.msra.mxu3 %v3294_v35  ;;  %v3094_v46 = vpack.c.bf16 %v2086_v37, %v2078_v31  ;;  %v2334_v47 = vcvt.s32.f32 %v1310_v38  ;;  %v2342_v48 = vcvt.s32.f32 %v1318_v39  ;;  %v1038_v49 = vunpack.c.0.s8 %v782_v10 }
 0x159   : > { %v3158_v50 = vpack.c.bf16 %v2214_v42, %v2206_v41  ;;  %v2462_v51 = vcvt.s32.f32 %v1438_v44  ;;  %v2470_v52 = vcvt.s32.f32 %v1446_v45  ;;  %v1046_v53 = vunpack.c.1.s8 %v782_v10 }
 0x15a   : > { %3850 = vmatpush.bf16.msra.mxu0 %v3094_v46  ;;  %v3222_v54 = vpack.c.bf16 %v2342_v48, %v2334_v47  ;;  %v2062_v55 = vcvt.s32.f32 %v1038_v49  ;;  %v1166_v56 = vunpack.c.0.s8 %v814_v19  ;;  %v1174_v57 = vunpack.c.1.s8 %v814_v19  ;;  %v926_v46 = vld [vmem:[%s8800_s10 + $0x490] sm:$0xff] }
 0x15b   : > { %3863 = vmatpush.bf16.msra.mxu1 %v3158_v50  ;;  %v3286_v59 = vpack.c.bf16 %v2470_v52, %v2462_v51  ;;  %v2070_v61 = vcvt.s32.f32 %v1046_v53  ;;  %v1294_v63 = vunpack.c.0.s8 %v846_v24  ;;  %v1302_v1 = vunpack.c.1.s8 %v846_v24 }
 0x15c   : > { %3876 = vmatpush.bf16.msra.mxu2 %v3222_v54  ;;  %v2190_v2 = vcvt.s32.f32 %v1166_v56  ;;  %v2198_v3 = vcvt.s32.f32 %v1174_v57  ;;  %v1422_v4 = vunpack.c.0.s8 %v878_v29  ;;  %v1430_v6 = vunpack.c.1.s8 %v878_v29 }
 0x15d   : > { %3889 = vmatpush.bf16.msra.mxu3 %v3286_v59  ;;  %v3086_v8 = vpack.c.bf16 %v2070_v61, %v2062_v55  ;;  %v2318_v9 = vcvt.s32.f32 %v1294_v63  ;;  %v2326_v10 = vcvt.s32.f32 %v1302_v1  ;;  %v1662_v11 = vunpack.c.2.s8 %v934_v58  ;;  %v958_v55 = vld [vmem:[%s8800_s10 + $0x590] sm:$0xff] }
 0x15e   : > { %v3150_v13 = vpack.c.bf16 %v2198_v3, %v2190_v2  ;;  %v2446_v14 = vcvt.s32.f32 %v1422_v4  ;;  %v2454_v15 = vcvt.s32.f32 %v1430_v6  ;;  %v1670_v16 = vunpack.c.3.s8 %v934_v58  ;;  %v990_v61 = vld [vmem:[%s8800_s10 + $0x690] sm:$0xff] }
 0x15f   : > { %3851 = vmatpush.bf16.msra.mxu0 %v3086_v8  ;;  %v3214_v18 = vpack.c.bf16 %v2326_v10, %v2318_v9  ;;  %v2686_v19 = vcvt.s32.f32 %v1662_v11  ;;  %v1790_v20 = vunpack.c.2.s8 %v966_v7  ;;  %v1798_v21 = vunpack.c.3.s8 %v966_v7  ;;  %v1022_v4 = vld [vmem:[%s8800_s10 + $0x790] sm:$0xff] }
 0x160   : > { %3864 = vmatpush.bf16.msra.mxu1 %v3150_v13  ;;  %v3278_v22 = vpack.c.bf16 %v2454_v15, %v2446_v14  ;;  %v2694_v23 = vcvt.s32.f32 %v1670_v16  ;;  %v1918_v24 = vunpack.c.2.s8 %v998_v12  ;;  %v1926_v25 = vunpack.c.3.s8 %v998_v12 }
 0x161   : > { %3877 = vmatpush.bf16.msra.mxu2 %v3214_v18  ;;  %v2814_v26 = vcvt.s32.f32 %v1790_v20  ;;  %v2822_v27 = vcvt.s32.f32 %v1798_v21  ;;  %v2046_v28 = vunpack.c.2.s8 %v1030_v17  ;;  %v2054_v29 = vunpack.c.3.s8 %v1030_v17 }
 0x162   : > { %3890 = vmatpush.bf16.msra.mxu3 %v3278_v22  ;;  %v3398_v30 = vpack.c.bf16 %v2694_v23, %v2686_v19  ;;  %v2942_v31 = vcvt.s32.f32 %v1918_v24  ;;  %v2950_v32 = vcvt.s32.f32 %v1926_v25  ;;  %v1646_v33 = vunpack.c.0.s8 %v934_v58  ;;  %3852 = vmatmul.bf16.vlgmr.msra.gmra.mxu0 %v8867_v60 }
 0x163   : > { %v3462_v35 = vpack.c.bf16 %v2822_v27, %v2814_v26  ;;  %v3070_v37 = vcvt.s32.f32 %v2046_v28  ;;  %v3078_v38 = vcvt.s32.f32 %v2054_v29  ;;  %v1654_v39 = vunpack.c.1.s8 %v934_v58  ;;  %3865 = vmatmul.bf16.vlgmr.msra.gmra.mxu1 %v8874_v5 }
 0x164   : > { %3896 = vmatpush.bf16.msrb.mxu0 %v3398_v30  ;;  %v3526_v41 = vpack.c.bf16 %v2950_v32, %v2942_v31  ;;  %v2670_v42 = vcvt.s32.f32 %v1646_v33  ;;  %v1774_v44 = vunpack.c.0.s8 %v966_v7  ;;  %v1782_v45 = vunpack.c.1.s8 %v966_v7  ;;  %3878 = vmatmul.bf16.vlgmr.msra.gmra.mxu2 %v8861_v36  ;;  %v918_v30 = vld [vmem:[%s8800_s10 + $0x450] sm:$0xff] }
 0x165   : > { %3909 = vmatpush.bf16.msrb.mxu1 %v3462_v35  ;;  %v3590_v47 = vpack.c.bf16 %v3078_v38, %v3070_v37  ;;  %v2678_v48 = vcvt.s32.f32 %v1654_v39  ;;  %v1902_v49 = vunpack.c.0.s8 %v998_v12  ;;  %v1910_v50 = vunpack.c.1.s8 %v998_v12  ;;  %3891 = vmatmul.bf16.vlgmr.msra.gmra.mxu3 %v8870_v0  ;;  %v8961_v37 = vpop.f32.mrf.mxu0  ;;  %v8963_v38 = vpop.f32.mrf.mxu1 }
 0x166   : > { %3922 = vmatpush.bf16.msrb.mxu2 %v3526_v41  ;;  %v2798_v51 = vcvt.s32.f32 %v1774_v44  ;;  %v2806_v52 = vcvt.s32.f32 %v1782_v45  ;;  %v2030_v53 = vunpack.c.0.s8 %v1030_v17  ;;  %v2038_v54 = vunpack.c.1.s8 %v1030_v17  ;;  %v950_v45 = vld [vmem:[%s8800_s10 + $0x550] sm:$0xff] }
 0x167   : > { %3935 = vmatpush.bf16.msrb.mxu3 %v3590_v47  ;;  %v3390_v56 = vpack.c.bf16 %v2678_v48, %v2670_v42  ;;  %v2926_v57 = vcvt.s32.f32 %v1902_v49  ;;  %v2934_v58 = vcvt.s32.f32 %v1910_v50  ;;  %v1630_v59 = vunpack.c.2.s8 %v926_v46  ;;  %v982_v50 = vld [vmem:[%s8800_s10 + $0x650] sm:$0xff] }
 0x168   : > { %v3454_v63 = vpack.c.bf16 %v2806_v52, %v2798_v51  ;;  %v3054_v1 = vcvt.s32.f32 %v2030_v53  ;;  %v3062_v2 = vcvt.s32.f32 %v2038_v54  ;;  %v1638_v3 = vunpack.c.3.s8 %v926_v46 }
 0x169   : > { %3897 = vmatpush.bf16.msrb.mxu0 %v3390_v56  ;;  %v3518_v6 = vpack.c.bf16 %v2934_v58, %v2926_v57  ;;  %v2654_v7 = vcvt.s32.f32 %v1630_v59  ;;  %v1758_v8 = vunpack.c.2.s8 %v958_v55  ;;  %v1766_v9 = vunpack.c.3.s8 %v958_v55 }
 0x16a   : > { %3910 = vmatpush.bf16.msrb.mxu1 %v3454_v63  ;;  %v3582_v10 = vpack.c.bf16 %v3062_v2, %v3054_v1  ;;  %v2662_v11 = vcvt.s32.f32 %v1638_v3  ;;  %v1886_v12 = vunpack.c.2.s8 %v990_v61  ;;  %v1894_v13 = vunpack.c.3.s8 %v990_v61 }
 0x16b   : > { %3923 = vmatpush.bf16.msrb.mxu2 %v3518_v6  ;;  %v2782_v14 = vcvt.s32.f32 %v1758_v8  ;;  %v2790_v15 = vcvt.s32.f32 %v1766_v9  ;;  %v2014_v16 = vunpack.c.2.s8 %v1022_v4  ;;  %v2022_v17 = vunpack.c.3.s8 %v1022_v4  ;;  %v8968_v8 = vpop.f32.mrf.mxu2  ;;  %v8970_v9 = vpop.f32.mrf.mxu3 }
 0x16c   : > { %3936 = vmatpush.bf16.msrb.mxu3 %v3582_v10  ;;  %v3382_v18 = vpack.c.bf16 %v2662_v11, %v2654_v7  ;;  %v2910_v19 = vcvt.s32.f32 %v1886_v12  ;;  %v2918_v20 = vcvt.s32.f32 %v1894_v13  ;;  %v1614_v21 = vunpack.c.0.s8 %v926_v46 }
 0x16d   : > { %v3446_v22 = vpack.c.bf16 %v2790_v15, %v2782_v14  ;;  %v3038_v23 = vcvt.s32.f32 %v2014_v16  ;;  %v3046_v24 = vcvt.s32.f32 %v2022_v17  ;;  %v1622_v25 = vunpack.c.1.s8 %v926_v46 }
 0x16e   : > { %3898 = vmatpush.bf16.msrb.mxu0 %v3382_v18  ;;  %v3510_v26 = vpack.c.bf16 %v2918_v20, %v2910_v19  ;;  %v2638_v27 = vcvt.s32.f32 %v1614_v21  ;;  %v1742_v28 = vunpack.c.0.s8 %v958_v55  ;;  %v1750_v29 = vunpack.c.1.s8 %v958_v55  ;;  %v1014_v55 = vld [vmem:[%s8800_s10 + $0x750] sm:$0xff]  ;;  %v3647_v18 = vpop.f32.mrf.mxu0  ;;  %v3660_v19 = vpop.f32.mrf.mxu1 }
 0x16f   : > { %3911 = vmatpush.bf16.msrb.mxu1 %v3446_v22  ;;  %v3574_v31 = vpack.c.bf16 %v3046_v24, %v3038_v23  ;;  %v2646_v32 = vcvt.s32.f32 %v1622_v25  ;;  %v1870_v33 = vunpack.c.0.s8 %v990_v61  ;;  %v1878_v35 = vunpack.c.1.s8 %v990_v61  ;;  %v910_v24 = vld [vmem:[%s8800_s10 + $0x410] sm:$0xff]  ;;  %v8977_v18 = vld [vmem:[%s8800_s10 + $0xd8] sm:$0xff] }
 0x170   : > { %3924 = vmatpush.bf16.msrb.mxu2 %v3510_v26  ;;  %v2766_v39 = vcvt.s32.f32 %v1742_v28  ;;  %v2774_v41 = vcvt.s32.f32 %v1750_v29  ;;  %v1998_v42 = vunpack.c.0.s8 %v1022_v4  ;;  %v2006_v44 = vunpack.c.1.s8 %v1022_v4 }
 0x171   : > { %3937 = vmatpush.bf16.msrb.mxu3 %v3574_v31  ;;  %v3374_v46 = vpack.c.bf16 %v2646_v32, %v2638_v27  ;;  %v2894_v47 = vcvt.s32.f32 %v1870_v33  ;;  %v2902_v48 = vcvt.s32.f32 %v1878_v35  ;;  %v1598_v49 = vunpack.c.2.s8 %v918_v30  ;;  %v942_v33 = vld [vmem:[%s8800_s10 + $0x510] sm:$0xff] }
 0x172   : > { %v3438_v51 = vpack.c.bf16 %v2774_v41, %v2766_v39  ;;  %v3022_v52 = vcvt.s32.f32 %v1998_v42  ;;  %v3030_v53 = vcvt.s32.f32 %v2006_v44  ;;  %v1606_v54 = vunpack.c.3.s8 %v918_v30  ;;  %v974_v44 = vld [vmem:[%s8800_s10 + $0x610] sm:$0xff] }
 0x173   : > { %3899 = vmatpush.bf16.msrb.mxu0 %v3374_v46  ;;  %v3502_v56 = vpack.c.bf16 %v2902_v48, %v2894_v47  ;;  %v2622_v57 = vcvt.s32.f32 %v1598_v49  ;;  %v1726_v58 = vunpack.c.2.s8 %v950_v45  ;;  %v1734_v59 = vunpack.c.3.s8 %v950_v45  ;;  %v1006_v49 = vld [vmem:[%s8800_s10 + $0x710] sm:$0xff] }
 0x174   : > { %3912 = vmatpush.bf16.msrb.mxu1 %v3438_v51  ;;  %v3566_v61 = vpack.c.bf16 %v3030_v53, %v3022_v52  ;;  %v2630_v63 = vcvt.s32.f32 %v1606_v54  ;;  %v1854_v1 = vunpack.c.2.s8 %v982_v50  ;;  %v1862_v2 = vunpack.c.3.s8 %v982_v50  ;;  %v3673_v54 = vpop.f32.mrf.mxu2 }
 0x175   : > { %3925 = vmatpush.bf16.msrb.mxu2 %v3502_v56  ;;  %v2750_v3 = vcvt.s32.f32 %v1726_v58  ;;  %v2758_v4 = vcvt.s32.f32 %v1734_v59  ;;  %v1982_v6 = vunpack.c.2.s8 %v1014_v55  ;;  %v1990_v7 = vunpack.c.3.s8 %v1014_v55  ;;  %v3686_v56 = vpop.f32.mrf.mxu3 }
 0x176   : > { %3938 = vmatpush.bf16.msrb.mxu3 %v3566_v61  ;;  %v3366_v10 = vpack.c.bf16 %v2630_v63, %v2622_v57  ;;  %v2878_v11 = vcvt.s32.f32 %v1854_v1  ;;  %v2886_v12 = vcvt.s32.f32 %v1862_v2  ;;  %v1582_v13 = vunpack.c.0.s8 %v918_v30 }
 0x177   : > { %v3430_v14 = vpack.c.bf16 %v2758_v4, %v2750_v3  ;;  %v3006_v15 = vcvt.s32.f32 %v1982_v6  ;;  %v3014_v16 = vcvt.s32.f32 %v1990_v7  ;;  %v1590_v17 = vunpack.c.1.s8 %v918_v30 }
 0x178   : > { %3900 = vmatpush.bf16.msrb.mxu0 %v3366_v10  ;;  %v3494_v20 = vpack.c.bf16 %v2886_v12, %v2878_v11  ;;  %v2606_v21 = vcvt.s32.f32 %v1582_v13  ;;  %v1710_v22 = vunpack.c.0.s8 %v950_v45  ;;  %v1718_v23 = vunpack.c.1.s8 %v950_v45 }
 0x179   : > { %3913 = vmatpush.bf16.msrb.mxu1 %v3430_v14  ;;  %v3558_v25 = vpack.c.bf16 %v3014_v16, %v3006_v15  ;;  %v2614_v26 = vcvt.s32.f32 %v1590_v17  ;;  %v1838_v27 = vunpack.c.0.s8 %v982_v50  ;;  %v1846_v28 = vunpack.c.1.s8 %v982_v50 }
 0x17a   : > { %3926 = vmatpush.bf16.msrb.mxu2 %v3494_v20  ;;  %v2734_v29 = vcvt.s32.f32 %v1710_v22  ;;  %v2742_v31 = vcvt.s32.f32 %v1718_v23  ;;  %v1966_v30 = vunpack.c.0.s8 %v1014_v55  ;;  %v1974_v32 = vunpack.c.1.s8 %v1014_v55 }
 0x17b   : > { %3939 = vmatpush.bf16.msrb.mxu3 %v3558_v25  ;;  %v3358_v35 = vpack.c.bf16 %v2614_v26, %v2606_v21  ;;  %v2862_v39 = vcvt.s32.f32 %v1838_v27  ;;  %v2870_v41 = vcvt.s32.f32 %v1846_v28  ;;  %v1566_v42 = vunpack.c.2.s8 %v910_v24  ;;  %v839_v27 = vld [vmem:[%s8800_s10 + $0x1d8] sm:$0xff]  ;;  %v8980_v28 = vpop.f32.mrf.mxu0 }
 0x17c   : > { %v3422_v45 = vpack.c.bf16 %v2742_v31, %v2734_v29  ;;  %v2990_v46 = vcvt.s32.f32 %v1966_v30  ;;  %v2998_v47 = vcvt.s32.f32 %v1974_v32  ;;  %v1574_v48 = vunpack.c.3.s8 %v910_v24  ;;  %v8982_v29 = vpop.f32.mrf.mxu1 }
 0x17d   : > { %3901 = vmatpush.bf16.msrb.mxu0 %v3358_v35  ;;  %v3486_v50 = vpack.c.bf16 %v2870_v41, %v2862_v39  ;;  %v2590_v51 = vcvt.s32.f32 %v1566_v42  ;;  %v1694_v52 = vunpack.c.2.s8 %v942_v33  ;;  %v1702_v53 = vunpack.c.3.s8 %v942_v33  ;;  %v871_v35 = vld [vmem:[%s8800_s10 + $0x2d8] sm:$0xff] }
 0x17e   : > { %3914 = vmatpush.bf16.msrb.mxu1 %v3422_v45  ;;  %v3550_v55 = vpack.c.bf16 %v2998_v47, %v2990_v46  ;;  %v2598_v57 = vcvt.s32.f32 %v1574_v48  ;;  %v1822_v58 = vunpack.c.2.s8 %v974_v44  ;;  %v1830_v59 = vunpack.c.3.s8 %v974_v44  ;;  %v903_v45 = vld [vmem:[%s8800_s10 + $0x3d8] sm:$0xff] }
 0x17f   : > { %3927 = vmatpush.bf16.msrb.mxu2 %v3486_v50  ;;  %v2718_v61 = vcvt.s32.f32 %v1694_v52  ;;  %v2726_v63 = vcvt.s32.f32 %v1702_v53  ;;  %v1950_v1 = vunpack.c.2.s8 %v1006_v49  ;;  %v1958_v2 = vunpack.c.3.s8 %v1006_v49 }
 0x180   : > { %3940 = vmatpush.bf16.msrb.mxu3 %v3550_v55  ;;  %v3350_v3 = vpack.c.bf16 %v2598_v57, %v2590_v51  ;;  %v2846_v4 = vcvt.s32.f32 %v1822_v58  ;;  %v2854_v6 = vcvt.s32.f32 %v1830_v59  ;;  %v1550_v7 = vunpack.c.0.s8 %v910_v24  ;;  %v8988_v58 = vpop.f32.mrf.mxu2  ;;  %v8990_v59 = vpop.f32.mrf.mxu3 }
 0x181   : > { %v3414_v10 = vpack.c.bf16 %v2726_v63, %v2718_v61  ;;  %v2974_v11 = vcvt.s32.f32 %v1950_v1  ;;  %v2982_v12 = vcvt.s32.f32 %v1958_v2  ;;  %v1558_v13 = vunpack.c.1.s8 %v910_v24 }
 0x182   : > { %3902 = vmatpush.bf16.msrb.mxu0 %v3350_v3  ;;  %v3478_v14 = vpack.c.bf16 %v2854_v6, %v2846_v4  ;;  %v2574_v15 = vcvt.s32.f32 %v1550_v7  ;;  %v1678_v16 = vunpack.c.0.s8 %v942_v33  ;;  %v1686_v17 = vunpack.c.1.s8 %v942_v33 }
 0x183   : > { %3915 = vmatpush.bf16.msrb.mxu1 %v3414_v10  ;;  %v3542_v19 = vpack.c.bf16 %v2982_v12, %v2974_v11  ;;  %v2582_v20 = vcvt.s32.f32 %v1558_v13  ;;  %v1806_v21 = vunpack.c.0.s8 %v974_v44  ;;  %v1814_v22 = vunpack.c.1.s8 %v974_v44 }
 0x184   : > { %3928 = vmatpush.bf16.msrb.mxu2 %v3478_v14  ;;  %v2702_v23 = vcvt.s32.f32 %v1678_v16  ;;  %v2710_v25 = vcvt.s32.f32 %v1686_v17  ;;  %v1934_v26 = vunpack.c.0.s8 %v1006_v49  ;;  %v1942_v24 = vunpack.c.1.s8 %v1006_v49  ;;  %v3699_v14 = vpop.f32.mrf.mxu0 }
 0x185   : > { %3941 = vmatpush.bf16.msrb.mxu3 %v3542_v19  ;;  %v3342_v31 = vpack.c.bf16 %v2582_v20, %v2574_v15  ;;  %v2830_v30 = vcvt.s32.f32 %v1806_v21  ;;  %v2838_v32 = vcvt.s32.f32 %v1814_v22  ;;  %v1151_v33 = vunpack.c.2.s8 %v8977_v18  ;;  %v799_v19 = vld [vmem:[%s8800_s10 + $0x98] sm:$0xff] }
 0x186   : > { %v3406_v39 = vpack.c.bf16 %v2710_v25, %v2702_v23  ;;  %v2958_v41 = vcvt.s32.f32 %v1934_v26  ;;  %v2966_v42 = vcvt.s32.f32 %v1942_v24  ;;  %v1159_v44 = vunpack.c.3.s8 %v8977_v18  ;;  %v791_v14 = vld [vmem:[%s8800_s10 + $0x58] sm:$0xff] }
 0x187   : > { %3903 = vmatpush.bf16.msrb.mxu0 %v3342_v31  ;;  %v3470_v46 = vpack.c.bf16 %v2838_v32, %v2830_v30  ;;  %v2175_v47 = vcvt.s32.f32 %v1151_v33  ;;  %v1279_v48 = vunpack.c.2.s8 %v839_v27  ;;  %v1287_v49 = vunpack.c.3.s8 %v839_v27  ;;  %v863_v31 = vld [vmem:[%s8800_s10 + $0x298] sm:$0xff] }
 0x188   : > { %3916 = vmatpush.bf16.msrb.mxu1 %v3406_v39  ;;  %v3534_v50 = vpack.c.bf16 %v2966_v42, %v2958_v41  ;;  %v2183_v51 = vcvt.s32.f32 %v1159_v44  ;;  %v1407_v52 = vunpack.c.2.s8 %v871_v35  ;;  %v1415_v53 = vunpack.c.3.s8 %v871_v35  ;;  %v895_v39 = vld [vmem:[%s8800_s10 + $0x398] sm:$0xff] }
 0x189   : > { %3929 = vmatpush.bf16.msrb.mxu2 %v3470_v46  ;;  %v2303_v54 = vcvt.s32.f32 %v1279_v48  ;;  %v2311_v56 = vcvt.s32.f32 %v1287_v49  ;;  %v1535_v55 = vunpack.c.2.s8 %v903_v45  ;;  %v1543_v57 = vunpack.c.3.s8 %v903_v45  ;;  %v3738_v48 = vpop.f32.mrf.mxu3 }
 0x18a   : > { %3942 = vmatpush.bf16.msrb.mxu3 %v3534_v50  ;;  %v3143_v61 = vpack.c.bf16 %v2183_v51, %v2175_v47  ;;  %v2431_v63 = vcvt.s32.f32 %v1407_v52  ;;  %v2439_v1 = vcvt.s32.f32 %v1415_v53  ;;  %v3659_v2 = vadd.f32 %v8963_v38, %v8961_v37  ;;  %3904 = vmatmul.bf16.vlgmr.msrb.gmra.mxu0 %v8890_v40  ;;  %v3712_v37 = vpop.f32.mrf.mxu1  ;;  %v3725_v47 = vpop.f32.mrf.mxu2 }
 0x18b   : > { %v3207_v3 = vpack.c.bf16 %v2311_v56, %v2303_v54  ;;  %v2559_v4 = vcvt.s32.f32 %v1535_v55  ;;  %v2567_v6 = vcvt.s32.f32 %v1543_v57  ;;  %v1135_v7 = vunpack.c.0.s8 %v8977_v18  ;;  %3917 = vmatmul.bf16.vlgmr.msrb.gmra.mxu1 %v8897_v62 }
 0x18c   : > { %3948 = vmatpush.bf16.msra.mxu0 %v3143_v61  ;;  %v3271_v10 = vpack.c.bf16 %v2439_v1, %v2431_v63  ;;  %v1143_v11 = vunpack.c.1.s8 %v8977_v18  ;;  %v1263_v12 = vunpack.c.0.s8 %v839_v27  ;;  %v1271_v13 = vunpack.c.1.s8 %v839_v27  ;;  %3930 = vmatmul.bf16.vlgmr.msrb.gmra.mxu2 %v8887_v34  ;;  %v831_v27 = vld [vmem:[%s8800_s10 + $0x198] sm:$0xff] }
 0x18d   : > { %3961 = vmatpush.bf16.msra.mxu1 %v3207_v3  ;;  %v3335_v38 = vpack.c.bf16 %v2567_v6, %v2559_v4  ;;  %v2159_v15 = vcvt.s32.f32 %v1135_v7  ;;  %v1391_v16 = vunpack.c.0.s8 %v871_v35  ;;  %v1399_v17 = vunpack.c.1.s8 %v871_v35  ;;  %3943 = vmatmul.bf16.vlgmr.msrb.gmra.mxu3 %v8892_v43 }
 0x18e   : > { %3974 = vmatpush.bf16.msra.mxu2 %v3271_v10  ;;  %v2167_v20 = vcvt.s32.f32 %v1143_v11  ;;  %v2287_v18 = vcvt.s32.f32 %v1263_v12  ;;  %v2295_v21 = vcvt.s32.f32 %v1271_v13  ;;  %v1519_v22 = vunpack.c.0.s8 %v903_v45 }
 0x18f   : > { %3987 = vmatpush.bf16.msra.mxu3 %v3335_v38  ;;  %v2415_v23 = vcvt.s32.f32 %v1391_v16  ;;  %v2423_v25 = vcvt.s32.f32 %v1399_v17  ;;  %v1527_v26 = vunpack.c.1.s8 %v903_v45  ;;  %v3672_v24 = vadd.f32 %v8968_v8, %v3659_v2  ;;  %v823_v17 = vld [vmem:[%s8800_s10 + $0x158] sm:$0xff] }
 0x190   : > { %v3135_v30 = vpack.c.bf16 %v2167_v20, %v2159_v15  ;;  %v3199_v32 = vpack.c.bf16 %v2295_v21, %v2287_v18  ;;  %v2543_v33 = vcvt.s32.f32 %v1519_v22  ;;  %v1119_v35 = vunpack.c.2.s8 %v799_v19 }
 0x191   : > { %v3263_v41 = vpack.c.bf16 %v2423_v25, %v2415_v23  ;;  %v2551_v42 = vcvt.s32.f32 %v1527_v26  ;;  %v9006_v44 = vadd.f32 %v8970_v9, %v3672_v24  ;;  %v1127_v46 = vunpack.c.3.s8 %v799_v19  ;;  %v855_v24 = vld [vmem:[%s8800_s10 + $0x258] sm:$0xff] }
 0x192   : > { %3949 = vmatpush.bf16.msra.mxu0 %v3135_v30  ;;  %3962 = vmatpush.bf16.msra.mxu1 %v3199_v32  ;;  %v2143_v45 = vcvt.s32.f32 %v1119_v35  ;;  %v1247_v49 = vunpack.c.2.s8 %v831_v27  ;;  %v1255_v8 = vunpack.c.3.s8 %v831_v27  ;;  %v1375_v50 = vunpack.c.2.s8 %v863_v31  ;;  %v887_v35 = vld [vmem:[%s8800_s10 + $0x358] sm:$0xff] }
 0x193   : > { %3975 = vmatpush.bf16.msra.mxu2 %v3263_v41  ;;  %v3327_v51 = vpack.c.bf16 %v2551_v42, %v2543_v33  ;;  %v2151_v52 = vcvt.s32.f32 %v1127_v46  ;;  %v1383_v53 = vunpack.c.3.s8 %v863_v31  ;;  %v1503_v54 = vunpack.c.2.s8 %v895_v39 }
 0x194   : > { %v2271_v56 = vcvt.s32.f32 %v1247_v49  ;;  %v2279_v55 = vcvt.s32.f32 %v1255_v8  ;;  %v2399_v57 = vcvt.s32.f32 %v1375_v50  ;;  %v1511_v9 = vunpack.c.3.s8 %v895_v39 }
 0x195   : > { %3988 = vmatpush.bf16.msra.mxu3 %v3327_v51  ;;  %v3127_v61 = vpack.c.bf16 %v2151_v52, %v2143_v45  ;;  %v2407_v63 = vcvt.s32.f32 %v1383_v53  ;;  %v2527_v1 = vcvt.s32.f32 %v1503_v54  ;;  %v1103_v2 = vunpack.c.0.s8 %v799_v19 }
 0x196   : > { %v3191_v3 = vpack.c.bf16 %v2279_v55, %v2271_v56  ;;  %v2535_v4 = vcvt.s32.f32 %v1511_v9  ;;  %v1111_v6 = vunpack.c.1.s8 %v799_v19  ;;  %v1231_v7 = vunpack.c.0.s8 %v831_v27 }
 0x197   : > { %3950 = vmatpush.bf16.msra.mxu0 %v3127_v61  ;;  %v3255_v10 = vpack.c.bf16 %v2407_v63, %v2399_v57  ;;  %v2127_v11 = vcvt.s32.f32 %v1103_v2  ;;  %v1239_v12 = vunpack.c.1.s8 %v831_v27  ;;  %v1359_v13 = vunpack.c.0.s8 %v863_v31 }
 0x198   : > { %3963 = vmatpush.bf16.msra.mxu1 %v3191_v3  ;;  %v3319_v37 = vpack.c.bf16 %v2535_v4, %v2527_v1  ;;  %v2135_v38 = vcvt.s32.f32 %v1111_v6  ;;  %v2255_v15 = vcvt.s32.f32 %v1231_v7  ;;  %v1367_v16 = vunpack.c.1.s8 %v863_v31 }
 0x199   : > { %3976 = vmatpush.bf16.msra.mxu2 %v3255_v10  ;;  %v2263_v20 = vcvt.s32.f32 %v1239_v12  ;;  %v2383_v18 = vcvt.s32.f32 %v1359_v13  ;;  %v1487_v21 = vunpack.c.0.s8 %v895_v39  ;;  %v1495_v19 = vunpack.c.1.s8 %v895_v39 }
 0x19a   : > { %3989 = vmatpush.bf16.msra.mxu3 %v3319_v37  ;;  %v3119_v22 = vpack.c.bf16 %v2135_v38, %v2127_v11  ;;  %v2391_v23 = vcvt.s32.f32 %v1367_v16  ;;  %v1087_v25 = vunpack.c.2.s8 %v791_v14  ;;  %v1095_v26 = vunpack.c.3.s8 %v791_v14  ;;  %v783_v11 = vld [vmem:[%s8800_s10 + $0x18] sm:$0xff] }
 0x19b   : > { %v3183_v27 = vpack.c.bf16 %v2263_v20, %v2255_v15  ;;  %v2511_v30 = vcvt.s32.f32 %v1487_v21  ;;  %v2519_v32 = vcvt.s32.f32 %v1495_v19  ;;  %v1215_v33 = vunpack.c.2.s8 %v823_v17  ;;  %v815_v37 = vld [vmem:[%s8800_s10 + $0x118] sm:$0xff] }
 0x19c   : > { %3951 = vmatpush.bf16.msra.mxu0 %v3119_v22  ;;  %v3247_v31 = vpack.c.bf16 %v2391_v23, %v2383_v18  ;;  %v2111_v41 = vcvt.s32.f32 %v1087_v25  ;;  %v2119_v42 = vcvt.s32.f32 %v1095_v26  ;;  %v1223_v46 = vunpack.c.3.s8 %v823_v17  ;;  %v847_v19 = vld [vmem:[%s8800_s10 + $0x218] sm:$0xff] }
 0x19d   : > { %3964 = vmatpush.bf16.msra.mxu1 %v3183_v27  ;;  %v3311_v47 = vpack.c.bf16 %v2519_v32, %v2511_v30  ;;  %v2239_v48 = vcvt.s32.f32 %v1215_v33  ;;  %v1343_v39 = vunpack.c.2.s8 %v855_v24  ;;  %v1351_v45 = vunpack.c.3.s8 %v855_v24 }
 0x19e   : > { %3977 = vmatpush.bf16.msra.mxu2 %v3247_v31  ;;  %v3111_v49 = vpack.c.bf16 %v2119_v42, %v2111_v41  ;;  %v2247_v8 = vcvt.s32.f32 %v1223_v46  ;;  %v1471_v50 = vunpack.c.2.s8 %v887_v35  ;;  %v1479_v51 = vunpack.c.3.s8 %v887_v35 }
 0x19f   : > { %3990 = vmatpush.bf16.msra.mxu3 %v3311_v47  ;;  %v2367_v52 = vcvt.s32.f32 %v1343_v39  ;;  %v2375_v53 = vcvt.s32.f32 %v1351_v45  ;;  %v3698_v54 = vadd.f32 %v8980_v28, %v9006_v44  ;;  %v1071_v56 = vunpack.c.0.s8 %v791_v14 }
 0x1a0   : > { %3952 = vmatpush.bf16.msra.mxu0 %v3111_v49  ;;  %v3175_v55 = vpack.c.bf16 %v2247_v8, %v2239_v48  ;;  %v2495_v57 = vcvt.s32.f32 %v1471_v50  ;;  %v2503_v9 = vcvt.s32.f32 %v1479_v51  ;;  %v1079_v61 = vunpack.c.1.s8 %v791_v14 }
 0x1a1   : > { %v3239_v63 = vpack.c.bf16 %v2375_v53, %v2367_v52  ;;  %v3711_v1 = vadd.f32 %v8982_v29, %v3698_v54  ;;  %v2095_v2 = vcvt.s32.f32 %v1071_v56  ;;  %v1199_v3 = vunpack.c.0.s8 %v823_v17 }
 0x1a2   : > { %3965 = vmatpush.bf16.msra.mxu1 %v3175_v55  ;;  %v3303_v4 = vpack.c.bf16 %v2503_v9, %v2495_v57  ;;  %v2103_v6 = vcvt.s32.f32 %v1079_v61  ;;  %v1207_v7 = vunpack.c.1.s8 %v823_v17  ;;  %v1327_v10 = vunpack.c.0.s8 %v855_v24  ;;  %v3596_v17 = vld [vmem:[#allocation2 + $0x30] sm:$0xff]  ;;  %v935_v57 = vld [vmem:[%s8800_s10 + $0x4d8] sm:$0xff] }
 0x1a3   : > { %3978 = vmatpush.bf16.msra.mxu2 %v3239_v63  ;;  %v2223_v28 = vcvt.s32.f32 %v1199_v3  ;;  %v1335_v44 = vunpack.c.1.s8 %v855_v24  ;;  %v1455_v12 = vunpack.c.0.s8 %v887_v35  ;;  %v1463_v13 = vunpack.c.1.s8 %v887_v35  ;;  %v879_v24 = vld [vmem:[%s8800_s10 + $0x318] sm:$0xff] }
 0x1a4   : > { %3991 = vmatpush.bf16.msra.mxu3 %v3303_v4  ;;  %v3103_v14 = vpack.c.bf16 %v2103_v6, %v2095_v2  ;;  %v2231_v38 = vcvt.s32.f32 %v1207_v7  ;;  %v2351_v29 = vcvt.s32.f32 %v1327_v10  ;;  %v3724_v15 = vadd.f32 %v8988_v58, %v3711_v1  ;;  %v967_v2 = vld [vmem:[%s8800_s10 + $0x5d8] sm:$0xff] }
 0x1a5   : > { %v2359_v16 = vcvt.s32.f32 %v1335_v44  ;;  %v2479_v20 = vcvt.s32.f32 %v1455_v12  ;;  %v2487_v18 = vcvt.s32.f32 %v1463_v13  ;;  %v1055_v21 = vunpack.c.2.s8 %v783_v11  ;;  %v999_v12 = vld [vmem:[%s8800_s10 + $0x6d8] sm:$0xff] }
 0x1a6   : > { %3953 = vmatpush.bf16.msra.mxu0 %v3103_v14  ;;  %v3167_v22 = vpack.c.bf16 %v2231_v38, %v2223_v28  ;;  %v3737_v23 = vadd.f32 %v8990_v59, %v3724_v15  ;;  %v1063_v25 = vunpack.c.3.s8 %v783_v11  ;;  %v1183_v26 = vunpack.c.2.s8 %v815_v37 }
 0x1a7   : > { %v3231_v27 = vpack.c.bf16 %v2359_v16, %v2351_v29  ;;  %v3295_v30 = vpack.c.bf16 %v2487_v18, %v2479_v20  ;;  %v2079_v32 = vcvt.s32.f32 %v1055_v21  ;;  %v1191_v33 = vunpack.c.3.s8 %v815_v37  ;;  %v1031_v29 = vld [vmem:[%s8800_s10 + $0x7d8] sm:$0xff] }
 0x1a8   : > { %3966 = vmatpush.bf16.msra.mxu1 %v3167_v22  ;;  %v4468_v35 = vadd.f32 %v3737_v23, %v3596_v17  ;;  %v2087_v58 = vcvt.s32.f32 %v1063_v25  ;;  %v2207_v31 = vcvt.s32.f32 %v1183_v26  ;;  %v1311_v41 = vunpack.c.2.s8 %v847_v19 }
 0x1a9   : > { %3979 = vmatpush.bf16.msra.mxu2 %v3231_v27  ;;  %3992 = vmatpush.bf16.msra.mxu3 %v3295_v30  ;;  %v2215_v42 = vcvt.s32.f32 %v1191_v33  ;;  %v1319_v46 = vunpack.c.3.s8 %v847_v19  ;;  %v1439_v47 = vunpack.c.2.s8 %v879_v24  ;;  %v1447_v48 = vunpack.c.3.s8 %v879_v24 }
 0x1aa   : > { %4476 = vst [vmem:[#allocation2 + $0x30] sm:$0xff] %v4468_v35  ;;  %v3095_v59 = vpack.c.bf16 %v2087_v58, %v2079_v32  ;;  %v2335_v39 = vcvt.s32.f32 %v1311_v41  ;;  %v1039_v45 = vunpack.c.0.s8 %v783_v11  ;;  %v1047_v49 = vunpack.c.1.s8 %v783_v11 }
 0x1ab   : > { %v3159_v8 = vpack.c.bf16 %v2215_v42, %v2207_v31  ;;  %v2343_v50 = vcvt.s32.f32 %v1319_v46  ;;  %v2463_v51 = vcvt.s32.f32 %v1439_v47  ;;  %v2471_v52 = vcvt.s32.f32 %v1447_v48 }
 0x1ac   : > { %3954 = vmatpush.bf16.msra.mxu0 %v3095_v59  ;;  %v2063_v53 = vcvt.s32.f32 %v1039_v45  ;;  %v2071_v54 = vcvt.s32.f32 %v1047_v49  ;;  %v1167_v56 = vunpack.c.0.s8 %v815_v37  ;;  %v1175_v55 = vunpack.c.1.s8 %v815_v37  ;;  %v927_v59 = vld [vmem:[%s8800_s10 + $0x498] sm:$0xff] }
 0x1ad   : > { %3967 = vmatpush.bf16.msra.mxu1 %v3159_v8  ;;  %v3223_v9 = vpack.c.bf16 %v2343_v50, %v2335_v39  ;;  %v3287_v61 = vpack.c.bf16 %v2471_v52, %v2463_v51  ;;  %v1295_v63 = vunpack.c.0.s8 %v847_v19  ;;  %v1303_v1 = vunpack.c.1.s8 %v847_v19 }
 0x1ae   : > { %v3087_v3 = vpack.c.bf16 %v2071_v54, %v2063_v53  ;;  %v2191_v4 = vcvt.s32.f32 %v1167_v56  ;;  %v2199_v6 = vcvt.s32.f32 %v1175_v55  ;;  %v1423_v7 = vunpack.c.0.s8 %v879_v24  ;;  %v959_v54 = vld [vmem:[%s8800_s10 + $0x598] sm:$0xff] }
 0x1af   : > { %3980 = vmatpush.bf16.msra.mxu2 %v3223_v9  ;;  %3993 = vmatpush.bf16.msra.mxu3 %v3287_v61  ;;  %v2319_v10 = vcvt.s32.f32 %v1295_v63  ;;  %v2327_v11 = vcvt.s32.f32 %v1303_v1  ;;  %v1431_v28 = vunpack.c.1.s8 %v879_v24  ;;  %v1663_v44 = vunpack.c.2.s8 %v935_v57  ;;  %v991_v61 = vld [vmem:[%s8800_s10 + $0x698] sm:$0xff] }
 0x1b0   : > { %3955 = vmatpush.bf16.msra.mxu0 %v3087_v3  ;;  %v3151_v13 = vpack.c.bf16 %v2199_v6, %v2191_v4  ;;  %v2447_v37 = vcvt.s32.f32 %v1423_v7  ;;  %v1671_v14 = vunpack.c.3.s8 %v935_v57  ;;  %v1791_v38 = vunpack.c.2.s8 %v967_v2  ;;  %v1023_v4 = vld [vmem:[%s8800_s10 + $0x798] sm:$0xff] }
 0x1b1   : > { %v3215_v15 = vpack.c.bf16 %v2327_v11, %v2319_v10  ;;  %v2455_v16 = vcvt.s32.f32 %v1431_v28  ;;  %v2687_v20 = vcvt.s32.f32 %v1663_v44  ;;  %v1799_v18 = vunpack.c.3.s8 %v967_v2 }
 0x1b2   : > { %3968 = vmatpush.bf16.msra.mxu1 %v3151_v13  ;;  %v2695_v17 = vcvt.s32.f32 %v1671_v14  ;;  %v2815_v21 = vcvt.s32.f32 %v1791_v38  ;;  %v1919_v19 = vunpack.c.2.s8 %v999_v12  ;;  %v1927_v22 = vunpack.c.3.s8 %v999_v12 }
 0x1b3   : > { %3981 = vmatpush.bf16.msra.mxu2 %v3215_v15  ;;  %v3279_v23 = vpack.c.bf16 %v2455_v16, %v2447_v37  ;;  %v2823_v25 = vcvt.s32.f32 %v1799_v18  ;;  %v2047_v26 = vunpack.c.2.s8 %v1031_v29  ;;  %v2055_v24 = vunpack.c.3.s8 %v1031_v29  ;;  %3956 = vmatmul.bf16.vlgmr.msra.gmra.mxu0 %v8867_v60 }
 0x1b4   : > { %v3399_v27 = vpack.c.bf16 %v2695_v17, %v2687_v20  ;;  %v2943_v30 = vcvt.s32.f32 %v1919_v19  ;;  %v2951_v32 = vcvt.s32.f32 %v1927_v22  ;;  %v1647_v33 = vunpack.c.0.s8 %v935_v57 }
 0x1b5   : > { %3994 = vmatpush.bf16.msra.mxu3 %v3279_v23  ;;  %v3463_v35 = vpack.c.bf16 %v2823_v25, %v2815_v21  ;;  %v3071_v58 = vcvt.s32.f32 %v2047_v26  ;;  %v3079_v31 = vcvt.s32.f32 %v2055_v24  ;;  %v1655_v41 = vunpack.c.1.s8 %v935_v57  ;;  %3969 = vmatmul.bf16.vlgmr.msra.gmra.mxu1 %v8874_v5 }
 0x1b6   : > { %4000 = vmatpush.bf16.msrb.mxu0 %v3399_v27  ;;  %v3527_v42 = vpack.c.bf16 %v2951_v32, %v2943_v30  ;;  %v2671_v46 = vcvt.s32.f32 %v1647_v33  ;;  %v1775_v47 = vunpack.c.0.s8 %v967_v2  ;;  %v1783_v48 = vunpack.c.1.s8 %v967_v2  ;;  %3982 = vmatmul.bf16.vlgmr.msra.gmra.mxu2 %v8861_v36  ;;  %v919_v27 = vld [vmem:[%s8800_s10 + $0x458] sm:$0xff] }
 0x1b7   : > { %4013 = vmatpush.bf16.msrb.mxu1 %v3463_v35  ;;  %v3591_v39 = vpack.c.bf16 %v3079_v31, %v3071_v58  ;;  %v2679_v45 = vcvt.s32.f32 %v1655_v41  ;;  %v1903_v49 = vunpack.c.0.s8 %v999_v12  ;;  %v1911_v8 = vunpack.c.1.s8 %v999_v12  ;;  %v9034_v58 = vpop.f32.mrf.mxu0  ;;  %v9036_v31 = vpop.f32.mrf.mxu1 }
 0x1b8   : > { %4026 = vmatpush.bf16.msrb.mxu2 %v3527_v42  ;;  %v2799_v50 = vcvt.s32.f32 %v1775_v47  ;;  %v2807_v51 = vcvt.s32.f32 %v1783_v48  ;;  %v2031_v52 = vunpack.c.0.s8 %v1031_v29  ;;  %v2039_v53 = vunpack.c.1.s8 %v1031_v29  ;;  %3995 = vmatmul.bf16.vlgmr.msra.gmra.mxu3 %v8870_v0  ;;  %v951_v48 = vld [vmem:[%s8800_s10 + $0x558] sm:$0xff] }
 0x1b9   : > { %4039 = vmatpush.bf16.msrb.mxu3 %v3591_v39  ;;  %v3391_v56 = vpack.c.bf16 %v2679_v45, %v2671_v46  ;;  %v2927_v55 = vcvt.s32.f32 %v1903_v49  ;;  %v2935_v57 = vcvt.s32.f32 %v1911_v8  ;;  %v1631_v9 = vunpack.c.2.s8 %v927_v59  ;;  %v983_v8 = vld [vmem:[%s8800_s10 + $0x658] sm:$0xff] }
 0x1ba   : > { %v3455_v63 = vpack.c.bf16 %v2807_v51, %v2799_v50  ;;  %v3055_v1 = vcvt.s32.f32 %v2031_v52  ;;  %v3063_v2 = vcvt.s32.f32 %v2039_v53  ;;  %v1639_v3 = vunpack.c.3.s8 %v927_v59 }
 0x1bb   : > { %4001 = vmatpush.bf16.msrb.mxu0 %v3391_v56  ;;  %v3519_v6 = vpack.c.bf16 %v2935_v57, %v2927_v55  ;;  %v2655_v7 = vcvt.s32.f32 %v1631_v9  ;;  %v1759_v10 = vunpack.c.2.s8 %v959_v54  ;;  %v1767_v11 = vunpack.c.3.s8 %v959_v54 }
 0x1bc   : > { %4014 = vmatpush.bf16.msrb.mxu1 %v3455_v63  ;;  %v3583_v28 = vpack.c.bf16 %v3063_v2, %v3055_v1  ;;  %v2663_v44 = vcvt.s32.f32 %v1639_v3  ;;  %v1887_v12 = vunpack.c.2.s8 %v991_v61  ;;  %v1895_v13 = vunpack.c.3.s8 %v991_v61 }
 0x1bd   : > { %4027 = vmatpush.bf16.msrb.mxu2 %v3519_v6  ;;  %v2783_v37 = vcvt.s32.f32 %v1759_v10  ;;  %v2791_v14 = vcvt.s32.f32 %v1767_v11  ;;  %v2015_v38 = vunpack.c.2.s8 %v1023_v4  ;;  %v2023_v29 = vunpack.c.3.s8 %v1023_v4  ;;  %v9041_v10 = vpop.f32.mrf.mxu2  ;;  %v9043_v11 = vpop.f32.mrf.mxu3 }
 0x1be   : > { %4040 = vmatpush.bf16.msrb.mxu3 %v3583_v28  ;;  %v3383_v15 = vpack.c.bf16 %v2663_v44, %v2655_v7  ;;  %v2911_v16 = vcvt.s32.f32 %v1887_v12  ;;  %v2919_v20 = vcvt.s32.f32 %v1895_v13  ;;  %v1615_v18 = vunpack.c.0.s8 %v927_v59 }
 0x1bf   : > { %v3447_v17 = vpack.c.bf16 %v2791_v14, %v2783_v37  ;;  %v3039_v21 = vcvt.s32.f32 %v2015_v38  ;;  %v3047_v19 = vcvt.s32.f32 %v2023_v29  ;;  %v1623_v22 = vunpack.c.1.s8 %v927_v59 }
 0x1c0   : > { %4002 = vmatpush.bf16.msrb.mxu0 %v3383_v15  ;;  %v3511_v23 = vpack.c.bf16 %v2919_v20, %v2911_v16  ;;  %v2639_v25 = vcvt.s32.f32 %v1615_v18  ;;  %v1743_v26 = vunpack.c.0.s8 %v959_v54  ;;  %v1751_v24 = vunpack.c.1.s8 %v959_v54  ;;  %v1015_v54 = vld [vmem:[%s8800_s10 + $0x758] sm:$0xff]  ;;  %v3751_v15 = vpop.f32.mrf.mxu0  ;;  %v3764_v16 = vpop.f32.mrf.mxu1 }
 0x1c1   : > { %4015 = vmatpush.bf16.msrb.mxu1 %v3447_v17  ;;  %v3575_v30 = vpack.c.bf16 %v3047_v19, %v3039_v21  ;;  %v2647_v32 = vcvt.s32.f32 %v1623_v22  ;;  %v1871_v33 = vunpack.c.0.s8 %v991_v61  ;;  %v1879_v35 = vunpack.c.1.s8 %v991_v61  ;;  %v911_v19 = vld [vmem:[%s8800_s10 + $0x418] sm:$0xff]  ;;  %v9050_v15 = vld [vmem:[%s8800_s10 + $0xe0] sm:$0xff] }
 0x1c2   : > { %4028 = vmatpush.bf16.msrb.mxu2 %v3511_v23  ;;  %v2767_v41 = vcvt.s32.f32 %v1743_v26  ;;  %v2775_v42 = vcvt.s32.f32 %v1751_v24  ;;  %v1999_v46 = vunpack.c.0.s8 %v1023_v4  ;;  %v2007_v47 = vunpack.c.1.s8 %v1023_v4 }
 0x1c3   : > { %4041 = vmatpush.bf16.msrb.mxu3 %v3575_v30  ;;  %v3375_v59 = vpack.c.bf16 %v2647_v32, %v2639_v25  ;;  %v2895_v39 = vcvt.s32.f32 %v1871_v33  ;;  %v2903_v45 = vcvt.s32.f32 %v1879_v35  ;;  %v1599_v49 = vunpack.c.2.s8 %v919_v27  ;;  %v943_v33 = vld [vmem:[%s8800_s10 + $0x518] sm:$0xff] }
 0x1c4   : > { %v3439_v50 = vpack.c.bf16 %v2775_v42, %v2767_v41  ;;  %v3023_v51 = vcvt.s32.f32 %v1999_v46  ;;  %v3031_v52 = vcvt.s32.f32 %v2007_v47  ;;  %v1607_v53 = vunpack.c.3.s8 %v919_v27  ;;  %v975_v47 = vld [vmem:[%s8800_s10 + $0x618] sm:$0xff] }
 0x1c5   : > { %4003 = vmatpush.bf16.msrb.mxu0 %v3375_v59  ;;  %v3503_v56 = vpack.c.bf16 %v2903_v45, %v2895_v39  ;;  %v2623_v55 = vcvt.s32.f32 %v1599_v49  ;;  %v1727_v57 = vunpack.c.2.s8 %v951_v48  ;;  %v1735_v9 = vunpack.c.3.s8 %v951_v48  ;;  %v1007_v49 = vld [vmem:[%s8800_s10 + $0x718] sm:$0xff] }
 0x1c6   : > { %4016 = vmatpush.bf16.msrb.mxu1 %v3439_v50  ;;  %v3567_v61 = vpack.c.bf16 %v3031_v52, %v3023_v51  ;;  %v2631_v63 = vcvt.s32.f32 %v1607_v53  ;;  %v1855_v1 = vunpack.c.2.s8 %v983_v8  ;;  %v1863_v2 = vunpack.c.3.s8 %v983_v8  ;;  %v3777_v53 = vpop.f32.mrf.mxu2 }
 0x1c7   : > { %4029 = vmatpush.bf16.msrb.mxu2 %v3503_v56  ;;  %v2751_v3 = vcvt.s32.f32 %v1727_v57  ;;  %v2759_v4 = vcvt.s32.f32 %v1735_v9  ;;  %v1983_v6 = vunpack.c.2.s8 %v1015_v54  ;;  %v1991_v7 = vunpack.c.3.s8 %v1015_v54  ;;  %v3790_v56 = vpop.f32.mrf.mxu3 }
 0x1c8   : > { %4042 = vmatpush.bf16.msrb.mxu3 %v3567_v61  ;;  %v3367_v28 = vpack.c.bf16 %v2631_v63, %v2623_v55  ;;  %v2879_v44 = vcvt.s32.f32 %v1855_v1  ;;  %v2887_v12 = vcvt.s32.f32 %v1863_v2  ;;  %v1583_v13 = vunpack.c.0.s8 %v919_v27 }
 0x1c9   : > { %v3431_v37 = vpack.c.bf16 %v2759_v4, %v2751_v3  ;;  %v3007_v14 = vcvt.s32.f32 %v1983_v6  ;;  %v3015_v38 = vcvt.s32.f32 %v1991_v7  ;;  %v1591_v29 = vunpack.c.1.s8 %v919_v27 }
 0x1ca   : > { %4004 = vmatpush.bf16.msrb.mxu0 %v3367_v28  ;;  %v3495_v20 = vpack.c.bf16 %v2887_v12, %v2879_v44  ;;  %v2607_v18 = vcvt.s32.f32 %v1583_v13  ;;  %v1711_v17 = vunpack.c.0.s8 %v951_v48  ;;  %v1719_v21 = vunpack.c.1.s8 %v951_v48 }
 0x1cb   : > { %4017 = vmatpush.bf16.msrb.mxu1 %v3431_v37  ;;  %v3559_v22 = vpack.c.bf16 %v3015_v38, %v3007_v14  ;;  %v2615_v23 = vcvt.s32.f32 %v1591_v29  ;;  %v1839_v25 = vunpack.c.0.s8 %v983_v8  ;;  %v1847_v26 = vunpack.c.1.s8 %v983_v8 }
 0x1cc   : > { %4030 = vmatpush.bf16.msrb.mxu2 %v3495_v20  ;;  %v2735_v24 = vcvt.s32.f32 %v1711_v17  ;;  %v2743_v30 = vcvt.s32.f32 %v1719_v21  ;;  %v1967_v27 = vunpack.c.0.s8 %v1015_v54  ;;  %v1975_v32 = vunpack.c.1.s8 %v1015_v54 }
 0x1cd   : > { %4043 = vmatpush.bf16.msrb.mxu3 %v3559_v22  ;;  %v3359_v35 = vpack.c.bf16 %v2615_v23, %v2607_v18  ;;  %v2863_v41 = vcvt.s32.f32 %v1839_v25  ;;  %v2871_v42 = vcvt.s32.f32 %v1847_v26  ;;  %v1567_v46 = vunpack.c.2.s8 %v911_v19  ;;  %v840_v25 = vld [vmem:[%s8800_s10 + $0x1e0] sm:$0xff]  ;;  %v9053_v26 = vpop.f32.mrf.mxu0 }
 0x1ce   : > { %v3423_v48 = vpack.c.bf16 %v2743_v30, %v2735_v24  ;;  %v2991_v59 = vcvt.s32.f32 %v1967_v27  ;;  %v2999_v39 = vcvt.s32.f32 %v1975_v32  ;;  %v1575_v45 = vunpack.c.3.s8 %v911_v19  ;;  %v9055_v24 = vpop.f32.mrf.mxu1 }
 0x1cf   : > { %4005 = vmatpush.bf16.msrb.mxu0 %v3359_v35  ;;  %v3487_v8 = vpack.c.bf16 %v2871_v42, %v2863_v41  ;;  %v2591_v50 = vcvt.s32.f32 %v1567_v46  ;;  %v1695_v51 = vunpack.c.2.s8 %v943_v33  ;;  %v1703_v52 = vunpack.c.3.s8 %v943_v33  ;;  %v872_v35 = vld [vmem:[%s8800_s10 + $0x2e0] sm:$0xff] }
 0x1d0   : > { %4018 = vmatpush.bf16.msrb.mxu1 %v3423_v48  ;;  %v3551_v54 = vpack.c.bf16 %v2999_v39, %v2991_v59  ;;  %v2599_v55 = vcvt.s32.f32 %v1575_v45  ;;  %v1823_v57 = vunpack.c.2.s8 %v975_v47  ;;  %v1831_v9 = vunpack.c.3.s8 %v975_v47  ;;  %v904_v48 = vld [vmem:[%s8800_s10 + $0x3e0] sm:$0xff] }
 0x1d1   : > { %4031 = vmatpush.bf16.msrb.mxu2 %v3487_v8  ;;  %v2719_v61 = vcvt.s32.f32 %v1695_v51  ;;  %v2727_v63 = vcvt.s32.f32 %v1703_v52  ;;  %v1951_v1 = vunpack.c.2.s8 %v1007_v49  ;;  %v1959_v2 = vunpack.c.3.s8 %v1007_v49 }
 0x1d2   : > { %4044 = vmatpush.bf16.msrb.mxu3 %v3551_v54  ;;  %v3351_v3 = vpack.c.bf16 %v2599_v55, %v2591_v50  ;;  %v2847_v4 = vcvt.s32.f32 %v1823_v57  ;;  %v2855_v6 = vcvt.s32.f32 %v1831_v9  ;;  %v1551_v7 = vunpack.c.0.s8 %v911_v19  ;;  %v9061_v57 = vpop.f32.mrf.mxu2  ;;  %v9063_v9 = vpop.f32.mrf.mxu3 }
 0x1d3   : > { %v3415_v28 = vpack.c.bf16 %v2727_v63, %v2719_v61  ;;  %v2975_v44 = vcvt.s32.f32 %v1951_v1  ;;  %v2983_v12 = vcvt.s32.f32 %v1959_v2  ;;  %v1559_v13 = vunpack.c.1.s8 %v911_v19 }
 0x1d4   : > { %4006 = vmatpush.bf16.msrb.mxu0 %v3351_v3  ;;  %v3479_v37 = vpack.c.bf16 %v2855_v6, %v2847_v4  ;;  %v2575_v14 = vcvt.s32.f32 %v1551_v7  ;;  %v1679_v38 = vunpack.c.0.s8 %v943_v33  ;;  %v1687_v29 = vunpack.c.1.s8 %v943_v33 }
 0x1d5   : > { %4019 = vmatpush.bf16.msrb.mxu1 %v3415_v28  ;;  %v3543_v16 = vpack.c.bf16 %v2983_v12, %v2975_v44  ;;  %v2583_v20 = vcvt.s32.f32 %v1559_v13  ;;  %v1807_v18 = vunpack.c.0.s8 %v975_v47  ;;  %v1815_v17 = vunpack.c.1.s8 %v975_v47 }
 0x1d6   : > { %4032 = vmatpush.bf16.msrb.mxu2 %v3479_v37  ;;  %v2703_v21 = vcvt.s32.f32 %v1679_v38  ;;  %v2711_v22 = vcvt.s32.f32 %v1687_v29  ;;  %v1935_v23 = vunpack.c.0.s8 %v1007_v49  ;;  %v1943_v19 = vunpack.c.1.s8 %v1007_v49  ;;  %v3803_v37 = vpop.f32.mrf.mxu0 }
 0x1d7   : > { %4045 = vmatpush.bf16.msrb.mxu3 %v3543_v16  ;;  %v3343_v30 = vpack.c.bf16 %v2583_v20, %v2575_v14  ;;  %v2831_v27 = vcvt.s32.f32 %v1807_v18  ;;  %v2839_v32 = vcvt.s32.f32 %v1815_v17  ;;  %v1152_v33 = vunpack.c.2.s8 %v9050_v15  ;;  %v800_v16 = vld [vmem:[%s8800_s10 + $0xa0] sm:$0xff] }
 0x1d8   : > { %v3407_v41 = vpack.c.bf16 %v2711_v22, %v2703_v21  ;;  %v2959_v42 = vcvt.s32.f32 %v1935_v23  ;;  %v2967_v46 = vcvt.s32.f32 %v1943_v19  ;;  %v1160_v47 = vunpack.c.3.s8 %v9050_v15  ;;  %v792_v37 = vld [vmem:[%s8800_s10 + $0x60] sm:$0xff] }
 0x1d9   : > { %4007 = vmatpush.bf16.msrb.mxu0 %v3343_v30  ;;  %v3471_v59 = vpack.c.bf16 %v2839_v32, %v2831_v27  ;;  %v2176_v39 = vcvt.s32.f32 %v1152_v33  ;;  %v1280_v45 = vunpack.c.2.s8 %v840_v25  ;;  %v1288_v49 = vunpack.c.3.s8 %v840_v25  ;;  %v864_v30 = vld [vmem:[%s8800_s10 + $0x2a0] sm:$0xff] }
 0x1da   : > { %4020 = vmatpush.bf16.msrb.mxu1 %v3407_v41  ;;  %v3535_v8 = vpack.c.bf16 %v2967_v46, %v2959_v42  ;;  %v2184_v50 = vcvt.s32.f32 %v1160_v47  ;;  %v1408_v51 = vunpack.c.2.s8 %v872_v35  ;;  %v1416_v52 = vunpack.c.3.s8 %v872_v35  ;;  %v896_v41 = vld [vmem:[%s8800_s10 + $0x3a0] sm:$0xff] }
 0x1db   : > { %4033 = vmatpush.bf16.msrb.mxu2 %v3471_v59  ;;  %v2304_v53 = vcvt.s32.f32 %v1280_v45  ;;  %v2312_v56 = vcvt.s32.f32 %v1288_v49  ;;  %v1536_v54 = vunpack.c.2.s8 %v904_v48  ;;  %v1544_v55 = vunpack.c.3.s8 %v904_v48  ;;  %v3842_v45 = vpop.f32.mrf.mxu3 }
 0x1dc   : > { %4046 = vmatpush.bf16.msrb.mxu3 %v3535_v8  ;;  %v3144_v61 = vpack.c.bf16 %v2184_v50, %v2176_v39  ;;  %v2432_v63 = vcvt.s32.f32 %v1408_v51  ;;  %v2440_v1 = vcvt.s32.f32 %v1416_v52  ;;  %v3763_v2 = vadd.f32 %v9036_v31, %v9034_v58  ;;  %4008 = vmatmul.bf16.vlgmr.msrb.gmra.mxu0 %v8890_v40  ;;  %v3816_v58 = vpop.f32.mrf.mxu1  ;;  %v3829_v39 = vpop.f32.mrf.mxu2 }
 0x1dd   : > { %v3208_v3 = vpack.c.bf16 %v2312_v56, %v2304_v53  ;;  %v2560_v4 = vcvt.s32.f32 %v1536_v54  ;;  %v2568_v6 = vcvt.s32.f32 %v1544_v55  ;;  %v1136_v7 = vunpack.c.0.s8 %v9050_v15  ;;  %4021 = vmatmul.bf16.vlgmr.msrb.gmra.mxu1 %v8897_v62 }
 0x1de   : > { %4052 = vmatpush.bf16.msra.mxu0 %v3144_v61  ;;  %v3272_v28 = vpack.c.bf16 %v2440_v1, %v2432_v63  ;;  %v1144_v44 = vunpack.c.1.s8 %v9050_v15  ;;  %v1264_v12 = vunpack.c.0.s8 %v840_v25  ;;  %v1272_v13 = vunpack.c.1.s8 %v840_v25  ;;  %4034 = vmatmul.bf16.vlgmr.msrb.gmra.mxu2 %v8887_v34  ;;  %v832_v25 = vld [vmem:[%s8800_s10 + $0x1a0] sm:$0xff] }
 0x1df   : > { %4065 = vmatpush.bf16.msra.mxu1 %v3208_v3  ;;  %v3336_v31 = vpack.c.bf16 %v2568_v6, %v2560_v4  ;;  %v2160_v14 = vcvt.s32.f32 %v1136_v7  ;;  %v1392_v38 = vunpack.c.0.s8 %v872_v35  ;;  %v1400_v29 = vunpack.c.1.s8 %v872_v35  ;;  %4047 = vmatmul.bf16.vlgmr.msrb.gmra.mxu3 %v8892_v43 }
 0x1e0   : > { %4078 = vmatpush.bf16.msra.mxu2 %v3272_v28  ;;  %v2168_v20 = vcvt.s32.f32 %v1144_v44  ;;  %v2288_v15 = vcvt.s32.f32 %v1264_v12  ;;  %v2296_v18 = vcvt.s32.f32 %v1272_v13  ;;  %v1520_v17 = vunpack.c.0.s8 %v904_v48 }
 0x1e1   : > { %4091 = vmatpush.bf16.msra.mxu3 %v3336_v31  ;;  %v2416_v21 = vcvt.s32.f32 %v1392_v38  ;;  %v2424_v22 = vcvt.s32.f32 %v1400_v29  ;;  %v1528_v23 = vunpack.c.1.s8 %v904_v48  ;;  %v3776_v19 = vadd.f32 %v9041_v10, %v3763_v2  ;;  %v824_v29 = vld [vmem:[%s8800_s10 + $0x160] sm:$0xff] }
 0x1e2   : > { %v3136_v27 = vpack.c.bf16 %v2168_v20, %v2160_v14  ;;  %v3200_v32 = vpack.c.bf16 %v2296_v18, %v2288_v15  ;;  %v2544_v33 = vcvt.s32.f32 %v1520_v17  ;;  %v1120_v35 = vunpack.c.2.s8 %v800_v16 }
 0x1e3   : > { %v3264_v42 = vpack.c.bf16 %v2424_v22, %v2416_v21  ;;  %v2552_v46 = vcvt.s32.f32 %v1528_v23  ;;  %v9079_v47 = vadd.f32 %v9043_v11, %v3776_v19  ;;  %v1128_v59 = vunpack.c.3.s8 %v800_v16  ;;  %v856_v19 = vld [vmem:[%s8800_s10 + $0x260] sm:$0xff] }
 0x1e4   : > { %4053 = vmatpush.bf16.msra.mxu0 %v3136_v27  ;;  %4066 = vmatpush.bf16.msra.mxu1 %v3200_v32  ;;  %v2144_v48 = vcvt.s32.f32 %v1120_v35  ;;  %v1248_v49 = vunpack.c.2.s8 %v832_v25  ;;  %v1256_v10 = vunpack.c.3.s8 %v832_v25  ;;  %v1376_v8 = vunpack.c.2.s8 %v864_v30  ;;  %v888_v35 = vld [vmem:[%s8800_s10 + $0x360] sm:$0xff] }
 0x1e5   : > { %4079 = vmatpush.bf16.msra.mxu2 %v3264_v42  ;;  %v3328_v50 = vpack.c.bf16 %v2552_v46, %v2544_v33  ;;  %v2152_v51 = vcvt.s32.f32 %v1128_v59  ;;  %v1384_v52 = vunpack.c.3.s8 %v864_v30  ;;  %v1504_v53 = vunpack.c.2.s8 %v896_v41 }
 0x1e6   : > { %v2272_v56 = vcvt.s32.f32 %v1248_v49  ;;  %v2280_v54 = vcvt.s32.f32 %v1256_v10  ;;  %v2400_v55 = vcvt.s32.f32 %v1376_v8  ;;  %v1512_v11 = vunpack.c.3.s8 %v896_v41 }
 0x1e7   : > { %4092 = vmatpush.bf16.msra.mxu3 %v3328_v50  ;;  %v3128_v61 = vpack.c.bf16 %v2152_v51, %v2144_v48  ;;  %v2408_v63 = vcvt.s32.f32 %v1384_v52  ;;  %v2528_v1 = vcvt.s32.f32 %v1504_v53  ;;  %v1104_v2 = vunpack.c.0.s8 %v800_v16 }
 0x1e8   : > { %v3192_v3 = vpack.c.bf16 %v2280_v54, %v2272_v56  ;;  %v2536_v4 = vcvt.s32.f32 %v1512_v11  ;;  %v1112_v6 = vunpack.c.1.s8 %v800_v16  ;;  %v1232_v7 = vunpack.c.0.s8 %v832_v25 }
 0x1e9   : > { %4054 = vmatpush.bf16.msra.mxu0 %v3128_v61  ;;  %v3256_v28 = vpack.c.bf16 %v2408_v63, %v2400_v55  ;;  %v2128_v44 = vcvt.s32.f32 %v1104_v2  ;;  %v1240_v12 = vunpack.c.1.s8 %v832_v25  ;;  %v1360_v13 = vunpack.c.0.s8 %v864_v30 }
 0x1ea   : > { %4067 = vmatpush.bf16.msra.mxu1 %v3192_v3  ;;  %v3320_v58 = vpack.c.bf16 %v2536_v4, %v2528_v1  ;;  %v2136_v31 = vcvt.s32.f32 %v1112_v6  ;;  %v2256_v14 = vcvt.s32.f32 %v1232_v7  ;;  %v1368_v38 = vunpack.c.1.s8 %v864_v30 }
 0x1eb   : > { %4080 = vmatpush.bf16.msra.mxu2 %v3256_v28  ;;  %v2264_v20 = vcvt.s32.f32 %v1240_v12  ;;  %v2384_v15 = vcvt.s32.f32 %v1360_v13  ;;  %v1488_v18 = vunpack.c.0.s8 %v896_v41  ;;  %v1496_v16 = vunpack.c.1.s8 %v896_v41 }
 0x1ec   : > { %4093 = vmatpush.bf16.msra.mxu3 %v3320_v58  ;;  %v3120_v17 = vpack.c.bf16 %v2136_v31, %v2128_v44  ;;  %v2392_v21 = vcvt.s32.f32 %v1368_v38  ;;  %v1088_v22 = vunpack.c.2.s8 %v792_v37  ;;  %v1096_v23 = vunpack.c.3.s8 %v792_v37  ;;  %v784_v44 = vld [vmem:[%s8800_s10 + $0x20] sm:$0xff] }
 0x1ed   : > { %v3184_v25 = vpack.c.bf16 %v2264_v20, %v2256_v14  ;;  %v2512_v27 = vcvt.s32.f32 %v1488_v18  ;;  %v2520_v32 = vcvt.s32.f32 %v1496_v16  ;;  %v1216_v33 = vunpack.c.2.s8 %v824_v29  ;;  %v816_v58 = vld [vmem:[%s8800_s10 + $0x120] sm:$0xff] }
 0x1ee   : > { %4055 = vmatpush.bf16.msra.mxu0 %v3120_v17  ;;  %v3248_v30 = vpack.c.bf16 %v2392_v21, %v2384_v15  ;;  %v2112_v42 = vcvt.s32.f32 %v1088_v22  ;;  %v2120_v46 = vcvt.s32.f32 %v1096_v23  ;;  %v1224_v59 = vunpack.c.3.s8 %v824_v29  ;;  %v848_v16 = vld [vmem:[%s8800_s10 + $0x220] sm:$0xff] }
 0x1ef   : > { %4068 = vmatpush.bf16.msra.mxu1 %v3184_v25  ;;  %v3312_v39 = vpack.c.bf16 %v2520_v32, %v2512_v27  ;;  %v2240_v45 = vcvt.s32.f32 %v1216_v33  ;;  %v1344_v41 = vunpack.c.2.s8 %v856_v19  ;;  %v1352_v48 = vunpack.c.3.s8 %v856_v19 }
 0x1f0   : > { %4081 = vmatpush.bf16.msra.mxu2 %v3248_v30  ;;  %v3112_v49 = vpack.c.bf16 %v2120_v46, %v2112_v42  ;;  %v2248_v10 = vcvt.s32.f32 %v1224_v59  ;;  %v1472_v8 = vunpack.c.2.s8 %v888_v35  ;;  %v1480_v50 = vunpack.c.3.s8 %v888_v35 }
 0x1f1   : > { %4094 = vmatpush.bf16.msra.mxu3 %v3312_v39  ;;  %v2368_v51 = vcvt.s32.f32 %v1344_v41  ;;  %v2376_v52 = vcvt.s32.f32 %v1352_v48  ;;  %v3802_v53 = vadd.f32 %v9053_v26, %v9079_v47  ;;  %v1072_v56 = vunpack.c.0.s8 %v792_v37 }
 0x1f2   : > { %4056 = vmatpush.bf16.msra.mxu0 %v3112_v49  ;;  %v3176_v54 = vpack.c.bf16 %v2248_v10, %v2240_v45  ;;  %v2496_v55 = vcvt.s32.f32 %v1472_v8  ;;  %v2504_v11 = vcvt.s32.f32 %v1480_v50  ;;  %v1080_v61 = vunpack.c.1.s8 %v792_v37 }
 0x1f3   : > { %v3240_v63 = vpack.c.bf16 %v2376_v52, %v2368_v51  ;;  %v3815_v1 = vadd.f32 %v9055_v24, %v3802_v53  ;;  %v2096_v2 = vcvt.s32.f32 %v1072_v56  ;;  %v1200_v3 = vunpack.c.0.s8 %v824_v29 }
 0x1f4   : > { %4069 = vmatpush.bf16.msra.mxu1 %v3176_v54  ;;  %v3304_v4 = vpack.c.bf16 %v2504_v11, %v2496_v55  ;;  %v2104_v6 = vcvt.s32.f32 %v1080_v61  ;;  %v1208_v7 = vunpack.c.1.s8 %v824_v29  ;;  %v1328_v28 = vunpack.c.0.s8 %v856_v19  ;;  %v3597_v29 = vld [vmem:[#allocation2] sm:$0xff] }
 0x1f5   : > { %4082 = vmatpush.bf16.msra.mxu2 %v3240_v63  ;;  %v2224_v26 = vcvt.s32.f32 %v1200_v3  ;;  %v1336_v47 = vunpack.c.1.s8 %v856_v19  ;;  %v1456_v12 = vunpack.c.0.s8 %v888_v35  ;;  %v1464_v13 = vunpack.c.1.s8 %v888_v35  ;;  %v880_v19 = vld [vmem:[%s8800_s10 + $0x320] sm:$0xff] }
 0x1f6   : > { %4095 = vmatpush.bf16.msra.mxu3 %v3304_v4  ;;  %v3104_v37 = vpack.c.bf16 %v2104_v6, %v2096_v2  ;;  %v2232_v31 = vcvt.s32.f32 %v1208_v7  ;;  %v2352_v24 = vcvt.s32.f32 %v1328_v28  ;;  %v3828_v14 = vadd.f32 %v9061_v57, %v3815_v1  ;;  %v936_v55 = vld [vmem:[%s8800_s10 + $0x4e0] sm:$0xff] }
 0x1f7   : > { %v2360_v38 = vcvt.s32.f32 %v1336_v47  ;;  %v2480_v20 = vcvt.s32.f32 %v1456_v12  ;;  %v2488_v15 = vcvt.s32.f32 %v1464_v13  ;;  %v1056_v18 = vunpack.c.2.s8 %v784_v44  ;;  %v968_v2 = vld [vmem:[%s8800_s10 + $0x5e0] sm:$0xff] }
 0x1f8   : > { %4057 = vmatpush.bf16.msra.mxu0 %v3104_v37  ;;  %v3168_v17 = vpack.c.bf16 %v2232_v31, %v2224_v26  ;;  %v3841_v21 = vadd.f32 %v9063_v9, %v3828_v14  ;;  %v1064_v22 = vunpack.c.3.s8 %v784_v44  ;;  %v1184_v23 = vunpack.c.2.s8 %v816_v58  ;;  %v1000_v12 = vld [vmem:[%s8800_s10 + $0x6e0] sm:$0xff] }
 0x1f9   : > { %v3232_v25 = vpack.c.bf16 %v2360_v38, %v2352_v24  ;;  %v3296_v27 = vpack.c.bf16 %v2488_v15, %v2480_v20  ;;  %v2080_v32 = vcvt.s32.f32 %v1056_v18  ;;  %v1192_v33 = vunpack.c.3.s8 %v816_v58  ;;  %v1032_v24 = vld [vmem:[%s8800_s10 + $0x7e0] sm:$0xff] }
 0x1fa   : > { %4070 = vmatpush.bf16.msra.mxu1 %v3168_v17  ;;  %v4469_v35 = vadd.f32 %v3841_v21, %v3597_v29  ;;  %v2088_v57 = vcvt.s32.f32 %v1064_v22  ;;  %v2208_v30 = vcvt.s32.f32 %v1184_v23  ;;  %v1312_v42 = vunpack.c.2.s8 %v848_v16 }
 0x1fb   : > { %4083 = vmatpush.bf16.msra.mxu2 %v3232_v25  ;;  %4096 = vmatpush.bf16.msra.mxu3 %v3296_v27  ;;  %v2216_v46 = vcvt.s32.f32 %v1192_v33  ;;  %v1320_v59 = vunpack.c.3.s8 %v848_v16  ;;  %v1440_v39 = vunpack.c.2.s8 %v880_v19  ;;  %v1448_v45 = vunpack.c.3.s8 %v880_v19 }
 0x1fc   : > { %4477 = vst [vmem:[#allocation2] sm:$0xff] %v4469_v35  ;;  %v3096_v9 = vpack.c.bf16 %v2088_v57, %v2080_v32  ;;  %v2336_v41 = vcvt.s32.f32 %v1312_v42  ;;  %v1040_v48 = vunpack.c.0.s8 %v784_v44  ;;  %v1048_v49 = vunpack.c.1.s8 %v784_v44 }
 0x1fd   : > { %v3160_v10 = vpack.c.bf16 %v2216_v46, %v2208_v30  ;;  %v2344_v8 = vcvt.s32.f32 %v1320_v59  ;;  %v2464_v50 = vcvt.s32.f32 %v1440_v39  ;;  %v2472_v51 = vcvt.s32.f32 %v1448_v45 }
 0x1fe   : > { %4058 = vmatpush.bf16.msra.mxu0 %v3096_v9  ;;  %v2064_v52 = vcvt.s32.f32 %v1040_v48  ;;  %v2072_v53 = vcvt.s32.f32 %v1048_v49  ;;  %v1168_v56 = vunpack.c.0.s8 %v816_v58  ;;  %v1176_v54 = vunpack.c.1.s8 %v816_v58  ;;  %v928_v9 = vld [vmem:[%s8800_s10 + $0x4a0] sm:$0xff] }
 0x1ff   : > { %4071 = vmatpush.bf16.msra.mxu1 %v3160_v10  ;;  %v3224_v11 = vpack.c.bf16 %v2344_v8, %v2336_v41  ;;  %v3288_v61 = vpack.c.bf16 %v2472_v51, %v2464_v50  ;;  %v1296_v63 = vunpack.c.0.s8 %v848_v16  ;;  %v1304_v1 = vunpack.c.1.s8 %v848_v16 }
 0x200   : > { %v3088_v3 = vpack.c.bf16 %v2072_v53, %v2064_v52  ;;  %v2192_v4 = vcvt.s32.f32 %v1168_v56  ;;  %v2200_v6 = vcvt.s32.f32 %v1176_v54  ;;  %v1424_v7 = vunpack.c.0.s8 %v880_v19  ;;  %v960_v53 = vld [vmem:[%s8800_s10 + $0x5a0] sm:$0xff] }
 0x201   : > { %4084 = vmatpush.bf16.msra.mxu2 %v3224_v11  ;;  %4097 = vmatpush.bf16.msra.mxu3 %v3288_v61  ;;  %v2320_v28 = vcvt.s32.f32 %v1296_v63  ;;  %v2328_v44 = vcvt.s32.f32 %v1304_v1  ;;  %v1432_v26 = vunpack.c.1.s8 %v880_v19  ;;  %v1664_v47 = vunpack.c.2.s8 %v936_v55  ;;  %v992_v61 = vld [vmem:[%s8800_s10 + $0x6a0] sm:$0xff] }
 0x202   : > { %4059 = vmatpush.bf16.msra.mxu0 %v3088_v3  ;;  %v3152_v13 = vpack.c.bf16 %v2200_v6, %v2192_v4  ;;  %v2448_v58 = vcvt.s32.f32 %v1424_v7  ;;  %v1672_v37 = vunpack.c.3.s8 %v936_v55  ;;  %v1792_v31 = vunpack.c.2.s8 %v968_v2  ;;  %v1024_v4 = vld [vmem:[%s8800_s10 + $0x7a0] sm:$0xff] }
 0x203   : > { %v3216_v14 = vpack.c.bf16 %v2328_v44, %v2320_v28  ;;  %v2456_v38 = vcvt.s32.f32 %v1432_v26  ;;  %v2688_v20 = vcvt.s32.f32 %v1664_v47  ;;  %v1800_v15 = vunpack.c.3.s8 %v968_v2 }
 0x204   : > { %4072 = vmatpush.bf16.msra.mxu1 %v3152_v13  ;;  %v2696_v29 = vcvt.s32.f32 %v1672_v37  ;;  %v2816_v18 = vcvt.s32.f32 %v1792_v31  ;;  %v1920_v16 = vunpack.c.2.s8 %v1000_v12  ;;  %v1928_v17 = vunpack.c.3.s8 %v1000_v12 }
 0x205   : > { %4085 = vmatpush.bf16.msra.mxu2 %v3216_v14  ;;  %v3280_v21 = vpack.c.bf16 %v2456_v38, %v2448_v58  ;;  %v2824_v22 = vcvt.s32.f32 %v1800_v15  ;;  %v2048_v23 = vunpack.c.2.s8 %v1032_v24  ;;  %v2056_v19 = vunpack.c.3.s8 %v1032_v24  ;;  %4060 = vmatmul.bf16.vlgmr.msra.gmra.mxu0 %v8867_v60 }
 0x206   : > { %v3400_v25 = vpack.c.bf16 %v2696_v29, %v2688_v20  ;;  %v2944_v27 = vcvt.s32.f32 %v1920_v16  ;;  %v2952_v32 = vcvt.s32.f32 %v1928_v17  ;;  %v1648_v33 = vunpack.c.0.s8 %v936_v55 }
 0x207   : > { %4098 = vmatpush.bf16.msra.mxu3 %v3280_v21  ;;  %v3464_v35 = vpack.c.bf16 %v2824_v22, %v2816_v18  ;;  %v3072_v57 = vcvt.s32.f32 %v2048_v23  ;;  %v3080_v30 = vcvt.s32.f32 %v2056_v19  ;;  %v1656_v42 = vunpack.c.1.s8 %v936_v55  ;;  %4073 = vmatmul.bf16.vlgmr.msra.gmra.mxu1 %v8874_v5 }
 0x208   : > { %4104 = vmatpush.bf16.msrb.mxu0 %v3400_v25  ;;  %v3528_v46 = vpack.c.bf16 %v2952_v32, %v2944_v27  ;;  %v2672_v59 = vcvt.s32.f32 %v1648_v33  ;;  %v1776_v39 = vunpack.c.0.s8 %v968_v2  ;;  %v1784_v45 = vunpack.c.1.s8 %v968_v2  ;;  %4086 = vmatmul.bf16.vlgmr.msra.gmra.mxu2 %v8861_v36  ;;  %v920_v25 = vld [vmem:[%s8800_s10 + $0x460] sm:$0xff] }
 0x209   : > { %4117 = vmatpush.bf16.msrb.mxu1 %v3464_v35  ;;  %v3592_v41 = vpack.c.bf16 %v3080_v30, %v3072_v57  ;;  %v2680_v48 = vcvt.s32.f32 %v1656_v42  ;;  %v1904_v49 = vunpack.c.0.s8 %v1000_v12  ;;  %v1912_v10 = vunpack.c.1.s8 %v1000_v12  ;;  %v9107_v57 = vpop.f32.mrf.mxu0  ;;  %v9109_v30 = vpop.f32.mrf.mxu1 }
 0x20a   : > { %4130 = vmatpush.bf16.msrb.mxu2 %v3528_v46  ;;  %v2800_v8 = vcvt.s32.f32 %v1776_v39  ;;  %v2808_v50 = vcvt.s32.f32 %v1784_v45  ;;  %v2032_v51 = vunpack.c.0.s8 %v1032_v24  ;;  %v2040_v52 = vunpack.c.1.s8 %v1032_v24  ;;  %4099 = vmatmul.bf16.vlgmr.msra.gmra.mxu3 %v8870_v0  ;;  %v952_v45 = vld [vmem:[%s8800_s10 + $0x560] sm:$0xff] }
 0x20b   : > { %4143 = vmatpush.bf16.msrb.mxu3 %v3592_v41  ;;  %v3392_v56 = vpack.c.bf16 %v2680_v48, %v2672_v59  ;;  %v2928_v54 = vcvt.s32.f32 %v1904_v49  ;;  %v2936_v55 = vcvt.s32.f32 %v1912_v10  ;;  %v1632_v11 = vunpack.c.2.s8 %v928_v9  ;;  %v984_v10 = vld [vmem:[%s8800_s10 + $0x660] sm:$0xff] }
 0x20c   : > { %v3456_v63 = vpack.c.bf16 %v2808_v50, %v2800_v8  ;;  %v3056_v1 = vcvt.s32.f32 %v2032_v51  ;;  %v3064_v2 = vcvt.s32.f32 %v2040_v52  ;;  %v1640_v3 = vunpack.c.3.s8 %v928_v9 }
 0x20d   : > { %4105 = vmatpush.bf16.msrb.mxu0 %v3392_v56  ;;  %v3520_v6 = vpack.c.bf16 %v2936_v55, %v2928_v54  ;;  %v2656_v7 = vcvt.s32.f32 %v1632_v11  ;;  %v1760_v28 = vunpack.c.2.s8 %v960_v53  ;;  %v1768_v44 = vunpack.c.3.s8 %v960_v53 }
 0x20e   : > { %4118 = vmatpush.bf16.msrb.mxu1 %v3456_v63  ;;  %v3584_v26 = vpack.c.bf16 %v3064_v2, %v3056_v1  ;;  %v2664_v47 = vcvt.s32.f32 %v1640_v3  ;;  %v1888_v12 = vunpack.c.2.s8 %v992_v61  ;;  %v1896_v13 = vunpack.c.3.s8 %v992_v61 }
 0x20f   : > { %4131 = vmatpush.bf16.msrb.mxu2 %v3520_v6  ;;  %v2784_v58 = vcvt.s32.f32 %v1760_v28  ;;  %v2792_v37 = vcvt.s32.f32 %v1768_v44  ;;  %v2016_v31 = vunpack.c.2.s8 %v1024_v4  ;;  %v2024_v24 = vunpack.c.3.s8 %v1024_v4  ;;  %v9114_v28 = vpop.f32.mrf.mxu2  ;;  %v9116_v44 = vpop.f32.mrf.mxu3 }
 0x210   : > { %4144 = vmatpush.bf16.msrb.mxu3 %v3584_v26  ;;  %v3384_v14 = vpack.c.bf16 %v2664_v47, %v2656_v7  ;;  %v2912_v38 = vcvt.s32.f32 %v1888_v12  ;;  %v2920_v20 = vcvt.s32.f32 %v1896_v13  ;;  %v1616_v15 = vunpack.c.0.s8 %v928_v9 }
 0x211   : > { %v3448_v29 = vpack.c.bf16 %v2792_v37, %v2784_v58  ;;  %v3040_v18 = vcvt.s32.f32 %v2016_v31  ;;  %v3048_v16 = vcvt.s32.f32 %v2024_v24  ;;  %v1624_v17 = vunpack.c.1.s8 %v928_v9 }
 0x212   : > { %4106 = vmatpush.bf16.msrb.mxu0 %v3384_v14  ;;  %v3512_v21 = vpack.c.bf16 %v2920_v20, %v2912_v38  ;;  %v2640_v22 = vcvt.s32.f32 %v1616_v15  ;;  %v1744_v23 = vunpack.c.0.s8 %v960_v53  ;;  %v1752_v19 = vunpack.c.1.s8 %v960_v53  ;;  %v1016_v53 = vld [vmem:[%s8800_s10 + $0x760] sm:$0xff]  ;;  %v3855_v14 = vpop.f32.mrf.mxu0  ;;  %v3868_v38 = vpop.f32.mrf.mxu1 }
 0x213   : > { %4119 = vmatpush.bf16.msrb.mxu1 %v3448_v29  ;;  %v3576_v27 = vpack.c.bf16 %v3048_v16, %v3040_v18  ;;  %v2648_v32 = vcvt.s32.f32 %v1624_v17  ;;  %v1872_v33 = vunpack.c.0.s8 %v992_v61  ;;  %v1880_v35 = vunpack.c.1.s8 %v992_v61  ;;  %v912_v16 = vld [vmem:[%s8800_s10 + $0x420] sm:$0xff]  ;;  %v9123_v14 = vld [vmem:[%s8800_s10 + $0xe8] sm:$0xff] }
 0x214   : > { %4132 = vmatpush.bf16.msrb.mxu2 %v3512_v21  ;;  %v2768_v42 = vcvt.s32.f32 %v1744_v23  ;;  %v2776_v46 = vcvt.s32.f32 %v1752_v19  ;;  %v2000_v59 = vunpack.c.0.s8 %v1024_v4  ;;  %v2008_v39 = vunpack.c.1.s8 %v1024_v4 }
 0x215   : > { %4145 = vmatpush.bf16.msrb.mxu3 %v3576_v27  ;;  %v3376_v9 = vpack.c.bf16 %v2648_v32, %v2640_v22  ;;  %v2896_v41 = vcvt.s32.f32 %v1872_v33  ;;  %v2904_v48 = vcvt.s32.f32 %v1880_v35  ;;  %v1600_v49 = vunpack.c.2.s8 %v920_v25  ;;  %v944_v33 = vld [vmem:[%s8800_s10 + $0x520] sm:$0xff] }
 0x216   : > { %v3440_v8 = vpack.c.bf16 %v2776_v46, %v2768_v42  ;;  %v3024_v50 = vcvt.s32.f32 %v2000_v59  ;;  %v3032_v51 = vcvt.s32.f32 %v2008_v39  ;;  %v1608_v52 = vunpack.c.3.s8 %v920_v25  ;;  %v976_v39 = vld [vmem:[%s8800_s10 + $0x620] sm:$0xff] }
 0x217   : > { %4107 = vmatpush.bf16.msrb.mxu0 %v3376_v9  ;;  %v3504_v56 = vpack.c.bf16 %v2904_v48, %v2896_v41  ;;  %v2624_v54 = vcvt.s32.f32 %v1600_v49  ;;  %v1728_v55 = vunpack.c.2.s8 %v952_v45  ;;  %v1736_v11 = vunpack.c.3.s8 %v952_v45  ;;  %v1008_v49 = vld [vmem:[%s8800_s10 + $0x720] sm:$0xff] }
 0x218   : > { %4120 = vmatpush.bf16.msrb.mxu1 %v3440_v8  ;;  %v3568_v61 = vpack.c.bf16 %v3032_v51, %v3024_v50  ;;  %v2632_v63 = vcvt.s32.f32 %v1608_v52  ;;  %v1856_v1 = vunpack.c.2.s8 %v984_v10  ;;  %v1864_v2 = vunpack.c.3.s8 %v984_v10  ;;  %v3881_v52 = vpop.f32.mrf.mxu2 }
 0x219   : > { %4133 = vmatpush.bf16.msrb.mxu2 %v3504_v56  ;;  %v2752_v3 = vcvt.s32.f32 %v1728_v55  ;;  %v2760_v4 = vcvt.s32.f32 %v1736_v11  ;;  %v1984_v6 = vunpack.c.2.s8 %v1016_v53  ;;  %v1992_v7 = vunpack.c.3.s8 %v1016_v53  ;;  %v3894_v56 = vpop.f32.mrf.mxu3 }
 0x21a   : > { %4146 = vmatpush.bf16.msrb.mxu3 %v3568_v61  ;;  %v3368_v26 = vpack.c.bf16 %v2632_v63, %v2624_v54  ;;  %v2880_v47 = vcvt.s32.f32 %v1856_v1  ;;  %v2888_v12 = vcvt.s32.f32 %v1864_v2  ;;  %v1584_v13 = vunpack.c.0.s8 %v920_v25 }
 0x21b   : > { %v3432_v58 = vpack.c.bf16 %v2760_v4, %v2752_v3  ;;  %v3008_v37 = vcvt.s32.f32 %v1984_v6  ;;  %v3016_v31 = vcvt.s32.f32 %v1992_v7  ;;  %v1592_v24 = vunpack.c.1.s8 %v920_v25 }
 0x21c   : > { %4108 = vmatpush.bf16.msrb.mxu0 %v3368_v26  ;;  %v3496_v20 = vpack.c.bf16 %v2888_v12, %v2880_v47  ;;  %v2608_v15 = vcvt.s32.f32 %v1584_v13  ;;  %v1712_v29 = vunpack.c.0.s8 %v952_v45  ;;  %v1720_v18 = vunpack.c.1.s8 %v952_v45 }
 0x21d   : > { %4121 = vmatpush.bf16.msrb.mxu1 %v3432_v58  ;;  %v3560_v17 = vpack.c.bf16 %v3016_v31, %v3008_v37  ;;  %v2616_v21 = vcvt.s32.f32 %v1592_v24  ;;  %v1840_v22 = vunpack.c.0.s8 %v984_v10  ;;  %v1848_v23 = vunpack.c.1.s8 %v984_v10 }
 0x21e   : > { %4134 = vmatpush.bf16.msrb.mxu2 %v3496_v20  ;;  %v2736_v19 = vcvt.s32.f32 %v1712_v29  ;;  %v2744_v27 = vcvt.s32.f32 %v1720_v18  ;;  %v1968_v25 = vunpack.c.0.s8 %v1016_v53  ;;  %v1976_v32 = vunpack.c.1.s8 %v1016_v53 }
 0x21f   : > { %4147 = vmatpush.bf16.msrb.mxu3 %v3560_v17  ;;  %v3360_v35 = vpack.c.bf16 %v2616_v21, %v2608_v15  ;;  %v2864_v42 = vcvt.s32.f32 %v1840_v22  ;;  %v2872_v46 = vcvt.s32.f32 %v1848_v23  ;;  %v1568_v59 = vunpack.c.2.s8 %v912_v16  ;;  %v841_v22 = vld [vmem:[%s8800_s10 + $0x1e8] sm:$0xff]  ;;  %v9126_v23 = vpop.f32.mrf.mxu0 }
 0x220   : > { %v3424_v45 = vpack.c.bf16 %v2744_v27, %v2736_v19  ;;  %v2992_v9 = vcvt.s32.f32 %v1968_v25  ;;  %v3000_v41 = vcvt.s32.f32 %v1976_v32  ;;  %v1576_v48 = vunpack.c.3.s8 %v912_v16  ;;  %v9128_v19 = vpop.f32.mrf.mxu1 }
 0x221   : > { %4109 = vmatpush.bf16.msrb.mxu0 %v3360_v35  ;;  %v3488_v10 = vpack.c.bf16 %v2872_v46, %v2864_v42  ;;  %v2592_v8 = vcvt.s32.f32 %v1568_v59  ;;  %v1696_v50 = vunpack.c.2.s8 %v944_v33  ;;  %v1704_v51 = vunpack.c.3.s8 %v944_v33  ;;  %v873_v35 = vld [vmem:[%s8800_s10 + $0x2e8] sm:$0xff] }
 0x222   : > { %4122 = vmatpush.bf16.msrb.mxu1 %v3424_v45  ;;  %v3552_v53 = vpack.c.bf16 %v3000_v41, %v2992_v9  ;;  %v2600_v54 = vcvt.s32.f32 %v1576_v48  ;;  %v1824_v55 = vunpack.c.2.s8 %v976_v39  ;;  %v1832_v11 = vunpack.c.3.s8 %v976_v39  ;;  %v905_v45 = vld [vmem:[%s8800_s10 + $0x3e8] sm:$0xff] }
 0x223   : > { %4135 = vmatpush.bf16.msrb.mxu2 %v3488_v10  ;;  %v2720_v61 = vcvt.s32.f32 %v1696_v50  ;;  %v2728_v63 = vcvt.s32.f32 %v1704_v51  ;;  %v1952_v1 = vunpack.c.2.s8 %v1008_v49  ;;  %v1960_v2 = vunpack.c.3.s8 %v1008_v49 }
 0x224   : > { %4148 = vmatpush.bf16.msrb.mxu3 %v3552_v53  ;;  %v3352_v3 = vpack.c.bf16 %v2600_v54, %v2592_v8  ;;  %v2848_v4 = vcvt.s32.f32 %v1824_v55  ;;  %v2856_v6 = vcvt.s32.f32 %v1832_v11  ;;  %v1552_v7 = vunpack.c.0.s8 %v912_v16  ;;  %v9134_v55 = vpop.f32.mrf.mxu2  ;;  %v9136_v11 = vpop.f32.mrf.mxu3 }
 0x225   : > { %v3416_v26 = vpack.c.bf16 %v2728_v63, %v2720_v61  ;;  %v2976_v47 = vcvt.s32.f32 %v1952_v1  ;;  %v2984_v12 = vcvt.s32.f32 %v1960_v2  ;;  %v1560_v13 = vunpack.c.1.s8 %v912_v16 }
 0x226   : > { %4110 = vmatpush.bf16.msrb.mxu0 %v3352_v3  ;;  %v3480_v58 = vpack.c.bf16 %v2856_v6, %v2848_v4  ;;  %v2576_v37 = vcvt.s32.f32 %v1552_v7  ;;  %v1680_v31 = vunpack.c.0.s8 %v944_v33  ;;  %v1688_v24 = vunpack.c.1.s8 %v944_v33 }
 0x227   : > { %4123 = vmatpush.bf16.msrb.mxu1 %v3416_v26  ;;  %v3544_v38 = vpack.c.bf16 %v2984_v12, %v2976_v47  ;;  %v2584_v20 = vcvt.s32.f32 %v1560_v13  ;;  %v1808_v15 = vunpack.c.0.s8 %v976_v39  ;;  %v1816_v29 = vunpack.c.1.s8 %v976_v39 }
 0x228   : > { %4136 = vmatpush.bf16.msrb.mxu2 %v3480_v58  ;;  %v2704_v18 = vcvt.s32.f32 %v1680_v31  ;;  %v2712_v17 = vcvt.s32.f32 %v1688_v24  ;;  %v1936_v21 = vunpack.c.0.s8 %v1008_v49  ;;  %v1944_v16 = vunpack.c.1.s8 %v1008_v49  ;;  %v3907_v58 = vpop.f32.mrf.mxu0 }
 0x229   : > { %4149 = vmatpush.bf16.msrb.mxu3 %v3544_v38  ;;  %v3344_v27 = vpack.c.bf16 %v2584_v20, %v2576_v37  ;;  %v2832_v25 = vcvt.s32.f32 %v1808_v15  ;;  %v2840_v32 = vcvt.s32.f32 %v1816_v29  ;;  %v1153_v33 = vunpack.c.2.s8 %v9123_v14  ;;  %v801_v38 = vld [vmem:[%s8800_s10 + $0xa8] sm:$0xff] }
 0x22a   : > { %v3408_v42 = vpack.c.bf16 %v2712_v17, %v2704_v18  ;;  %v2960_v46 = vcvt.s32.f32 %v1936_v21  ;;  %v2968_v59 = vcvt.s32.f32 %v1944_v16  ;;  %v1161_v39 = vunpack.c.3.s8 %v9123_v14  ;;  %v793_v58 = vld [vmem:[%s8800_s10 + $0x68] sm:$0xff] }
 0x22b   : > { %4111 = vmatpush.bf16.msrb.mxu0 %v3344_v27  ;;  %v3472_v9 = vpack.c.bf16 %v2840_v32, %v2832_v25  ;;  %v2177_v41 = vcvt.s32.f32 %v1153_v33  ;;  %v1281_v48 = vunpack.c.2.s8 %v841_v22  ;;  %v1289_v49 = vunpack.c.3.s8 %v841_v22  ;;  %v865_v27 = vld [vmem:[%s8800_s10 + $0x2a8] sm:$0xff] }
 0x22c   : > { %4124 = vmatpush.bf16.msrb.mxu1 %v3408_v42  ;;  %v3536_v10 = vpack.c.bf16 %v2968_v59, %v2960_v46  ;;  %v2185_v8 = vcvt.s32.f32 %v1161_v39  ;;  %v1409_v50 = vunpack.c.2.s8 %v873_v35  ;;  %v1417_v51 = vunpack.c.3.s8 %v873_v35  ;;  %v897_v42 = vld [vmem:[%s8800_s10 + $0x3a8] sm:$0xff] }
 0x22d   : > { %4137 = vmatpush.bf16.msrb.mxu2 %v3472_v9  ;;  %v2305_v52 = vcvt.s32.f32 %v1281_v48  ;;  %v2313_v56 = vcvt.s32.f32 %v1289_v49  ;;  %v1537_v53 = vunpack.c.2.s8 %v905_v45  ;;  %v1545_v54 = vunpack.c.3.s8 %v905_v45  ;;  %v3946_v48 = vpop.f32.mrf.mxu3 }
 0x22e   : > { %4150 = vmatpush.bf16.msrb.mxu3 %v3536_v10  ;;  %v3145_v61 = vpack.c.bf16 %v2185_v8, %v2177_v41  ;;  %v2433_v63 = vcvt.s32.f32 %v1409_v50  ;;  %v2441_v1 = vcvt.s32.f32 %v1417_v51  ;;  %v3867_v2 = vadd.f32 %v9109_v30, %v9107_v57  ;;  %4112 = vmatmul.bf16.vlgmr.msrb.gmra.mxu0 %v8890_v40  ;;  %v3920_v57 = vpop.f32.mrf.mxu1  ;;  %v3933_v41 = vpop.f32.mrf.mxu2 }
 0x22f   : > { %v3209_v3 = vpack.c.bf16 %v2313_v56, %v2305_v52  ;;  %v2561_v4 = vcvt.s32.f32 %v1537_v53  ;;  %v2569_v6 = vcvt.s32.f32 %v1545_v54  ;;  %v1137_v7 = vunpack.c.0.s8 %v9123_v14  ;;  %4125 = vmatmul.bf16.vlgmr.msrb.gmra.mxu1 %v8897_v62 }
 0x230   : > { %4156 = vmatpush.bf16.msra.mxu0 %v3145_v61  ;;  %v3273_v26 = vpack.c.bf16 %v2441_v1, %v2433_v63  ;;  %v1145_v47 = vunpack.c.1.s8 %v9123_v14  ;;  %v1265_v12 = vunpack.c.0.s8 %v841_v22  ;;  %v1273_v13 = vunpack.c.1.s8 %v841_v22  ;;  %4138 = vmatmul.bf16.vlgmr.msrb.gmra.mxu2 %v8887_v34  ;;  %v833_v22 = vld [vmem:[%s8800_s10 + $0x1a8] sm:$0xff] }
 0x231   : > { %4169 = vmatpush.bf16.msra.mxu1 %v3209_v3  ;;  %v3337_v30 = vpack.c.bf16 %v2569_v6, %v2561_v4  ;;  %v2161_v37 = vcvt.s32.f32 %v1137_v7  ;;  %v1393_v31 = vunpack.c.0.s8 %v873_v35  ;;  %v1401_v24 = vunpack.c.1.s8 %v873_v35  ;;  %4151 = vmatmul.bf16.vlgmr.msrb.gmra.mxu3 %v8892_v43 }
 0x232   : > { %4182 = vmatpush.bf16.msra.mxu2 %v3273_v26  ;;  %v2169_v20 = vcvt.s32.f32 %v1145_v47  ;;  %v2289_v14 = vcvt.s32.f32 %v1265_v12  ;;  %v2297_v15 = vcvt.s32.f32 %v1273_v13  ;;  %v1521_v29 = vunpack.c.0.s8 %v905_v45 }
 0x233   : > { %4195 = vmatpush.bf16.msra.mxu3 %v3337_v30  ;;  %v2417_v18 = vcvt.s32.f32 %v1393_v31  ;;  %v2425_v17 = vcvt.s32.f32 %v1401_v24  ;;  %v1529_v21 = vunpack.c.1.s8 %v905_v45  ;;  %v3880_v16 = vadd.f32 %v9114_v28, %v3867_v2  ;;  %v825_v24 = vld [vmem:[%s8800_s10 + $0x168] sm:$0xff] }
 0x234   : > { %v3137_v25 = vpack.c.bf16 %v2169_v20, %v2161_v37  ;;  %v3201_v32 = vpack.c.bf16 %v2297_v15, %v2289_v14  ;;  %v2545_v33 = vcvt.s32.f32 %v1521_v29  ;;  %v1121_v35 = vunpack.c.2.s8 %v801_v38 }
 0x235   : > { %v3265_v46 = vpack.c.bf16 %v2425_v17, %v2417_v18  ;;  %v2553_v59 = vcvt.s32.f32 %v1529_v21  ;;  %v9152_v39 = vadd.f32 %v9116_v44, %v3880_v16  ;;  %v1129_v9 = vunpack.c.3.s8 %v801_v38  ;;  %v857_v16 = vld [vmem:[%s8800_s10 + $0x268] sm:$0xff] }
 0x236   : > { %4157 = vmatpush.bf16.msra.mxu0 %v3137_v25  ;;  %4170 = vmatpush.bf16.msra.mxu1 %v3201_v32  ;;  %v2145_v45 = vcvt.s32.f32 %v1121_v35  ;;  %v1249_v49 = vunpack.c.2.s8 %v833_v22  ;;  %v1257_v28 = vunpack.c.3.s8 %v833_v22  ;;  %v1377_v10 = vunpack.c.2.s8 %v865_v27  ;;  %v889_v35 = vld [vmem:[%s8800_s10 + $0x368] sm:$0xff] }
 0x237   : > { %4183 = vmatpush.bf16.msra.mxu2 %v3265_v46  ;;  %v3329_v8 = vpack.c.bf16 %v2553_v59, %v2545_v33  ;;  %v2153_v50 = vcvt.s32.f32 %v1129_v9  ;;  %v1385_v51 = vunpack.c.3.s8 %v865_v27  ;;  %v1505_v52 = vunpack.c.2.s8 %v897_v42 }
 0x238   : > { %v2273_v56 = vcvt.s32.f32 %v1249_v49  ;;  %v2281_v53 = vcvt.s32.f32 %v1257_v28  ;;  %v2401_v54 = vcvt.s32.f32 %v1377_v10  ;;  %v1513_v44 = vunpack.c.3.s8 %v897_v42 }
 0x239   : > { %4196 = vmatpush.bf16.msra.mxu3 %v3329_v8  ;;  %v3129_v61 = vpack.c.bf16 %v2153_v50, %v2145_v45  ;;  %v2409_v63 = vcvt.s32.f32 %v1385_v51  ;;  %v2529_v1 = vcvt.s32.f32 %v1505_v52  ;;  %v1105_v2 = vunpack.c.0.s8 %v801_v38 }
 0x23a   : > { %v3193_v3 = vpack.c.bf16 %v2281_v53, %v2273_v56  ;;  %v2537_v4 = vcvt.s32.f32 %v1513_v44  ;;  %v1113_v6 = vunpack.c.1.s8 %v801_v38  ;;  %v1233_v7 = vunpack.c.0.s8 %v833_v22 }
 0x23b   : > { %4158 = vmatpush.bf16.msra.mxu0 %v3129_v61  ;;  %v3257_v26 = vpack.c.bf16 %v2409_v63, %v2401_v54  ;;  %v2129_v47 = vcvt.s32.f32 %v1105_v2  ;;  %v1241_v12 = vunpack.c.1.s8 %v833_v22  ;;  %v1361_v13 = vunpack.c.0.s8 %v865_v27 }
 0x23c   : > { %4171 = vmatpush.bf16.msra.mxu1 %v3193_v3  ;;  %v3321_v57 = vpack.c.bf16 %v2537_v4, %v2529_v1  ;;  %v2137_v30 = vcvt.s32.f32 %v1113_v6  ;;  %v2257_v37 = vcvt.s32.f32 %v1233_v7  ;;  %v1369_v31 = vunpack.c.1.s8 %v865_v27 }
 0x23d   : > { %4184 = vmatpush.bf16.msra.mxu2 %v3257_v26  ;;  %v2265_v20 = vcvt.s32.f32 %v1241_v12  ;;  %v2385_v14 = vcvt.s32.f32 %v1361_v13  ;;  %v1489_v15 = vunpack.c.0.s8 %v897_v42  ;;  %v1497_v38 = vunpack.c.1.s8 %v897_v42 }
 0x23e   : > { %4197 = vmatpush.bf16.msra.mxu3 %v3321_v57  ;;  %v3121_v29 = vpack.c.bf16 %v2137_v30, %v2129_v47  ;;  %v2393_v18 = vcvt.s32.f32 %v1369_v31  ;;  %v1089_v17 = vunpack.c.2.s8 %v793_v58  ;;  %v1097_v21 = vunpack.c.3.s8 %v793_v58  ;;  %v785_v47 = vld [vmem:[%s8800_s10 + $0x28] sm:$0xff] }
 0x23f   : > { %v3185_v22 = vpack.c.bf16 %v2265_v20, %v2257_v37  ;;  %v2513_v25 = vcvt.s32.f32 %v1489_v15  ;;  %v2521_v32 = vcvt.s32.f32 %v1497_v38  ;;  %v1217_v33 = vunpack.c.2.s8 %v825_v24  ;;  %v817_v57 = vld [vmem:[%s8800_s10 + $0x128] sm:$0xff] }
 0x240   : > { %4159 = vmatpush.bf16.msra.mxu0 %v3121_v29  ;;  %v3249_v27 = vpack.c.bf16 %v2393_v18, %v2385_v14  ;;  %v2113_v46 = vcvt.s32.f32 %v1089_v17  ;;  %v2121_v59 = vcvt.s32.f32 %v1097_v21  ;;  %v1225_v9 = vunpack.c.3.s8 %v825_v24  ;;  %v849_v38 = vld [vmem:[%s8800_s10 + $0x228] sm:$0xff] }
 0x241   : > { %4172 = vmatpush.bf16.msra.mxu1 %v3185_v22  ;;  %v3313_v41 = vpack.c.bf16 %v2521_v32, %v2513_v25  ;;  %v2241_v48 = vcvt.s32.f32 %v1217_v33  ;;  %v1345_v42 = vunpack.c.2.s8 %v857_v16  ;;  %v1353_v45 = vunpack.c.3.s8 %v857_v16 }
 0x242   : > { %4185 = vmatpush.bf16.msra.mxu2 %v3249_v27  ;;  %v3113_v49 = vpack.c.bf16 %v2121_v59, %v2113_v46  ;;  %v2249_v28 = vcvt.s32.f32 %v1225_v9  ;;  %v1473_v10 = vunpack.c.2.s8 %v889_v35  ;;  %v1481_v8 = vunpack.c.3.s8 %v889_v35 }
 0x243   : > { %4198 = vmatpush.bf16.msra.mxu3 %v3313_v41  ;;  %v2369_v50 = vcvt.s32.f32 %v1345_v42  ;;  %v2377_v51 = vcvt.s32.f32 %v1353_v45  ;;  %v3906_v52 = vadd.f32 %v9126_v23, %v9152_v39  ;;  %v1073_v56 = vunpack.c.0.s8 %v793_v58 }
 0x244   : > { %4160 = vmatpush.bf16.msra.mxu0 %v3113_v49  ;;  %v3177_v53 = vpack.c.bf16 %v2249_v28, %v2241_v48  ;;  %v2497_v54 = vcvt.s32.f32 %v1473_v10  ;;  %v2505_v44 = vcvt.s32.f32 %v1481_v8  ;;  %v1081_v61 = vunpack.c.1.s8 %v793_v58 }
 0x245   : > { %v3241_v63 = vpack.c.bf16 %v2377_v51, %v2369_v50  ;;  %v3919_v1 = vadd.f32 %v9128_v19, %v3906_v52  ;;  %v2097_v2 = vcvt.s32.f32 %v1073_v56  ;;  %v1201_v3 = vunpack.c.0.s8 %v825_v24 }
 0x246   : > { %4173 = vmatpush.bf16.msra.mxu1 %v3177_v53  ;;  %v3305_v4 = vpack.c.bf16 %v2505_v44, %v2497_v54  ;;  %v2105_v6 = vcvt.s32.f32 %v1081_v61  ;;  %v1209_v7 = vunpack.c.1.s8 %v825_v24  ;;  %v1329_v26 = vunpack.c.0.s8 %v857_v16  ;;  %v3598_v24 = vld [vmem:[#allocation2 + $0x18] sm:$0xff]  ;;  %v937_v54 = vld [vmem:[%s8800_s10 + $0x4e8] sm:$0xff] }
 0x247   : > { %4186 = vmatpush.bf16.msra.mxu2 %v3241_v63  ;;  %v2225_v23 = vcvt.s32.f32 %v1201_v3  ;;  %v1337_v39 = vunpack.c.1.s8 %v857_v16  ;;  %v1457_v12 = vunpack.c.0.s8 %v889_v35  ;;  %v1465_v13 = vunpack.c.1.s8 %v889_v35  ;;  %v881_v16 = vld [vmem:[%s8800_s10 + $0x328] sm:$0xff] }
 0x248   : > { %4199 = vmatpush.bf16.msra.mxu3 %v3305_v4  ;;  %v3105_v58 = vpack.c.bf16 %v2105_v6, %v2097_v2  ;;  %v2233_v30 = vcvt.s32.f32 %v1209_v7  ;;  %v2353_v19 = vcvt.s32.f32 %v1329_v26  ;;  %v3932_v37 = vadd.f32 %v9134_v55, %v3919_v1  ;;  %v969_v2 = vld [vmem:[%s8800_s10 + $0x5e8] sm:$0xff] }
 0x249   : > { %v2361_v31 = vcvt.s32.f32 %v1337_v39  ;;  %v2481_v20 = vcvt.s32.f32 %v1457_v12  ;;  %v2489_v14 = vcvt.s32.f32 %v1465_v13  ;;  %v1057_v15 = vunpack.c.2.s8 %v785_v47  ;;  %v1001_v12 = vld [vmem:[%s8800_s10 + $0x6e8] sm:$0xff] }
 0x24a   : > { %4161 = vmatpush.bf16.msra.mxu0 %v3105_v58  ;;  %v3169_v29 = vpack.c.bf16 %v2233_v30, %v2225_v23  ;;  %v3945_v18 = vadd.f32 %v9136_v11, %v3932_v37  ;;  %v1065_v17 = vunpack.c.3.s8 %v785_v47  ;;  %v1185_v21 = vunpack.c.2.s8 %v817_v57 }
 0x24b   : > { %v3233_v22 = vpack.c.bf16 %v2361_v31, %v2353_v19  ;;  %v3297_v25 = vpack.c.bf16 %v2489_v14, %v2481_v20  ;;  %v2081_v32 = vcvt.s32.f32 %v1057_v15  ;;  %v1193_v33 = vunpack.c.3.s8 %v817_v57  ;;  %v1033_v19 = vld [vmem:[%s8800_s10 + $0x7e8] sm:$0xff] }
 0x24c   : > { %4174 = vmatpush.bf16.msra.mxu1 %v3169_v29  ;;  %v4470_v35 = vadd.f32 %v3945_v18, %v3598_v24  ;;  %v2089_v55 = vcvt.s32.f32 %v1065_v17  ;;  %v2209_v27 = vcvt.s32.f32 %v1185_v21  ;;  %v1313_v46 = vunpack.c.2.s8 %v849_v38 }
 0x24d   : > { %4187 = vmatpush.bf16.msra.mxu2 %v3233_v22  ;;  %4200 = vmatpush.bf16.msra.mxu3 %v3297_v25  ;;  %v2217_v59 = vcvt.s32.f32 %v1193_v33  ;;  %v1321_v9 = vunpack.c.3.s8 %v849_v38  ;;  %v1441_v41 = vunpack.c.2.s8 %v881_v16  ;;  %v1449_v48 = vunpack.c.3.s8 %v881_v16 }
 0x24e   : > { %4478 = vst [vmem:[#allocation2 + $0x18] sm:$0xff] %v4470_v35  ;;  %v3097_v11 = vpack.c.bf16 %v2089_v55, %v2081_v32  ;;  %v2337_v42 = vcvt.s32.f32 %v1313_v46  ;;  %v1041_v45 = vunpack.c.0.s8 %v785_v47  ;;  %v1049_v49 = vunpack.c.1.s8 %v785_v47 }
 0x24f   : > { %v3161_v28 = vpack.c.bf16 %v2217_v59, %v2209_v27  ;;  %v2345_v10 = vcvt.s32.f32 %v1321_v9  ;;  %v2465_v8 = vcvt.s32.f32 %v1441_v41  ;;  %v2473_v50 = vcvt.s32.f32 %v1449_v48 }
 0x250   : > { %4162 = vmatpush.bf16.msra.mxu0 %v3097_v11  ;;  %v2065_v51 = vcvt.s32.f32 %v1041_v45  ;;  %v2073_v52 = vcvt.s32.f32 %v1049_v49  ;;  %v1169_v56 = vunpack.c.0.s8 %v817_v57  ;;  %v1177_v53 = vunpack.c.1.s8 %v817_v57  ;;  %v929_v11 = vld [vmem:[%s8800_s10 + $0x4a8] sm:$0xff] }
 0x251   : > { %4175 = vmatpush.bf16.msra.mxu1 %v3161_v28  ;;  %v3225_v44 = vpack.c.bf16 %v2345_v10, %v2337_v42  ;;  %v3289_v61 = vpack.c.bf16 %v2473_v50, %v2465_v8  ;;  %v1297_v63 = vunpack.c.0.s8 %v849_v38  ;;  %v1305_v1 = vunpack.c.1.s8 %v849_v38 }
 0x252   : > { %v3089_v3 = vpack.c.bf16 %v2073_v52, %v2065_v51  ;;  %v2193_v4 = vcvt.s32.f32 %v1169_v56  ;;  %v2201_v6 = vcvt.s32.f32 %v1177_v53  ;;  %v1425_v7 = vunpack.c.0.s8 %v881_v16  ;;  %v961_v52 = vld [vmem:[%s8800_s10 + $0x5a8] sm:$0xff] }
 0x253   : > { %4188 = vmatpush.bf16.msra.mxu2 %v3225_v44  ;;  %4201 = vmatpush.bf16.msra.mxu3 %v3289_v61  ;;  %v2321_v26 = vcvt.s32.f32 %v1297_v63  ;;  %v2329_v47 = vcvt.s32.f32 %v1305_v1  ;;  %v1433_v23 = vunpack.c.1.s8 %v881_v16  ;;  %v1665_v39 = vunpack.c.2.s8 %v937_v54  ;;  %v993_v61 = vld [vmem:[%s8800_s10 + $0x6a8] sm:$0xff] }
 0x254   : > { %4163 = vmatpush.bf16.msra.mxu0 %v3089_v3  ;;  %v3153_v13 = vpack.c.bf16 %v2201_v6, %v2193_v4  ;;  %v2449_v57 = vcvt.s32.f32 %v1425_v7  ;;  %v1673_v58 = vunpack.c.3.s8 %v937_v54  ;;  %v1793_v30 = vunpack.c.2.s8 %v969_v2  ;;  %v1025_v4 = vld [vmem:[%s8800_s10 + $0x7a8] sm:$0xff] }
 0x255   : > { %v3217_v37 = vpack.c.bf16 %v2329_v47, %v2321_v26  ;;  %v2457_v31 = vcvt.s32.f32 %v1433_v23  ;;  %v2689_v20 = vcvt.s32.f32 %v1665_v39  ;;  %v1801_v14 = vunpack.c.3.s8 %v969_v2 }
 0x256   : > { %4176 = vmatpush.bf16.msra.mxu1 %v3153_v13  ;;  %v2697_v24 = vcvt.s32.f32 %v1673_v58  ;;  %v2817_v15 = vcvt.s32.f32 %v1793_v30  ;;  %v1921_v38 = vunpack.c.2.s8 %v1001_v12  ;;  %v1929_v29 = vunpack.c.3.s8 %v1001_v12 }
 0x257   : > { %4189 = vmatpush.bf16.msra.mxu2 %v3217_v37  ;;  %v3281_v18 = vpack.c.bf16 %v2457_v31, %v2449_v57  ;;  %v2825_v17 = vcvt.s32.f32 %v1801_v14  ;;  %v2049_v21 = vunpack.c.2.s8 %v1033_v19  ;;  %v2057_v16 = vunpack.c.3.s8 %v1033_v19  ;;  %4164 = vmatmul.bf16.vlgmr.msra.gmra.mxu0 %v8867_v60 }
 0x258   : > { %v3401_v22 = vpack.c.bf16 %v2697_v24, %v2689_v20  ;;  %v2945_v25 = vcvt.s32.f32 %v1921_v38  ;;  %v2953_v32 = vcvt.s32.f32 %v1929_v29  ;;  %v1649_v33 = vunpack.c.0.s8 %v937_v54 }
 0x259   : > { %4202 = vmatpush.bf16.msra.mxu3 %v3281_v18  ;;  %v3465_v35 = vpack.c.bf16 %v2825_v17, %v2817_v15  ;;  %v3073_v55 = vcvt.s32.f32 %v2049_v21  ;;  %v3081_v27 = vcvt.s32.f32 %v2057_v16  ;;  %v1657_v46 = vunpack.c.1.s8 %v937_v54  ;;  %4177 = vmatmul.bf16.vlgmr.msra.gmra.mxu1 %v8874_v5 }
 0x25a   : > { %4208 = vmatpush.bf16.msrb.mxu0 %v3401_v22  ;;  %v3529_v59 = vpack.c.bf16 %v2953_v32, %v2945_v25  ;;  %v2673_v9 = vcvt.s32.f32 %v1649_v33  ;;  %v1777_v41 = vunpack.c.0.s8 %v969_v2  ;;  %v1785_v48 = vunpack.c.1.s8 %v969_v2  ;;  %4190 = vmatmul.bf16.vlgmr.msra.gmra.mxu2 %v8861_v36  ;;  %v921_v22 = vld [vmem:[%s8800_s10 + $0x468] sm:$0xff] }
 0x25b   : > { %4221 = vmatpush.bf16.msrb.mxu1 %v3465_v35  ;;  %v3593_v42 = vpack.c.bf16 %v3081_v27, %v3073_v55  ;;  %v2681_v45 = vcvt.s32.f32 %v1657_v46  ;;  %v1905_v49 = vunpack.c.0.s8 %v1001_v12  ;;  %v1913_v28 = vunpack.c.1.s8 %v1001_v12  ;;  %v9180_v55 = vpop.f32.mrf.mxu0  ;;  %v9182_v27 = vpop.f32.mrf.mxu1 }
 0x25c   : > { %4234 = vmatpush.bf16.msrb.mxu2 %v3529_v59  ;;  %v2801_v10 = vcvt.s32.f32 %v1777_v41  ;;  %v2809_v8 = vcvt.s32.f32 %v1785_v48  ;;  %v2033_v50 = vunpack.c.0.s8 %v1033_v19  ;;  %v2041_v51 = vunpack.c.1.s8 %v1033_v19  ;;  %4203 = vmatmul.bf16.vlgmr.msra.gmra.mxu3 %v8870_v0  ;;  %v953_v48 = vld [vmem:[%s8800_s10 + $0x568] sm:$0xff] }
 0x25d   : > { %4247 = vmatpush.bf16.msrb.mxu3 %v3593_v42  ;;  %v3393_v56 = vpack.c.bf16 %v2681_v45, %v2673_v9  ;;  %v2929_v53 = vcvt.s32.f32 %v1905_v49  ;;  %v2937_v54 = vcvt.s32.f32 %v1913_v28  ;;  %v1633_v44 = vunpack.c.2.s8 %v929_v11  ;;  %v985_v28 = vld [vmem:[%s8800_s10 + $0x668] sm:$0xff] }
 0x25e   : > { %v3457_v63 = vpack.c.bf16 %v2809_v8, %v2801_v10  ;;  %v3057_v1 = vcvt.s32.f32 %v2033_v50  ;;  %v3065_v2 = vcvt.s32.f32 %v2041_v51  ;;  %v1641_v3 = vunpack.c.3.s8 %v929_v11 }
 0x25f   : > { %4209 = vmatpush.bf16.msrb.mxu0 %v3393_v56  ;;  %v3521_v6 = vpack.c.bf16 %v2937_v54, %v2929_v53  ;;  %v2657_v7 = vcvt.s32.f32 %v1633_v44  ;;  %v1761_v26 = vunpack.c.2.s8 %v961_v52  ;;  %v1769_v47 = vunpack.c.3.s8 %v961_v52 }
 0x260   : > { %4222 = vmatpush.bf16.msrb.mxu1 %v3457_v63  ;;  %v3585_v23 = vpack.c.bf16 %v3065_v2, %v3057_v1  ;;  %v2665_v39 = vcvt.s32.f32 %v1641_v3  ;;  %v1889_v12 = vunpack.c.2.s8 %v993_v61  ;;  %v1897_v13 = vunpack.c.3.s8 %v993_v61 }
 0x261   : > { %4235 = vmatpush.bf16.msrb.mxu2 %v3521_v6  ;;  %v2785_v57 = vcvt.s32.f32 %v1761_v26  ;;  %v2793_v58 = vcvt.s32.f32 %v1769_v47  ;;  %v2017_v30 = vunpack.c.2.s8 %v1025_v4  ;;  %v2025_v19 = vunpack.c.3.s8 %v1025_v4  ;;  %v9187_v26 = vpop.f32.mrf.mxu2  ;;  %v9189_v47 = vpop.f32.mrf.mxu3 }
 0x262   : > { %4248 = vmatpush.bf16.msrb.mxu3 %v3585_v23  ;;  %v3385_v37 = vpack.c.bf16 %v2665_v39, %v2657_v7  ;;  %v2913_v31 = vcvt.s32.f32 %v1889_v12  ;;  %v2921_v20 = vcvt.s32.f32 %v1897_v13  ;;  %v1617_v14 = vunpack.c.0.s8 %v929_v11 }
 0x263   : > { %v3449_v24 = vpack.c.bf16 %v2793_v58, %v2785_v57  ;;  %v3041_v15 = vcvt.s32.f32 %v2017_v30  ;;  %v3049_v38 = vcvt.s32.f32 %v2025_v19  ;;  %v1625_v29 = vunpack.c.1.s8 %v929_v11 }
 0x264   : > { %4210 = vmatpush.bf16.msrb.mxu0 %v3385_v37  ;;  %v3513_v18 = vpack.c.bf16 %v2921_v20, %v2913_v31  ;;  %v2641_v17 = vcvt.s32.f32 %v1617_v14  ;;  %v1745_v21 = vunpack.c.0.s8 %v961_v52  ;;  %v1753_v16 = vunpack.c.1.s8 %v961_v52  ;;  %v1017_v52 = vld [vmem:[%s8800_s10 + $0x768] sm:$0xff]  ;;  %v3959_v37 = vpop.f32.mrf.mxu0  ;;  %v3972_v31 = vpop.f32.mrf.mxu1 }
 0x265   : > { %4223 = vmatpush.bf16.msrb.mxu1 %v3449_v24  ;;  %v3577_v25 = vpack.c.bf16 %v3049_v38, %v3041_v15  ;;  %v2649_v32 = vcvt.s32.f32 %v1625_v29  ;;  %v1873_v33 = vunpack.c.0.s8 %v993_v61  ;;  %v1881_v35 = vunpack.c.1.s8 %v993_v61  ;;  %v913_v38 = vld [vmem:[%s8800_s10 + $0x428] sm:$0xff]  ;;  %v9196_v37 = vld [vmem:[%s8800_s10 + $0xf0] sm:$0xff] }
 0x266   : > { %4236 = vmatpush.bf16.msrb.mxu2 %v3513_v18  ;;  %v2769_v46 = vcvt.s32.f32 %v1745_v21  ;;  %v2777_v59 = vcvt.s32.f32 %v1753_v16  ;;  %v2001_v9 = vunpack.c.0.s8 %v1025_v4  ;;  %v2009_v41 = vunpack.c.1.s8 %v1025_v4 }
 0x267   : > { %4249 = vmatpush.bf16.msrb.mxu3 %v3577_v25  ;;  %v3377_v11 = vpack.c.bf16 %v2649_v32, %v2641_v17  ;;  %v2897_v42 = vcvt.s32.f32 %v1873_v33  ;;  %v2905_v45 = vcvt.s32.f32 %v1881_v35  ;;  %v1601_v49 = vunpack.c.2.s8 %v921_v22  ;;  %v945_v33 = vld [vmem:[%s8800_s10 + $0x528] sm:$0xff] }
 0x268   : > { %v3441_v10 = vpack.c.bf16 %v2777_v59, %v2769_v46  ;;  %v3025_v8 = vcvt.s32.f32 %v2001_v9  ;;  %v3033_v50 = vcvt.s32.f32 %v2009_v41  ;;  %v1609_v51 = vunpack.c.3.s8 %v921_v22  ;;  %v977_v41 = vld [vmem:[%s8800_s10 + $0x628] sm:$0xff] }
 0x269   : > { %4211 = vmatpush.bf16.msrb.mxu0 %v3377_v11  ;;  %v3505_v56 = vpack.c.bf16 %v2905_v45, %v2897_v42  ;;  %v2625_v53 = vcvt.s32.f32 %v1601_v49  ;;  %v1729_v54 = vunpack.c.2.s8 %v953_v48  ;;  %v1737_v44 = vunpack.c.3.s8 %v953_v48  ;;  %v1009_v49 = vld [vmem:[%s8800_s10 + $0x728] sm:$0xff] }
 0x26a   : > { %4224 = vmatpush.bf16.msrb.mxu1 %v3441_v10  ;;  %v3569_v61 = vpack.c.bf16 %v3033_v50, %v3025_v8  ;;  %v2633_v63 = vcvt.s32.f32 %v1609_v51  ;;  %v1857_v1 = vunpack.c.2.s8 %v985_v28  ;;  %v1865_v2 = vunpack.c.3.s8 %v985_v28  ;;  %v3985_v51 = vpop.f32.mrf.mxu2 }
 0x26b   : > { %4237 = vmatpush.bf16.msrb.mxu2 %v3505_v56  ;;  %v2753_v3 = vcvt.s32.f32 %v1729_v54  ;;  %v2761_v4 = vcvt.s32.f32 %v1737_v44  ;;  %v1985_v6 = vunpack.c.2.s8 %v1017_v52  ;;  %v1993_v7 = vunpack.c.3.s8 %v1017_v52  ;;  %v3998_v56 = vpop.f32.mrf.mxu3 }
 0x26c   : > { %4250 = vmatpush.bf16.msrb.mxu3 %v3569_v61  ;;  %v3369_v23 = vpack.c.bf16 %v2633_v63, %v2625_v53  ;;  %v2881_v39 = vcvt.s32.f32 %v1857_v1  ;;  %v2889_v12 = vcvt.s32.f32 %v1865_v2  ;;  %v1585_v13 = vunpack.c.0.s8 %v921_v22 }
 0x26d   : > { %v3433_v57 = vpack.c.bf16 %v2761_v4, %v2753_v3  ;;  %v3009_v58 = vcvt.s32.f32 %v1985_v6  ;;  %v3017_v30 = vcvt.s32.f32 %v1993_v7  ;;  %v1593_v19 = vunpack.c.1.s8 %v921_v22 }
 0x26e   : > { %4212 = vmatpush.bf16.msrb.mxu0 %v3369_v23  ;;  %v3497_v20 = vpack.c.bf16 %v2889_v12, %v2881_v39  ;;  %v2609_v14 = vcvt.s32.f32 %v1585_v13  ;;  %v1713_v24 = vunpack.c.0.s8 %v953_v48  ;;  %v1721_v15 = vunpack.c.1.s8 %v953_v48 }
 0x26f   : > { %4225 = vmatpush.bf16.msrb.mxu1 %v3433_v57  ;;  %v3561_v29 = vpack.c.bf16 %v3017_v30, %v3009_v58  ;;  %v2617_v18 = vcvt.s32.f32 %v1593_v19  ;;  %v1841_v17 = vunpack.c.0.s8 %v985_v28  ;;  %v1849_v21 = vunpack.c.1.s8 %v985_v28 }
 0x270   : > { %4238 = vmatpush.bf16.msrb.mxu2 %v3497_v20  ;;  %v2737_v16 = vcvt.s32.f32 %v1713_v24  ;;  %v2745_v25 = vcvt.s32.f32 %v1721_v15  ;;  %v1969_v22 = vunpack.c.0.s8 %v1017_v52  ;;  %v1977_v32 = vunpack.c.1.s8 %v1017_v52 }
 0x271   : > { %4251 = vmatpush.bf16.msrb.mxu3 %v3561_v29  ;;  %v3361_v35 = vpack.c.bf16 %v2617_v18, %v2609_v14  ;;  %v2865_v46 = vcvt.s32.f32 %v1841_v17  ;;  %v2873_v59 = vcvt.s32.f32 %v1849_v21  ;;  %v1569_v9 = vunpack.c.2.s8 %v913_v38  ;;  %v842_v17 = vld [vmem:[%s8800_s10 + $0x1f0] sm:$0xff]  ;;  %v9199_v21 = vpop.f32.mrf.mxu0 }
 0x272   : > { %v3425_v48 = vpack.c.bf16 %v2745_v25, %v2737_v16  ;;  %v2993_v11 = vcvt.s32.f32 %v1969_v22  ;;  %v3001_v42 = vcvt.s32.f32 %v1977_v32  ;;  %v1577_v45 = vunpack.c.3.s8 %v913_v38  ;;  %v9201_v16 = vpop.f32.mrf.mxu1 }
 0x273   : > { %4213 = vmatpush.bf16.msrb.mxu0 %v3361_v35  ;;  %v3489_v28 = vpack.c.bf16 %v2873_v59, %v2865_v46  ;;  %v2593_v10 = vcvt.s32.f32 %v1569_v9  ;;  %v1697_v8 = vunpack.c.2.s8 %v945_v33  ;;  %v1705_v50 = vunpack.c.3.s8 %v945_v33  ;;  %v874_v35 = vld [vmem:[%s8800_s10 + $0x2f0] sm:$0xff] }
 0x274   : > { %4226 = vmatpush.bf16.msrb.mxu1 %v3425_v48  ;;  %v3553_v52 = vpack.c.bf16 %v3001_v42, %v2993_v11  ;;  %v2601_v53 = vcvt.s32.f32 %v1577_v45  ;;  %v1825_v54 = vunpack.c.2.s8 %v977_v41  ;;  %v1833_v44 = vunpack.c.3.s8 %v977_v41  ;;  %v906_v48 = vld [vmem:[%s8800_s10 + $0x3f0] sm:$0xff] }
 0x275   : > { %4239 = vmatpush.bf16.msrb.mxu2 %v3489_v28  ;;  %v2721_v61 = vcvt.s32.f32 %v1697_v8  ;;  %v2729_v63 = vcvt.s32.f32 %v1705_v50  ;;  %v1953_v1 = vunpack.c.2.s8 %v1009_v49  ;;  %v1961_v2 = vunpack.c.3.s8 %v1009_v49 }
 0x276   : > { %4252 = vmatpush.bf16.msrb.mxu3 %v3553_v52  ;;  %v3353_v3 = vpack.c.bf16 %v2601_v53, %v2593_v10  ;;  %v2849_v4 = vcvt.s32.f32 %v1825_v54  ;;  %v2857_v6 = vcvt.s32.f32 %v1833_v44  ;;  %v1553_v7 = vunpack.c.0.s8 %v913_v38  ;;  %v9207_v54 = vpop.f32.mrf.mxu2  ;;  %v9209_v44 = vpop.f32.mrf.mxu3 }
 0x277   : > { %v3417_v23 = vpack.c.bf16 %v2729_v63, %v2721_v61  ;;  %v2977_v39 = vcvt.s32.f32 %v1953_v1  ;;  %v2985_v12 = vcvt.s32.f32 %v1961_v2  ;;  %v1561_v13 = vunpack.c.1.s8 %v913_v38 }
 0x278   : > { %4214 = vmatpush.bf16.msrb.mxu0 %v3353_v3  ;;  %v3481_v57 = vpack.c.bf16 %v2857_v6, %v2849_v4  ;;  %v2577_v58 = vcvt.s32.f32 %v1553_v7  ;;  %v1681_v30 = vunpack.c.0.s8 %v945_v33  ;;  %v1689_v19 = vunpack.c.1.s8 %v945_v33 }
 0x279   : > { %4227 = vmatpush.bf16.msrb.mxu1 %v3417_v23  ;;  %v3545_v31 = vpack.c.bf16 %v2985_v12, %v2977_v39  ;;  %v2585_v20 = vcvt.s32.f32 %v1561_v13  ;;  %v1809_v14 = vunpack.c.0.s8 %v977_v41  ;;  %v1817_v24 = vunpack.c.1.s8 %v977_v41 }
 0x27a   : > { %4240 = vmatpush.bf16.msrb.mxu2 %v3481_v57  ;;  %v2705_v15 = vcvt.s32.f32 %v1681_v30  ;;  %v2713_v29 = vcvt.s32.f32 %v1689_v19  ;;  %v1937_v18 = vunpack.c.0.s8 %v1009_v49  ;;  %v1945_v38 = vunpack.c.1.s8 %v1009_v49  ;;  %v4011_v57 = vpop.f32.mrf.mxu0 }
 0x27b   : > { %4253 = vmatpush.bf16.msrb.mxu3 %v3545_v31  ;;  %v3345_v25 = vpack.c.bf16 %v2585_v20, %v2577_v58  ;;  %v2833_v22 = vcvt.s32.f32 %v1809_v14  ;;  %v2841_v32 = vcvt.s32.f32 %v1817_v24  ;;  %v1154_v33 = vunpack.c.2.s8 %v9196_v37  ;;  %v802_v31 = vld [vmem:[%s8800_s10 + $0xb0] sm:$0xff] }
 0x27c   : > { %v3409_v46 = vpack.c.bf16 %v2713_v29, %v2705_v15  ;;  %v2961_v59 = vcvt.s32.f32 %v1937_v18  ;;  %v2969_v9 = vcvt.s32.f32 %v1945_v38  ;;  %v1162_v41 = vunpack.c.3.s8 %v9196_v37  ;;  %v794_v57 = vld [vmem:[%s8800_s10 + $0x70] sm:$0xff] }
 0x27d   : > { %4215 = vmatpush.bf16.msrb.mxu0 %v3345_v25  ;;  %v3473_v11 = vpack.c.bf16 %v2841_v32, %v2833_v22  ;;  %v2178_v42 = vcvt.s32.f32 %v1154_v33  ;;  %v1282_v45 = vunpack.c.2.s8 %v842_v17  ;;  %v1290_v49 = vunpack.c.3.s8 %v842_v17  ;;  %v866_v25 = vld [vmem:[%s8800_s10 + $0x2b0] sm:$0xff] }
 0x27e   : > { %4228 = vmatpush.bf16.msrb.mxu1 %v3409_v46  ;;  %v3537_v28 = vpack.c.bf16 %v2969_v9, %v2961_v59  ;;  %v2186_v10 = vcvt.s32.f32 %v1162_v41  ;;  %v1410_v8 = vunpack.c.2.s8 %v874_v35  ;;  %v1418_v50 = vunpack.c.3.s8 %v874_v35  ;;  %v898_v46 = vld [vmem:[%s8800_s10 + $0x3b0] sm:$0xff] }
 0x27f   : > { %4241 = vmatpush.bf16.msrb.mxu2 %v3473_v11  ;;  %v2306_v51 = vcvt.s32.f32 %v1282_v45  ;;  %v2314_v56 = vcvt.s32.f32 %v1290_v49  ;;  %v1538_v52 = vunpack.c.2.s8 %v906_v48  ;;  %v1546_v53 = vunpack.c.3.s8 %v906_v48  ;;  %v4050_v45 = vpop.f32.mrf.mxu3 }
 0x280   : > { %4254 = vmatpush.bf16.msrb.mxu3 %v3537_v28  ;;  %v3146_v61 = vpack.c.bf16 %v2186_v10, %v2178_v42  ;;  %v2434_v63 = vcvt.s32.f32 %v1410_v8  ;;  %v2442_v1 = vcvt.s32.f32 %v1418_v50  ;;  %v3971_v2 = vadd.f32 %v9182_v27, %v9180_v55  ;;  %4216 = vmatmul.bf16.vlgmr.msrb.gmra.mxu0 %v8890_v40  ;;  %v4024_v55 = vpop.f32.mrf.mxu1  ;;  %v4037_v42 = vpop.f32.mrf.mxu2 }
 0x281   : > { %v3210_v3 = vpack.c.bf16 %v2314_v56, %v2306_v51  ;;  %v2562_v4 = vcvt.s32.f32 %v1538_v52  ;;  %v2570_v6 = vcvt.s32.f32 %v1546_v53  ;;  %v1138_v7 = vunpack.c.0.s8 %v9196_v37  ;;  %4229 = vmatmul.bf16.vlgmr.msrb.gmra.mxu1 %v8897_v62 }
 0x282   : > { %4260 = vmatpush.bf16.msra.mxu0 %v3146_v61  ;;  %v3274_v23 = vpack.c.bf16 %v2442_v1, %v2434_v63  ;;  %v1146_v39 = vunpack.c.1.s8 %v9196_v37  ;;  %v1266_v12 = vunpack.c.0.s8 %v842_v17  ;;  %v1274_v13 = vunpack.c.1.s8 %v842_v17  ;;  %4242 = vmatmul.bf16.vlgmr.msrb.gmra.mxu2 %v8887_v34  ;;  %v834_v17 = vld [vmem:[%s8800_s10 + $0x1b0] sm:$0xff] }
 0x283   : > { %4273 = vmatpush.bf16.msra.mxu1 %v3210_v3  ;;  %v3338_v27 = vpack.c.bf16 %v2570_v6, %v2562_v4  ;;  %v2162_v58 = vcvt.s32.f32 %v1138_v7  ;;  %v1394_v30 = vunpack.c.0.s8 %v874_v35  ;;  %v1402_v19 = vunpack.c.1.s8 %v874_v35  ;;  %4255 = vmatmul.bf16.vlgmr.msrb.gmra.mxu3 %v8892_v43 }
 0x284   : > { %4286 = vmatpush.bf16.msra.mxu2 %v3274_v23  ;;  %v2170_v20 = vcvt.s32.f32 %v1146_v39  ;;  %v2290_v37 = vcvt.s32.f32 %v1266_v12  ;;  %v2298_v14 = vcvt.s32.f32 %v1274_v13  ;;  %v1522_v24 = vunpack.c.0.s8 %v906_v48 }
 0x285   : > { %4299 = vmatpush.bf16.msra.mxu3 %v3338_v27  ;;  %v2418_v15 = vcvt.s32.f32 %v1394_v30  ;;  %v2426_v29 = vcvt.s32.f32 %v1402_v19  ;;  %v1530_v18 = vunpack.c.1.s8 %v906_v48  ;;  %v3984_v38 = vadd.f32 %v9187_v26, %v3971_v2  ;;  %v826_v19 = vld [vmem:[%s8800_s10 + $0x170] sm:$0xff] }
 0x286   : > { %v3138_v22 = vpack.c.bf16 %v2170_v20, %v2162_v58  ;;  %v3202_v32 = vpack.c.bf16 %v2298_v14, %v2290_v37  ;;  %v2546_v33 = vcvt.s32.f32 %v1522_v24  ;;  %v1122_v35 = vunpack.c.2.s8 %v802_v31 }
 0x287   : > { %v3266_v59 = vpack.c.bf16 %v2426_v29, %v2418_v15  ;;  %v2554_v9 = vcvt.s32.f32 %v1530_v18  ;;  %v9225_v41 = vadd.f32 %v9189_v47, %v3984_v38  ;;  %v1130_v11 = vunpack.c.3.s8 %v802_v31  ;;  %v858_v38 = vld [vmem:[%s8800_s10 + $0x270] sm:$0xff] }
 0x288   : > { %4261 = vmatpush.bf16.msra.mxu0 %v3138_v22  ;;  %4274 = vmatpush.bf16.msra.mxu1 %v3202_v32  ;;  %v2146_v48 = vcvt.s32.f32 %v1122_v35  ;;  %v1250_v49 = vunpack.c.2.s8 %v834_v17  ;;  %v1258_v26 = vunpack.c.3.s8 %v834_v17  ;;  %v1378_v28 = vunpack.c.2.s8 %v866_v25  ;;  %v890_v35 = vld [vmem:[%s8800_s10 + $0x370] sm:$0xff] }
 0x289   : > { %4287 = vmatpush.bf16.msra.mxu2 %v3266_v59  ;;  %v3330_v10 = vpack.c.bf16 %v2554_v9, %v2546_v33  ;;  %v2154_v8 = vcvt.s32.f32 %v1130_v11  ;;  %v1386_v50 = vunpack.c.3.s8 %v866_v25  ;;  %v1506_v51 = vunpack.c.2.s8 %v898_v46 }
 0x28a   : > { %v2274_v56 = vcvt.s32.f32 %v1250_v49  ;;  %v2282_v52 = vcvt.s32.f32 %v1258_v26  ;;  %v2402_v53 = vcvt.s32.f32 %v1378_v28  ;;  %v1514_v47 = vunpack.c.3.s8 %v898_v46 }
 0x28b   : > { %4300 = vmatpush.bf16.msra.mxu3 %v3330_v10  ;;  %v3130_v61 = vpack.c.bf16 %v2154_v8, %v2146_v48  ;;  %v2410_v63 = vcvt.s32.f32 %v1386_v50  ;;  %v2530_v1 = vcvt.s32.f32 %v1506_v51  ;;  %v1106_v2 = vunpack.c.0.s8 %v802_v31 }
 0x28c   : > { %v3194_v3 = vpack.c.bf16 %v2282_v52, %v2274_v56  ;;  %v2538_v4 = vcvt.s32.f32 %v1514_v47  ;;  %v1114_v6 = vunpack.c.1.s8 %v802_v31  ;;  %v1234_v7 = vunpack.c.0.s8 %v834_v17 }
 0x28d   : > { %4262 = vmatpush.bf16.msra.mxu0 %v3130_v61  ;;  %v3258_v23 = vpack.c.bf16 %v2410_v63, %v2402_v53  ;;  %v2130_v39 = vcvt.s32.f32 %v1106_v2  ;;  %v1242_v12 = vunpack.c.1.s8 %v834_v17  ;;  %v1362_v13 = vunpack.c.0.s8 %v866_v25 }
 0x28e   : > { %4275 = vmatpush.bf16.msra.mxu1 %v3194_v3  ;;  %v3322_v55 = vpack.c.bf16 %v2538_v4, %v2530_v1  ;;  %v2138_v27 = vcvt.s32.f32 %v1114_v6  ;;  %v2258_v58 = vcvt.s32.f32 %v1234_v7  ;;  %v1370_v30 = vunpack.c.1.s8 %v866_v25 }
 0x28f   : > { %4288 = vmatpush.bf16.msra.mxu2 %v3258_v23  ;;  %v2266_v20 = vcvt.s32.f32 %v1242_v12  ;;  %v2386_v37 = vcvt.s32.f32 %v1362_v13  ;;  %v1490_v14 = vunpack.c.0.s8 %v898_v46  ;;  %v1498_v31 = vunpack.c.1.s8 %v898_v46 }
 0x290   : > { %4301 = vmatpush.bf16.msra.mxu3 %v3322_v55  ;;  %v3122_v24 = vpack.c.bf16 %v2138_v27, %v2130_v39  ;;  %v2394_v15 = vcvt.s32.f32 %v1370_v30  ;;  %v1090_v29 = vunpack.c.2.s8 %v794_v57  ;;  %v1098_v18 = vunpack.c.3.s8 %v794_v57  ;;  %v786_v39 = vld [vmem:[%s8800_s10 + $0x30] sm:$0xff] }
 0x291   : > { %v3186_v17 = vpack.c.bf16 %v2266_v20, %v2258_v58  ;;  %v2514_v22 = vcvt.s32.f32 %v1490_v14  ;;  %v2522_v32 = vcvt.s32.f32 %v1498_v31  ;;  %v1218_v33 = vunpack.c.2.s8 %v826_v19  ;;  %v818_v55 = vld [vmem:[%s8800_s10 + $0x130] sm:$0xff] }
 0x292   : > { %4263 = vmatpush.bf16.msra.mxu0 %v3122_v24  ;;  %v3250_v25 = vpack.c.bf16 %v2394_v15, %v2386_v37  ;;  %v2114_v59 = vcvt.s32.f32 %v1090_v29  ;;  %v2122_v9 = vcvt.s32.f32 %v1098_v18  ;;  %v1226_v11 = vunpack.c.3.s8 %v826_v19  ;;  %v850_v31 = vld [vmem:[%s8800_s10 + $0x230] sm:$0xff] }
 0x293   : > { %4276 = vmatpush.bf16.msra.mxu1 %v3186_v17  ;;  %v3314_v42 = vpack.c.bf16 %v2522_v32, %v2514_v22  ;;  %v2242_v45 = vcvt.s32.f32 %v1218_v33  ;;  %v1346_v46 = vunpack.c.2.s8 %v858_v38  ;;  %v1354_v48 = vunpack.c.3.s8 %v858_v38 }
 0x294   : > { %4289 = vmatpush.bf16.msra.mxu2 %v3250_v25  ;;  %v3114_v49 = vpack.c.bf16 %v2122_v9, %v2114_v59  ;;  %v2250_v26 = vcvt.s32.f32 %v1226_v11  ;;  %v1474_v28 = vunpack.c.2.s8 %v890_v35  ;;  %v1482_v10 = vunpack.c.3.s8 %v890_v35 }
 0x295   : > { %4302 = vmatpush.bf16.msra.mxu3 %v3314_v42  ;;  %v2370_v8 = vcvt.s32.f32 %v1346_v46  ;;  %v2378_v50 = vcvt.s32.f32 %v1354_v48  ;;  %v4010_v51 = vadd.f32 %v9199_v21, %v9225_v41  ;;  %v1074_v56 = vunpack.c.0.s8 %v794_v57 }
 0x296   : > { %4264 = vmatpush.bf16.msra.mxu0 %v3114_v49  ;;  %v3178_v52 = vpack.c.bf16 %v2250_v26, %v2242_v45  ;;  %v2498_v53 = vcvt.s32.f32 %v1474_v28  ;;  %v2506_v47 = vcvt.s32.f32 %v1482_v10  ;;  %v1082_v61 = vunpack.c.1.s8 %v794_v57 }
 0x297   : > { %v3242_v63 = vpack.c.bf16 %v2378_v50, %v2370_v8  ;;  %v4023_v1 = vadd.f32 %v9201_v16, %v4010_v51  ;;  %v2098_v2 = vcvt.s32.f32 %v1074_v56  ;;  %v1202_v3 = vunpack.c.0.s8 %v826_v19 }
 0x298   : > { %4277 = vmatpush.bf16.msra.mxu1 %v3178_v52  ;;  %v3306_v4 = vpack.c.bf16 %v2506_v47, %v2498_v53  ;;  %v2106_v6 = vcvt.s32.f32 %v1082_v61  ;;  %v1210_v7 = vunpack.c.1.s8 %v826_v19  ;;  %v1330_v23 = vunpack.c.0.s8 %v858_v38  ;;  %v3599_v19 = vld [vmem:[#allocation2 + $0x10] sm:$0xff] }
 0x299   : > { %4290 = vmatpush.bf16.msra.mxu2 %v3242_v63  ;;  %v2226_v21 = vcvt.s32.f32 %v1202_v3  ;;  %v1338_v41 = vunpack.c.1.s8 %v858_v38  ;;  %v1458_v12 = vunpack.c.0.s8 %v890_v35  ;;  %v1466_v13 = vunpack.c.1.s8 %v890_v35  ;;  %v882_v38 = vld [vmem:[%s8800_s10 + $0x330] sm:$0xff] }
 0x29a   : > { %4303 = vmatpush.bf16.msra.mxu3 %v3306_v4  ;;  %v3106_v57 = vpack.c.bf16 %v2106_v6, %v2098_v2  ;;  %v2234_v27 = vcvt.s32.f32 %v1210_v7  ;;  %v2354_v16 = vcvt.s32.f32 %v1330_v23  ;;  %v4036_v58 = vadd.f32 %v9207_v54, %v4023_v1  ;;  %v938_v53 = vld [vmem:[%s8800_s10 + $0x4f0] sm:$0xff] }
 0x29b   : > { %v2362_v30 = vcvt.s32.f32 %v1338_v41  ;;  %v2482_v20 = vcvt.s32.f32 %v1458_v12  ;;  %v2490_v37 = vcvt.s32.f32 %v1466_v13  ;;  %v1058_v14 = vunpack.c.2.s8 %v786_v39  ;;  %v970_v2 = vld [vmem:[%s8800_s10 + $0x5f0] sm:$0xff] }
 0x29c   : > { %4265 = vmatpush.bf16.msra.mxu0 %v3106_v57  ;;  %v3170_v24 = vpack.c.bf16 %v2234_v27, %v2226_v21  ;;  %v4049_v15 = vadd.f32 %v9209_v44, %v4036_v58  ;;  %v1066_v29 = vunpack.c.3.s8 %v786_v39  ;;  %v1186_v18 = vunpack.c.2.s8 %v818_v55  ;;  %v1002_v12 = vld [vmem:[%s8800_s10 + $0x6f0] sm:$0xff] }
 0x29d   : > { %v3234_v17 = vpack.c.bf16 %v2362_v30, %v2354_v16  ;;  %v3298_v22 = vpack.c.bf16 %v2490_v37, %v2482_v20  ;;  %v2082_v32 = vcvt.s32.f32 %v1058_v14  ;;  %v1194_v33 = vunpack.c.3.s8 %v818_v55  ;;  %v1034_v16 = vld [vmem:[%s8800_s10 + $0x7f0] sm:$0xff] }
 0x29e   : > { %4278 = vmatpush.bf16.msra.mxu1 %v3170_v24  ;;  %v4471_v35 = vadd.f32 %v4049_v15, %v3599_v19  ;;  %v2090_v54 = vcvt.s32.f32 %v1066_v29  ;;  %v2210_v25 = vcvt.s32.f32 %v1186_v18  ;;  %v1314_v59 = vunpack.c.2.s8 %v850_v31 }
 0x29f   : > { %4291 = vmatpush.bf16.msra.mxu2 %v3234_v17  ;;  %4304 = vmatpush.bf16.msra.mxu3 %v3298_v22  ;;  %v2218_v9 = vcvt.s32.f32 %v1194_v33  ;;  %v1322_v11 = vunpack.c.3.s8 %v850_v31  ;;  %v1442_v42 = vunpack.c.2.s8 %v882_v38  ;;  %v1450_v45 = vunpack.c.3.s8 %v882_v38 }
 0x2a0   : > { %4479 = vst [vmem:[#allocation2 + $0x10] sm:$0xff] %v4471_v35  ;;  %v3098_v44 = vpack.c.bf16 %v2090_v54, %v2082_v32  ;;  %v2338_v46 = vcvt.s32.f32 %v1314_v59  ;;  %v1042_v48 = vunpack.c.0.s8 %v786_v39  ;;  %v1050_v49 = vunpack.c.1.s8 %v786_v39 }
 0x2a1   : > { %v3162_v26 = vpack.c.bf16 %v2218_v9, %v2210_v25  ;;  %v2346_v28 = vcvt.s32.f32 %v1322_v11  ;;  %v2466_v10 = vcvt.s32.f32 %v1442_v42  ;;  %v2474_v8 = vcvt.s32.f32 %v1450_v45 }
 0x2a2   : > { %4266 = vmatpush.bf16.msra.mxu0 %v3098_v44  ;;  %v2066_v50 = vcvt.s32.f32 %v1042_v48  ;;  %v2074_v51 = vcvt.s32.f32 %v1050_v49  ;;  %v1170_v56 = vunpack.c.0.s8 %v818_v55  ;;  %v1178_v52 = vunpack.c.1.s8 %v818_v55  ;;  %v930_v44 = vld [vmem:[%s8800_s10 + $0x4b0] sm:$0xff] }
 0x2a3   : > { %4279 = vmatpush.bf16.msra.mxu1 %v3162_v26  ;;  %v3226_v47 = vpack.c.bf16 %v2346_v28, %v2338_v46  ;;  %v3290_v61 = vpack.c.bf16 %v2474_v8, %v2466_v10  ;;  %v1298_v63 = vunpack.c.0.s8 %v850_v31  ;;  %v1306_v1 = vunpack.c.1.s8 %v850_v31 }
 0x2a4   : > { %v3090_v3 = vpack.c.bf16 %v2074_v51, %v2066_v50  ;;  %v2194_v4 = vcvt.s32.f32 %v1170_v56  ;;  %v2202_v6 = vcvt.s32.f32 %v1178_v52  ;;  %v1426_v7 = vunpack.c.0.s8 %v882_v38  ;;  %v962_v51 = vld [vmem:[%s8800_s10 + $0x5b0] sm:$0xff] }
 0x2a5   : > { %4292 = vmatpush.bf16.msra.mxu2 %v3226_v47  ;;  %4305 = vmatpush.bf16.msra.mxu3 %v3290_v61  ;;  %v2322_v23 = vcvt.s32.f32 %v1298_v63  ;;  %v2330_v39 = vcvt.s32.f32 %v1306_v1  ;;  %v1434_v21 = vunpack.c.1.s8 %v882_v38  ;;  %v1666_v41 = vunpack.c.2.s8 %v938_v53  ;;  %v994_v61 = vld [vmem:[%s8800_s10 + $0x6b0] sm:$0xff] }
 0x2a6   : > { %4267 = vmatpush.bf16.msra.mxu0 %v3090_v3  ;;  %v3154_v13 = vpack.c.bf16 %v2202_v6, %v2194_v4  ;;  %v2450_v55 = vcvt.s32.f32 %v1426_v7  ;;  %v1674_v57 = vunpack.c.3.s8 %v938_v53  ;;  %v1794_v27 = vunpack.c.2.s8 %v970_v2  ;;  %v1026_v4 = vld [vmem:[%s8800_s10 + $0x7b0] sm:$0xff] }
 0x2a7   : > { %v3218_v58 = vpack.c.bf16 %v2330_v39, %v2322_v23  ;;  %v2458_v30 = vcvt.s32.f32 %v1434_v21  ;;  %v2690_v20 = vcvt.s32.f32 %v1666_v41  ;;  %v1802_v37 = vunpack.c.3.s8 %v970_v2 }
 0x2a8   : > { %4280 = vmatpush.bf16.msra.mxu1 %v3154_v13  ;;  %v2698_v19 = vcvt.s32.f32 %v1674_v57  ;;  %v2818_v14 = vcvt.s32.f32 %v1794_v27  ;;  %v1922_v31 = vunpack.c.2.s8 %v1002_v12  ;;  %v1930_v24 = vunpack.c.3.s8 %v1002_v12 }
 0x2a9   : > { %4293 = vmatpush.bf16.msra.mxu2 %v3218_v58  ;;  %v3282_v15 = vpack.c.bf16 %v2458_v30, %v2450_v55  ;;  %v2826_v29 = vcvt.s32.f32 %v1802_v37  ;;  %v2050_v18 = vunpack.c.2.s8 %v1034_v16  ;;  %v2058_v38 = vunpack.c.3.s8 %v1034_v16  ;;  %4268 = vmatmul.bf16.vlgmr.msra.gmra.mxu0 %v8867_v60 }
 0x2aa   : > { %v3402_v17 = vpack.c.bf16 %v2698_v19, %v2690_v20  ;;  %v2946_v22 = vcvt.s32.f32 %v1922_v31  ;;  %v2954_v32 = vcvt.s32.f32 %v1930_v24  ;;  %v1650_v33 = vunpack.c.0.s8 %v938_v53 }
 0x2ab   : > { %4306 = vmatpush.bf16.msra.mxu3 %v3282_v15  ;;  %v3466_v35 = vpack.c.bf16 %v2826_v29, %v2818_v14  ;;  %v3074_v54 = vcvt.s32.f32 %v2050_v18  ;;  %v3082_v25 = vcvt.s32.f32 %v2058_v38  ;;  %v1658_v59 = vunpack.c.1.s8 %v938_v53  ;;  %4281 = vmatmul.bf16.vlgmr.msra.gmra.mxu1 %v8874_v5 }
 0x2ac   : > { %4312 = vmatpush.bf16.msrb.mxu0 %v3402_v17  ;;  %v3530_v9 = vpack.c.bf16 %v2954_v32, %v2946_v22  ;;  %v2674_v11 = vcvt.s32.f32 %v1650_v33  ;;  %v1778_v42 = vunpack.c.0.s8 %v970_v2  ;;  %v1786_v45 = vunpack.c.1.s8 %v970_v2  ;;  %4294 = vmatmul.bf16.vlgmr.msra.gmra.mxu2 %v8861_v36  ;;  %v922_v17 = vld [vmem:[%s8800_s10 + $0x470] sm:$0xff] }
 0x2ad   : > { %4325 = vmatpush.bf16.msrb.mxu1 %v3466_v35  ;;  %v3594_v46 = vpack.c.bf16 %v3082_v25, %v3074_v54  ;;  %v2682_v48 = vcvt.s32.f32 %v1658_v59  ;;  %v1906_v49 = vunpack.c.0.s8 %v1002_v12  ;;  %v1914_v26 = vunpack.c.1.s8 %v1002_v12  ;;  %v9253_v54 = vpop.f32.mrf.mxu0  ;;  %v9255_v25 = vpop.f32.mrf.mxu1 }
 0x2ae   : > { %4338 = vmatpush.bf16.msrb.mxu2 %v3530_v9  ;;  %v2802_v28 = vcvt.s32.f32 %v1778_v42  ;;  %v2810_v10 = vcvt.s32.f32 %v1786_v45  ;;  %v2034_v8 = vunpack.c.0.s8 %v1034_v16  ;;  %v2042_v50 = vunpack.c.1.s8 %v1034_v16  ;;  %4307 = vmatmul.bf16.vlgmr.msra.gmra.mxu3 %v8870_v0  ;;  %v954_v45 = vld [vmem:[%s8800_s10 + $0x570] sm:$0xff] }
 0x2af   : > { %4351 = vmatpush.bf16.msrb.mxu3 %v3594_v46  ;;  %v3394_v56 = vpack.c.bf16 %v2682_v48, %v2674_v11  ;;  %v2930_v52 = vcvt.s32.f32 %v1906_v49  ;;  %v2938_v53 = vcvt.s32.f32 %v1914_v26  ;;  %v1634_v47 = vunpack.c.2.s8 %v930_v44  ;;  %v986_v26 = vld [vmem:[%s8800_s10 + $0x670] sm:$0xff] }
 0x2b0   : > { %v3458_v63 = vpack.c.bf16 %v2810_v10, %v2802_v28  ;;  %v3058_v1 = vcvt.s32.f32 %v2034_v8  ;;  %v3066_v2 = vcvt.s32.f32 %v2042_v50  ;;  %v1642_v3 = vunpack.c.3.s8 %v930_v44 }
 0x2b1   : > { %4313 = vmatpush.bf16.msrb.mxu0 %v3394_v56  ;;  %v3522_v6 = vpack.c.bf16 %v2938_v53, %v2930_v52  ;;  %v2658_v7 = vcvt.s32.f32 %v1634_v47  ;;  %v1762_v23 = vunpack.c.2.s8 %v962_v51  ;;  %v1770_v39 = vunpack.c.3.s8 %v962_v51 }
 0x2b2   : > { %4326 = vmatpush.bf16.msrb.mxu1 %v3458_v63  ;;  %v3586_v21 = vpack.c.bf16 %v3066_v2, %v3058_v1  ;;  %v2666_v41 = vcvt.s32.f32 %v1642_v3  ;;  %v1890_v12 = vunpack.c.2.s8 %v994_v61  ;;  %v1898_v13 = vunpack.c.3.s8 %v994_v61 }
 0x2b3   : > { %4339 = vmatpush.bf16.msrb.mxu2 %v3522_v6  ;;  %v2786_v55 = vcvt.s32.f32 %v1762_v23  ;;  %v2794_v57 = vcvt.s32.f32 %v1770_v39  ;;  %v2018_v27 = vunpack.c.2.s8 %v1026_v4  ;;  %v2026_v16 = vunpack.c.3.s8 %v1026_v4  ;;  %v9260_v23 = vpop.f32.mrf.mxu2  ;;  %v9262_v39 = vpop.f32.mrf.mxu3 }
 0x2b4   : > { %4352 = vmatpush.bf16.msrb.mxu3 %v3586_v21  ;;  %v3386_v58 = vpack.c.bf16 %v2666_v41, %v2658_v7  ;;  %v2914_v30 = vcvt.s32.f32 %v1890_v12  ;;  %v2922_v20 = vcvt.s32.f32 %v1898_v13  ;;  %v1618_v37 = vunpack.c.0.s8 %v930_v44 }
 0x2b5   : > { %v3450_v19 = vpack.c.bf16 %v2794_v57, %v2786_v55  ;;  %v3042_v14 = vcvt.s32.f32 %v2018_v27  ;;  %v3050_v31 = vcvt.s32.f32 %v2026_v16  ;;  %v1626_v24 = vunpack.c.1.s8 %v930_v44 }
 0x2b6   : > { %4314 = vmatpush.bf16.msrb.mxu0 %v3386_v58  ;;  %v3514_v15 = vpack.c.bf16 %v2922_v20, %v2914_v30  ;;  %v2642_v29 = vcvt.s32.f32 %v1618_v37  ;;  %v1746_v18 = vunpack.c.0.s8 %v962_v51  ;;  %v1754_v38 = vunpack.c.1.s8 %v962_v51  ;;  %v1018_v51 = vld [vmem:[%s8800_s10 + $0x770] sm:$0xff]  ;;  %v4063_v58 = vpop.f32.mrf.mxu0  ;;  %v4076_v30 = vpop.f32.mrf.mxu1 }
 0x2b7   : > { %4327 = vmatpush.bf16.msrb.mxu1 %v3450_v19  ;;  %v3578_v22 = vpack.c.bf16 %v3050_v31, %v3042_v14  ;;  %v2650_v32 = vcvt.s32.f32 %v1626_v24  ;;  %v1874_v33 = vunpack.c.0.s8 %v994_v61  ;;  %v1882_v35 = vunpack.c.1.s8 %v994_v61  ;;  %v914_v31 = vld [vmem:[%s8800_s10 + $0x430] sm:$0xff]  ;;  %v9269_v58 = vld [vmem:[%s8800_s10 + $0xf8] sm:$0xff] }
 0x2b8   : > { %4340 = vmatpush.bf16.msrb.mxu2 %v3514_v15  ;;  %v2770_v59 = vcvt.s32.f32 %v1746_v18  ;;  %v2778_v9 = vcvt.s32.f32 %v1754_v38  ;;  %v2002_v11 = vunpack.c.0.s8 %v1026_v4  ;;  %v2010_v42 = vunpack.c.1.s8 %v1026_v4 }
 0x2b9   : > { %4353 = vmatpush.bf16.msrb.mxu3 %v3578_v22  ;;  %v3378_v44 = vpack.c.bf16 %v2650_v32, %v2642_v29  ;;  %v2898_v46 = vcvt.s32.f32 %v1874_v33  ;;  %v2906_v48 = vcvt.s32.f32 %v1882_v35  ;;  %v1602_v49 = vunpack.c.2.s8 %v922_v17  ;;  %v946_v33 = vld [vmem:[%s8800_s10 + $0x530] sm:$0xff] }
 0x2ba   : > { %v3442_v28 = vpack.c.bf16 %v2778_v9, %v2770_v59  ;;  %v3026_v10 = vcvt.s32.f32 %v2002_v11  ;;  %v3034_v8 = vcvt.s32.f32 %v2010_v42  ;;  %v1610_v50 = vunpack.c.3.s8 %v922_v17  ;;  %v978_v42 = vld [vmem:[%s8800_s10 + $0x630] sm:$0xff] }
 0x2bb   : > { %4315 = vmatpush.bf16.msrb.mxu0 %v3378_v44  ;;  %v3506_v56 = vpack.c.bf16 %v2906_v48, %v2898_v46  ;;  %v2626_v52 = vcvt.s32.f32 %v1602_v49  ;;  %v1730_v53 = vunpack.c.2.s8 %v954_v45  ;;  %v1738_v47 = vunpack.c.3.s8 %v954_v45  ;;  %v1010_v49 = vld [vmem:[%s8800_s10 + $0x730] sm:$0xff] }
 0x2bc   : > { %4328 = vmatpush.bf16.msrb.mxu1 %v3442_v28  ;;  %v3570_v61 = vpack.c.bf16 %v3034_v8, %v3026_v10  ;;  %v2634_v63 = vcvt.s32.f32 %v1610_v50  ;;  %v1858_v1 = vunpack.c.2.s8 %v986_v26  ;;  %v1866_v2 = vunpack.c.3.s8 %v986_v26  ;;  %v4089_v50 = vpop.f32.mrf.mxu2 }
 0x2bd   : > { %4341 = vmatpush.bf16.msrb.mxu2 %v3506_v56  ;;  %v2754_v3 = vcvt.s32.f32 %v1730_v53  ;;  %v2762_v4 = vcvt.s32.f32 %v1738_v47  ;;  %v1986_v6 = vunpack.c.2.s8 %v1018_v51  ;;  %v1994_v7 = vunpack.c.3.s8 %v1018_v51  ;;  %v4102_v56 = vpop.f32.mrf.mxu3 }
 0x2be   : > { %4354 = vmatpush.bf16.msrb.mxu3 %v3570_v61  ;;  %v3370_v21 = vpack.c.bf16 %v2634_v63, %v2626_v52  ;;  %v2882_v41 = vcvt.s32.f32 %v1858_v1  ;;  %v2890_v12 = vcvt.s32.f32 %v1866_v2  ;;  %v1586_v13 = vunpack.c.0.s8 %v922_v17 }
 0x2bf   : > { %v3434_v55 = vpack.c.bf16 %v2762_v4, %v2754_v3  ;;  %v3010_v57 = vcvt.s32.f32 %v1986_v6  ;;  %v3018_v27 = vcvt.s32.f32 %v1994_v7  ;;  %v1594_v16 = vunpack.c.1.s8 %v922_v17 }
 0x2c0   : > { %4316 = vmatpush.bf16.msrb.mxu0 %v3370_v21  ;;  %v3498_v20 = vpack.c.bf16 %v2890_v12, %v2882_v41  ;;  %v2610_v37 = vcvt.s32.f32 %v1586_v13  ;;  %v1714_v19 = vunpack.c.0.s8 %v954_v45  ;;  %v1722_v14 = vunpack.c.1.s8 %v954_v45 }
 0x2c1   : > { %4329 = vmatpush.bf16.msrb.mxu1 %v3434_v55  ;;  %v3562_v24 = vpack.c.bf16 %v3018_v27, %v3010_v57  ;;  %v2618_v15 = vcvt.s32.f32 %v1594_v16  ;;  %v1842_v29 = vunpack.c.0.s8 %v986_v26  ;;  %v1850_v18 = vunpack.c.1.s8 %v986_v26 }
 0x2c2   : > { %4342 = vmatpush.bf16.msrb.mxu2 %v3498_v20  ;;  %v2738_v38 = vcvt.s32.f32 %v1714_v19  ;;  %v2746_v22 = vcvt.s32.f32 %v1722_v14  ;;  %v1970_v17 = vunpack.c.0.s8 %v1018_v51  ;;  %v1978_v32 = vunpack.c.1.s8 %v1018_v51 }
 0x2c3   : > { %4355 = vmatpush.bf16.msrb.mxu3 %v3562_v24  ;;  %v3362_v35 = vpack.c.bf16 %v2618_v15, %v2610_v37  ;;  %v2866_v59 = vcvt.s32.f32 %v1842_v29  ;;  %v2874_v9 = vcvt.s32.f32 %v1850_v18  ;;  %v1570_v11 = vunpack.c.2.s8 %v914_v31  ;;  %v843_v29 = vld [vmem:[%s8800_s10 + $0x1f8] sm:$0xff]  ;;  %v9272_v18 = vpop.f32.mrf.mxu0 }
 0x2c4   : > { %v3426_v45 = vpack.c.bf16 %v2746_v22, %v2738_v38  ;;  %v2994_v44 = vcvt.s32.f32 %v1970_v17  ;;  %v3002_v46 = vcvt.s32.f32 %v1978_v32  ;;  %v1578_v48 = vunpack.c.3.s8 %v914_v31  ;;  %v9274_v38 = vpop.f32.mrf.mxu1 }
 0x2c5   : > { %4317 = vmatpush.bf16.msrb.mxu0 %v3362_v35  ;;  %v3490_v26 = vpack.c.bf16 %v2874_v9, %v2866_v59  ;;  %v2594_v28 = vcvt.s32.f32 %v1570_v11  ;;  %v1698_v10 = vunpack.c.2.s8 %v946_v33  ;;  %v1706_v8 = vunpack.c.3.s8 %v946_v33  ;;  %v875_v35 = vld [vmem:[%s8800_s10 + $0x2f8] sm:$0xff] }
 0x2c6   : > { %4330 = vmatpush.bf16.msrb.mxu1 %v3426_v45  ;;  %v3554_v51 = vpack.c.bf16 %v3002_v46, %v2994_v44  ;;  %v2602_v52 = vcvt.s32.f32 %v1578_v48  ;;  %v1826_v53 = vunpack.c.2.s8 %v978_v42  ;;  %v1834_v47 = vunpack.c.3.s8 %v978_v42  ;;  %v907_v45 = vld [vmem:[%s8800_s10 + $0x3f8] sm:$0xff] }
 0x2c7   : > { %4343 = vmatpush.bf16.msrb.mxu2 %v3490_v26  ;;  %v2722_v61 = vcvt.s32.f32 %v1698_v10  ;;  %v2730_v63 = vcvt.s32.f32 %v1706_v8  ;;  %v1954_v1 = vunpack.c.2.s8 %v1010_v49  ;;  %v1962_v2 = vunpack.c.3.s8 %v1010_v49 }
 0x2c8   : > { %4356 = vmatpush.bf16.msrb.mxu3 %v3554_v51  ;;  %v3354_v3 = vpack.c.bf16 %v2602_v52, %v2594_v28  ;;  %v2850_v4 = vcvt.s32.f32 %v1826_v53  ;;  %v2858_v6 = vcvt.s32.f32 %v1834_v47  ;;  %v1554_v7 = vunpack.c.0.s8 %v914_v31  ;;  %v9280_v53 = vpop.f32.mrf.mxu2  ;;  %v9282_v47 = vpop.f32.mrf.mxu3 }
 0x2c9   : > { %v3418_v21 = vpack.c.bf16 %v2730_v63, %v2722_v61  ;;  %v2978_v41 = vcvt.s32.f32 %v1954_v1  ;;  %v2986_v12 = vcvt.s32.f32 %v1962_v2  ;;  %v1562_v13 = vunpack.c.1.s8 %v914_v31 }
 0x2ca   : > { %4318 = vmatpush.bf16.msrb.mxu0 %v3354_v3  ;;  %v3482_v55 = vpack.c.bf16 %v2858_v6, %v2850_v4  ;;  %v2578_v57 = vcvt.s32.f32 %v1554_v7  ;;  %v1682_v27 = vunpack.c.0.s8 %v946_v33  ;;  %v1690_v16 = vunpack.c.1.s8 %v946_v33 }
 0x2cb   : > { %4331 = vmatpush.bf16.msrb.mxu1 %v3418_v21  ;;  %v3546_v30 = vpack.c.bf16 %v2986_v12, %v2978_v41  ;;  %v2586_v20 = vcvt.s32.f32 %v1562_v13  ;;  %v1810_v37 = vunpack.c.0.s8 %v978_v42  ;;  %v1818_v19 = vunpack.c.1.s8 %v978_v42 }
 0x2cc   : > { %4344 = vmatpush.bf16.msrb.mxu2 %v3482_v55  ;;  %v2706_v14 = vcvt.s32.f32 %v1682_v27  ;;  %v2714_v24 = vcvt.s32.f32 %v1690_v16  ;;  %v1938_v15 = vunpack.c.0.s8 %v1010_v49  ;;  %v1946_v31 = vunpack.c.1.s8 %v1010_v49  ;;  %v4115_v55 = vpop.f32.mrf.mxu0 }
 0x2cd   : > { %4357 = vmatpush.bf16.msrb.mxu3 %v3546_v30  ;;  %v3346_v22 = vpack.c.bf16 %v2586_v20, %v2578_v57  ;;  %v2834_v17 = vcvt.s32.f32 %v1810_v37  ;;  %v2842_v32 = vcvt.s32.f32 %v1818_v19  ;;  %v1155_v33 = vunpack.c.2.s8 %v9269_v58  ;;  %v803_v30 = vld [vmem:[%s8800_s10 + $0xb8] sm:$0xff] }
 0x2ce   : > { %v3410_v59 = vpack.c.bf16 %v2714_v24, %v2706_v14  ;;  %v2962_v9 = vcvt.s32.f32 %v1938_v15  ;;  %v2970_v11 = vcvt.s32.f32 %v1946_v31  ;;  %v1163_v42 = vunpack.c.3.s8 %v9269_v58  ;;  %v795_v55 = vld [vmem:[%s8800_s10 + $0x78] sm:$0xff] }
 0x2cf   : > { %4319 = vmatpush.bf16.msrb.mxu0 %v3346_v22  ;;  %v3474_v44 = vpack.c.bf16 %v2842_v32, %v2834_v17  ;;  %v2179_v46 = vcvt.s32.f32 %v1155_v33  ;;  %v1283_v48 = vunpack.c.2.s8 %v843_v29  ;;  %v1291_v49 = vunpack.c.3.s8 %v843_v29  ;;  %v867_v22 = vld [vmem:[%s8800_s10 + $0x2b8] sm:$0xff] }
 0x2d0   : > { %4332 = vmatpush.bf16.msrb.mxu1 %v3410_v59  ;;  %v3538_v26 = vpack.c.bf16 %v2970_v11, %v2962_v9  ;;  %v2187_v28 = vcvt.s32.f32 %v1163_v42  ;;  %v1411_v10 = vunpack.c.2.s8 %v875_v35  ;;  %v1419_v8 = vunpack.c.3.s8 %v875_v35  ;;  %v899_v59 = vld [vmem:[%s8800_s10 + $0x3b8] sm:$0xff] }
 0x2d1   : > { %4345 = vmatpush.bf16.msrb.mxu2 %v3474_v44  ;;  %v2307_v50 = vcvt.s32.f32 %v1283_v48  ;;  %v2315_v56 = vcvt.s32.f32 %v1291_v49  ;;  %v1539_v51 = vunpack.c.2.s8 %v907_v45  ;;  %v1547_v52 = vunpack.c.3.s8 %v907_v45  ;;  %v4154_v48 = vpop.f32.mrf.mxu3 }
 0x2d2   : > { %4358 = vmatpush.bf16.msrb.mxu3 %v3538_v26  ;;  %v3147_v61 = vpack.c.bf16 %v2187_v28, %v2179_v46  ;;  %v2435_v63 = vcvt.s32.f32 %v1411_v10  ;;  %v2443_v1 = vcvt.s32.f32 %v1419_v8  ;;  %v4075_v2 = vadd.f32 %v9255_v25, %v9253_v54  ;;  %4320 = vmatmul.bf16.vlgmr.msrb.gmra.mxu0 %v8890_v40  ;;  %v4128_v54 = vpop.f32.mrf.mxu1  ;;  %v4141_v46 = vpop.f32.mrf.mxu2 }
 0x2d3   : > { %v3211_v3 = vpack.c.bf16 %v2315_v56, %v2307_v50  ;;  %v2563_v4 = vcvt.s32.f32 %v1539_v51  ;;  %v2571_v6 = vcvt.s32.f32 %v1547_v52  ;;  %v1139_v7 = vunpack.c.0.s8 %v9269_v58  ;;  %4333 = vmatmul.bf16.vlgmr.msrb.gmra.mxu1 %v8897_v62 }
 0x2d4   : > { %4364 = vmatpush.bf16.msra.mxu0 %v3147_v61  ;;  %v3275_v21 = vpack.c.bf16 %v2443_v1, %v2435_v63  ;;  %v1147_v41 = vunpack.c.1.s8 %v9269_v58  ;;  %v1267_v12 = vunpack.c.0.s8 %v843_v29  ;;  %v1275_v13 = vunpack.c.1.s8 %v843_v29  ;;  %4346 = vmatmul.bf16.vlgmr.msrb.gmra.mxu2 %v8887_v34  ;;  %v835_v29 = vld [vmem:[%s8800_s10 + $0x1b8] sm:$0xff] }
 0x2d5   : > { %4377 = vmatpush.bf16.msra.mxu1 %v3211_v3  ;;  %v3339_v25 = vpack.c.bf16 %v2571_v6, %v2563_v4  ;;  %v2163_v57 = vcvt.s32.f32 %v1139_v7  ;;  %v1395_v27 = vunpack.c.0.s8 %v875_v35  ;;  %v1403_v16 = vunpack.c.1.s8 %v875_v35  ;;  %4359 = vmatmul.bf16.vlgmr.msrb.gmra.mxu3 %v8892_v43 }
 0x2d6   : > { %4390 = vmatpush.bf16.msra.mxu2 %v3275_v21  ;;  %v2171_v20 = vcvt.s32.f32 %v1147_v41  ;;  %v2291_v58 = vcvt.s32.f32 %v1267_v12  ;;  %v2299_v37 = vcvt.s32.f32 %v1275_v13  ;;  %v1523_v19 = vunpack.c.0.s8 %v907_v45 }
 0x2d7   : > { %4403 = vmatpush.bf16.msra.mxu3 %v3339_v25  ;;  %v2419_v14 = vcvt.s32.f32 %v1395_v27  ;;  %v2427_v24 = vcvt.s32.f32 %v1403_v16  ;;  %v1531_v15 = vunpack.c.1.s8 %v907_v45  ;;  %v4088_v31 = vadd.f32 %v9260_v23, %v4075_v2  ;;  %v827_v16 = vld [vmem:[%s8800_s10 + $0x178] sm:$0xff] }
 0x2d8   : > { %v3139_v17 = vpack.c.bf16 %v2171_v20, %v2163_v57  ;;  %v3203_v32 = vpack.c.bf16 %v2299_v37, %v2291_v58  ;;  %v2547_v33 = vcvt.s32.f32 %v1523_v19  ;;  %v1123_v35 = vunpack.c.2.s8 %v803_v30 }
 0x2d9   : > { %v3267_v9 = vpack.c.bf16 %v2427_v24, %v2419_v14  ;;  %v2555_v11 = vcvt.s32.f32 %v1531_v15  ;;  %v9298_v42 = vadd.f32 %v9262_v39, %v4088_v31  ;;  %v1131_v44 = vunpack.c.3.s8 %v803_v30  ;;  %v859_v31 = vld [vmem:[%s8800_s10 + $0x278] sm:$0xff] }
 0x2da   : > { %4365 = vmatpush.bf16.msra.mxu0 %v3139_v17  ;;  %4378 = vmatpush.bf16.msra.mxu1 %v3203_v32  ;;  %v2147_v45 = vcvt.s32.f32 %v1123_v35  ;;  %v1251_v49 = vunpack.c.2.s8 %v835_v29  ;;  %v1259_v23 = vunpack.c.3.s8 %v835_v29  ;;  %v1379_v26 = vunpack.c.2.s8 %v867_v22  ;;  %v891_v35 = vld [vmem:[%s8800_s10 + $0x378] sm:$0xff] }
 0x2db   : > { %4391 = vmatpush.bf16.msra.mxu2 %v3267_v9  ;;  %v3331_v28 = vpack.c.bf16 %v2555_v11, %v2547_v33  ;;  %v2155_v10 = vcvt.s32.f32 %v1131_v44  ;;  %v1387_v8 = vunpack.c.3.s8 %v867_v22  ;;  %v1507_v50 = vunpack.c.2.s8 %v899_v59 }
 0x2dc   : > { %v2275_v56 = vcvt.s32.f32 %v1251_v49  ;;  %v2283_v51 = vcvt.s32.f32 %v1259_v23  ;;  %v2403_v52 = vcvt.s32.f32 %v1379_v26  ;;  %v1515_v39 = vunpack.c.3.s8 %v899_v59 }
 0x2dd   : > { %4404 = vmatpush.bf16.msra.mxu3 %v3331_v28  ;;  %v3131_v61 = vpack.c.bf16 %v2155_v10, %v2147_v45  ;;  %v2411_v63 = vcvt.s32.f32 %v1387_v8  ;;  %v2531_v1 = vcvt.s32.f32 %v1507_v50  ;;  %v1107_v2 = vunpack.c.0.s8 %v803_v30 }
 0x2de   : > { %v3195_v3 = vpack.c.bf16 %v2283_v51, %v2275_v56  ;;  %v2539_v4 = vcvt.s32.f32 %v1515_v39  ;;  %v1115_v6 = vunpack.c.1.s8 %v803_v30  ;;  %v1235_v7 = vunpack.c.0.s8 %v835_v29 }
 0x2df   : > { %4366 = vmatpush.bf16.msra.mxu0 %v3131_v61  ;;  %v3259_v21 = vpack.c.bf16 %v2411_v63, %v2403_v52  ;;  %v2131_v41 = vcvt.s32.f32 %v1107_v2  ;;  %v1243_v12 = vunpack.c.1.s8 %v835_v29  ;;  %v1363_v13 = vunpack.c.0.s8 %v867_v22 }
 0x2e0   : > { %4379 = vmatpush.bf16.msra.mxu1 %v3195_v3  ;;  %v3323_v54 = vpack.c.bf16 %v2539_v4, %v2531_v1  ;;  %v2139_v25 = vcvt.s32.f32 %v1115_v6  ;;  %v2259_v57 = vcvt.s32.f32 %v1235_v7  ;;  %v1371_v27 = vunpack.c.1.s8 %v867_v22 }
 0x2e1   : > { %4392 = vmatpush.bf16.msra.mxu2 %v3259_v21  ;;  %v2267_v20 = vcvt.s32.f32 %v1243_v12  ;;  %v2387_v58 = vcvt.s32.f32 %v1363_v13  ;;  %v1491_v37 = vunpack.c.0.s8 %v899_v59  ;;  %v1499_v30 = vunpack.c.1.s8 %v899_v59 }
 0x2e2   : > { %4405 = vmatpush.bf16.msra.mxu3 %v3323_v54  ;;  %v3123_v19 = vpack.c.bf16 %v2139_v25, %v2131_v41  ;;  %v2395_v14 = vcvt.s32.f32 %v1371_v27  ;;  %v1091_v24 = vunpack.c.2.s8 %v795_v55  ;;  %v1099_v15 = vunpack.c.3.s8 %v795_v55  ;;  %v787_v41 = vld [vmem:[%s8800_s10 + $0x38] sm:$0xff] }
 0x2e3   : > { %v3187_v29 = vpack.c.bf16 %v2267_v20, %v2259_v57  ;;  %v2515_v17 = vcvt.s32.f32 %v1491_v37  ;;  %v2523_v32 = vcvt.s32.f32 %v1499_v30  ;;  %v1219_v33 = vunpack.c.2.s8 %v827_v16  ;;  %v819_v54 = vld [vmem:[%s8800_s10 + $0x138] sm:$0xff] }
 0x2e4   : > { %4367 = vmatpush.bf16.msra.mxu0 %v3123_v19  ;;  %v3251_v22 = vpack.c.bf16 %v2395_v14, %v2387_v58  ;;  %v2115_v9 = vcvt.s32.f32 %v1091_v24  ;;  %v2123_v11 = vcvt.s32.f32 %v1099_v15  ;;  %v1227_v44 = vunpack.c.3.s8 %v827_v16  ;;  %v851_v30 = vld [vmem:[%s8800_s10 + $0x238] sm:$0xff] }
 0x2e5   : > { %4380 = vmatpush.bf16.msra.mxu1 %v3187_v29  ;;  %v3315_v46 = vpack.c.bf16 %v2523_v32, %v2515_v17  ;;  %v2243_v48 = vcvt.s32.f32 %v1219_v33  ;;  %v1347_v59 = vunpack.c.2.s8 %v859_v31  ;;  %v1355_v45 = vunpack.c.3.s8 %v859_v31 }
 0x2e6   : > { %4393 = vmatpush.bf16.msra.mxu2 %v3251_v22  ;;  %v3115_v49 = vpack.c.bf16 %v2123_v11, %v2115_v9  ;;  %v2251_v23 = vcvt.s32.f32 %v1227_v44  ;;  %v1475_v26 = vunpack.c.2.s8 %v891_v35  ;;  %v1483_v28 = vunpack.c.3.s8 %v891_v35 }
 0x2e7   : > { %4406 = vmatpush.bf16.msra.mxu3 %v3315_v46  ;;  %v2371_v10 = vcvt.s32.f32 %v1347_v59  ;;  %v2379_v8 = vcvt.s32.f32 %v1355_v45  ;;  %v4114_v50 = vadd.f32 %v9272_v18, %v9298_v42  ;;  %v1075_v56 = vunpack.c.0.s8 %v795_v55 }
 0x2e8   : > { %4368 = vmatpush.bf16.msra.mxu0 %v3115_v49  ;;  %v3179_v51 = vpack.c.bf16 %v2251_v23, %v2243_v48  ;;  %v2499_v52 = vcvt.s32.f32 %v1475_v26  ;;  %v2507_v39 = vcvt.s32.f32 %v1483_v28  ;;  %v1083_v61 = vunpack.c.1.s8 %v795_v55 }
 0x2e9   : > { %v3243_v63 = vpack.c.bf16 %v2379_v8, %v2371_v10  ;;  %v4127_v1 = vadd.f32 %v9274_v38, %v4114_v50  ;;  %v2099_v2 = vcvt.s32.f32 %v1075_v56  ;;  %v1203_v3 = vunpack.c.0.s8 %v827_v16 }
 0x2ea   : > { %4381 = vmatpush.bf16.msra.mxu1 %v3179_v51  ;;  %v3307_v4 = vpack.c.bf16 %v2507_v39, %v2499_v52  ;;  %v2107_v6 = vcvt.s32.f32 %v1083_v61  ;;  %v1211_v7 = vunpack.c.1.s8 %v827_v16  ;;  %v1331_v21 = vunpack.c.0.s8 %v859_v31  ;;  %v3600_v16 = vld [vmem:[#allocation2 + $0x8] sm:$0xff]  ;;  %v939_v52 = vld [vmem:[%s8800_s10 + $0x4f8] sm:$0xff] }
 0x2eb   : > { %4394 = vmatpush.bf16.msra.mxu2 %v3243_v63  ;;  %v2227_v18 = vcvt.s32.f32 %v1203_v3  ;;  %v1339_v42 = vunpack.c.1.s8 %v859_v31  ;;  %v1459_v12 = vunpack.c.0.s8 %v891_v35  ;;  %v1467_v13 = vunpack.c.1.s8 %v891_v35  ;;  %v883_v31 = vld [vmem:[%s8800_s10 + $0x338] sm:$0xff] }
 0x2ec   : > { %4407 = vmatpush.bf16.msra.mxu3 %v3307_v4  ;;  %v3107_v55 = vpack.c.bf16 %v2107_v6, %v2099_v2  ;;  %v2235_v25 = vcvt.s32.f32 %v1211_v7  ;;  %v2355_v38 = vcvt.s32.f32 %v1331_v21  ;;  %v4140_v57 = vadd.f32 %v9280_v53, %v4127_v1  ;;  %v971_v2 = vld [vmem:[%s8800_s10 + $0x5f8] sm:$0xff] }
 0x2ed   : > { %v2363_v27 = vcvt.s32.f32 %v1339_v42  ;;  %v2483_v20 = vcvt.s32.f32 %v1459_v12  ;;  %v2491_v58 = vcvt.s32.f32 %v1467_v13  ;;  %v1059_v37 = vunpack.c.2.s8 %v787_v41  ;;  %v1003_v12 = vld [vmem:[%s8800_s10 + $0x6f8] sm:$0xff] }
 0x2ee   : > { %4369 = vmatpush.bf16.msra.mxu0 %v3107_v55  ;;  %v3171_v19 = vpack.c.bf16 %v2235_v25, %v2227_v18  ;;  %v4153_v14 = vadd.f32 %v9282_v47, %v4140_v57  ;;  %v1067_v24 = vunpack.c.3.s8 %v787_v41  ;;  %v1187_v15 = vunpack.c.2.s8 %v819_v54 }
 0x2ef   : > { %v3235_v29 = vpack.c.bf16 %v2363_v27, %v2355_v38  ;;  %v3299_v17 = vpack.c.bf16 %v2491_v58, %v2483_v20  ;;  %v2083_v32 = vcvt.s32.f32 %v1059_v37  ;;  %v1195_v33 = vunpack.c.3.s8 %v819_v54  ;;  %v1035_v38 = vld [vmem:[%s8800_s10 + $0x7f8] sm:$0xff] }
 0x2f0   : > { %4382 = vmatpush.bf16.msra.mxu1 %v3171_v19  ;;  %v4472_v35 = vadd.f32 %v4153_v14, %v3600_v16  ;;  %v2091_v53 = vcvt.s32.f32 %v1067_v24  ;;  %v2211_v22 = vcvt.s32.f32 %v1187_v15  ;;  %v1315_v9 = vunpack.c.2.s8 %v851_v30 }
 0x2f1   : > { %4395 = vmatpush.bf16.msra.mxu2 %v3235_v29  ;;  %4408 = vmatpush.bf16.msra.mxu3 %v3299_v17  ;;  %v2219_v11 = vcvt.s32.f32 %v1195_v33  ;;  %v1323_v44 = vunpack.c.3.s8 %v851_v30  ;;  %v1443_v46 = vunpack.c.2.s8 %v883_v31  ;;  %v1451_v48 = vunpack.c.3.s8 %v883_v31 }
 0x2f2   : > { %4480 = vst [vmem:[#allocation2 + $0x8] sm:$0xff] %v4472_v35  ;;  %v3099_v47 = vpack.c.bf16 %v2091_v53, %v2083_v32  ;;  %v2339_v59 = vcvt.s32.f32 %v1315_v9  ;;  %v1043_v45 = vunpack.c.0.s8 %v787_v41  ;;  %v1051_v49 = vunpack.c.1.s8 %v787_v41 }
 0x2f3   : > { %v3163_v23 = vpack.c.bf16 %v2219_v11, %v2211_v22  ;;  %v2347_v26 = vcvt.s32.f32 %v1323_v44  ;;  %v2467_v28 = vcvt.s32.f32 %v1443_v46  ;;  %v2475_v10 = vcvt.s32.f32 %v1451_v48 }
 0x2f4   : > { %4370 = vmatpush.bf16.msra.mxu0 %v3099_v47  ;;  %v2067_v8 = vcvt.s32.f32 %v1043_v45  ;;  %v2075_v50 = vcvt.s32.f32 %v1051_v49  ;;  %v1171_v56 = vunpack.c.0.s8 %v819_v54  ;;  %v1179_v51 = vunpack.c.1.s8 %v819_v54 }
 0x2f5   : > { %4383 = vmatpush.bf16.msra.mxu1 %v3163_v23  ;;  %v3227_v39 = vpack.c.bf16 %v2347_v26, %v2339_v59  ;;  %v3291_v61 = vpack.c.bf16 %v2475_v10, %v2467_v28  ;;  %v1299_v63 = vunpack.c.0.s8 %v851_v30  ;;  %v1307_v1 = vunpack.c.1.s8 %v851_v30  ;;  %v963_v10 = vld [vmem:[%s8800_s10 + $0x5b8] sm:$0xff] }
 0x2f6   : > { %v3091_v3 = vpack.c.bf16 %v2075_v50, %v2067_v8  ;;  %v2195_v4 = vcvt.s32.f32 %v1171_v56  ;;  %v2203_v6 = vcvt.s32.f32 %v1179_v51  ;;  %v1427_v7 = vunpack.c.0.s8 %v883_v31  ;;  %v995_v51 = vld [vmem:[%s8800_s10 + $0x6b8] sm:$0xff] }
 0x2f7   : > { %4396 = vmatpush.bf16.msra.mxu2 %v3227_v39  ;;  %4409 = vmatpush.bf16.msra.mxu3 %v3291_v61  ;;  %v2323_v21 = vcvt.s32.f32 %v1299_v63  ;;  %v2331_v41 = vcvt.s32.f32 %v1307_v1  ;;  %v1435_v18 = vunpack.c.1.s8 %v883_v31  ;;  %v1667_v42 = vunpack.c.2.s8 %v939_v52  ;;  %v1027_v1 = vld [vmem:[%s8800_s10 + $0x7b8] sm:$0xff] }
 0x2f8   : > { %4371 = vmatpush.bf16.msra.mxu0 %v3091_v3  ;;  %v3155_v13 = vpack.c.bf16 %v2203_v6, %v2195_v4  ;;  %v2451_v54 = vcvt.s32.f32 %v1427_v7  ;;  %v1675_v55 = vunpack.c.3.s8 %v939_v52  ;;  %v1795_v25 = vunpack.c.2.s8 %v971_v2 }
 0x2f9   : > { %v3219_v57 = vpack.c.bf16 %v2331_v41, %v2323_v21  ;;  %v2459_v27 = vcvt.s32.f32 %v1435_v18  ;;  %v2691_v20 = vcvt.s32.f32 %v1667_v42  ;;  %v1803_v58 = vunpack.c.3.s8 %v971_v2  ;;  %v9325_v18 = vpop.f32.mrf.mxu0 }
 0x2fa   : > { %4384 = vmatpush.bf16.msra.mxu1 %v3155_v13  ;;  %v2699_v16 = vcvt.s32.f32 %v1675_v55  ;;  %v2819_v37 = vcvt.s32.f32 %v1795_v25  ;;  %v1923_v30 = vunpack.c.2.s8 %v1003_v12  ;;  %v1931_v19 = vunpack.c.3.s8 %v1003_v12 }
 0x2fb   : > { %4397 = vmatpush.bf16.msra.mxu2 %v3219_v57  ;;  %v3283_v14 = vpack.c.bf16 %v2459_v27, %v2451_v54  ;;  %v2827_v24 = vcvt.s32.f32 %v1803_v58  ;;  %v2051_v15 = vunpack.c.2.s8 %v1035_v38  ;;  %v2059_v31 = vunpack.c.3.s8 %v1035_v38  ;;  %4372 = vmatmul.bf16.vlgmr.msra.gmra.mxu0 %v8867_v60  ;;  %v931_v60 = vld [vmem:[%s8800_s10 + $0x4b8] sm:$0xff] }
 0x2fc   : > { %v3403_v29 = vpack.c.bf16 %v2699_v16, %v2691_v20  ;;  %v2947_v17 = vcvt.s32.f32 %v1923_v30  ;;  %v2955_v32 = vcvt.s32.f32 %v1931_v19  ;;  %v1651_v33 = vunpack.c.0.s8 %v939_v52  ;;  %v9329_v30 = vpop.f32.mrf.mxu2 }
 0x2fd   : > { %4410 = vmatpush.bf16.msra.mxu3 %v3283_v14  ;;  %v3467_v35 = vpack.c.bf16 %v2827_v24, %v2819_v37  ;;  %v3075_v53 = vcvt.s32.f32 %v2051_v15  ;;  %v3083_v22 = vcvt.s32.f32 %v2059_v31  ;;  %v1659_v9 = vunpack.c.1.s8 %v939_v52  ;;  %4385 = vmatmul.bf16.vlgmr.msra.gmra.mxu1 %v8874_v5  ;;  %v9327_v37 = vpop.f32.mrf.mxu1  ;;  %v923_v31 = vld [vmem:[%s8800_s10 + $0x478] sm:$0xff] }
 0x2fe   : > { %4416 = vmatpush.bf16.msrb.mxu0 %v3403_v29  ;;  %v3531_v11 = vpack.c.bf16 %v2955_v32, %v2947_v17  ;;  %v2675_v44 = vcvt.s32.f32 %v1651_v33  ;;  %v1779_v46 = vunpack.c.0.s8 %v971_v2  ;;  %v1787_v48 = vunpack.c.1.s8 %v971_v2  ;;  %4398 = vmatmul.bf16.vlgmr.msra.gmra.mxu2 %v8861_v36  ;;  %v9332_v29 = vpop.f32.mrf.mxu3 }
 0x2ff   : > { %4429 = vmatpush.bf16.msrb.mxu1 %v3467_v35  ;;  %v3595_v47 = vpack.c.bf16 %v3083_v22, %v3075_v53  ;;  %v2683_v59 = vcvt.s32.f32 %v1659_v9  ;;  %v1907_v45 = vunpack.c.0.s8 %v1003_v12  ;;  %v1915_v49 = vunpack.c.1.s8 %v1003_v12 }
 0x300   : > { %4442 = vmatpush.bf16.msrb.mxu2 %v3531_v11  ;;  %v2803_v23 = vcvt.s32.f32 %v1779_v46  ;;  %v2811_v26 = vcvt.s32.f32 %v1787_v48  ;;  %v2035_v5 = vunpack.c.0.s8 %v1035_v38  ;;  %v2043_v28 = vunpack.c.1.s8 %v1035_v38  ;;  %4411 = vmatmul.bf16.vlgmr.msra.gmra.mxu3 %v8870_v0 }
 0x301   : > { %4455 = vmatpush.bf16.msrb.mxu3 %v3595_v47  ;;  %v3395_v8 = vpack.c.bf16 %v2683_v59, %v2675_v44  ;;  %v2931_v50 = vcvt.s32.f32 %v1907_v45  ;;  %v2939_v36 = vcvt.s32.f32 %v1915_v49  ;;  %v1635_v56 = vunpack.c.2.s8 %v931_v60  ;;  %v955_v44 = vld [vmem:[%s8800_s10 + $0x578] sm:$0xff] }
 0x302   : > { %v3459_v52 = vpack.c.bf16 %v2811_v26, %v2803_v23  ;;  %v3059_v39 = vcvt.s32.f32 %v2035_v5  ;;  %v3067_v61 = vcvt.s32.f32 %v2043_v28  ;;  %v1643_v63 = vunpack.c.3.s8 %v931_v60  ;;  %v987_v59 = vld [vmem:[%s8800_s10 + $0x678] sm:$0xff]  ;;  %v4167_v28 = vpop.f32.mrf.mxu0 }
 0x303   : > { %4417 = vmatpush.bf16.msrb.mxu0 %v3395_v8  ;;  %v3523_v2 = vpack.c.bf16 %v2939_v36, %v2931_v50  ;;  %v2659_v3 = vcvt.s32.f32 %v1635_v56  ;;  %v1763_v4 = vunpack.c.2.s8 %v963_v10  ;;  %v1771_v6 = vunpack.c.3.s8 %v963_v10  ;;  %v1019_v5 = vld [vmem:[%s8800_s10 + $0x778] sm:$0xff] }
 0x304   : > { %4430 = vmatpush.bf16.msrb.mxu1 %v3459_v52  ;;  %v3587_v7 = vpack.c.bf16 %v3067_v61, %v3059_v39  ;;  %v2667_v0 = vcvt.s32.f32 %v1643_v63  ;;  %v1891_v21 = vunpack.c.2.s8 %v995_v51  ;;  %v1899_v41 = vunpack.c.3.s8 %v995_v51 }
 0x305   : > { %4443 = vmatpush.bf16.msrb.mxu2 %v3523_v2  ;;  %v2787_v42 = vcvt.s32.f32 %v1763_v4  ;;  %v2795_v12 = vcvt.s32.f32 %v1771_v6  ;;  %v2019_v13 = vunpack.c.2.s8 %v1027_v1  ;;  %v2027_v54 = vunpack.c.3.s8 %v1027_v1  ;;  %v4193_v4 = vpop.f32.mrf.mxu2 }
 0x306   : > { %4456 = vmatpush.bf16.msrb.mxu3 %v3587_v7  ;;  %v3387_v55 = vpack.c.bf16 %v2667_v0, %v2659_v3  ;;  %v2915_v25 = vcvt.s32.f32 %v1891_v21  ;;  %v2923_v38 = vcvt.s32.f32 %v1899_v41  ;;  %v1619_v57 = vunpack.c.0.s8 %v931_v60  ;;  %v4180_v3 = vpop.f32.mrf.mxu1  ;;  %v4206_v41 = vpop.f32.mrf.mxu3 }
 0x307   : > { %v3451_v27 = vpack.c.bf16 %v2795_v12, %v2787_v42  ;;  %v3043_v20 = vcvt.s32.f32 %v2019_v13  ;;  %v3051_v58 = vcvt.s32.f32 %v2027_v54  ;;  %v1627_v16 = vunpack.c.1.s8 %v931_v60 }
 0x308   : > { %4418 = vmatpush.bf16.msrb.mxu0 %v3387_v55  ;;  %v3515_v19 = vpack.c.bf16 %v2923_v38, %v2915_v25  ;;  %v2643_v14 = vcvt.s32.f32 %v1619_v57  ;;  %v1747_v24 = vunpack.c.0.s8 %v963_v10  ;;  %v1755_v15 = vunpack.c.1.s8 %v963_v10 }
 0x309   : > { %4431 = vmatpush.bf16.msrb.mxu1 %v3451_v27  ;;  %v3579_v17 = vpack.c.bf16 %v3051_v58, %v3043_v20  ;;  %v2651_v32 = vcvt.s32.f32 %v1627_v16  ;;  %v1875_v33 = vunpack.c.0.s8 %v995_v51  ;;  %v1883_v35 = vunpack.c.1.s8 %v995_v51  ;;  %v915_v27 = vld [vmem:[%s8800_s10 + $0x438] sm:$0xff] }
 0x30a   : > { %4444 = vmatpush.bf16.msrb.mxu2 %v3515_v19  ;;  %v2771_v53 = vcvt.s32.f32 %v1747_v24  ;;  %v2779_v22 = vcvt.s32.f32 %v1755_v15  ;;  %v2003_v9 = vunpack.c.0.s8 %v1027_v1  ;;  %v2011_v11 = vunpack.c.1.s8 %v1027_v1 }
 0x30b   : > { %4457 = vmatpush.bf16.msrb.mxu3 %v3579_v17  ;;  %v3379_v46 = vpack.c.bf16 %v2651_v32, %v2643_v14  ;;  %v2899_v48 = vcvt.s32.f32 %v1875_v33  ;;  %v2907_v60 = vcvt.s32.f32 %v1883_v35  ;;  %v1603_v47 = vunpack.c.2.s8 %v923_v31  ;;  %v9339_v32 = vpop.f32.mrf.mxu0 }
 0x30c   : > { %v3443_v45 = vpack.c.bf16 %v2779_v22, %v2771_v53  ;;  %v3027_v49 = vcvt.s32.f32 %v2003_v9  ;;  %v3035_v23 = vcvt.s32.f32 %v2011_v11  ;;  %v1611_v26 = vunpack.c.3.s8 %v923_v31  ;;  %v979_v9 = vld [vmem:[%s8800_s10 + $0x638] sm:$0xff] }
 0x30d   : > { %4419 = vmatpush.bf16.msrb.mxu0 %v3379_v46  ;;  %v3507_v10 = vpack.c.bf16 %v2907_v60, %v2899_v48  ;;  %v2627_v8 = vcvt.s32.f32 %v1603_v47  ;;  %v1731_v50 = vunpack.c.2.s8 %v955_v44  ;;  %v1739_v36 = vunpack.c.3.s8 %v955_v44  ;;  %v1011_v60 = vld [vmem:[%s8800_s10 + $0x738] sm:$0xff] }
 0x30e   : > { %4432 = vmatpush.bf16.msrb.mxu1 %v3443_v45  ;;  %v3571_v56 = vpack.c.bf16 %v3035_v23, %v3027_v49  ;;  %v2635_v51 = vcvt.s32.f32 %v1611_v26  ;;  %v1859_v52 = vunpack.c.2.s8 %v987_v59  ;;  %v1867_v39 = vunpack.c.3.s8 %v987_v59  ;;  %v9343_v23 = vpop.f32.mrf.mxu1  ;;  %v9345_v26 = vpop.f32.mrf.mxu2 }
 0x30f   : > { %4445 = vmatpush.bf16.msrb.mxu2 %v3507_v10  ;;  %v2755_v61 = vcvt.s32.f32 %v1731_v50  ;;  %v2763_v63 = vcvt.s32.f32 %v1739_v36  ;;  %v1987_v1 = vunpack.c.2.s8 %v1019_v5  ;;  %v1995_v2 = vunpack.c.3.s8 %v1019_v5  ;;  %v4256_v50 = vpop.f32.mrf.mxu3 }
 0x310   : > { %4458 = vmatpush.bf16.msrb.mxu3 %v3571_v56  ;;  %v3371_v6 = vpack.c.bf16 %v2635_v51, %v2627_v8  ;;  %v2883_v7 = vcvt.s32.f32 %v1859_v52  ;;  %v2891_v0 = vcvt.s32.f32 %v1867_v39  ;;  %v1587_v21 = vunpack.c.0.s8 %v923_v31 }
 0x311   : > { %v3435_v42 = vpack.c.bf16 %v2763_v63, %v2755_v61  ;;  %v3011_v12 = vcvt.s32.f32 %v1987_v1  ;;  %v3019_v13 = vcvt.s32.f32 %v1995_v2  ;;  %v1595_v54 = vunpack.c.1.s8 %v923_v31  ;;  %v947_v31 = vld [vmem:[%s8800_s10 + $0x538] sm:$0xff] }
 0x312   : > { %4420 = vmatpush.bf16.msrb.mxu0 %v3371_v6  ;;  %v3499_v55 = vpack.c.bf16 %v2891_v0, %v2883_v7  ;;  %v2611_v25 = vcvt.s32.f32 %v1587_v21  ;;  %v1715_v38 = vunpack.c.0.s8 %v955_v44  ;;  %v1723_v57 = vunpack.c.1.s8 %v955_v44 }
 0x313   : > { %4433 = vmatpush.bf16.msrb.mxu1 %v3435_v42  ;;  %v3563_v20 = vpack.c.bf16 %v3019_v13, %v3011_v12  ;;  %v2619_v58 = vcvt.s32.f32 %v1595_v54  ;;  %v1843_v16 = vunpack.c.0.s8 %v987_v59  ;;  %v1851_v19 = vunpack.c.1.s8 %v987_v59  ;;  %v4219_v42 = vpop.f32.mrf.mxu0 }
 0x314   : > { %4446 = vmatpush.bf16.msrb.mxu2 %v3499_v55  ;;  %v2739_v14 = vcvt.s32.f32 %v1715_v38  ;;  %v2747_v24 = vcvt.s32.f32 %v1723_v57  ;;  %v1971_v15 = vunpack.c.0.s8 %v1019_v5  ;;  %v1979_v17 = vunpack.c.1.s8 %v1019_v5 }
 0x315   : > { %4459 = vmatpush.bf16.msrb.mxu3 %v3563_v20  ;;  %v3363_v33 = vpack.c.bf16 %v2619_v58, %v2611_v25  ;;  %v2867_v35 = vcvt.s32.f32 %v1843_v16  ;;  %v2875_v53 = vcvt.s32.f32 %v1851_v19  ;;  %v1571_v22 = vunpack.c.2.s8 %v915_v27 }
 0x316   : > { %v3427_v11 = vpack.c.bf16 %v2747_v24, %v2739_v14  ;;  %v2995_v44 = vcvt.s32.f32 %v1971_v15  ;;  %v3003_v46 = vcvt.s32.f32 %v1979_v17  ;;  %v1579_v48 = vunpack.c.3.s8 %v915_v27  ;;  %v4232_v14 = vpop.f32.mrf.mxu1  ;;  %v4245_v24 = vpop.f32.mrf.mxu2 }
 0x317   : > { %4421 = vmatpush.bf16.msrb.mxu0 %v3363_v33  ;;  %v3491_v47 = vpack.c.bf16 %v2875_v53, %v2867_v35  ;;  %v2595_v59 = vcvt.s32.f32 %v1571_v22  ;;  %v1699_v45 = vunpack.c.2.s8 %v947_v31  ;;  %v1707_v49 = vunpack.c.3.s8 %v947_v31  ;;  %v4258_v33 = vpop.f32.mrf.mxu3 }
 0x318   : > { %4434 = vmatpush.bf16.msrb.mxu1 %v3427_v11  ;;  %v3555_v5 = vpack.c.bf16 %v3003_v46, %v2995_v44  ;;  %v2603_v28 = vcvt.s32.f32 %v1579_v48  ;;  %v1827_v10 = vunpack.c.2.s8 %v979_v9  ;;  %v1835_v8 = vunpack.c.3.s8 %v979_v9  ;;  %v3601_v46 = vld [vmem:[#allocation2 + $0x20] sm:$0xff] }
 0x319   : > { %4447 = vmatpush.bf16.msrb.mxu2 %v3491_v47  ;;  %v2723_v36 = vcvt.s32.f32 %v1699_v45  ;;  %v2731_v56 = vcvt.s32.f32 %v1707_v49  ;;  %v1955_v51 = vunpack.c.2.s8 %v1011_v60  ;;  %v1963_v52 = vunpack.c.3.s8 %v1011_v60 }
 0x31a   : > { %4460 = vmatpush.bf16.msrb.mxu3 %v3555_v5  ;;  %v3355_v39 = vpack.c.bf16 %v2603_v28, %v2595_v59  ;;  %v2851_v61 = vcvt.s32.f32 %v1827_v10  ;;  %v2859_v63 = vcvt.s32.f32 %v1835_v8  ;;  %v1555_v1 = vunpack.c.0.s8 %v915_v27 }
 0x31b   : > { %v3419_v2 = vpack.c.bf16 %v2731_v56, %v2723_v36  ;;  %v2979_v3 = vcvt.s32.f32 %v1955_v51  ;;  %v2987_v4 = vcvt.s32.f32 %v1963_v52  ;;  %v1563_v6 = vunpack.c.1.s8 %v915_v27  ;;  %v3602_v56 = vld [vmem:[#allocation2 + $0x28] sm:$0xff] }
 0x31c   : > { %4422 = vmatpush.bf16.msrb.mxu0 %v3355_v39  ;;  %v3483_v7 = vpack.c.bf16 %v2859_v63, %v2851_v61  ;;  %v2579_v0 = vcvt.s32.f32 %v1555_v1  ;;  %v1683_v21 = vunpack.c.0.s8 %v947_v31  ;;  %v1691_v41 = vunpack.c.1.s8 %v947_v31 }
 0x31d   : > { %4435 = vmatpush.bf16.msrb.mxu1 %v3419_v2  ;;  %v3547_v12 = vpack.c.bf16 %v2987_v4, %v2979_v3  ;;  %v2587_v13 = vcvt.s32.f32 %v1563_v6  ;;  %v1811_v54 = vunpack.c.0.s8 %v979_v9  ;;  %v1819_v55 = vunpack.c.1.s8 %v979_v9 }
 0x31e   : > { %4448 = vmatpush.bf16.msrb.mxu2 %v3483_v7  ;;  %v2707_v25 = vcvt.s32.f32 %v1683_v21  ;;  %v2715_v38 = vcvt.s32.f32 %v1691_v41  ;;  %v1939_v57 = vunpack.c.0.s8 %v1011_v60  ;;  %v1947_v20 = vunpack.c.1.s8 %v1011_v60 }
 0x31f   : > { %4461 = vmatpush.bf16.msrb.mxu3 %v3547_v12  ;;  %v3347_v58 = vpack.c.bf16 %v2587_v13, %v2579_v0  ;;  %v2835_v16 = vcvt.s32.f32 %v1811_v54  ;;  %v2843_v27 = vcvt.s32.f32 %v1819_v55  ;;  %v4179_v19 = vadd.f32 %v9327_v37, %v9325_v18 }
 0x320   : > { %v3411_v15 = vpack.c.bf16 %v2715_v38, %v2707_v25  ;;  %v2963_v17 = vcvt.s32.f32 %v1939_v57  ;;  %v2971_v31 = vcvt.s32.f32 %v1947_v20 }
 0x321   : > { %4423 = vmatpush.bf16.msrb.mxu0 %v3347_v58  ;;  %v3475_v35 = vpack.c.bf16 %v2843_v27, %v2835_v16  ;;  %v4192_v53 = vadd.f32 %v9329_v30, %v4179_v19  ;;  %v3603_v16 = vld [vmem:[#allocation2 + $0x38] sm:$0xff] }
 0x322   : > { %4436 = vmatpush.bf16.msrb.mxu1 %v3411_v15  ;;  %v3539_v22 = vpack.c.bf16 %v2971_v31, %v2963_v17 }
 0x323   : > { %4449 = vmatpush.bf16.msrb.mxu2 %v3475_v35  ;;  %v4205_v9 = vadd.f32 %v9332_v29, %v4192_v53 }
 0x324   : > { %4462 = vmatpush.bf16.msrb.mxu3 %v3539_v22  ;;  %4424 = vmatmul.bf16.vlgmr.msrb.gmra.mxu0 %v8890_v40 }
 0x325   : > { %4437 = vmatmul.bf16.vlgmr.msrb.gmra.mxu1 %v8897_v62  ;;  %v4218_v18 = vadd.f32 %v9339_v32, %v4205_v9 }
 0x326   : > { %4450 = vmatmul.bf16.vlgmr.msrb.gmra.mxu2 %v8887_v34  ;;  %v4269_v37 = vpop.f32.mrf.mxu0 }
 0x327   : > { %4463 = vmatmul.bf16.vlgmr.msrb.gmra.mxu3 %v8892_v43  ;;  %v4231_v11 = vadd.f32 %v9343_v23, %v4218_v18 }
 0x328   : > { %v4282_v30 = vpop.f32.mrf.mxu1 }
 0x329   : > { %v4244_v44 = vadd.f32 %v9345_v26, %v4231_v11  ;;  %v4283_v45 = vadd.f32 %v4282_v30, %v4269_v37 }
 0x32b   : > { %v4257_v48 = vadd.f32 %v4256_v50, %v4244_v44 }
 0x32d   : > { %v4473_v29 = vadd.f32 %v4257_v48, %v3601_v46 }
 0x32e   : > { %v4271_v60 = vpop.f32.mrf.mxu0 }
 0x32f   : > { %4481 = vst [vmem:[#allocation2 + $0x20] sm:$0xff] %v4473_v29  ;;  %v4295_v40 = vpop.f32.mrf.mxu2 }
 0x330   : > { %v4284_v47 = vpop.f32.mrf.mxu1  ;;  %v4296_v34 = vadd.f32 %v4295_v40, %v4283_v45 }
 0x331   : > { %v4308_v62 = vpop.f32.mrf.mxu3 }
 0x332   : > { %v4309_v49 = vadd.f32 %v4308_v62, %v4296_v34 }
 0x337   : > { %v4297_v59 = vpop.f32.mrf.mxu2 }
 0x339   : > { %v4310_v32 = vpop.f32.mrf.mxu3 }
 0x34f   : > { %v4321_v5 = vpop.f32.mrf.mxu0 }
 0x350   : > { %v4322_v43 = vadd.f32 %v4321_v5, %v4309_v49  ;;  %v4334_v28 = vpop.f32.mrf.mxu1 }
 0x352   : > { %v4335_v23 = vadd.f32 %v4334_v28, %v4322_v43 }
 0x357   : > { %v4347_v10 = vpop.f32.mrf.mxu2  ;;  %v4323_v8 = vpop.f32.mrf.mxu0 }
 0x358   : > { %v4348_v26 = vadd.f32 %v4347_v10, %v4335_v23  ;;  %v4360_v36 = vpop.f32.mrf.mxu3  ;;  %v4336_v50 = vpop.f32.mrf.mxu1 }
 0x35a   : > { %v4361_v51 = vadd.f32 %v4360_v36, %v4348_v26 }
 0x35c   : > { %v4474_v52 = vadd.f32 %v4361_v51, %v3602_v56 }
 0x35e   : > { %4482 = vst [vmem:[#allocation2 + $0x28] sm:$0xff] %v4474_v52 }
 0x35f   : > { %v4349_v39 = vpop.f32.mrf.mxu2 }
 0x360   : > { %v4362_v61 = vpop.f32.mrf.mxu3 }
 0x378   : > { %v4373_v63 = vpop.f32.mrf.mxu0 }
 0x37a   : > { %v4386_v1 = vpop.f32.mrf.mxu1 }
 0x37b   : > { %v4387_v21 = vadd.f32 %v4386_v1, %v4373_v63 }
 0x380   : > { %v4375_v2 = vpop.f32.mrf.mxu0 }
 0x381   : > { %v4399_v3 = vpop.f32.mrf.mxu2 }
 0x382   : > { %v4388_v4 = vpop.f32.mrf.mxu1  ;;  %v4400_v41 = vadd.f32 %v4399_v3, %v4387_v21 }
 0x383   : > { %v4412_v6 = vpop.f32.mrf.mxu3 }
 0x384   : > { %v4413_v12 = vadd.f32 %v4412_v6, %v4400_v41 }
 0x389   : > { %v4401_v7 = vpop.f32.mrf.mxu2 }
 0x38b   : > { %v4414_v0 = vpop.f32.mrf.mxu3 }
 0x3a1   : > { %v4425_v42 = vpop.f32.mrf.mxu0 }
 0x3a2   : > { %v4438_v13 = vpop.f32.mrf.mxu1  ;;  %v4426_v54 = vadd.f32 %v4425_v42, %v4413_v12 }
 0x3a4   : > { %v4439_v55 = vadd.f32 %v4438_v13, %v4426_v54 }
 0x3a9   : > { %v4451_v25 = vpop.f32.mrf.mxu2  ;;  %v4427_v38 = vpop.f32.mrf.mxu0 }
 0x3aa   : > { %v4452_v57 = vadd.f32 %v4451_v25, %v4439_v55  ;;  %v4464_v20 = vpop.f32.mrf.mxu3  ;;  %v4440_v58 = vpop.f32.mrf.mxu1 }
 0x3ac   : > { %v4465_v27 = vadd.f32 %v4464_v20, %v4452_v57 }
 0x3ae   : > { %v4475_v19 = vadd.f32 %v4465_v27, %v3603_v16  ;;  %4487 = sbr.rel (%p6677_p1) target bundleno = 2084 (0x824), region = 132 }
 0x3b0   : > { %4483 = vst [vmem:[#allocation2 + $0x38] sm:$0xff] %v4475_v19 }
 0x3b1   : > { %v4453_v14 = vpop.f32.mrf.mxu2 }
 0x3b2   : > { %v4466_v24 = vpop.f32.mrf.mxu3 }
 0x3b3   : > { %v6736_v15 = vld [vmem:[#allocation12 + $0x70] sm:$0xf]  ;;  %v7541_v17 = vld [vmem:[#allocation12 + $0x74] sm:$0xf0]  ;;  %v6728_v30 = vld [vmem:[#allocation12 + $0x60] sm:$0xf] }
 0x3b4   : > { %v6800_v31 = vld [vmem:[#allocation12 + $0xf0] sm:$0xf]  ;;  %v6737_v33 = vor.u32 %v7541_v17, %v6736_v15  ;;  %v7557_v35 = vld [vmem:[#allocation12 + $0xf4] sm:$0xf0]  ;;  %v7539_v46 = vld [vmem:[#allocation12 + $0x64] sm:$0xf0] }
 0x3b5   : > { %v6864_v53 = vld [vmem:[#allocation12 + $0x170] sm:$0xf]  ;;  %v7573_v22 = vld [vmem:[#allocation12 + $0x174] sm:$0xf0]  ;;  %v6801_v9 = vor.u32 %v7557_v35, %v6800_v31  ;;  %v6792_v48 = vld [vmem:[#allocation12 + $0xe0] sm:$0xf]  ;;  %v6729_v60 = vor.u32 %v7539_v46, %v6728_v30 }
 0x3b6   : > { %v6865_v18 = vor.u32 %v7573_v22, %v6864_v53  ;;  %v6928_v37 = vld [vmem:[#allocation12 + $0x1f0] sm:$0xf]  ;;  %v7589_v11 = vld [vmem:[#allocation12 + $0x1f4] sm:$0xf0]  ;;  %5330 = vmatpush.bf16.msra.mxu0 %v6737_v33  ;;  %v7555_v29 = vld [vmem:[#allocation12 + $0xe4] sm:$0xf0] }
 0x3b7   : > { %v6929_v44 = vor.u32 %v7589_v11, %v6928_v37  ;;  %5343 = vmatpush.bf16.msra.mxu1 %v6801_v9  ;;  %v6793_v40 = vor.u32 %v7555_v29, %v6792_v48  ;;  %v6856_v47 = vld [vmem:[#allocation12 + $0x160] sm:$0xf]  ;;  %v7571_v62 = vld [vmem:[#allocation12 + $0x164] sm:$0xf0]  ;;  %v6720_v34 = vld [vmem:[#allocation12 + $0x50] sm:$0xf] }
 0x3b8   : > { %5356 = vmatpush.bf16.msra.mxu2 %v6865_v18  ;;  %v6920_v59 = vld [vmem:[#allocation12 + $0x1e0] sm:$0xf]  ;;  %v6857_v32 = vor.u32 %v7571_v62, %v6856_v47  ;;  %v7587_v45 = vld [vmem:[#allocation12 + $0x1e4] sm:$0xf0]  ;;  %v7537_v49 = vld [vmem:[#allocation12 + $0x54] sm:$0xf0] }
 0x3b9   : > { %5369 = vmatpush.bf16.msra.mxu3 %v6929_v44  ;;  %v6921_v5 = vor.u32 %v7587_v45, %v6920_v59  ;;  %v6784_v43 = vld [vmem:[#allocation12 + $0xd0] sm:$0xf]  ;;  %v7553_v28 = vld [vmem:[#allocation12 + $0xd4] sm:$0xf0]  ;;  %v6721_v10 = vor.u32 %v7537_v49, %v6720_v34  ;;  %v6712_v51 = vld [vmem:[#allocation12 + $0x40] sm:$0xf] }
 0x3ba   : > { %v6848_v23 = vld [vmem:[#allocation12 + $0x150] sm:$0xf]  ;;  %5331 = vmatpush.bf16.msra.mxu0 %v6729_v60  ;;  %v7569_v8 = vld [vmem:[#allocation12 + $0x154] sm:$0xf0]  ;;  %v6785_v50 = vor.u32 %v7553_v28, %v6784_v43  ;;  %v7535_v52 = vld [vmem:[#allocation12 + $0x44] sm:$0xf0] }
 0x3bb   : > { %v6912_v26 = vld [vmem:[#allocation12 + $0x1d0] sm:$0xf]  ;;  %v7585_v36 = vld [vmem:[#allocation12 + $0x1d4] sm:$0xf0]  ;;  %5344 = vmatpush.bf16.msra.mxu1 %v6793_v40  ;;  %v6849_v56 = vor.u32 %v7569_v8, %v6848_v23  ;;  %v6776_v39 = vld [vmem:[#allocation12 + $0xc0] sm:$0xf]  ;;  %v6713_v6 = vor.u32 %v7535_v52, %v6712_v51 }
 0x3bc   : > { %5357 = vmatpush.bf16.msra.mxu2 %v6857_v32  ;;  %v6913_v61 = vor.u32 %v7585_v36, %v6912_v26  ;;  %v7551_v63 = vld [vmem:[#allocation12 + $0xc4] sm:$0xf0]  ;;  %v6840_v1 = vld [vmem:[#allocation12 + $0x140] sm:$0xf]  ;;  %v6704_v21 = vld [vmem:[#allocation12 + $0x30] sm:$0xf] }
 0x3bd   : > { %5370 = vmatpush.bf16.msra.mxu3 %v6921_v5  ;;  %v7567_v2 = vld [vmem:[#allocation12 + $0x144] sm:$0xf0]  ;;  %v6904_v3 = vld [vmem:[#allocation12 + $0x1c0] sm:$0xf]  ;;  %v6777_v7 = vor.u32 %v7551_v63, %v6776_v39  ;;  %v7533_v41 = vld [vmem:[#allocation12 + $0x34] sm:$0xf0] }
 0x3be   : > { %v7583_v4 = vld [vmem:[#allocation12 + $0x1c4] sm:$0xf0]  ;;  %5332 = vmatpush.bf16.msra.mxu0 %v6721_v10  ;;  %v6841_v0 = vor.u32 %v7567_v2, %v6840_v1  ;;  %v6768_v42 = vld [vmem:[#allocation12 + $0xb0] sm:$0xf]  ;;  %v7549_v13 = vld [vmem:[#allocation12 + $0xb4] sm:$0xf0]  ;;  %v6705_v57 = vor.u32 %v7533_v41, %v6704_v21 }
 0x3bf   : > { %5345 = vmatpush.bf16.msra.mxu1 %v6785_v50  ;;  %v6905_v12 = vor.u32 %v7583_v4, %v6904_v3  ;;  %v6832_v54 = vld [vmem:[#allocation12 + $0x130] sm:$0xf]  ;;  %v7565_v55 = vld [vmem:[#allocation12 + $0x134] sm:$0xf0]  ;;  %v6769_v20 = vor.u32 %v7549_v13, %v6768_v42  ;;  %v6696_v16 = vld [vmem:[#allocation12 + $0x20] sm:$0xf] }
 0x3c0   : > { %5358 = vmatpush.bf16.msra.mxu2 %v6849_v56  ;;  %v6896_v25 = vld [vmem:[#allocation12 + $0x1b0] sm:$0xf]  ;;  %v7581_v38 = vld [vmem:[#allocation12 + $0x1b4] sm:$0xf0]  ;;  %v6833_v58 = vor.u32 %v7565_v55, %v6832_v54  ;;  %v7531_v27 = vld [vmem:[#allocation12 + $0x24] sm:$0xf0] }
 0x3c1   : > { %5371 = vmatpush.bf16.msra.mxu3 %v6913_v61  ;;  %v6760_v19 = vld [vmem:[#allocation12 + $0xa0] sm:$0xf]  ;;  %v6897_v14 = vor.u32 %v7581_v38, %v6896_v25  ;;  %v7547_v24 = vld [vmem:[#allocation12 + $0xa4] sm:$0xf0]  ;;  %v6697_v35 = vor.u32 %v7531_v27, %v6696_v16  ;;  %v6688_v9 = vld [vmem:[#allocation12 + $0x10] sm:$0xf] }
 0x3c2   : > { %5333 = vmatpush.bf16.msra.mxu0 %v6713_v6  ;;  %v6824_v15 = vld [vmem:[#allocation12 + $0x120] sm:$0xf]  ;;  %v7563_v17 = vld [vmem:[#allocation12 + $0x124] sm:$0xf0]  ;;  %v6761_v53 = vor.u32 %v7547_v24, %v6760_v19  ;;  %v7529_v18 = vld [vmem:[#allocation12 + $0x14] sm:$0xf0] }
 0x3c3   : > { %5346 = vmatpush.bf16.msra.mxu1 %v6777_v7  ;;  %v6888_v31 = vld [vmem:[#allocation12 + $0x1a0] sm:$0xf]  ;;  %v7579_v33 = vld [vmem:[#allocation12 + $0x1a4] sm:$0xf0]  ;;  %v6825_v22 = vor.u32 %v7563_v17, %v6824_v15  ;;  %v6752_v37 = vld [vmem:[#allocation12 + $0x90] sm:$0xf]  ;;  %v6689_v60 = vor.u32 %v7529_v18, %v6688_v9 }
 0x3c4   : > { %5359 = vmatpush.bf16.msra.mxu2 %v6841_v0  ;;  %v6889_v11 = vor.u32 %v7579_v33, %v6888_v31  ;;  %v7545_v30 = vld [vmem:[#allocation12 + $0x94] sm:$0xf0]  ;;  %v6816_v44 = vld [vmem:[#allocation12 + $0x110] sm:$0xf]  ;;  %v6680_v40 = vld [vmem:[#allocation12] sm:$0xf] }
 0x3c5   : > { %5372 = vmatpush.bf16.msra.mxu3 %v6905_v12  ;;  %v7561_v46 = vld [vmem:[#allocation12 + $0x114] sm:$0xf0]  ;;  %v6880_v48 = vld [vmem:[#allocation12 + $0x190] sm:$0xf]  ;;  %v7527_v47 = vld [vmem:[#allocation12 + $0x4] sm:$0xf0]  ;;  %v6753_v62 = vor.u32 %v7545_v30, %v6752_v37 }
 0x3c6   : > { %5334 = vmatpush.bf16.msra.mxu0 %v6705_v57  ;;  %v7577_v29 = vld [vmem:[#allocation12 + $0x194] sm:$0xf0]  ;;  %v6817_v59 = vor.u32 %v7561_v46, %v6816_v44  ;;  %v6744_v32 = vld [vmem:[#allocation12 + $0x80] sm:$0xf]  ;;  %v7543_v45 = vld [vmem:[#allocation12 + $0x84] sm:$0xf0]  ;;  %v6681_v26 = vor.u32 %v7527_v47, %v6680_v40 }
 0x3c7   : > { %5347 = vmatpush.bf16.msra.mxu1 %v6769_v20  ;;  %v6808_v34 = vld [vmem:[#allocation12 + $0x100] sm:$0xf]  ;;  %v6881_v49 = vor.u32 %v7577_v29, %v6880_v48  ;;  %v7559_v5 = vld [vmem:[#allocation12 + $0x104] sm:$0xf0]  ;;  %v6992_v23 = vld [vmem:[#allocation12 + $0x270] sm:$0xf]  ;;  %v6745_v51 = vor.u32 %v7543_v45, %v6744_v32 }
 0x3c8   : > { %5360 = vmatpush.bf16.msra.mxu2 %v6833_v58  ;;  %v6872_v43 = vld [vmem:[#allocation12 + $0x180] sm:$0xf]  ;;  %v7575_v28 = vld [vmem:[#allocation12 + $0x184] sm:$0xf0]  ;;  %v7605_v10 = vld [vmem:[#allocation12 + $0x274] sm:$0xf0]  ;;  %v6809_v52 = vor.u32 %v7559_v5, %v6808_v34 }
 0x3c9   : > { %5373 = vmatpush.bf16.msra.mxu3 %v6897_v14  ;;  %v7056_v8 = vld [vmem:[#allocation12 + $0x2f0] sm:$0xf]  ;;  %v7621_v36 = vld [vmem:[#allocation12 + $0x2f4] sm:$0xf0]  ;;  %v6873_v63 = vor.u32 %v7575_v28, %v6872_v43  ;;  %v6993_v1 = vor.u32 %v7605_v10, %v6992_v23  ;;  %v6984_v2 = vld [vmem:[#allocation12 + $0x260] sm:$0xf] }
 0x3ca   : > { %5335 = vmatpush.bf16.msra.mxu0 %v6697_v35  ;;  %v7120_v50 = vld [vmem:[#allocation12 + $0x370] sm:$0xf]  ;;  %v7637_v56 = vld [vmem:[#allocation12 + $0x374] sm:$0xf0]  ;;  %v7603_v3 = vld [vmem:[#allocation12 + $0x264] sm:$0xf0]  ;;  %v7057_v4 = vor.u32 %v7621_v36, %v7056_v8 }
 0x3cb   : > { %5348 = vmatpush.bf16.msra.mxu1 %v6761_v53  ;;  %v7184_v39 = vld [vmem:[#allocation12 + $0x3f0] sm:$0xf]  ;;  %v7653_v61 = vld [vmem:[#allocation12 + $0x3f4] sm:$0xf0]  ;;  %v7121_v6 = vor.u32 %v7637_v56, %v7120_v50  ;;  %v7048_v7 = vld [vmem:[#allocation12 + $0x2e0] sm:$0xf]  ;;  %v6985_v38 = vor.u32 %v7603_v3, %v6984_v2 }
 0x3cc   : > { %5361 = vmatpush.bf16.msra.mxu2 %v6825_v22  ;;  %v7619_v0 = vld [vmem:[#allocation12 + $0x2e4] sm:$0xf0]  ;;  %v7112_v21 = vld [vmem:[#allocation12 + $0x360] sm:$0xf]  ;;  %v7185_v41 = vor.u32 %v7653_v61, %v7184_v39  ;;  %v9359_v55 = vld [vmem:[#allocation9] sm:$0xff]  ;;  %vm6105_vm9 = vcmask 64512  }
 0x3cd   : > { %5374 = vmatpush.bf16.msra.mxu3 %v6889_v11  ;;  %v7635_v42 = vld [vmem:[#allocation12 + $0x364] sm:$0xf0]  ;;  %v7176_v12 = vld [vmem:[#allocation12 + $0x3e0] sm:$0xf]  ;;  %v9361_v25 = vld [vmem:[#allocation10] sm:$0xff]  ;;  %v4500_v58 = vperm.slane %v9359_v55, 2  ;;  %v7049_v27 = vor.u32 %v7619_v0, %v7048_v7 }
 0x3ce   : > { %5336 = vmatpush.bf16.msra.mxu0 %v6689_v60  ;;  %v7651_v13 = vld [vmem:[#allocation12 + $0x3e4] sm:$0xf0]  ;;  %v6976_v57 = vld [vmem:[#allocation12 + $0x250] sm:$0xf]  ;;  %v7601_v20 = vld [vmem:[#allocation12 + $0x254] sm:$0xf0]  ;;  %v7113_v19 = vor.u32 %v7635_v42, %v7112_v21 }
 0x3cf   : > { %5349 = vmatpush.bf16.msra.mxu1 %v6753_v62  ;;  %v4490_v54 = vld [vmem:[#allocation2 + $0x18] sm:$0xff]  ;;  %v4526_v16 = vperm.slane %v9361_v25, 2  ;;  %v7040_v14 = vld [vmem:[#allocation12 + $0x2d0] sm:$0xf]  ;;  %v7617_v24 = vld [vmem:[#allocation12 + $0x2d4] sm:$0xf0]  ;;  %v7177_v17 = vor.u32 %v7651_v13, %v7176_v12  ;;  %v6977_v22 = vor.u32 %v7601_v20, %v6976_v57 }
 0x3d0   : > { %5362 = vmatpush.bf16.msra.mxu2 %v6817_v59  ;;  %v7104_v15 = vld [vmem:[#allocation12 + $0x350] sm:$0xf]  ;;  %v7633_v31 = vld [vmem:[#allocation12 + $0x354] sm:$0xf0]  ;;  %v4516_v53 = vmul.f32 %v4500_v58, %v4490_v54  ;;  %v4488_v9 = vld [vmem:[#allocation2 + $0x30] sm:$0xff]  ;;  %v4498_v18 = vperm.slane %v9359_v55, 0  ;;  %v7041_v40 = vor.u32 %v7617_v24, %v7040_v14 }
 0x3d1   : > { %5375 = vmatpush.bf16.msra.mxu3 %v6881_v49  ;;  %v7168_v33 = vld [vmem:[#allocation12 + $0x3d0] sm:$0xf]  ;;  %v7649_v35 = vld [vmem:[#allocation12 + $0x3d4] sm:$0xf0]  ;;  %v4524_v37 = vperm.slane %v9361_v25, 0  ;;  %v4491_v11 = vld [vmem:[#allocation2 + $0x10] sm:$0xff]  ;;  %v7105_v47 = vor.u32 %v7633_v31, %v7104_v15 }
 0x3d2   : > { %5337 = vmatpush.bf16.msra.mxu0 %v6681_v26  ;;  %v4489_v30 = vld [vmem:[#allocation2] sm:$0xff]  ;;  %v6968_v44 = vld [vmem:[#allocation12 + $0x240] sm:$0xf]  ;;  %v4542_v46 = vadd.f32 %v4526_v16, %v4516_v53  ;;  %v4501_v48 = vperm.slane %v9359_v55, 3  ;;  %v4527_v29 = vperm.slane %v9361_v25, 3  ;;  %v4499_v60 = vperm.slane %v9359_v55, 1 }
 0x3d3   : > { %5350 = vmatpush.bf16.msra.mxu1 %v6745_v51  ;;  %v7599_v62 = vld [vmem:[#allocation12 + $0x244] sm:$0xf0]  ;;  %v7032_v59 = vld [vmem:[#allocation12 + $0x2c0] sm:$0xf]  ;;  %v4514_v32 = vmul.f32 %v4498_v18, %v4488_v9  ;;  %v4525_v45 = vperm.slane %v9361_v25, 1  ;;  %v7169_v34 = vor.u32 %v7649_v35, %v7168_v33  ;;  %v4504_v16 = vperm.slane %v9359_v55, 6 }
 0x3d4   : > { %5363 = vmatpush.bf16.msra.mxu2 %v6809_v52  ;;  %v7615_v49 = vld [vmem:[#allocation12 + $0x2c4] sm:$0xf0]  ;;  %v7096_v5 = vld [vmem:[#allocation12 + $0x340] sm:$0xf]  ;;  %v9371_v28 = vpack.c.bf16 %v4542_v46, %v4542_v46  ;;  %v4517_v23 = vmul.f32 %v4501_v48, %v4491_v11  ;;  %v4515_v10 = vmul.f32 %v4499_v60, %v4489_v30  ;;  %v6969_v50 = vor.u32 %v7599_v62, %v6968_v44  ;;  %v6960_v61 = vld [vmem:[#allocation12 + $0x230] sm:$0xf] }
 0x3d5   : > { %5376 = vmatpush.bf16.msra.mxu3 %v6873_v63  ;;  %v7631_v43 = vld [vmem:[#allocation12 + $0x344] sm:$0xf0]  ;;  %v7160_v8 = vld [vmem:[#allocation12 + $0x3c0] sm:$0xf]  ;;  %v4540_v36 = vadd.f32 %v4524_v37, %v4514_v32  ;;  %v7033_v52 = vor.u32 %v7615_v49, %v7032_v59  ;;  %v7597_v63 = vld [vmem:[#allocation12 + $0x234] sm:$0xf0] }
 0x3d6   : > { %5382 = vmatpush.bf16.msrb.mxu0 %v6993_v1  ;;  %v7647_v26 = vld [vmem:[#allocation12 + $0x3c4] sm:$0xf0]  ;;  %v4543_v56 = vadd.f32 %v4527_v29, %v4517_v23  ;;  %v4541_v51 = vadd.f32 %v4525_v45, %v4515_v10  ;;  %v7097_v39 = vor.u32 %v7631_v43, %v7096_v5  ;;  %v7024_v1 = vld [vmem:[#allocation12 + $0x2b0] sm:$0xf]  ;;  %v7629_v7 = vld [vmem:[#allocation12 + $0x334] sm:$0xf0]  ;;  %v6961_v12 = vor.u32 %v7597_v63, %v6960_v61 }
 0x3d7   : > { %5395 = vmatpush.bf16.msrb.mxu1 %v7057_v4  ;;  %5364 = vmatmul.bf16.vlgmr.msra.gmra.mxu2 %v9371_v28  ;;  %v9374_v2 = vpack.c.bf16 %v4540_v36, %v4540_v36  ;;  %v7161_v3 = vor.u32 %v7647_v26, %v7160_v8  ;;  %v7613_v4 = vld [vmem:[#allocation12 + $0x2b4] sm:$0xf0]  ;;  %v6952_v13 = vld [vmem:[#allocation12 + $0x220] sm:$0xf]  ;;  %v7595_v54 = vld [vmem:[#allocation12 + $0x224] sm:$0xf0] }
 0x3d8   : > { %5408 = vmatpush.bf16.msrb.mxu2 %v7121_v6  ;;  %v7088_v6 = vld [vmem:[#allocation12 + $0x330] sm:$0xf]  ;;  %v9376_v0 = vpack.c.bf16 %v4543_v56, %v4543_v56  ;;  %v9378_v21 = vpack.c.bf16 %v4541_v51, %v4541_v51  ;;  %v7645_v42 = vld [vmem:[#allocation12 + $0x3b4] sm:$0xf0]  ;;  %v7016_v20 = vld [vmem:[#allocation12 + $0x2a0] sm:$0xf]  ;;  %v6953_v35 = vor.u32 %v7595_v54, %v6952_v13 }
 0x3d9   : > { %5421 = vmatpush.bf16.msrb.mxu3 %v7185_v41  ;;  %v7152_v41 = vld [vmem:[#allocation12 + $0x3b0] sm:$0xf]  ;;  %5338 = vmatmul.bf16.vlgmr.msra.gmra.mxu0 %v9374_v2  ;;  %v7089_v57 = vor.u32 %v7629_v7, %v7088_v6  ;;  %v7611_v58 = vld [vmem:[#allocation12 + $0x2a4] sm:$0xf0]  ;;  %v7144_v24 = vld [vmem:[#allocation12 + $0x3a0] sm:$0xf] }
 0x3da   : > { %5383 = vmatpush.bf16.msrb.mxu0 %v6985_v38  ;;  %5377 = vmatmul.bf16.vlgmr.msra.gmra.mxu3 %v9376_v0  ;;  %v7025_v38 = vor.u32 %v7613_v4, %v7024_v1  ;;  %v7627_v14 = vld [vmem:[#allocation12 + $0x324] sm:$0xf0]  ;;  %v4494_v15 = vld [vmem:[#allocation2 + $0x28] sm:$0xff]  ;;  %v6944_v31 = vld [vmem:[#allocation12 + $0x210] sm:$0xf]  ;;  %v7017_v18 = vor.u32 %v7611_v58, %v7016_v20  ;;  %v4502_v44 = vperm.slane %v9359_v55, 4 }
 0x3db   : > { %5396 = vmatpush.bf16.msrb.mxu1 %v7049_v27  ;;  %v7153_v27 = vor.u32 %v7645_v42, %v7152_v41  ;;  %v7593_v33 = vld [vmem:[#allocation12 + $0x214] sm:$0xf0]  ;;  %v7008_v53 = vld [vmem:[#allocation12 + $0x290] sm:$0xf]  ;;  %v4505_v46 = vperm.slane %v9359_v55, 7  ;;  %v4520_v59 = vmul.f32 %v4504_v16, %v4494_v15  ;;  %v4503_v45 = vperm.slane %v9359_v55, 5 }
 0x3dc   : > { %5409 = vmatpush.bf16.msrb.mxu2 %v7113_v19  ;;  %5351 = vmatmul.bf16.vlgmr.msra.gmra.mxu1 %v9378_v21  ;;  %v7080_v19 = vld [vmem:[#allocation12 + $0x320] sm:$0xf]  ;;  %v7072_v9 = vld [vmem:[#allocation12 + $0x310] sm:$0xf]  ;;  %v7625_v11 = vld [vmem:[#allocation12 + $0x314] sm:$0xf0] }
 0x3dd   : > { %5422 = vmatpush.bf16.msrb.mxu3 %v7177_v17  ;;  %v7643_v17 = vld [vmem:[#allocation12 + $0x3a4] sm:$0xf0]  ;;  %v7081_v37 = vor.u32 %v7627_v14, %v7080_v19  ;;  %v7136_v30 = vld [vmem:[#allocation12 + $0x390] sm:$0xf]  ;;  %v7641_v29 = vld [vmem:[#allocation12 + $0x394] sm:$0xf0]  ;;  %v7073_v5 = vor.u32 %v7625_v11, %v7072_v9 }
 0x3de   : > { %5384 = vmatpush.bf16.msrb.mxu0 %v6977_v22  ;;  %v7609_v22 = vld [vmem:[#allocation12 + $0x294] sm:$0xf0]  ;;  %v7145_v48 = vor.u32 %v7643_v17, %v7144_v24  ;;  %v7591_v62 = vld [vmem:[#allocation12 + $0x204] sm:$0xf0]  ;;  %v4493_v32 = vld [vmem:[#allocation2 + $0x20] sm:$0xff]  ;;  %v4530_v10 = vperm.slane %v9361_v25, 6  ;;  %v7137_v55 = vor.u32 %v7641_v29, %v7136_v30 }
 0x3df   : > { %5397 = vmatpush.bf16.msrb.mxu1 %v7041_v40  ;;  %v4492_v60 = vld [vmem:[#allocation2 + $0x8] sm:$0xff]  ;;  %v4495_v40 = vld [vmem:[#allocation2 + $0x38] sm:$0xff]  ;;  %v7009_v49 = vor.u32 %v7609_v22, %v7008_v53  ;;  %v7000_v43 = vld [vmem:[#allocation12 + $0x280] sm:$0xf]  ;;  %v4531_v51 = vperm.slane %v9361_v25, 7  ;;  %v4519_v61 = vmul.f32 %v4503_v45, %v4493_v32  ;;  %v4529_v63 = vperm.slane %v9361_v25, 5 }
 0x3e0   : > { %5410 = vmatpush.bf16.msrb.mxu2 %v7105_v47  ;;  %v6936_v47 = vld [vmem:[#allocation12 + $0x200] sm:$0xf]  ;;  %v7607_v23 = vld [vmem:[#allocation12 + $0x284] sm:$0xf0]  ;;  %v4518_v36 = vmul.f32 %v4502_v44, %v4492_v60  ;;  %v4521_v56 = vmul.f32 %v4505_v46, %v4495_v40  ;;  %v7540_v1 = vld [vmem:[#allocation12 + $0x74] sm:$0xf]  ;;  %v4546_v13 = vadd.f32 %v4530_v10, %v4520_v59 }
 0x3e1   : > { %5423 = vmatpush.bf16.msrb.mxu3 %v7169_v34  ;;  %v6945_v34 = vor.u32 %v7593_v33, %v6944_v31  ;;  %v7064_v8 = vld [vmem:[#allocation12 + $0x300] sm:$0xf]  ;;  %v7623_v26 = vld [vmem:[#allocation12 + $0x304] sm:$0xf0]  ;;  %v7556_v4 = vld [vmem:[#allocation12 + $0xf4] sm:$0xf]  ;;  %v6937_v6 = vor.u32 %v7591_v62, %v6936_v47  ;;  %v7001_v7 = vor.u32 %v7607_v23, %v7000_v43 }
 0x3e2   : > { %5385 = vmatpush.bf16.msrb.mxu0 %v6969_v50  ;;  %v4528_v50 = vperm.slane %v9361_v25, 4  ;;  %v6802_v41 = vld [vmem:[#allocation12 + $0xf8] sm:$0xf0]  ;;  %v7572_v42 = vld [vmem:[#allocation12 + $0x174] sm:$0xf]  ;;  %v7065_v54 = vor.u32 %v7623_v26, %v7064_v8  ;;  %v4547_v58 = vadd.f32 %v4531_v51, %v4521_v56  ;;  %v9391_v33 = vpack.c.bf16 %v4546_v13, %v4546_v13 }
 0x3e3   : > { %5398 = vmatpush.bf16.msrb.mxu1 %v7033_v52  ;;  %v7128_v52 = vld [vmem:[#allocation12 + $0x380] sm:$0xf]  ;;  %v6805_v19 = vor.u32 %v7556_v4, %v6802_v41  ;;  %v7538_v24 = vld [vmem:[#allocation12 + $0x64] sm:$0xf]  ;;  %v6730_v15 = vld [vmem:[#allocation12 + $0x68] sm:$0xf0] }
 0x3e4   : > { %5411 = vmatpush.bf16.msrb.mxu2 %v7097_v39  ;;  %v7639_v39 = vld [vmem:[#allocation12 + $0x384] sm:$0xf0]  ;;  %v4544_v20 = vadd.f32 %v4528_v50, %v4518_v36  ;;  %v7554_v17 = vld [vmem:[#allocation12 + $0xe4] sm:$0xf]  ;;  %v6858_v22 = vld [vmem:[#allocation12 + $0x168] sm:$0xf0]  ;;  %v6733_v30 = vor.u32 %v7538_v24, %v6730_v15 }
 0x3e5   : > { %5424 = vmatpush.bf16.msrb.mxu3 %v7161_v3  ;;  %v6738_v3 = vld [vmem:[#allocation12 + $0x78] sm:$0xf0]  ;;  %v7129_v16 = vor.u32 %v7639_v39, %v7128_v52  ;;  %v7570_v53 = vld [vmem:[#allocation12 + $0x164] sm:$0xf]  ;;  %v6922_v11 = vld [vmem:[#allocation12 + $0x1e8] sm:$0xf0] }
 0x3e6   : > { %5386 = vmatpush.bf16.msrb.mxu0 %v6961_v12  ;;  %v6866_v12 = vld [vmem:[#allocation12 + $0x178] sm:$0xf0]  ;;  %v6741_v25 = vor.u32 %v7540_v1, %v6738_v3  ;;  %v9393_v9 = vpack.c.bf16 %v4544_v20, %v4544_v20  ;;  %v7536_v29 = vld [vmem:[#allocation12 + $0x54] sm:$0xf]  ;;  %v7534_v23 = vld [vmem:[#allocation12 + $0x44] sm:$0xf] }
 0x3e7   : > { %5399 = vmatpush.bf16.msrb.mxu1 %v7025_v38  ;;  %v7588_v38 = vld [vmem:[#allocation12 + $0x1f4] sm:$0xf]  ;;  %v6869_v14 = vor.u32 %v7572_v42, %v6866_v12  ;;  %v6722_v60 = vld [vmem:[#allocation12 + $0x58] sm:$0xf0]  ;;  %v6714_v10 = vld [vmem:[#allocation12 + $0x48] sm:$0xf0] }
 0x3e8   : > { %5412 = vmatpush.bf16.msrb.mxu2 %v7089_v57  ;;  %v6930_v57 = vld [vmem:[#allocation12 + $0x1f8] sm:$0xf0]  ;;  %v7552_v40 = vld [vmem:[#allocation12 + $0xd4] sm:$0xf]  ;;  %v7550_v8 = vld [vmem:[#allocation12 + $0xc4] sm:$0xf]  ;;  %v6717_v52 = vor.u32 %v7534_v23, %v6714_v10 }
 0x3e9   : > { %5425 = vmatpush.bf16.msrb.mxu3 %v7153_v27  ;;  %v4545_v27 = vadd.f32 %v4529_v63, %v4519_v61  ;;  %v6933_v31 = vor.u32 %v7588_v38, %v6930_v57  ;;  %v6786_v62 = vld [vmem:[#allocation12 + $0xd8] sm:$0xf0]  ;;  %v7568_v59 = vld [vmem:[#allocation12 + $0x154] sm:$0xf]  ;;  %v6778_v36 = vld [vmem:[#allocation12 + $0xc8] sm:$0xf0] }
 0x3ea   : > { %5387 = vmatpush.bf16.msrb.mxu0 %v6953_v35  ;;  %v6794_v35 = vld [vmem:[#allocation12 + $0xe8] sm:$0xf0]  ;;  %v6850_v32 = vld [vmem:[#allocation12 + $0x158] sm:$0xf0]  ;;  %v7584_v45 = vld [vmem:[#allocation12 + $0x1d4] sm:$0xf]  ;;  %v6781_v39 = vor.u32 %v7550_v8, %v6778_v36 }
 0x3eb   : > { %5400 = vmatpush.bf16.msrb.mxu1 %v7017_v18  ;;  %v9395_v18 = vpack.c.bf16 %v4547_v58, %v4547_v58  ;;  %v9397_v44 = vpack.c.bf16 %v4545_v27, %v4545_v27  ;;  %v6797_v46 = vor.u32 %v7554_v17, %v6794_v35  ;;  %v6853_v43 = vor.u32 %v7568_v59, %v6850_v32  ;;  %v7566_v50 = vld [vmem:[#allocation12 + $0x144] sm:$0xf]  ;;  %v6842_v56 = vld [vmem:[#allocation12 + $0x148] sm:$0xf0]  ;;  %v7532_v63 = vld [vmem:[#allocation12 + $0x34] sm:$0xf] }
 0x3ec   : > { %5413 = vmatpush.bf16.msrb.mxu2 %v7081_v37  ;;  %v7586_v37 = vld [vmem:[#allocation12 + $0x1e4] sm:$0xf]  ;;  %v6845_v61 = vor.u32 %v7566_v50, %v6842_v56  ;;  %v6706_v1 = vld [vmem:[#allocation12 + $0x38] sm:$0xf0]  ;;  %v7548_v3 = vld [vmem:[#allocation12 + $0xb4] sm:$0xf] }
 0x3ed   : > { %5426 = vmatpush.bf16.msrb.mxu3 %v7145_v48  ;;  %v6861_v48 = vor.u32 %v7570_v53, %v6858_v22  ;;  %v6925_v47 = vor.u32 %v7586_v37, %v6922_v11  ;;  %v7582_v51 = vld [vmem:[#allocation12 + $0x1c4] sm:$0xf]  ;;  %v6834_v41 = vld [vmem:[#allocation12 + $0x138] sm:$0xf0]  ;;  %v7580_v42 = vld [vmem:[#allocation12 + $0x1b4] sm:$0xf]  ;;  %v6709_v13 = vor.u32 %v7532_v63, %v6706_v1 }
 0x3ee   : > { %5388 = vmatpush.bf16.msrb.mxu0 %v6945_v34  ;;  %v6914_v34 = vld [vmem:[#allocation12 + $0x1d8] sm:$0xf0]  ;;  %v7530_v57 = vld [vmem:[#allocation12 + $0x24] sm:$0xf]  ;;  %v6698_v20 = vld [vmem:[#allocation12 + $0x28] sm:$0xf0] }
 0x3ef   : > { %5401 = vmatpush.bf16.msrb.mxu1 %v7009_v49  ;;  %v6725_v49 = vor.u32 %v7536_v29, %v6722_v60  ;;  %v6917_v26 = vor.u32 %v7584_v45, %v6914_v34  ;;  %v6898_v12 = vld [vmem:[#allocation12 + $0x1b8] sm:$0xf0]  ;;  %v7546_v58 = vld [vmem:[#allocation12 + $0xa4] sm:$0xf]  ;;  %v6890_v24 = vld [vmem:[#allocation12 + $0x1a8] sm:$0xf0]  ;;  %v6701_v15 = vor.u32 %v7530_v57, %v6698_v20 }
 0x3f0   : > { %5414 = vmatpush.bf16.msrb.mxu2 %v7073_v5  ;;  %v6789_v5 = vor.u32 %v7552_v40, %v6786_v62  ;;  %v7562_v27 = vld [vmem:[#allocation12 + $0x124] sm:$0xf]  ;;  %v7528_v35 = vld [vmem:[#allocation12 + $0x14] sm:$0xf]  ;;  %v6690_v53 = vld [vmem:[#allocation12 + $0x18] sm:$0xf0] }
 0x3f1   : > { %5427 = vmatpush.bf16.msrb.mxu3 %v7137_v55  ;;  %v6906_v55 = vld [vmem:[#allocation12 + $0x1c8] sm:$0xf0]  ;;  %v7544_v22 = vld [vmem:[#allocation12 + $0x94] sm:$0xf]  ;;  %v6754_v11 = vld [vmem:[#allocation12 + $0x98] sm:$0xf0]  ;;  %v6693_v60 = vor.u32 %v7528_v35, %v6690_v53 }
 0x3f2   : > { %5389 = vmatpush.bf16.msrb.mxu0 %v6937_v6  ;;  %v6909_v4 = vor.u32 %v7582_v51, %v6906_v55  ;;  %v6770_v6 = vld [vmem:[#allocation12 + $0xb8] sm:$0xf0]  ;;  %v7526_v40 = vld [vmem:[#allocation12 + $0x4] sm:$0xf]  ;;  %v6757_v62 = vor.u32 %v7544_v22, %v6754_v11  ;;  %v6746_v45 = vld [vmem:[#allocation12 + $0x88] sm:$0xf0] }
 0x3f3   : > { %5402 = vmatpush.bf16.msrb.mxu1 %v7001_v7  ;;  %v7564_v7 = vld [vmem:[#allocation12 + $0x134] sm:$0xf]  ;;  %v6882_v29 = vld [vmem:[#allocation12 + $0x198] sm:$0xf0]  ;;  %v7542_v32 = vld [vmem:[#allocation12 + $0x84] sm:$0xf] }
 0x3f4   : > { %5415 = vmatpush.bf16.msrb.mxu2 %v7065_v54  ;;  %v6773_v54 = vor.u32 %v7548_v3, %v6770_v6  ;;  %v6837_v38 = vor.u32 %v7564_v7, %v6834_v41  ;;  %v7558_v34 = vld [vmem:[#allocation12 + $0x104] sm:$0xf]  ;;  %v6874_v23 = vld [vmem:[#allocation12 + $0x188] sm:$0xf0]  ;;  %v7604_v10 = vld [vmem:[#allocation12 + $0x274] sm:$0xf]  ;;  %v6749_v55 = vor.u32 %v7542_v32, %v6746_v45 }
 0x3f5   : > { %5428 = vmatpush.bf16.msrb.mxu3 %v7129_v16  ;;  %5390 = vmatmul.bf16.vlgmr.msrb.gmra.mxu0 %v9393_v9  ;;  %v6901_v16 = vor.u32 %v7580_v42, %v6898_v12  ;;  %v6994_v8 = vld [vmem:[#allocation12 + $0x278] sm:$0xf0]  ;;  %v7636_v56 = vld [vmem:[#allocation12 + $0x374] sm:$0xf]  ;;  %v7602_v6 = vld [vmem:[#allocation12 + $0x264] sm:$0xf] }
 0x3f6   : > { %5434 = vmatpush.bf16.msra.mxu0 %v6741_v25  ;;  %5403 = vmatmul.bf16.vlgmr.msrb.gmra.mxu1 %v9397_v44  ;;  %v6762_v25 = vld [vmem:[#allocation12 + $0xa8] sm:$0xf0]  ;;  %v7058_v50 = vld [vmem:[#allocation12 + $0x2f8] sm:$0xf0]  ;;  %v6997_v1 = vor.u32 %v7604_v10, %v6994_v8  ;;  %v7618_v41 = vld [vmem:[#allocation12 + $0x2e4] sm:$0xf] }
 0x3f7   : > { %5447 = vmatpush.bf16.msra.mxu1 %v6805_v19  ;;  %5416 = vmatmul.bf16.vlgmr.msrb.gmra.mxu2 %v9391_v33  ;;  %v6826_v19 = vld [vmem:[#allocation12 + $0x128] sm:$0xf0]  ;;  %v6765_v17 = vor.u32 %v7546_v58, %v6762_v25  ;;  %v7122_v51 = vld [vmem:[#allocation12 + $0x378] sm:$0xf0]  ;;  %v7600_v25 = vld [vmem:[#allocation12 + $0x254] sm:$0xf] }
 0x3f8   : > { %5460 = vmatpush.bf16.msra.mxu2 %v6869_v14  ;;  %5429 = vmatmul.bf16.vlgmr.msrb.gmra.mxu3 %v9395_v18  ;;  %v7578_v14 = vld [vmem:[#allocation12 + $0x1a4] sm:$0xf]  ;;  %v6986_v7 = vld [vmem:[#allocation12 + $0x268] sm:$0xf0]  ;;  %v7170_v35 = vld [vmem:[#allocation12 + $0x3d8] sm:$0xf0] }
 0x3f9   : > { %5473 = vmatpush.bf16.msra.mxu3 %v6933_v31  ;;  %v6829_v31 = vor.u32 %v7562_v27, %v6826_v19  ;;  %v6893_v37 = vor.u32 %v7578_v14, %v6890_v24  ;;  %v7050_v12 = vld [vmem:[#allocation12 + $0x2e8] sm:$0xf0]  ;;  %v6989_v20 = vor.u32 %v7602_v6, %v6986_v7  ;;  %v6978_v27 = vld [vmem:[#allocation12 + $0x258] sm:$0xf0]  ;;  %v7616_v19 = vld [vmem:[#allocation12 + $0x2d4] sm:$0xf] }
 0x3fa   : > { %5435 = vmatpush.bf16.msra.mxu0 %v6733_v30  ;;  %v7560_v30 = vld [vmem:[#allocation12 + $0x114] sm:$0xf]  ;;  %v7178_v57 = vld [vmem:[#allocation12 + $0x3e8] sm:$0xf0]  ;;  %v7053_v58 = vor.u32 %v7618_v41, %v7050_v12  ;;  %v7042_v24 = vld [vmem:[#allocation12 + $0x2d8] sm:$0xf0]  ;;  %v6981_v53 = vor.u32 %v7600_v25, %v6978_v27 }
 0x3fb   : > { %5448 = vmatpush.bf16.msra.mxu1 %v6797_v46  ;;  %v6818_v46 = vld [vmem:[#allocation12 + $0x118] sm:$0xf0]  ;;  %v7045_v22 = vor.u32 %v7616_v19, %v7042_v24  ;;  %v7598_v11 = vld [vmem:[#allocation12 + $0x244] sm:$0xf]  ;;  %v7612_v32 = vld [vmem:[#allocation12 + $0x2b4] sm:$0xf] }
 0x3fc   : > { %5461 = vmatpush.bf16.msra.mxu2 %v6861_v48  ;;  %v7576_v48 = vld [vmem:[#allocation12 + $0x194] sm:$0xf]  ;;  %v6821_v59 = vor.u32 %v7560_v30, %v6818_v46  ;;  %v6970_v30 = vld [vmem:[#allocation12 + $0x248] sm:$0xf0]  ;;  %v6946_v7 = vld [vmem:[#allocation12 + $0x218] sm:$0xf0] }
 0x3fd   : > { %5474 = vmatpush.bf16.msra.mxu3 %v6925_v47  ;;  %v6682_v47 = vld [vmem:[#allocation12 + $0x8] sm:$0xf0]  ;;  %v7592_v6 = vld [vmem:[#allocation12 + $0x214] sm:$0xf]  ;;  %v7010_v12 = vld [vmem:[#allocation12 + $0x298] sm:$0xf0] }
 0x3fe   : > { %5436 = vmatpush.bf16.msra.mxu0 %v6725_v49  ;;  %v6885_v49 = vor.u32 %v7576_v48, %v6882_v29  ;;  %v6685_v36 = vor.u32 %v7526_v40, %v6682_v47  ;;  %v7034_v48 = vld [vmem:[#allocation12 + $0x2c8] sm:$0xf0]  ;;  %v7630_v29 = vld [vmem:[#allocation12 + $0x344] sm:$0xf]  ;;  %v7608_v41 = vld [vmem:[#allocation12 + $0x294] sm:$0xf] }
 0x3ff   : > { %5449 = vmatpush.bf16.msra.mxu1 %v6789_v5  ;;  %v6810_v5 = vld [vmem:[#allocation12 + $0x108] sm:$0xf0]  ;;  %v7646_v40 = vld [vmem:[#allocation12 + $0x3c4] sm:$0xf]  ;;  %vm6113_vm10 = vcmask 57344   ;;  %vm6162_vm15 = vcmask 1040384  }
 0x400   : > { %5462 = vmatpush.bf16.msra.mxu2 %v6853_v43  ;;  %v7574_v43 = vld [vmem:[#allocation12 + $0x184] sm:$0xf]  ;;  %v6938_v27 = vld [vmem:[#allocation12 + $0x208] sm:$0xf0] }
 0x401   : > { %5475 = vmatpush.bf16.msra.mxu3 %v6917_v26  ;;  %v7620_v26 = vld [vmem:[#allocation12 + $0x2f4] sm:$0xf]  ;;  %v6877_v63 = vor.u32 %v7574_v43, %v6874_v23  ;;  %v7154_v23 = vld [vmem:[#allocation12 + $0x3b8] sm:$0xf0]  ;;  %v7606_v19 = vld [vmem:[#allocation12 + $0x284] sm:$0xf] }
 0x402   : > { %5437 = vmatpush.bf16.msra.mxu0 %v6717_v52  ;;  %v6813_v52 = vor.u32 %v7558_v34, %v6810_v5  ;;  %v7061_v3 = vor.u32 %v7620_v26, %v7058_v50  ;;  %v7026_v34 = vld [vmem:[#allocation12 + $0x2b8] sm:$0xf0]  ;;  %v7644_v43 = vld [vmem:[#allocation12 + $0x3b4] sm:$0xf]  ;;  %v6954_v50 = vld [vmem:[#allocation12 + $0x228] sm:$0xf0] }
 0x403   : > { %5450 = vmatpush.bf16.msra.mxu1 %v6781_v39  ;;  %v7652_v39 = vld [vmem:[#allocation12 + $0x3f4] sm:$0xf]  ;;  %v7090_v5 = vld [vmem:[#allocation12 + $0x338] sm:$0xf0]  ;;  %v7029_v8 = vor.u32 %v7612_v32, %v7026_v34 }
 0x404   : > { %5463 = vmatpush.bf16.msra.mxu2 %v6845_v61  ;;  %v7186_v61 = vld [vmem:[#allocation12 + $0x3f8] sm:$0xf0] }
 0x405   : > { %5476 = vmatpush.bf16.msra.mxu3 %v6909_v4  ;;  %v7125_v4 = vor.u32 %v7636_v56, %v7122_v51  ;;  %v7189_v42 = vor.u32 %v7652_v39, %v7186_v61  ;;  %v7610_v56 = vld [vmem:[#allocation12 + $0x2a4] sm:$0xf]  ;;  %v7157_v51 = vor.u32 %v7644_v43, %v7154_v23  ;;  %v7082_v39 = vld [vmem:[#allocation12 + $0x328] sm:$0xf0]  ;;  %v7665_v32 = vld [vmem:[#allocation15 + $0x54] sm:$0xf0] }
 0x406   : > { %5438 = vmatpush.bf16.msra.mxu0 %v6709_v13  ;;  %v7634_v13 = vld [vmem:[#allocation12 + $0x364] sm:$0xf]  ;;  %v7234_v34 = vld [vmem:[#allocation15 + $0x58] sm:$0xf0]  ;;  %v7663_v23 = vld [vmem:[#allocation15 + $0x44] sm:$0xf0] }
 0x407   : > { %5451 = vmatpush.bf16.msra.mxu1 %v6773_v54  ;;  %v7114_v54 = vld [vmem:[#allocation12 + $0x368] sm:$0xf0]  ;;  %v7642_v61 = vld [vmem:[#allocation12 + $0x3a4] sm:$0xf] }
 0x408   : > { %5464 = vmatpush.bf16.msra.mxu2 %v6837_v38  ;;  %v7650_v38 = vld [vmem:[#allocation12 + $0x3e4] sm:$0xf] }
 0x409   : > { %5477 = vmatpush.bf16.msra.mxu3 %v6901_v16  ;;  %v7117_v16 = vor.u32 %v7634_v13, %v7114_v54  ;;  %v7181_v14 = vor.u32 %v7650_v38, %v7178_v57  ;;  %v7624_v13 = vld [vmem:[#allocation12 + $0x314] sm:$0xf]  ;;  %v7074_v54 = vld [vmem:[#allocation12 + $0x318] sm:$0xf0]  ;;  %v7224_v43 = vld [vmem:[#allocation15 + $0x40] sm:$0xf] }
 0x40a   : > { %5439 = vmatpush.bf16.msra.mxu0 %v6701_v15  ;;  %v7632_v15 = vld [vmem:[#allocation12 + $0x354] sm:$0xf]  ;;  %v7138_v57 = vld [vmem:[#allocation12 + $0x398] sm:$0xf0]  ;;  %v7077_v25 = vor.u32 %v7624_v13, %v7074_v54  ;;  %v7654_v13 = vld [vmem:[#allocation15 + $0x4] sm:$0xf] }
 0x40b   : > { %5452 = vmatpush.bf16.msra.mxu1 %v6765_v17  ;;  %v7106_v17 = vld [vmem:[#allocation12 + $0x358] sm:$0xf0]  ;;  %v7640_v38 = vld [vmem:[#allocation12 + $0x394] sm:$0xf]  ;;  %v7194_v54 = vld [vmem:[#allocation15 + $0x8] sm:$0xf0] }
 0x40c   : > { %5465 = vmatpush.bf16.msra.mxu2 %v6829_v31  ;;  %v7648_v31 = vld [vmem:[#allocation12 + $0x3d4] sm:$0xf]  ;;  %v7141_v24 = vor.u32 %v7640_v38, %v7138_v57  ;;  %v7197_v57 = vor.u32 %v7654_v13, %v7194_v54  ;;  %v7687_v13 = vld [vmem:[#allocation18 + $0x4] sm:$0xf0]  ;;  %v7686_v54 = vld [vmem:[#allocation18 + $0x4] sm:$0xf] }
 0x40d   : > { %5478 = vmatpush.bf16.msra.mxu3 %v6893_v37  ;;  %v7109_v37 = vor.u32 %v7632_v15, %v7106_v17  ;;  %v7173_v46 = vor.u32 %v7648_v31, %v7170_v35  ;;  %v7622_v15 = vld [vmem:[#allocation12 + $0x304] sm:$0xf]  ;;  %v7066_v17 = vld [vmem:[#allocation12 + $0x308] sm:$0xf0] }
 0x40e   : > { %5440 = vmatpush.bf16.msra.mxu0 %v6693_v60  ;;  %v7098_v60 = vld [vmem:[#allocation12 + $0x348] sm:$0xf0]  ;;  %v7638_v31 = vld [vmem:[#allocation12 + $0x384] sm:$0xf] }
 0x40f   : > { %5453 = vmatpush.bf16.msra.mxu1 %v6757_v62  ;;  %v7596_v62 = vld [vmem:[#allocation12 + $0x234] sm:$0xf]  ;;  %v7130_v35 = vld [vmem:[#allocation12 + $0x388] sm:$0xf0] }
 0x410   : > { %5466 = vmatpush.bf16.msra.mxu2 %v6821_v59  ;;  %v6962_v59 = vld [vmem:[#allocation12 + $0x238] sm:$0xf0] }
 0x411   : > { %5479 = vmatpush.bf16.msra.mxu3 %v6885_v49  ;;  %v7628_v49 = vld [vmem:[#allocation12 + $0x334] sm:$0xf]  ;;  %v6965_v10 = vor.u32 %v7596_v62, %v6962_v59 }
 0x412   : > { %5441 = vmatpush.bf16.msra.mxu0 %v6685_v36  ;;  %v7093_v26 = vor.u32 %v7628_v49, %v7090_v5  ;;  %v7594_v36 = vld [vmem:[#allocation12 + $0x224] sm:$0xf]  ;;  %v7232_v59 = vld [vmem:[#allocation15 + $0x50] sm:$0xf] }
 0x413   : > { %5454 = vmatpush.bf16.msra.mxu1 %v6749_v55  ;;  %v7018_v55 = vld [vmem:[#allocation12 + $0x2a8] sm:$0xf0]  ;;  %v7233_v49 = vor.u32 %v7665_v32, %v7232_v59  ;;  %v7344_v32 = vld [vmem:[#allocation18 + $0x30] sm:$0xf] }
 0x414   : > { %5467 = vmatpush.bf16.msra.mxu2 %v6813_v52  ;;  %v7626_v52 = vld [vmem:[#allocation12 + $0x324] sm:$0xf] }
 0x415   : > { %5480 = vmatpush.bf16.msra.mxu3 %v6877_v63  ;;  %5442 = vmatmul.bf16.vlgmr.msra.gmra.mxu0 %v9374_v2  ;;  %v7162_v2 = vld [vmem:[#allocation12 + $0x3c8] sm:$0xf0] }
 0x416   : > { %5486 = vmatpush.bf16.msrb.mxu0 %v6997_v1  ;;  %5455 = vmatmul.bf16.vlgmr.msra.gmra.mxu1 %v9378_v21  ;;  %v7101_v21 = vor.u32 %v7630_v29, %v7098_v60  ;;  %v7165_v45 = vor.u32 %v7646_v40, %v7162_v2  ;;  %v7146_v63 = vld [vmem:[#allocation12 + $0x3a8] sm:$0xf0]  ;;  %v6957_v1 = vor.u32 %v7594_v36, %v6954_v50  ;;  %v7240_v40 = vld [vmem:[#allocation15 + $0x60] sm:$0xf]  ;;  %v7660_v36 = vld [vmem:[#allocation15 + $0x34] sm:$0xf] }
 0x417   : > { %5499 = vmatpush.bf16.msrb.mxu1 %v7061_v3  ;;  %5468 = vmatmul.bf16.vlgmr.msra.gmra.mxu2 %v9371_v28  ;;  %v7614_v28 = vld [vmem:[#allocation12 + $0x2c4] sm:$0xf]  ;;  %v7021_v3 = vor.u32 %v7610_v56, %v7018_v55  ;;  %v7667_v2 = vld [vmem:[#allocation15 + $0x64] sm:$0xf0]  ;;  %v7218_v56 = vld [vmem:[#allocation15 + $0x38] sm:$0xf0] }
 0x418   : > { %5512 = vmatpush.bf16.msrb.mxu2 %v7125_v4  ;;  %5481 = vmatmul.bf16.vlgmr.msra.gmra.mxu3 %v9376_v0  ;;  %v6973_v0 = vor.u32 %v7598_v11, %v6970_v30  ;;  %v7037_v47 = vor.u32 %v7614_v28, %v7034_v48  ;;  %v7085_v4 = vor.u32 %v7626_v52, %v7082_v39  ;;  %v7668_v11 = vld [vmem:[#allocation15 + $0x74] sm:$0xf]  ;;  %v7250_v30 = vld [vmem:[#allocation15 + $0x78] sm:$0xf0]  ;;  %v7659_v55 = vld [vmem:[#allocation15 + $0x24] sm:$0xf0] }
 0x419   : > { %5525 = vmatpush.bf16.msrb.mxu3 %v7189_v42  ;;  %v7149_v42 = vor.u32 %v7642_v61, %v7146_v63  ;;  %v7133_v48 = vor.u32 %v7638_v31, %v7130_v35  ;;  %v7253_v60 = vor.u32 %v7668_v11, %v7250_v30  ;;  %v7658_v52 = vld [vmem:[#allocation15 + $0x24] sm:$0xf]  ;;  %v7210_v61 = vld [vmem:[#allocation15 + $0x28] sm:$0xf0]  ;;  %v7362_v30 = vld [vmem:[#allocation18 + $0x58] sm:$0xf0] }
 0x41a   : > { %5487 = vmatpush.bf16.msrb.mxu0 %v6989_v20  ;;  %v6949_v20 = vor.u32 %v7592_v6, %v6946_v7  ;;  %v7213_v63 = vor.u32 %v7658_v52, %v7210_v61  ;;  %v7202_v7 = vld [vmem:[#allocation15 + $0x18] sm:$0xf0]  ;;  %v7370_v31 = vld [vmem:[#allocation18 + $0x68] sm:$0xf0]  ;;  %v7685_v52 = vld [vmem:[#allocation15 + $0xf4] sm:$0xf0] }
 0x41b   : > { %5500 = vmatpush.bf16.msrb.mxu1 %v7053_v58  ;;  %v7590_v58 = vld [vmem:[#allocation12 + $0x204] sm:$0xf] }
 0x41c   : > { %5513 = vmatpush.bf16.msrb.mxu2 %v7117_v16  ;;  %v7013_v16 = vor.u32 %v7608_v41, %v7010_v12  ;;  %v7655_v12 = vld [vmem:[#allocation15 + $0x4] sm:$0xf0] }
 0x41d   : > { %5526 = vmatpush.bf16.msrb.mxu3 %v7181_v14  ;;  %v7002_v14 = vld [vmem:[#allocation12 + $0x288] sm:$0xf0] }
 0x41e   : > { %5488 = vmatpush.bf16.msrb.mxu0 %v6981_v53  ;;  %v7248_v53 = vld [vmem:[#allocation15 + $0x70] sm:$0xf]  ;;  %v7005_v28 = vor.u32 %v7606_v19, %v7002_v14  ;;  %v7368_v14 = vld [vmem:[#allocation18 + $0x60] sm:$0xf] }
 0x41f   : > { %5501 = vmatpush.bf16.msrb.mxu1 %v7045_v22  ;;  %v7669_v22 = vld [vmem:[#allocation15 + $0x74] sm:$0xf0] }
 0x420   : > { %5514 = vmatpush.bf16.msrb.mxu2 %v7109_v37  ;;  %v6941_v37 = vor.u32 %v7590_v58, %v6938_v27  ;;  %v7249_v29 = vor.u32 %v7669_v22, %v7248_v53  ;;  %v7701_v58 = vld [vmem:[#allocation18 + $0x74] sm:$0xf0]  ;;  %v7378_v27 = vld [vmem:[#allocation18 + $0x78] sm:$0xf0]  ;;  %v7360_v53 = vld [vmem:[#allocation18 + $0x50] sm:$0xf] }
 0x421   : > { %5527 = vmatpush.bf16.msrb.mxu3 %v7173_v46  ;;  %v7069_v46 = vor.u32 %v7622_v15, %v7066_v17  ;;  %v7698_v15 = vld [vmem:[#allocation18 + $0x64] sm:$0xf]  ;;  %v7697_v22 = vld [vmem:[#allocation18 + $0x54] sm:$0xf0] }
 0x422   : > { %5489 = vmatpush.bf16.msrb.mxu0 %v6973_v0  ;;  %v7666_v0 = vld [vmem:[#allocation15 + $0x64] sm:$0xf]  ;;  %v7373_v35 = vor.u32 %v7698_v15, %v7370_v31  ;;  %v7361_v11 = vor.u32 %v7697_v22, %v7360_v53  ;;  %v7306_v15 = vld [vmem:[#allocation15 + $0xe8] sm:$0xf0]  ;;  %v7681_v53 = vld [vmem:[#allocation15 + $0xd4] sm:$0xf0] }
 0x423   : > { %5502 = vmatpush.bf16.msrb.mxu1 %v7037_v47  ;;  %v7242_v47 = vld [vmem:[#allocation15 + $0x68] sm:$0xf0]  ;;  %v7680_v22 = vld [vmem:[#allocation15 + $0xd4] sm:$0xf] }
 0x424   : > { %5515 = vmatpush.bf16.msrb.mxu2 %v7101_v21  ;;  %v7241_v21 = vor.u32 %v7667_v2, %v7240_v40  ;;  %v7245_v62 = vor.u32 %v7666_v0, %v7242_v47  ;;  %v7694_v40 = vld [vmem:[#allocation18 + $0x44] sm:$0xf]  ;;  %v7354_v0 = vld [vmem:[#allocation18 + $0x48] sm:$0xf0] }
 0x425   : > { %5528 = vmatpush.bf16.msrb.mxu3 %v7165_v45  ;;  %v7664_v45 = vld [vmem:[#allocation15 + $0x54] sm:$0xf]  ;;  %v7357_v59 = vor.u32 %v7694_v40, %v7354_v0  ;;  %v7679_v40 = vld [vmem:[#allocation15 + $0xc4] sm:$0xf0] }
 0x426   : > { %5490 = vmatpush.bf16.msrb.mxu0 %v6965_v10  ;;  %v7237_v5 = vor.u32 %v7664_v45, %v7234_v34  ;;  %v7662_v10 = vld [vmem:[#allocation15 + $0x44] sm:$0xf]  ;;  %v7693_v45 = vld [vmem:[#allocation18 + $0x34] sm:$0xf0]  ;;  %v7692_v34 = vld [vmem:[#allocation18 + $0x34] sm:$0xf] }
 0x427   : > { %5503 = vmatpush.bf16.msrb.mxu1 %v7029_v8  ;;  %v7225_v8 = vor.u32 %v7663_v23, %v7224_v43  ;;  %v7336_v43 = vld [vmem:[#allocation18 + $0x20] sm:$0xf]  ;;  %v7691_v23 = vld [vmem:[#allocation18 + $0x24] sm:$0xf0] }
 0x428   : > { %5516 = vmatpush.bf16.msrb.mxu2 %v7093_v26 }
 0x429   : > { %5529 = vmatpush.bf16.msrb.mxu3 %v7157_v51  ;;  %v7208_v51 = vld [vmem:[#allocation15 + $0x20] sm:$0xf] }
 0x42a   : > { %5491 = vmatpush.bf16.msrb.mxu0 %v6957_v1  ;;  %v7209_v39 = vor.u32 %v7659_v55, %v7208_v51  ;;  %v7200_v1 = vld [vmem:[#allocation15 + $0x10] sm:$0xf]  ;;  %v7688_v51 = vld [vmem:[#allocation18 + $0x14] sm:$0xf] }
 0x42b   : > { %5504 = vmatpush.bf16.msrb.mxu1 %v7021_v3  ;;  %v7657_v3 = vld [vmem:[#allocation15 + $0x14] sm:$0xf0]  ;;  %v7312_v55 = vld [vmem:[#allocation15 + $0xf0] sm:$0xf] }
 0x42c   : > { %5517 = vmatpush.bf16.msrb.mxu2 %v7085_v4  ;;  %v7656_v4 = vld [vmem:[#allocation15 + $0x14] sm:$0xf]  ;;  %v7201_v6 = vor.u32 %v7657_v3, %v7200_v1  ;;  %v7313_v61 = vor.u32 %v7685_v52, %v7312_v55  ;;  %v7314_v1 = vld [vmem:[#allocation15 + $0xf8] sm:$0xf0]  ;;  %v7264_v52 = vld [vmem:[#allocation15 + $0x90] sm:$0xf] }
 0x42d   : > { %5530 = vmatpush.bf16.msrb.mxu3 %v7149_v42  ;;  %v7205_v41 = vor.u32 %v7656_v4, %v7202_v7  ;;  %v7192_v42 = vld [vmem:[#allocation15] sm:$0xf] }
 0x42e   : > { %5492 = vmatpush.bf16.msrb.mxu0 %v6949_v20  ;;  %v7193_v38 = vor.u32 %v7655_v12, %v7192_v42  ;;  %v7376_v20 = vld [vmem:[#allocation18 + $0x70] sm:$0xf]  ;;  %v7320_v12 = vld [vmem:[#allocation18] sm:$0xf] }
 0x42f   : > { %5505 = vmatpush.bf16.msrb.mxu1 %v7013_v16  ;;  %v7700_v16 = vld [vmem:[#allocation18 + $0x74] sm:$0xf] }
 0x430   : > { %5518 = vmatpush.bf16.msrb.mxu2 %v7077_v25  ;;  %v7377_v25 = vor.u32 %v7701_v58, %v7376_v20  ;;  %v7381_v19 = vor.u32 %v7700_v16, %v7378_v27  ;;  %v7321_v58 = vor.u32 %v7687_v13, %v7320_v12  ;;  %v7304_v27 = vld [vmem:[#allocation15 + $0xe0] sm:$0xf] }
 0x431   : > { %5531 = vmatpush.bf16.msrb.mxu3 %v7141_v24  ;;  %v7699_v24 = vld [vmem:[#allocation18 + $0x64] sm:$0xf0] }
 0x432   : > { %5493 = vmatpush.bf16.msrb.mxu0 %v6941_v37  ;;  %v7369_v17 = vor.u32 %v7699_v24, %v7368_v14  ;;  %v7696_v37 = vld [vmem:[#allocation18 + $0x54] sm:$0xf]  ;;  %v7682_v14 = vld [vmem:[#allocation15 + $0xe4] sm:$0xf] }
 0x433   : > { %5506 = vmatpush.bf16.msrb.mxu1 %v7005_v28  ;;  %v7365_v28 = vor.u32 %v7696_v37, %v7362_v30  ;;  %v7298_v37 = vld [vmem:[#allocation15 + $0xd8] sm:$0xf0] }
 0x434   : > { %5519 = vmatpush.bf16.msrb.mxu2 %v7069_v46  ;;  %v9411_v46 = vld [vmem:[#allocation13] sm:$0x3] }
 0x435   : > { %5532 = vmatpush.bf16.msrb.mxu3 %v7133_v48  ;;  %5494 = vmatmul.bf16.vlgmr.msrb.gmra.mxu0 %v9393_v9  ;;  %v7226_v9 = vld [vmem:[#allocation15 + $0x48] sm:$0xf0]  ;;  %v4686_v47 = vperm.slane %v9411_v46, 0 }
 0x436   : > { %5740 = vmatpush.bf16.msra.mxu0 %v7249_v29  ;;  %5507 = vmatmul.bf16.vlgmr.msrb.gmra.mxu1 %v9397_v44  ;;  %v7229_v26 = vor.u32 %v7662_v10, %v7226_v9  ;;  %v7216_v44 = vld [vmem:[#allocation15 + $0x30] sm:$0xf]  ;;  %v7352_v29 = vld [vmem:[#allocation18 + $0x40] sm:$0xf]  ;;  %v7690_v9 = vld [vmem:[#allocation18 + $0x24] sm:$0xf] }
 0x437   : > { %5520 = vmatmul.bf16.vlgmr.msrb.gmra.mxu2 %v9391_v33  ;;  %v7661_v33 = vld [vmem:[#allocation15 + $0x34] sm:$0xf0]  ;;  %5753 = vmatpush.bf16.msra.mxu1 %v7313_v61 }
 0x438   : > { %5766 = vmatpush.bf16.msra.mxu2 %v7253_v60  ;;  %5533 = vmatmul.bf16.vlgmr.msrb.gmra.mxu3 %v9395_v18  ;;  %v7217_v50 = vor.u32 %v7661_v33, %v7216_v44  ;;  %v7221_v18 = vor.u32 %v7660_v36, %v7218_v56  ;;  %v7695_v60 = vld [vmem:[#allocation18 + $0x44] sm:$0xf0]  ;;  %v7337_v36 = vor.u32 %v7691_v23, %v7336_v43  ;;  %v7689_v56 = vld [vmem:[#allocation18 + $0x14] sm:$0xf0]  ;;  %v7676_v43 = vld [vmem:[#allocation15 + $0xb4] sm:$0xf] }
 0x439   : > { %v7353_v2 = vor.u32 %v7695_v60, %v7352_v29  ;;  %v7288_v60 = vld [vmem:[#allocation15 + $0xc0] sm:$0xf]  ;;  %v7282_v23 = vld [vmem:[#allocation15 + $0xb8] sm:$0xf0] }
 0x43a   : > { %5741 = vmatpush.bf16.msra.mxu0 %v7241_v21 }
 0x43c   : > { %5767 = vmatpush.bf16.msra.mxu2 %v7245_v62 }
 0x43e   : > { %5742 = vmatpush.bf16.msra.mxu0 %v7233_v49  ;;  %v7345_v49 = vor.u32 %v7693_v45, %v7344_v32  ;;  %v7280_v45 = vld [vmem:[#allocation15 + $0xb0] sm:$0xf] }
 0x440   : > { %5768 = vmatpush.bf16.msra.mxu2 %v7237_v5  ;;  %v7346_v5 = vld [vmem:[#allocation18 + $0x38] sm:$0xf0] }
 0x441   : > { %v7349_v10 = vor.u32 %v7692_v34, %v7346_v5  ;;  %v7677_v34 = vld [vmem:[#allocation15 + $0xb4] sm:$0xf0] }
 0x442   : > { %5743 = vmatpush.bf16.msra.mxu0 %v7225_v8  ;;  %v7338_v8 = vld [vmem:[#allocation18 + $0x28] sm:$0xf0] }
 0x444   : > { %5769 = vmatpush.bf16.msra.mxu2 %v7229_v26 }
 0x446   : > { %5744 = vmatpush.bf16.msra.mxu0 %v7217_v50  ;;  %v7328_v50 = vld [vmem:[#allocation18 + $0x10] sm:$0xf] }
 0x448   : > { %5770 = vmatpush.bf16.msra.mxu2 %v7221_v18  ;;  %v7341_v18 = vor.u32 %v7690_v9, %v7338_v8  ;;  %v7281_v9 = vor.u32 %v7677_v34, %v7280_v45  ;;  %v7709_v45 = vld [vmem:[#allocation18 + $0xb4] sm:$0xf0]  ;;  %v7708_v34 = vld [vmem:[#allocation18 + $0xb4] sm:$0xf] }
 0x44a   : > { %5745 = vmatpush.bf16.msra.mxu0 %v7209_v39  ;;  %v7330_v39 = vld [vmem:[#allocation18 + $0x18] sm:$0xf0] }
 0x44b   : > { %v7333_v42 = vor.u32 %v7688_v51, %v7330_v39  ;;  %v7673_v39 = vld [vmem:[#allocation15 + $0x94] sm:$0xf0] }
 0x44c   : > { %5771 = vmatpush.bf16.msra.mxu2 %v7213_v63  ;;  %v7684_v63 = vld [vmem:[#allocation15 + $0xf4] sm:$0xf] }
 0x44d   : > { %v7317_v7 = vor.u32 %v7684_v63, %v7314_v1  ;;  %v7672_v63 = vld [vmem:[#allocation15 + $0x94] sm:$0xf]  ;;  %v7266_v1 = vld [vmem:[#allocation15 + $0x98] sm:$0xf0] }
 0x44e   : > { %5746 = vmatpush.bf16.msra.mxu0 %v7201_v6 }
 0x44f   : > { %5779 = vmatpush.bf16.msra.mxu3 %v7317_v7  ;;  %v7269_v7 = vor.u32 %v7672_v63, %v7266_v1  ;;  %v7703_v63 = vld [vmem:[#allocation18 + $0x84] sm:$0xf0] }
 0x450   : > { %5772 = vmatpush.bf16.msra.mxu2 %v7205_v41  ;;  %v7329_v41 = vor.u32 %v7689_v56, %v7328_v50  ;;  %v7674_v50 = vld [vmem:[#allocation15 + $0xa4] sm:$0xf]  ;;  %v7274_v56 = vld [vmem:[#allocation15 + $0xa8] sm:$0xf0] }
 0x451   : > { %v7277_v61 = vor.u32 %v7674_v50, %v7274_v56  ;;  %v7392_v56 = vld [vmem:[#allocation18 + $0x90] sm:$0xf] }
 0x452   : > { %5747 = vmatpush.bf16.msra.mxu0 %v7193_v38  ;;  %v7322_v38 = vld [vmem:[#allocation18 + $0x8] sm:$0xf0] }
 0x453   : > { %v7325_v16 = vor.u32 %v7686_v54, %v7322_v38  ;;  %v7440_v54 = vld [vmem:[#allocation18 + $0xf0] sm:$0xf]  ;;  %v7717_v38 = vld [vmem:[#allocation18 + $0xf4] sm:$0xf0] }
 0x454   : > { %5773 = vmatpush.bf16.msra.mxu2 %v7197_v57 }
 0x456   : > { %5992 = vmatpush.bf16.msrb.mxu0 %v7377_v25  ;;  %v5339_v48 = vpop.f32.mrf.mxu0 }
 0x457   : > { %v5340_v26 = vadd.f32 %v5339_v48, %v4686_v47  ;;  %v7301_v48 = vor.u32 %v7680_v22, %v7298_v37  ;;  %v7289_v47 = vor.u32 %v7679_v40, %v7288_v60  ;;  %v7712_v22 = vld [vmem:[#allocation18 + $0xd4] sm:$0xf]  ;;  %v7711_v60 = vld [vmem:[#allocation18 + $0xc4] sm:$0xf0]  ;;  %v7710_v40 = vld [vmem:[#allocation18 + $0xc4] sm:$0xf] }
 0x458   : > { %6018 = vmatpush.bf16.msrb.mxu2 %v7381_v19  ;;  %v7683_v19 = vld [vmem:[#allocation15 + $0xe4] sm:$0xf0] }
 0x459   : > { %v5352_v21 = vpop.f32.mrf.mxu1  ;;  %v7305_v24 = vor.u32 %v7683_v19, %v7304_v27  ;;  %v7715_v27 = vld [vmem:[#allocation18 + $0xe4] sm:$0xf0]  ;;  %v7714_v19 = vld [vmem:[#allocation18 + $0xe4] sm:$0xf] }
 0x45a   : > { %5993 = vmatpush.bf16.msrb.mxu0 %v7369_v17  ;;  %v5365_v62 = vpop.f32.mrf.mxu2  ;;  %v5353_v3 = vadd.f32 %v5352_v21, %v5340_v26  ;;  %v7296_v17 = vld [vmem:[#allocation15 + $0xd0] sm:$0xf]  ;;  %v7290_v21 = vld [vmem:[#allocation15 + $0xc8] sm:$0xf0]  ;;  %v7285_v26 = vor.u32 %v7676_v43, %v7282_v23  ;;  %v7400_v43 = vld [vmem:[#allocation18 + $0xa0] sm:$0xf] }
 0x45b   : > { %5754 = vmatpush.bf16.msra.mxu1 %v7305_v24  ;;  %v7707_v23 = vld [vmem:[#allocation18 + $0xa4] sm:$0xf0] }
 0x45c   : > { %6019 = vmatpush.bf16.msrb.mxu2 %v7373_v35  ;;  %v5366_v57 = vadd.f32 %v5365_v62, %v5353_v3  ;;  %v7309_v35 = vor.u32 %v7682_v14, %v7306_v15  ;;  %v7265_v3 = vor.u32 %v7673_v39, %v7264_v52  ;;  %v7434_v15 = vld [vmem:[#allocation18 + $0xe8] sm:$0xf0] }
 0x45d   : > { %v5378_v44 = vpop.f32.mrf.mxu3 }
 0x45e   : > { %5994 = vmatpush.bf16.msrb.mxu0 %v7361_v11  ;;  %v5341_v33 = vpop.f32.mrf.mxu0  ;;  %v5379_v25 = vadd.f32 %v5378_v44, %v5366_v57  ;;  %5780 = vmatpush.bf16.msra.mxu3 %v7309_v35  ;;  %v7272_v44 = vld [vmem:[#allocation15 + $0xa0] sm:$0xf]  ;;  %v7716_v57 = vld [vmem:[#allocation18 + $0xf4] sm:$0xf]  ;;  %v7424_v35 = vld [vmem:[#allocation18 + $0xd0] sm:$0xf] }
 0x45f   : > { %v7675_v33 = vld [vmem:[#allocation15 + $0xa4] sm:$0xf0] }
 0x460   : > { %6020 = vmatpush.bf16.msrb.mxu2 %v7365_v28  ;;  %v7297_v28 = vor.u32 %v7681_v53, %v7296_v17  ;;  %v7273_v51 = vor.u32 %v7675_v33, %v7272_v44  ;;  %v7713_v53 = vld [vmem:[#allocation18 + $0xd4] sm:$0xf0]  ;;  %v7402_v44 = vld [vmem:[#allocation18 + $0xa8] sm:$0xf0] }
 0x461   : > { %v5354_v4 = vpop.f32.mrf.mxu1  ;;  %v7425_v37 = vor.u32 %v7713_v53, %v7424_v35 }
 0x462   : > { %5995 = vmatpush.bf16.msrb.mxu0 %v7353_v2  ;;  %v5367_v6 = vpop.f32.mrf.mxu2  ;;  %v7678_v2 = vld [vmem:[#allocation15 + $0xc4] sm:$0xf]  ;;  %5755 = vmatpush.bf16.msra.mxu1 %v7297_v28  ;;  %v7256_v4 = vld [vmem:[#allocation15 + $0x80] sm:$0xf] }
 0x463   : > { %5781 = vmatpush.bf16.msra.mxu3 %v7301_v48  ;;  %v7293_v32 = vor.u32 %v7678_v2, %v7290_v21  ;;  %v7671_v6 = vld [vmem:[#allocation15 + $0x84] sm:$0xf0] }
 0x464   : > { %6021 = vmatpush.bf16.msrb.mxu2 %v7357_v59  ;;  %v7257_v12 = vor.u32 %v7671_v6, %v7256_v4  ;;  %v7386_v4 = vld [vmem:[#allocation18 + $0x88] sm:$0xf0] }
 0x465   : > { %v5380_v20 = vpop.f32.mrf.mxu3 }
 0x466   : > { %5996 = vmatpush.bf16.msrb.mxu0 %v7345_v49  ;;  %5756 = vmatpush.bf16.msra.mxu1 %v7289_v47  ;;  %v7441_v20 = vor.u32 %v7717_v38, %v7440_v54  ;;  %v7418_v47 = vld [vmem:[#allocation18 + $0xc8] sm:$0xf0] }
 0x467   : > { %5782 = vmatpush.bf16.msra.mxu3 %v7293_v32  ;;  %v7408_v32 = vld [vmem:[#allocation18 + $0xb0] sm:$0xf] }
 0x468   : > { %6022 = vmatpush.bf16.msrb.mxu2 %v7349_v10 }
 0x46a   : > { %5997 = vmatpush.bf16.msrb.mxu0 %v7337_v36  ;;  %5757 = vmatpush.bf16.msra.mxu1 %v7281_v9 }
 0x46b   : > { %5783 = vmatpush.bf16.msra.mxu3 %v7285_v26  ;;  %v7706_v26 = vld [vmem:[#allocation18 + $0xa4] sm:$0xf] }
 0x46c   : > { %6023 = vmatpush.bf16.msrb.mxu2 %v7341_v18  ;;  %v7405_v50 = vor.u32 %v7706_v26, %v7402_v44 }
 0x46e   : > { %5998 = vmatpush.bf16.msrb.mxu0 %v7329_v41  ;;  %5758 = vmatpush.bf16.msra.mxu1 %v7273_v51  ;;  %v7670_v41 = vld [vmem:[#allocation15 + $0x84] sm:$0xf]  ;;  %v7704_v51 = vld [vmem:[#allocation18 + $0x94] sm:$0xf] }
 0x46f   : > { %5784 = vmatpush.bf16.msra.mxu3 %v7277_v61  ;;  %v7384_v61 = vld [vmem:[#allocation18 + $0x80] sm:$0xf] }
 0x470   : > { %6024 = vmatpush.bf16.msrb.mxu2 %v7333_v42  ;;  %v7258_v42 = vld [vmem:[#allocation15 + $0x88] sm:$0xf0]  ;;  %v7385_v6 = vor.u32 %v7703_v63, %v7384_v61 }
 0x471   : > { %v7261_v13 = vor.u32 %v7670_v41, %v7258_v42 }
 0x472   : > { %5999 = vmatpush.bf16.msrb.mxu0 %v7321_v58  ;;  %v5391_v31 = vpop.f32.mrf.mxu0  ;;  %5759 = vmatpush.bf16.msra.mxu1 %v7265_v3  ;;  %v7442_v58 = vld [vmem:[#allocation18 + $0xf8] sm:$0xf0]  ;;  %v7702_v3 = vld [vmem:[#allocation18 + $0x84] sm:$0xf] }
 0x473   : > { %v5392_v11 = vadd.f32 %v5391_v31, %v5379_v25  ;;  %v5404_v30 = vpop.f32.mrf.mxu1  ;;  %5785 = vmatpush.bf16.msra.mxu3 %v7269_v7  ;;  %v7432_v25 = vld [vmem:[#allocation18 + $0xe0] sm:$0xf]  ;;  %v7437_v31 = vor.u32 %v7714_v19, %v7434_v15  ;;  %v7389_v7 = vor.u32 %v7702_v3, %v7386_v4 }
 0x474   : > { %6025 = vmatpush.bf16.msrb.mxu2 %v7325_v16  ;;  %v7445_v16 = vor.u32 %v7716_v57, %v7442_v58  ;;  %v7433_v24 = vor.u32 %v7715_v27, %v7432_v25 }
 0x475   : > { %v5405_v29 = vadd.f32 %v5404_v30, %v5392_v11  ;;  %v7426_v11 = vld [vmem:[#allocation18 + $0xd8] sm:$0xf0] }
 0x476   : > { %5760 = vmatpush.bf16.msra.mxu1 %v7257_v12  ;;  %v7429_v28 = vor.u32 %v7712_v22, %v7426_v11 }
 0x477   : > { %5786 = vmatpush.bf16.msra.mxu3 %v7261_v13 }
 0x47a   : > { %v5417_v0 = vpop.f32.mrf.mxu2  ;;  %v5393_v5 = vpop.f32.mrf.mxu0  ;;  %6005 = vmatpush.bf16.msrb.mxu1 %v7441_v20 }
 0x47b   : > { %v5418_v62 = vadd.f32 %v5417_v0, %v5405_v29  ;;  %v5430_v59 = vpop.f32.mrf.mxu3  ;;  %v5406_v10 = vpop.f32.mrf.mxu1  ;;  %6031 = vmatpush.bf16.msrb.mxu3 %v7445_v16  ;;  %v7416_v29 = vld [vmem:[#allocation18 + $0xc0] sm:$0xf]  ;;  %v7410_v5 = vld [vmem:[#allocation18 + $0xb8] sm:$0xf0] }
 0x47c   : > { %v7417_v0 = vor.u32 %v7711_v60, %v7416_v29  ;;  %v7413_v9 = vor.u32 %v7708_v34, %v7410_v5  ;;  %v5826_v29 = vld [vmem:[#allocation19] sm:$0x3] }
 0x47d   : > { %v5431_v49 = vadd.f32 %v5430_v59, %v5418_v62  ;;  %v7421_v62 = vor.u32 %v7710_v40, %v7418_v47  ;;  %v4687_v59 = vperm.slane %v9411_v46, 1  ;;  %v7705_v46 = vld [vmem:[#allocation18 + $0x94] sm:$0xf0]  ;;  %v5828_v40 = vperm.slane %v5826_v29, 0 }
 0x47e   : > { %6006 = vmatpush.bf16.msrb.mxu1 %v7433_v24  ;;  %v7393_v52 = vor.u32 %v7705_v46, %v7392_v56 }
 0x47f   : > { %v9414_v8 = vmax.f32 %v5431_v49, 0.0  ;;  %6032 = vmatpush.bf16.msrb.mxu3 %v7437_v31  ;;  %v7409_v49 = vor.u32 %v7709_v45, %v7408_v32 }
 0x481   : > { %v5540_v36 = vpack.c.bf16 %v9414_v8, %v9414_v8 }
 0x482   : > { %v5419_v18 = vpop.f32.mrf.mxu2  ;;  %6007 = vmatpush.bf16.msrb.mxu1 %v7425_v37 }
 0x483   : > { %5748 = vmatmul.bf16.vlgmr.msra.gmra.mxu0 %v5540_v36  ;;  %5774 = vmatmul.bf16.vlgmr.msra.gmra.mxu2 %v5540_v36  ;;  %v5432_v55 = vpop.f32.mrf.mxu3 }
 0x484   : > { %6033 = vmatpush.bf16.msrb.mxu3 %v7429_v28  ;;  %v7394_v55 = vld [vmem:[#allocation18 + $0x98] sm:$0xf0] }
 0x485   : > { %v7397_v39 = vor.u32 %v7704_v51, %v7394_v55 }
 0x486   : > { %6008 = vmatpush.bf16.msrb.mxu1 %v7417_v0 }
 0x488   : > { %6034 = vmatpush.bf16.msrb.mxu3 %v7421_v62 }
 0x48a   : > { %6009 = vmatpush.bf16.msrb.mxu1 %v7409_v49 }
 0x48c   : > { %6035 = vmatpush.bf16.msrb.mxu3 %v7413_v9 }
 0x490   : > { %6036 = vmatpush.bf16.msrb.mxu3 %v7405_v50 }
 0x492   : > { %v5443_v14 = vpop.f32.mrf.mxu0 }
 0x493   : > { %6000 = vmatmul.bf16.vlgmr.msrb.gmra.mxu0 %v5540_v36  ;;  %6026 = vmatmul.bf16.vlgmr.msrb.gmra.mxu2 %v5540_v36  ;;  %v5456_v17 = vpop.f32.mrf.mxu1  ;;  %v7401_v36 = vor.u32 %v7707_v23, %v7400_v43  ;;  %v5444_v18 = vadd.f32 %v5443_v14, %v4687_v59  ;;  %v5574_v23 = vld [vmem:[#allocation16] sm:$0x3] }
 0x494   : > { %6037 = vmatpush.bf16.msrb.mxu3 %v7397_v39  ;;  %v5576_v26 = vperm.slane %v5574_v23, 0  ;;  %v5577_v46 = vperm.slane %v5574_v23, 1 }
 0x495   : > { %6010 = vmatpush.bf16.msrb.mxu1 %v7401_v36  ;;  %v5457_v1 = vadd.f32 %v5456_v17, %v5444_v18 }
 0x498   : > { %6038 = vmatpush.bf16.msrb.mxu3 %v7389_v7 }
 0x499   : > { %6011 = vmatpush.bf16.msrb.mxu1 %v7393_v52 }
 0x49a   : > { %v5469_v30 = vpop.f32.mrf.mxu2  ;;  %v5445_v2 = vpop.f32.mrf.mxu0 }
 0x49b   : > { %v5482_v48 = vpop.f32.mrf.mxu3  ;;  %v5458_v21 = vpop.f32.mrf.mxu1  ;;  %v5470_v41 = vadd.f32 %v5469_v30, %v5457_v1 }
 0x49c   : > { %v5829_v21 = vperm.slane %v5826_v29, 1 }
 0x49d   : > { %6012 = vmatpush.bf16.msrb.mxu1 %v7385_v6  ;;  %v5483_v42 = vadd.f32 %v5482_v48, %v5470_v41 }
 0x4a2   : > { %v5471_v10 = vpop.f32.mrf.mxu2 }
 0x4a3   : > { %v5484_v33 = vpop.f32.mrf.mxu3  ;;  %v6095_v10 = vld [vmem:[#allocation3] sm:$0x1] }
 0x4a4   : > { %7734 = vpush %v6095_v10  ;;  %v7723_v10 = vld [vmem:[%s9548_s12 + $0x28] sm:$0xff] }
 0x4b2   : > { %v5495_v12 = vpop.f32.mrf.mxu0 }
 0x4b3   : > { %v5508_v13 = vpop.f32.mrf.mxu1  ;;  %v5496_v54 = vadd.f32 %v5495_v12, %v5483_v42 }
 0x4b5   : > { %v5509_v38 = vadd.f32 %v5508_v13, %v5496_v54 }
 0x4ba   : > { %v5521_v57 = vpop.f32.mrf.mxu2  ;;  %v5497_v16 = vpop.f32.mrf.mxu0 }
 0x4bb   : > { %v5522_v20 = vadd.f32 %v5521_v57, %v5509_v38  ;;  %v5534_v58 = vpop.f32.mrf.mxu3  ;;  %v5510_v25 = vpop.f32.mrf.mxu1 }
 0x4bd   : > { %v5535_v27 = vadd.f32 %v5534_v58, %v5522_v20  ;;  %v6084_v58 = vld [vmem:[#allocation21] sm:$0x3] }
 0x4bf   : > { %v9419_v19 = vmax.f32 %v5535_v27, 0.0 }
 0x4c1   : > { %v5541_v14 = vpack.c.bf16 %v9419_v19, %v9419_v19 }
 0x4c2   : > { %v5523_v24 = vpop.f32.mrf.mxu2 }
 0x4c3   : > { %v5536_v15 = vpop.f32.mrf.mxu3  ;;  %5761 = vmatmul.bf16.vlgmr.msra.gmra.mxu1 %v5541_v14  ;;  %5787 = vmatmul.bf16.vlgmr.msra.gmra.mxu3 %v5541_v14  ;;  %v6087_v24 = vperm.slane %v6084_v58, 1 }
 0x4d3   : > { %6013 = vmatmul.bf16.vlgmr.msrb.gmra.mxu1 %v5541_v14  ;;  %6039 = vmatmul.bf16.vlgmr.msrb.gmra.mxu3 %v5541_v14  ;;  %v6086_v14 = vperm.slane %v6084_v58, 0 }
 0x4d5   : > { %s7735_s2 = spop %7734 }
 0x500   : > { %v5749_v17 = vpop.f32.mrf.mxu0 }
 0x501   : > { %v5750_v36 = vadd.f32 %v5749_v17, %v5576_v26 }
 0x506   : > { %v5775_v31 = vpop.f32.mrf.mxu2 }
 0x507   : > { %v5776_v52 = vadd.f32 %v5775_v31, %v5577_v46 }
 0x508   : > { %v5751_v35 = vpop.f32.mrf.mxu0 }
 0x50e   : > { %v5777_v53 = vpop.f32.mrf.mxu2 }
 0x510   : > { %v6001_v22 = vpop.f32.mrf.mxu0 }
 0x511   : > { %v6002_v0 = vadd.f32 %v6001_v22, %v5828_v40 }
 0x516   : > { %v6027_v37 = vpop.f32.mrf.mxu2 }
 0x517   : > { %v6028_v32 = vadd.f32 %v6027_v37, %v5829_v21  ;;  %v6099_v37 = vlaneseq  ;;  %v7725_v21 = vld [vmem:[%s9548_s12 + $0x38] sm:$0xff] }
 0x518   : > { %v6003_v11 = vpop.f32.mrf.mxu0  ;;  %6301 = vmatpush.bf16.msra.mxu0 %v7725_v21 }
 0x519   : > { %v6100_v11 = vshrl.u32 %v6099_v37, 7 }
 0x51e   : > { %v6029_v30 = vpop.f32.mrf.mxu2 }
 0x51f   : > { %v9425_v30 = vand.u32 127, %v6099_v37 }
 0x521   : > { %vm6103_vm8 = vcmp.eq.s32.totalorder %v6100_v11, %v9425_v30 }
 0x540   : > { %v5762_v28 = vpop.f32.mrf.mxu1 }
 0x541   : > { %v5763_v18 = vadd.f32 %v5762_v28, %v5750_v36  ;;  %v6097_v28 = vstv %s7735_s2 }
 0x546   : > { %v5788_v48 = vpop.f32.mrf.mxu3 }
 0x547   : > { %v5789_v3 = vadd.f32 %v5788_v48, %v5776_v52  ;;  %v7728_v52 = vld [vmem:[%s9548_s12 + $0x50] sm:$0xff] }
 0x548   : > { %v5764_v60 = vpop.f32.mrf.mxu1 }
 0x54e   : > { %v5790_v2 = vpop.f32.mrf.mxu3 }
 0x550   : > { %v6014_v47 = vpop.f32.mrf.mxu1 }
 0x551   : > { %v6015_v62 = vadd.f32 %v6014_v47, %v6002_v0 }
 0x553   : > { %v7446_v59 = vmul.f32 -1.442695, %v6015_v62  ;;  %v7733_v62 = vld [vmem:[%s9548_s12 + $0x78] sm:$0xff] }
 0x554   : > { %6314 = vmatpush.bf16.msra.mxu1 %v7733_v62 }
 0x555   : > { %7921 = vpow2.f32 %v7446_v59 }
 0x556   : > { %v6040_v45 = vpop.f32.mrf.mxu3 }
 0x557   : > { %v6041_v34 = vadd.f32 %v6040_v45, %v6028_v32  ;;  %v7724_v45 = vld [vmem:[%s9548_s12 + $0x30] sm:$0xff] }
 0x558   : > { %v6016_v49 = vpop.f32.mrf.mxu1  ;;  %6302 = vmatpush.bf16.msra.mxu0 %v7724_v45 }
 0x559   : > { %v7447_v5 = vmul.f32 -1.442695, %v6041_v34  ;;  %v7732_v34 = vld [vmem:[%s9548_s12 + $0x70] sm:$0xff] }
 0x55a   : > { %6315 = vmatpush.bf16.msra.mxu1 %v7732_v34 }
 0x55b   : > { %v7922_v43 = vpop.eup %7921  ;;  %7923 = vpow2.f32 %v7447_v5 }
 0x55c   : > { %v6050_v9 = vadd.f32 1.0, %v7922_v43  ;;  %6303 = vmatpush.bf16.msra.mxu0 %v7723_v10 }
 0x55e   : > { %7925 = vrcp.f32 %v6050_v9  ;;  %v6042_v44 = vpop.f32.mrf.mxu3  ;;  %v6063_v39 = vand.u32 2147483648, %v6050_v9  ;;  %v6061_v63 = vand.u32 2147483647, %v6050_v9  ;;  %vm6057_vm1 = vweird.f32 %v6050_v9 }
 0x560   : > { %v6064_v7 = vor.u32 1.1754944e-38, %v6063_v39  ;;  %vm6062_vm3 = vcmp.eq.f32.partialorder %v6061_v63, 8.507059e+37 }
 0x561   : > { %v7924_v33 = vpop.eup %7923 }
 0x562   : > { %v6051_v50 = vadd.f32 1.0, %v7924_v33 }
 0x564   : > { %v7926_v56 = vpop.eup %7925  ;;  %7927 = vrcp.f32 %v6051_v50  ;;  %v6078_v54 = vand.u32 2147483648, %v6051_v50  ;;  %v6076_v57 = vand.u32 2147483647, %v6051_v50  ;;  %vm6072_vm5 = vweird.f32 %v6051_v50 }
 0x565   : > { %v6053_v51 = vmul.f32 %v7926_v56, %v6050_v9  ;;  %7929 = vtanh.f32 %v5763_v18  ;;  %vm6058_vm0 = vweird.f32 %v7926_v56  ;;  %v7731_v9 = vld [vmem:[%s9548_s12 + $0x68] sm:$0xff]  ;;  %v7721_v18 = vld [vmem:[%s9548_s12 + $0x18] sm:$0xff] }
 0x566   : > { %vm6059_vm2 = vmor %vm6057_vm1, %vm6058_vm0  ;;  %7931 = vtanh.f32 %v5789_v3  ;;  %v6079_v25 = vor.u32 1.1754944e-38, %v6078_v54  ;;  %vm6077_vm7 = vcmp.eq.f32.partialorder %v6076_v57, 8.507059e+37  ;;  %6316 = vmatpush.bf16.msra.mxu1 %v7731_v9  ;;  %v7727_v3 = vld [vmem:[%s9548_s12 + $0x48] sm:$0xff]  ;;  %vm6167_vm0 = vcmp.lt.s32.totalorder %v6099_v37, 256 }
 0x567   : > { %v6054_v55 = vsub.f32 1.0, %v6053_v51  ;;  %v7729_v51 = vld [vmem:[%s9548_s12 + $0x58] sm:$0xff]  ;;  %vm6327_vm1 = vcmask 24576  }
 0x569   : > { %v6055_v61 = vmul.f32 %v7926_v56, %v6054_v55  ;;  %v7720_v55 = vld [vmem:[%s9548_s12 + $0x10] sm:$0xff] }
 0x56a   : > { %v7928_v1 = vpop.eup %7927 }
 0x56b   : > { %v6068_v4 = vmul.f32 %v7928_v1, %v6051_v50  ;;  %v6056_v6 = vadd.f32 %v7926_v56, %v6055_v61  ;;  %v7930_v12 = vpop.eup %7929  ;;  %vm6073_vm4 = vweird.f32 %v7928_v1  ;;  %v7722_v50 = vld [vmem:[%s9548_s12 + $0x20] sm:$0xff] }
 0x56c   : > { %vm6074_vm6 = vmor %vm6072_vm5, %vm6073_vm4  ;;  %v7932_v15 = vpop.eup %7931  ;;  %6304 = vmatpush.bf16.msra.mxu0 %v7722_v50 }
 0x56d   : > { %v6060_v41 = vsel %vm6059_vm2, %v7926_v56, %v6056_v6  ;;  %v6069_v42 = vsub.f32 1.0, %v6068_v4  ;;  %v7730_v56 = vld [vmem:[%s9548_s12 + $0x60] sm:$0xff] }
 0x56e   : > { %v6065_v13 = vsel %vm6062_vm3, %v6064_v7, %v6060_v41  ;;  %6317 = vmatpush.bf16.msra.mxu1 %v7730_v56  ;;  %v7718_v7 = vld [vmem:[%s9548_s12] sm:$0xff] }
 0x56f   : > { %v6070_v38 = vmul.f32 %v7928_v1, %v6069_v42  ;;  %v6082_v20 = vmul.f32 %v7930_v12, %v6065_v13  ;;  %v7726_v41 = vld [vmem:[%s9548_s12 + $0x40] sm:$0xff] }
 0x570   : > { %6305 = vmatpush.bf16.msra.mxu0 %v7721_v18 }
 0x571   : > { %v6071_v16 = vadd.f32 %v7928_v1, %v6070_v38  ;;  %v6090_v35 = vmul.f32 %v6086_v14, %v6082_v20 }
 0x572   : > { %6318 = vmatpush.bf16.msra.mxu1 %v7729_v51 }
 0x573   : > { %v6075_v27 = vsel %vm6074_vm6, %v7928_v1, %v6071_v16  ;;  %v7719_v1 = vld [vmem:[%s9548_s12 + $0x8] sm:$0xff] }
 0x574   : > { %v6080_v17 = vsel %vm6077_vm7, %v6079_v25, %v6075_v27  ;;  %6306 = vmatpush.bf16.msra.mxu0 %v7720_v55 }
 0x575   : > { %v6083_v31 = vmul.f32 %v7932_v15, %v6080_v17 }
 0x576   : > { %6319 = vmatpush.bf16.msra.mxu1 %v7728_v52 }
 0x577   : > { %v6091_v53 = vmul.f32 %v6087_v24, %v6083_v31 }
 0x578   : > { %6307 = vmatpush.bf16.msra.mxu0 %v7719_v1 }
 0x579   : > { %v6092_v22 = vadd.f32 %v6091_v53, %v6090_v35 }
 0x57a   : > { %6320 = vmatpush.bf16.msra.mxu1 %v7727_v3 }
 0x57b   : > { %6093 = vadd.xlane.f32.xlu0 %v6092_v22 }
 0x57c   : > { %6308 = vmatpush.bf16.msra.mxu0 %v7718_v7 }
 0x57e   : > { %6321 = vmatpush.bf16.msra.mxu1 %v7726_v41 }
 0x5ee   : > { %v6094_v48 = vpop.xlane.xlu0 %6093 }
 0x5ef   : > { %v6098_v29 = vadd.f32 %v6097_v28, %v6094_v48 }
 0x5f1   : > { %v6115_v60 = vrot.slane %v6098_v29, 4  ;;  %v6104_v40 = vsel %vm6103_vm8, %v6098_v29, 0.0  ;;  %vm6371_vm8 = vcmask 0  }
 0x5f2   : > { %v6106_v2 = vsel %vm6105_vm9, %v6104_v40, 0.0 }
 0x5f3   : > { %v6116_v0 = vmax.f32 %v6098_v29, %v6115_v60  ;;  %v6107_v47 = vrot.slane %v6106_v2, 4 }
 0x5f5   : > { %v6117_v59 = vrot.slane %v6116_v0, 2  ;;  %v6108_v32 = vadd.f32 %v6107_v47, %v6106_v2 }
 0x5f7   : > { %v6118_v49 = vmax.f32 %v6116_v0, %v6117_v59  ;;  %v6109_v5 = vrot.slane %v6108_v32, 2 }
 0x5f9   : > { %v6119_v43 = vrot.slane %v6118_v49, 1  ;;  %v6110_v23 = vadd.f32 %v6109_v5, %v6108_v32 }
 0x5fb   : > { %v6120_v26 = vmax.f32 %v6118_v49, %v6119_v43  ;;  %v6111_v44 = vrot.slane %v6110_v23, 1 }
 0x5fd   : > { %v6121_v33 = vsub.f32 %v6098_v29, %v6120_v26  ;;  %v6112_v36 = vadd.f32 %v6111_v44, %v6110_v23 }
 0x5ff   : > { %v6122_v46 = vmul.f32 1.442695, %v6121_v33  ;;  %6114 = vst.msk [vmem:[#allocation24] sm:$0x1] %vm6113_vm10, %v6112_v36 }
 0x601   : > { %7933 = vpow2.f32 %v6122_v46 }
 0x607   : > { %v7934_v39 = vpop.eup %7933 }
 0x608   : > { %v6124_v61 = vrot.slane %v7934_v39, 4 }
 0x60a   : > { %v6125_v63 = vadd.f32 %v7934_v39, %v6124_v61 }
 0x60c   : > { %v6126_v4 = vrot.slane %v6125_v63, 2 }
 0x60e   : > { %v6127_v6 = vadd.f32 %v6126_v4, %v6125_v63 }
 0x610   : > { %v6128_v42 = vrot.slane %v6127_v6, 1 }
 0x612   : > { %v6129_v12 = vadd.f32 %v6128_v42, %v6127_v6 }
 0x614   : > { %7935 = vrcp.f32 %v6129_v12  ;;  %v6141_v57 = vand.u32 2147483648, %v6129_v12  ;;  %v6139_v58 = vand.u32 2147483647, %v6129_v12  ;;  %vm6135_vm12 = vweird.f32 %v6129_v12 }
 0x616   : > { %v6142_v25 = vor.u32 1.1754944e-38, %v6141_v57  ;;  %vm6140_vm14 = vcmp.eq.f32.partialorder %v6139_v58, 8.507059e+37 }
 0x61a   : > { %v7936_v13 = vpop.eup %7935 }
 0x61b   : > { %v6131_v54 = vmul.f32 %v7936_v13, %v6129_v12  ;;  %vm6136_vm11 = vweird.f32 %v7936_v13 }
 0x61c   : > { %vm6137_vm13 = vmor %vm6135_vm12, %vm6136_vm11 }
 0x61d   : > { %v6132_v38 = vsub.f32 1.0, %v6131_v54 }
 0x61f   : > { %v6133_v20 = vmul.f32 %v7936_v13, %v6132_v38 }
 0x621   : > { %v6134_v16 = vadd.f32 %v7936_v13, %v6133_v20 }
 0x623   : > { %v6138_v27 = vsel %vm6137_vm13, %v7936_v13, %v6134_v16 }
 0x624   : > { %v6143_v14 = vsel %vm6140_vm14, %v6142_v25, %v6138_v27 }
 0x625   : > { %v6144_v24 = vmul.f32 %v7934_v39, %v6143_v14 }
 0x627   : > { %v6145_v15 = vmul.f32 %v6144_v24, %v9414_v8  ;;  %v6146_v17 = vmul.f32 %v6144_v24, %v9419_v19  ;;  %v6204_v19 = vld [vmem:[#allocation22] sm:$0x1] }
 0x629   : > { %v6147_v31 = vrot.slane %v6145_v15, 4  ;;  %v6153_v35 = vrot.slane %v6146_v17, 4 }
 0x62b   : > { %v6148_v53 = vadd.f32 %v6147_v31, %v6145_v15  ;;  %v6154_v22 = vadd.f32 %v6153_v35, %v6146_v17 }
 0x62d   : > { %v6149_v11 = vrot.slane %v6148_v53, 2  ;;  %v6155_v28 = vrot.slane %v6154_v22, 2 }
 0x62f   : > { %v6150_v48 = vadd.f32 %v6149_v11, %v6148_v53  ;;  %v6156_v29 = vadd.f32 %v6155_v28, %v6154_v22 }
 0x631   : > { %v6151_v60 = vrot.slane %v6150_v48, 1  ;;  %v6157_v40 = vrot.slane %v6156_v29, 1 }
 0x633   : > { %v6152_v2 = vadd.f32 %v6151_v60, %v6150_v48  ;;  %v6158_v0 = vadd.f32 %v6157_v40, %v6156_v29 }
 0x635   : > { %v6170_v47 = vpack.c.bf16 %v6152_v2, %v6152_v2  ;;  %v6161_v21 = vrot.slane %v6158_v0, 7  ;;  %v6171_v62 = vpack.c.bf16 %v6158_v0, %v6158_v0 }
 0x637   : > { %6309 = vmatmul.bf16.vlgmr.msra.gmra.mxu0 %v6170_v47  ;;  %6322 = vmatmul.bf16.vlgmr.msra.gmra.mxu1 %v6171_v62  ;;  %v6163_v8 = vsel %vm6162_vm15, %v6152_v2, %v6161_v21 }
 0x638   : > { %6169 = vst.msk [vmem:[#allocation25] sm:$0x3] %vm6167_vm0, %v6163_v8 }
 0x6b4   : > { %v6310_v59 = vpop.f32.mrf.mxu0  ;;  %v6323_v32 = vpop.f32.mrf.mxu1 }
 0x6b5   : > { %v6311_v45 = vadd.f32 %v6310_v59, %v6204_v19 }
 0x6b7   : > { %v6324_v34 = vadd.f32 %v6323_v32, %v6311_v45 }
 0x6b9   : > { %v6329_v49 = vsel %vm6327_vm1, %v6324_v34, -inf  ;;  %6328 = vst.msk [vmem:[#allocation27] sm:$0x1] %vm6327_vm1, %v6324_v34 }
 0x6ba   : > { %6330 = vmax.xlane.f32.xlu0 %v6329_v49 }
 0x6bc   : > { %v6312_v5 = vpop.f32.mrf.mxu0  ;;  %v6325_v43 = vpop.f32.mrf.mxu1 }
 0x72d   : > { %v6331_v23 = vpop.xlane.xlu0 %6330 }
 0x72e   : > { %v6332_v10 = vsub.f32 %v6324_v34, %v6331_v23  ;;  %vm6354_vm2 = vcmp.ge.f32.partialorder %v6324_v34, %v6331_v23 }
 0x72f   : > { %v6355_v37 = vsel %vm6354_vm2, %v9425_v30, 4 }
 0x730   : > { %v6333_v9 = vmul.f32 1.442695, %v6332_v10  ;;  %v6356_v26 = vsel %vm6327_vm1, %v6355_v37, 2147483647 }
 0x731   : > { %v6358_v44 = vshra.s32 %v6356_v26, 16  ;;  %v6357_v56 = vand.u32 65535, %v6356_v26 }
 0x732   : > { %7937 = vpow2.f32 %v6333_v9 }
 0x733   : > { %v6360_v33 = vcvt.s32.f32 %v6358_v44  ;;  %v6359_v18 = vcvt.s32.f32 %v6357_v56 }
 0x735   : > { %6361 = vmin.xlane.f32.xlu1 %v6360_v33 }
 0x738   : > { %v7938_v36 = vpop.eup %7937 }
 0x739   : > { %v6335_v50 = vsel %vm6327_vm1, %v7938_v36, 0.0 }
 0x73d   : > { %6336 = vadd.xlane.f32.xlu1 %v6335_v50 }
 0x7a8   : > { %v6362_v46 = vpop.xlane.xlu1 %6361 }
 0x7a9   : > { %vm6363_vm3 = vcmp.eq.f32.partialorder %v6360_v33, %v6362_v46  ;;  %v6368_v42 = vcvt.f32.s32 %v6362_v46 }
 0x7aa   : > { %v6364_v51 = vsel %vm6363_vm3, %v6359_v18, inf }
 0x7ab   : > { %6365 = vmin.xlane.f32.xlu2 %v6364_v51  ;;  %v6369_v13 = vshll.u32 %v6368_v42, 16 }
 0x7b0   : > { %v6337_v55 = vpop.xlane.xlu1 %6336 }
 0x7b1   : > { %7939 = vrcp.f32 %v6337_v55  ;;  %v6349_v61 = vand.u32 2147483648, %v6337_v55  ;;  %v6347_v1 = vand.u32 2147483647, %v6337_v55  ;;  %vm6343_vm5 = vweird.f32 %v6337_v55 }
 0x7b3   : > { %v6350_v4 = vor.u32 1.1754944e-38, %v6349_v61  ;;  %vm6348_vm7 = vcmp.eq.f32.partialorder %v6347_v1, 8.507059e+37 }
 0x7b7   : > { %v7940_v30 = vpop.eup %7939 }
 0x7b8   : > { %v6339_v52 = vmul.f32 %v7940_v30, %v6337_v55  ;;  %vm6344_vm4 = vweird.f32 %v7940_v30 }
 0x7b9   : > { %vm6345_vm6 = vmor %vm6343_vm5, %vm6344_vm4 }
 0x7ba   : > { %v6340_v39 = vsub.f32 1.0, %v6339_v52 }
 0x7bc   : > { %v6341_v63 = vmul.f32 %v7940_v30, %v6340_v39 }
 0x7be   : > { %v6342_v3 = vadd.f32 %v7940_v30, %v6341_v63 }
 0x7c0   : > { %v6346_v6 = vsel %vm6345_vm6, %v7940_v30, %v6342_v3 }
 0x7c1   : > { %v6351_v7 = vsel %vm6348_vm7, %v6350_v4, %v6346_v6 }
 0x7c2   : > { %v6352_v41 = vmul.f32 %v7938_v36, %v6351_v7 }
 0x7c4   : > { %6353 = vst.msk [vmem:[#allocation28] sm:$0x1] %vm6327_vm1, %v6352_v41 }
 0x81e   : > { %v6366_v12 = vpop.xlane.xlu2 %6365 }
 0x81f   : > { %v6367_v54 = vcvt.f32.s32 %v6366_v12 }
 0x821   : > { %v6370_v38 = vadd.s32 %v6369_v13, %v6367_v54 }
 0x823   : > { %6372 = vst.msk [vmem:[#allocation30] sm:$0x1] %vm6371_vm8, %v6370_v38 }
 0x824 PF: > { %p7859_p3 = scmp.eq.s32.totalorder %s8659_s22, 3  ;;  %s8532_s6 = smov [#allocation25]  }
 0x825   : > { %s6391_s28 = sshll.u32 %s8532_s6, 4  ;;  %s6393_s21 = sshll.u32 %s9551_s15, 4  ;;  %s6392_s28 = int_to_ptr.vmem [resolvable:$true] %s6391_s28  ;;  %s6394_s21 = int_to_ptr.hbm [resolvable:$true] %s6393_s21 }
 0x826   : > { %7783 = dma.vmem_to_hbm [thread:$0]  (%p7859_p3), %s6392_s28, 32, %s6394_s21, [#allocation26]  }
 0x827   : > { %s6417_s2 = sshll.u32 %s9553_s17, 4  ;;  %s8533_s14 = smov [#allocation28]   ;;  %s6418_s2 = int_to_ptr.hbm [resolvable:$true] %s6417_s2 }
 0x828   : > { %s6415_s19 = sshll.u32 %s8533_s14, 4  ;;  %s8534_s29 = smov [#allocation24]   ;;  %s6416_s19 = int_to_ptr.vmem [resolvable:$true] %s6415_s19 }
 0x829   : > { %7787 = dma.vmem_to_hbm [thread:$0]  (%p7859_p3), %s6416_s19, 16, %s6418_s2, [#allocation29]  }
 0x82a   : > { %s6379_s9 = sshll.u32 %s8534_s29, 4  ;;  %s9587_s8 = sld [smem:[#allocation53_spill]]  ;;  %s6380_s9 = int_to_ptr.vmem [resolvable:$true] %s6379_s9 }
 0x82b   : > { %s9588_s5 = sld [smem:[#allocation54_spill]]  ;;  %s8535_s6 = smov [#allocation27]  }
 0x82c   : > { %s6403_s28 = sshll.u32 %s8535_s6, 4  ;;  %s8536_s16 = smov [#allocation30]   ;;  %s6404_s28 = int_to_ptr.vmem [resolvable:$true] %s6403_s28 }
 0x82d   : > { %s6427_s3 = sshll.u32 %s8536_s16, 4  ;;  %s9589_s10 = sld [smem:[#allocation55_spill]]  ;;  %s6428_s3 = int_to_ptr.vmem [resolvable:$true] %s6427_s3 }
 0x830   : > { %s6381_s11 = sshll.u32 %s9587_s8, 4  ;;  %s6382_s11 = int_to_ptr.hbm [resolvable:$true] %s6381_s11 }
 0x831   : > { %7781 = dma.vmem_to_hbm [thread:$0]  (%p7859_p3), %s6380_s9, 16, %s6382_s11, [#allocation6]  }
 0x832   : > { %s6405_s24 = sshll.u32 %s9588_s5, 4  ;;  %s6406_s24 = int_to_ptr.hbm [resolvable:$true] %s6405_s24 }
 0x833   : > { %7785 = dma.vmem_to_hbm [thread:$0]  (%p7859_p3), %s6404_s28, 16, %s6406_s24, [#allocation26]  }
 0x834   : > { %s6429_s2 = sshll.u32 %s9589_s10, 4  ;;  %s6430_s2 = int_to_ptr.hbm [resolvable:$true] %s6429_s2 }
 0x835   : > { %7789 = dma.vmem_to_hbm [thread:$0]  (%p7859_p3), %s6428_s3, 16, %s6430_s2, [#allocation29]  }
 0x836   : > { %8490 = dma.done.wait (%p7859_p3), [#allocation6], 16  }
 0x837   : > { %8492 = vsyncadd (%p7859_p3), [#allocation6], 4294967280 }
 0x838   : > { %8494 = dma.done.wait (%p7859_p3), [#allocation26], 48  }
 0x839   : > { %8496 = vsyncadd (%p7859_p3), [#allocation26], 4294967248 }
 0x83a   : > { %8498 = dma.done.wait (%p7859_p3), [#allocation29], 32  }
 0x83b   : > { %8500 = vsyncadd (%p7859_p3), [#allocation29], 4294967264 }
 0x83c PF: > { %p42_p4 = scmp.ge.s32.totalorder %s8725_s26, 6   ;;  %s9590_s29 = smov %s8507_s30 }
 0x83d   : > { %s9591_s30 = smov %s8511_s0  ;;  %s9592_s0 = smov %s8737_s1 }
 0x83e   : > { %s9593_s11 = smov %s8725_s26  ;;  %44 = sbr.rel (!%p42_p4) target bundleno = 28 (0x1c), region = 206 }
 0x843   :  { %6463 = vsyncpa [#allocation5], 1 }
 0x844   :  { %6465 = vsyncpa [#allocation5 + $0x1], 1 }
 0x845   :  { %6466 = vsyncpa [#allocation8], 1 }
 0x846   :  { %6468 = vsyncpa [#allocation8 + $0x1], 1 }
 0x847   :  { %6469 = vsyncpa [#allocation11], 1 }
 0x848   :  { %6470 = vsyncpa [#allocation14], 1 }
 0x849   :  { %6471 = vsyncpa [#allocation17], 1 }
 0x84a   :  { %6472 = vsyncpa [#allocation20], 1 }
 0x84b   :  { %6473 = vsyncpa [#allocation23], 1 }
 0x84c   :  { %6474 = vsyncpa [#allocation6], 1 }
 0x84d   :  { %6476 = vsyncpa [#allocation6 + $0x1], 1 }
 0x84e   :  { %6477 = vsyncpa [#allocation26], 1 }
 0x84f   :  { %6478 = vsyncpa [#allocation29], 1 }

</bundles_post_ra>
